<compile_context>
chip_gen: v7x
topology: tpu7x:2x2x1
jax: 0.10.0
libtpu: 0.0.40
codegen_flags: <defaults>
</compile_context>

<pallas_src>
import functools
import math

import jax
import jax.numpy as jnp
from jax import lax
from jax.experimental import pallas as pl
from jax.experimental.pallas import tpu as pltpu

_VMEM_LIMIT = 48 * 1024 * 1024  # leave headroom vs. v7x's 64 MiB physical VMEM


def _pick_tile(dim, cap, mult):
    """Largest tile <= cap that divides dim and is a multiple of `mult` (else full dim)."""
    if dim <= cap:
        return dim
    for t in range(cap, 0, -1):
        if dim % t == 0 and t % mult == 0:
            return t
    return dim


def _gelu(y):
    # tanh-approx GELU.  TODO(synk): HF BERT/RoBERTa default is exact erf GELU.
    return 0.5 * y * (1.0 + jnp.tanh(0.7978845608028654 * (y + 0.044715 * y * y * y)))


# ----------------------------- tiled linear (bias + optional activation) -----------------------------

def _linear_kernel(x_ref, w_ref, b_ref, o_ref, acc_ref, *, act):
    @pl.when(pl.program_id(2) == 0)
    def _():
        acc_ref[...] = jnp.zeros_like(acc_ref)

    acc_ref[...] += jnp.dot(x_ref[...], w_ref[...], preferred_element_type=jnp.float32)

    @pl.when(pl.program_id(2) == pl.num_programs(2) - 1)
    def _():
        y = acc_ref[...] + b_ref[...]
        if act == "gelu":
            y = _gelu(y)
        elif act == "tanh":
            y = jnp.tanh(y)
        o_ref[...] = y.astype(o_ref.dtype)


def linear(x, w, b, act="none", out_dtype=jnp.bfloat16,
           tm_cap=256, tn_cap=512, tk_cap=512):
    """x: (M,K) bf16, w: (K,N) bf16, b: (N,) f32 -> (M,N). Tiled K-reduction matmul."""
    M, K = x.shape
    N = w.shape[1]
    tm = _pick_tile(M, tm_cap, 8)
    tn = _pick_tile(N, tn_cap, 128)
    tk = _pick_tile(K, tk_cap, 128)
    grid = (M // tm, N // tn, K // tk)
    return pl.pallas_call(
        functools.partial(_linear_kernel, act=act),
        out_shape=jax.ShapeDtypeStruct((M, N), out_dtype),
        grid=grid,
        in_specs=[
            pl.BlockSpec((tm, tk), lambda i, j, k: (i, k)),
            pl.BlockSpec((tk, tn), lambda i, j, k: (k, j)),
            pl.BlockSpec((1, tn), lambda i, j, k: (0, j)),
        ],
        out_specs=pl.BlockSpec((tm, tn), lambda i, j, k: (i, j)),
        scratch_shapes=[pltpu.VMEM((tm, tn), jnp.float32)],
        compiler_params=pltpu.CompilerParams(
            dimension_semantics=("parallel", "parallel", "arbitrary"),
            vmem_limit_bytes=_VMEM_LIMIT),
    )(x, w, b.reshape(1, N).astype(jnp.float32))


# ----------------------------- layernorm (with fused residual add) -----------------------------

def _ln_math(x, g, b):
    mean = jnp.mean(x, axis=-1, keepdims=True)
    var = jnp.mean(jnp.square(x - mean), axis=-1, keepdims=True)
    return (x - mean) * lax.rsqrt(var + 1e-12) * g + b


def _layernorm_kernel(x_ref, g_ref, b_ref, o_ref):
    x = x_ref[...].astype(jnp.float32)
    o_ref[...] = _ln_math(x, g_ref[...], b_ref[...]).astype(o_ref.dtype)


def _add_layernorm_kernel(x_ref, y_ref, g_ref, b_ref, o_ref):
    # residual add fused into the LN kernel: LN(x + y) without an HBM round trip.
    x = x_ref[...].astype(jnp.float32) + y_ref[...].astype(jnp.float32)
    o_ref[...] = _ln_math(x, g_ref[...], b_ref[...]).astype(o_ref.dtype)


def layernorm(x, g, b, out_dtype=jnp.bfloat16, tm_cap=512):
    M, H = x.shape
    tm = _pick_tile(M, tm_cap, 8)
    return pl.pallas_call(
        _layernorm_kernel,
        out_shape=jax.ShapeDtypeStruct((M, H), out_dtype),
        grid=(M // tm,),
        in_specs=[pl.BlockSpec((tm, H), lambda i: (i, 0)),
                  pl.BlockSpec((1, H), lambda i: (0, 0)),
                  pl.BlockSpec((1, H), lambda i: (0, 0))],
        out_specs=pl.BlockSpec((tm, H), lambda i: (i, 0)),
        compiler_params=pltpu.CompilerParams(dimension_semantics=("parallel",)),
    )(x, g.reshape(1, H), b.reshape(1, H))


def add_layernorm(x, y, g, b, out_dtype=jnp.bfloat16, tm_cap=512):
    M, H = x.shape
    tm = _pick_tile(M, tm_cap, 8)
    return pl.pallas_call(
        _add_layernorm_kernel,
        out_shape=jax.ShapeDtypeStruct((M, H), out_dtype),
        grid=(M // tm,),
        in_specs=[pl.BlockSpec((tm, H), lambda i: (i, 0)),
                  pl.BlockSpec((tm, H), lambda i: (i, 0)),
                  pl.BlockSpec((1, H), lambda i: (0, 0)),
                  pl.BlockSpec((1, H), lambda i: (0, 0))],
        out_specs=pl.BlockSpec((tm, H), lambda i: (i, 0)),
        compiler_params=pltpu.CompilerParams(dimension_semantics=("parallel",)),
    )(x, y, g.reshape(1, H), b.reshape(1, H))


# ----------------------------- fused FFN: GELU(x@w1+b1)@w2 + b2 -----------------------------

def _ffn_kernel(x_ref, w1_ref, b1_ref, w2_ref, b2_ref, o_ref, acc_ref):
    @pl.when(pl.program_id(1) == 0)
    def _():
        acc_ref[...] = jnp.zeros_like(acc_ref)

    h = jnp.dot(x_ref[...], w1_ref[...], preferred_element_type=jnp.float32) + b1_ref[...]
    h = _gelu(h)
    acc_ref[...] += jnp.dot(h.astype(jnp.bfloat16), w2_ref[...],
                            preferred_element_type=jnp.float32)

    @pl.when(pl.program_id(1) == pl.num_programs(1) - 1)
    def _():
        o_ref[...] = (acc_ref[...] + b2_ref[...]).astype(o_ref.dtype)


def ffn(x, w1, b1, w2, b2, out_dtype=jnp.bfloat16, tm_cap=256, ti_cap=512):
    """The (tm, ti) GELU intermediate lives only in VMEM; the I axis is the reduction grid."""
    M, H = x.shape
    I = w1.shape[1]
    tm = _pick_tile(M, tm_cap, 8)
    ti = _pick_tile(I, ti_cap, 128)
    grid = (M // tm, I // ti)
    return pl.pallas_call(
        _ffn_kernel,
        out_shape=jax.ShapeDtypeStruct((M, H), out_dtype),
        grid=grid,
        in_specs=[
            pl.BlockSpec((tm, H), lambda m, i: (m, 0)),
            pl.BlockSpec((H, ti), lambda m, i: (0, i)),
            pl.BlockSpec((1, ti), lambda m, i: (0, i)),
            pl.BlockSpec((ti, H), lambda m, i: (i, 0)),
            pl.BlockSpec((1, H), lambda m, i: (0, 0)),
        ],
        out_specs=pl.BlockSpec((tm, H), lambda m, i: (m, 0)),
        scratch_shapes=[pltpu.VMEM((tm, H), jnp.float32)],
        compiler_params=pltpu.CompilerParams(
            dimension_semantics=("parallel", "arbitrary"),
            vmem_limit_bytes=_VMEM_LIMIT),
    )(x, w1, b1.reshape(1, I).astype(jnp.float32), w2, b2.reshape(1, H).astype(jnp.float32))


# ----------------------------- attention -----------------------------

def _attention_kernel(q_ref, k_ref, v_ref, m_ref, o_ref, *, scale):
    q = q_ref[0]  # (S, Dh) bf16
    k = k_ref[0]  # (S, Dh) bf16
    v = v_ref[0]  # (S, Dh) bf16
    # contract last dims directly: no k.T materialized through the XLU.
    scores = lax.dot_general(q, k, (((1,), (1,)), ((), ())),
                             preferred_element_type=jnp.float32) * scale      # (S, S) f32
    scores = scores + (1.0 - m_ref[0]) * (-1e9)                               # (1, S) key mask
    mx = jnp.max(scores, axis=-1, keepdims=True)
    p = jnp.exp(scores - mx)
    p = p * pl.reciprocal(jnp.sum(p, axis=-1, keepdims=True), approx=True)
    o_ref[0] = jnp.dot(p.astype(v.dtype), v,
                       preferred_element_type=jnp.float32).astype(o_ref.dtype)


def attention(qkv, mask, n_heads):
    """qkv: (B, S, 3H) bf16 (output of the fused QKV projection); mask: (B, S) {0,1}.
    Per-(batch, head) (S, Dh) Q/K/V windows are selected purely via BlockSpec index_maps,
    so there is no JAX-side head-split transpose. Returns context (B, S, H) bf16."""
    B, S, H3 = qkv.shape
    H = H3 // 3
    Dh = H // n_heads
    scale = 1.0 / math.sqrt(Dh)
    mask3 = mask.astype(jnp.float32).reshape(B, 1, S)

    def head_spec(part):  # part 0/1/2 -> Q/K/V column group of the fused projection
        return pl.BlockSpec((1, S, Dh), lambda b, h: (b, 0, part * n_heads + h))

    # TODO(synk): at real RoBERTa scale (Dh=64) pack 2 heads per grid step for full lane
    # density, and switch to a flash-style online softmax with a KV grid axis for long S.
    return pl.pallas_call(
        functools.partial(_attention_kernel, scale=scale),
        out_shape=jax.ShapeDtypeStruct((B, S, H), jnp.bfloat16),
        grid=(B, n_heads),
        in_specs=[head_spec(0), head_spec(1), head_spec(2),
                  pl.BlockSpec((1, 1, S), lambda b, h: (b, 0, 0))],
        out_specs=pl.BlockSpec((1, S, Dh), lambda b, h: (b, 0, h)),
        compiler_params=pltpu.CompilerParams(
            dimension_semantics=("parallel", "parallel")),
    )(qkv, qkv, qkv, mask3)


# ----------------------------- Model (synthetic small BERT encoder) -----------------------------

def init_params(key, cfg):
    H, I = cfg["hidden"], cfg["inter"]

    def nrm(k, shape, scale=0.02, dtype=jnp.float32):
        return (scale * jax.random.normal(k, shape, dtype=jnp.float32)).astype(dtype)

    keys = jax.random.split(key, 4 + cfg["layers"])
    params = {
        "word_emb": nrm(keys[0], (cfg["vocab"], H)),
        "pos_emb": nrm(keys[1], (cfg["max_pos"], H)),
        "type_emb": nrm(keys[2], (cfg["type_vocab"], H)),
        "emb_ln_g": jnp.ones((H,), jnp.float32),
        "emb_ln_b": jnp.zeros((H,), jnp.float32),
        "pool_w": nrm(keys[3], (H, H), dtype=jnp.bfloat16),
        "pool_b": jnp.zeros((H,), jnp.float32),
        "layers": [],
    }
    for li in range(cfg["layers"]):
        lk = jax.random.split(keys[4 + li], 4)
        params["layers"].append({
            # fused QKV projection: columns [0:H]=Q, [H:2H]=K, [2H:3H]=V
            "w_qkv": nrm(lk[0], (H, 3 * H), dtype=jnp.bfloat16),
            "b_qkv": jnp.zeros((3 * H,), jnp.float32),
            "wo": nrm(lk[1], (H, H), dtype=jnp.bfloat16),
            "bo": jnp.zeros((H,), jnp.float32),
            "ln1_g": jnp.ones((H,), jnp.float32), "ln1_b": jnp.zeros((H,), jnp.float32),
            "w1": nrm(lk[2], (H, I), dtype=jnp.bfloat16), "b1": jnp.zeros((I,), jnp.float32),
            "w2": nrm(lk[3], (I, H), dtype=jnp.bfloat16), "b2": jnp.zeros((H,), jnp.float32),
            "ln2_g": jnp.ones((H,), jnp.float32), "ln2_b": jnp.zeros((H,), jnp.float32),
        })
    return params


def encoder_layer(p, x, mask, B, S, cfg):
    H = cfg["hidden"]
    nH = cfg["heads"]

    qkv = linear(x, p["w_qkv"], p["b_qkv"])               # (B*S, 3H) bf16 — one fused matmul
    ctx = attention(qkv.reshape(B, S, 3 * H), mask, nH)   # (B, S, H) bf16
    attn_out = linear(ctx.reshape(B * S, H), p["wo"], p["bo"])
    x = add_layernorm(x, attn_out, p["ln1_g"], p["ln1_b"])

    ff = ffn(x, p["w1"], p["b1"], p["w2"], p["b2"])        # fused GELU-MLP
    x = add_layernorm(x, ff, p["ln2_g"], p["ln2_b"])
    return x


def bert_forward(params, input_ids, token_type_ids, attention_mask, cfg):
    B, S = input_ids.shape
    H = cfg["hidden"]
    # RoBERTa-style position ids: cumsum over attention mask + padding_idx (=1), so
    # padded positions map to padding_idx and real tokens start at padding_idx+1.
    padding_idx = 1
    pos_ids = jnp.cumsum(attention_mask, axis=1) * attention_mask + padding_idx
    emb = (params["word_emb"][input_ids]
           + params["pos_emb"][pos_ids]
           + params["type_emb"][token_type_ids])          # (B, S, H) f32 (gathers stay in JAX)
    x = layernorm(emb.reshape(B * S, H), params["emb_ln_g"], params["emb_ln_b"])  # -> bf16
    for layer in params["layers"]:
        x = encoder_layer(layer, x, attention_mask, B, S, cfg)
    cls = x.reshape(B, S, H)[:, 0, :]                     # (B, H) bf16 -- [CLS] token
    pooler = linear(cls, params["pool_w"], params["pool_b"], act="tanh",
                    out_dtype=jnp.float32)
    return pooler                                         # 'pooler_output' (B, H) f32


def roberta_forward(params, input_ids, token_type_ids, attention_mask, cfg, dr_rate=None):
    pooler = bert_forward(params, input_ids, token_type_ids, attention_mask, cfg)
    # Default dr_rate=None -> identity (matches the reference else-branch; nn.Dropout is
    # also identity in eval mode).
    # TODO(synk): training-mode dropout via pltpu.prng_seed/prng_random_bits if dr_rate set.
    return pooler


# ----------------------------- Main -----------------------------

if __name__ == "__main__":
    # Small but (8,128)-aligned shapes so every block is lane/sublane dense.
    B, S = 2, 128
    cfg = dict(vocab=100, hidden=256, heads=2, layers=2, inter=512,
               max_pos=S + 8, type_vocab=2)

    key = jax.random.PRNGKey(0)
    kp, ki = jax.random.split(key)
    params = init_params(kp, cfg)

    input_ids = jax.random.randint(ki, (B, S), 0, cfg["vocab"], dtype=jnp.int32)
    token_type_ids = jnp.zeros((B, S), dtype=jnp.int32)
    attention_mask = jnp.ones((B, S), dtype=jnp.int32).at[1, S - 16:].set(0)  # pad tail of seq 1

    fwd = jax.jit(functools.partial(roberta_forward, cfg=cfg, dr_rate=None))
    out = fwd(params, input_ids, token_type_ids, attention_mask)
    out = jax.block_until_ready(out)
    assert out.shape == (B, cfg["hidden"]) and out.dtype == jnp.float32
    assert bool(jnp.all(jnp.isfinite(out)))
    print("KERNEL_OK")
</pallas_src>

<mosaic_0001>
module attributes {stable_mosaic.version = 11 : i64} {
  func.func @_layernorm_kernel(%arg0: i32, %arg1: memref<256x256xf32, #tpu.memory_space<vmem>>, %arg2: memref<1x256xf32, #tpu.memory_space<vmem>>, %arg3: memref<1x256xf32, #tpu.memory_space<vmem>>, %arg4: memref<256x256xbf16, #tpu.memory_space<vmem>>) attributes {dimension_semantics = [#tpu.dimension_semantics<parallel>], iteration_bounds = array<i64: 1>, scalar_prefetch = 0 : i64, scratch_operands = 0 : i64, tpu.core_type = #tpu.core_type<tc>, window_params = [{transform_indices = @transform_0, window_bounds = array<i64: 256, 256>}, {pipeline_mode = #tpu.pipeline_mode<synchronous>, transform_indices = @transform_1, window_bounds = array<i64: 1, 256>}, {pipeline_mode = #tpu.pipeline_mode<synchronous>, transform_indices = @transform_2, window_bounds = array<i64: 1, 256>}, {transform_indices = @transform_3, window_bounds = array<i64: 256, 256>}]} {
    %c0 = arith.constant 0 : index
    %c0_0 = arith.constant 0 : index
    %0 = vector.load %arg1[%c0, %c0_0] : memref<256x256xf32, #tpu.memory_space<vmem>>, vector<256x256xf32>
    %c0_1 = arith.constant 0 : index
    %c0_2 = arith.constant 0 : index
    %1 = vector.load %arg2[%c0_1, %c0_2] : memref<1x256xf32, #tpu.memory_space<vmem>>, vector<1x256xf32>
    %c0_3 = arith.constant 0 : index
    %c0_4 = arith.constant 0 : index
    %2 = vector.load %arg3[%c0_3, %c0_4] : memref<1x256xf32, #tpu.memory_space<vmem>>, vector<1x256xf32>
    %cst = arith.constant dense<0.000000e+00> : vector<256xf32>
    %3 = vector.multi_reduction <add>, %0, %cst [1] : vector<256x256xf32> to vector<256xf32>
    %4 = vector.shape_cast %3 : vector<256xf32> to vector<256x1xf32>
    %cst_5 = arith.constant 2.560000e+02 : f32
    %5 = vector.broadcast %cst_5 : f32 to vector<256x1xf32>
    %6 = arith.divf %4, %5 : vector<256x1xf32>
    %7 = vector.broadcast %6 : vector<256x1xf32> to vector<256x256xf32>
    %8 = arith.subf %0, %7 : vector<256x256xf32>
    %9 = arith.mulf %8, %8 : vector<256x256xf32>
    %cst_6 = arith.constant dense<0.000000e+00> : vector<256xf32>
    %10 = vector.multi_reduction <add>, %9, %cst_6 [1] : vector<256x256xf32> to vector<256xf32>
    %11 = vector.shape_cast %10 : vector<256xf32> to vector<256x1xf32>
    %cst_7 = arith.constant 2.560000e+02 : f32
    %12 = vector.broadcast %cst_7 : f32 to vector<256x1xf32>
    %13 = arith.divf %11, %12 : vector<256x1xf32>
    %14 = vector.broadcast %6 : vector<256x1xf32> to vector<256x256xf32>
    %15 = arith.subf %0, %14 : vector<256x256xf32>
    %cst_8 = arith.constant 9.99999996E-13 : f32
    %16 = vector.broadcast %cst_8 : f32 to vector<256x1xf32>
    %17 = arith.addf %13, %16 : vector<256x1xf32>
    %18 = math.rsqrt %17 : vector<256x1xf32>
    %19 = vector.broadcast %18 : vector<256x1xf32> to vector<256x256xf32>
    %20 = arith.mulf %15, %19 : vector<256x256xf32>
    %21 = vector.broadcast %1 : vector<1x256xf32> to vector<256x256xf32>
    %22 = arith.mulf %20, %21 : vector<256x256xf32>
    %23 = vector.broadcast %2 : vector<1x256xf32> to vector<256x256xf32>
    %24 = arith.addf %22, %23 : vector<256x256xf32>
    %25 = arith.truncf %24 : vector<256x256xf32> to vector<256x256xbf16>
    %c0_9 = arith.constant 0 : index
    %c0_10 = arith.constant 0 : index
    %26 = vector.load %arg4[%c0_9, %c0_10] : memref<256x256xbf16, #tpu.memory_space<vmem>>, vector<256x256xbf16>
    tpu.vector_store %arg4[%c0_9, %c0_10], %25 {strides = array<i32>} : memref<256x256xbf16, #tpu.memory_space<vmem>>, vector<256x256xbf16>,
    return
  }
  func.func @transform_0(%arg0: i32) -> (i32, i32) {
    %c0_i32 = arith.constant 0 : i32
    %c0_i32_0 = arith.constant 0 : i32
    return %arg0, %c0_i32 : i32, i32
  }
  func.func @transform_1(%arg0: i32) -> (i32, i32) {
    %c0_i32 = arith.constant 0 : i32
    %c0_i32_0 = arith.constant 0 : i32
    %c0_i32_1 = arith.constant 0 : i32
    return %c0_i32, %c0_i32_0 : i32, i32
  }
  func.func @transform_2(%arg0: i32) -> (i32, i32) {
    %c0_i32 = arith.constant 0 : i32
    %c0_i32_0 = arith.constant 0 : i32
    %c0_i32_1 = arith.constant 0 : i32
    return %c0_i32, %c0_i32_0 : i32, i32
  }
  func.func @transform_3(%arg0: i32) -> (i32, i32) {
    %c0_i32 = arith.constant 0 : i32
    %c0_i32_0 = arith.constant 0 : i32
    return %arg0, %c0_i32 : i32, i32
  }
}

module attributes {stable_mosaic.version = 11 : i64} {
  func.func @_linear_kernel(%arg0: i32, %arg1: i32, %arg2: i32, %arg3: memref<256x256xbf16, #tpu.memory_space<vmem>>, %arg4: memref<256x384xbf16, #tpu.memory_space<vmem>>, %arg5: memref<1x384xf32, #tpu.memory_space<vmem>>, %arg6: memref<256x384xbf16, #tpu.memory_space<vmem>>, %arg7: memref<256x384xf32, #tpu.memory_space<vmem>>) attributes {dimension_semantics = [#tpu.dimension_semantics<parallel>, #tpu.dimension_semantics<parallel>, #tpu.dimension_semantics<arbitrary>], iteration_bounds = array<i64: 1, 2, 1>, scalar_prefetch = 0 : i64, scratch_operands = 1 : i64, tpu.core_type = #tpu.core_type<tc>, window_params = [{transform_indices = @transform_0, window_bounds = array<i64: 256, 256>}, {transform_indices = @transform_1, window_bounds = array<i64: 256, 384>}, {transform_indices = @transform_2, window_bounds = array<i64: 1, 384>}, {transform_indices = @transform_3, window_bounds = array<i64: 256, 384>}]} {
    %c0_i32 = arith.constant 0 : i32
    %0 = arith.cmpi eq, %arg2, %c0_i32 : i32
    %1 = arith.extui %0 : i1 to i32
    %c0_i32_0 = arith.constant 0 : i32
    %2 = arith.cmpi ne, %1, %c0_i32_0 : i32
    scf.if %2 {
      %cst_10 = arith.constant 0.000000e+00 : f32
      %12 = vector.broadcast %cst_10 : f32 to vector<256x384xf32>
      %c0_11 = arith.constant 0 : index
      %c0_12 = arith.constant 0 : index
      %13 = vector.load %arg7[%c0_11, %c0_12] : memref<256x384xf32, #tpu.memory_space<vmem>>, vector<256x384xf32>
      tpu.vector_store %arg7[%c0_11, %c0_12], %12 {strides = array<i32>} : memref<256x384xf32, #tpu.memory_space<vmem>>, vector<256x384xf32>,
    } else {
    }
    %c0 = arith.constant 0 : index
    %c0_1 = arith.constant 0 : index
    %3 = vector.load %arg7[%c0, %c0_1] : memref<256x384xf32, #tpu.memory_space<vmem>>, vector<256x384xf32>
    %c0_2 = arith.constant 0 : index
    %c0_3 = arith.constant 0 : index
    %4 = vector.load %arg3[%c0_2, %c0_3] : memref<256x256xbf16, #tpu.memory_space<vmem>>, vector<256x256xbf16>
    %c0_4 = arith.constant 0 : index
    %c0_5 = arith.constant 0 : index
    %5 = vector.load %arg4[%c0_4, %c0_5] : memref<256x384xbf16, #tpu.memory_space<vmem>>, vector<256x384xbf16>
    %cst = arith.constant dense<0.000000e+00> : vector<256x384xf32>
    %6 = tpu.matmul %4, %5, %cst {dimension_numbers = #tpu.dot_dimension_numbers<[1], [0], [0], [1], [0, 0, 1, 1], [], []>} : vector<256x256xbf16>, vector<256x384xbf16>, vector<256x384xf32> -> vector<256x384xf32>
    %7 = arith.addf %3, %6 : vector<256x384xf32>
    %c0_6 = arith.constant 0 : index
    %c0_7 = arith.constant 0 : index
    %8 = vector.load %arg7[%c0_6, %c0_7] : memref<256x384xf32, #tpu.memory_space<vmem>>, vector<256x384xf32>
    tpu.vector_store %arg7[%c0_6, %c0_7], %7 {strides = array<i32>} : memref<256x384xf32, #tpu.memory_space<vmem>>, vector<256x384xf32>,
    %c0_i32_8 = arith.constant 0 : i32
    %9 = arith.cmpi eq, %arg2, %c0_i32_8 : i32
    %10 = arith.extui %9 : i1 to i32
    %c0_i32_9 = arith.constant 0 : i32
    %11 = arith.cmpi ne, %10, %c0_i32_9 : i32
    scf.if %11 {
      %c0_10 = arith.constant 0 : index
      %c0_11 = arith.constant 0 : index
      %12 = vector.load %arg7[%c0_10, %c0_11] : memref<256x384xf32, #tpu.memory_space<vmem>>, vector<256x384xf32>
      %c0_12 = arith.constant 0 : index
      %c0_13 = arith.constant 0 : index
      %13 = vector.load %arg5[%c0_12, %c0_13] : memref<1x384xf32, #tpu.memory_space<vmem>>, vector<1x384xf32>
      %14 = vector.broadcast %13 : vector<1x384xf32> to vector<256x384xf32>
      %15 = arith.addf %12, %14 : vector<256x384xf32>
      %16 = arith.truncf %15 : vector<256x384xf32> to vector<256x384xbf16>
      %c0_14 = arith.constant 0 : index
      %c0_15 = arith.constant 0 : index
      %17 = vector.load %arg6[%c0_14, %c0_15] : memref<256x384xbf16, #tpu.memory_space<vmem>>, vector<256x384xbf16>
      tpu.vector_store %arg6[%c0_14, %c0_15], %16 {strides = array<i32>} : memref<256x384xbf16, #tpu.memory_space<vmem>>, vector<256x384xbf16>,
    } else {
    }
    return
  }
  func.func @transform_0(%arg0: i32, %arg1: i32, %arg2: i32) -> (i32, i32) {
    %c0_i32 = arith.constant 0 : i32
    return %arg0, %arg2 : i32, i32
  }
  func.func @transform_1(%arg0: i32, %arg1: i32, %arg2: i32) -> (i32, i32) {
    %c0_i32 = arith.constant 0 : i32
    return %arg2, %arg1 : i32, i32
  }
  func.func @transform_2(%arg0: i32, %arg1: i32, %arg2: i32) -> (i32, i32) {
    %c0_i32 = arith.constant 0 : i32
    %c0_i32_0 = arith.constant 0 : i32
    return %c0_i32, %arg1 : i32, i32
  }
  func.func @transform_3(%arg0: i32, %arg1: i32, %arg2: i32) -> (i32, i32) {
    %c0_i32 = arith.constant 0 : i32
    return %arg0, %arg1 : i32, i32
  }
}

module attributes {stable_mosaic.version = 11 : i64} {
  func.func @_attention_kernel(%arg0: i32, %arg1: i32, %arg2: memref<1x128x128xbf16, #tpu.memory_space<vmem>>, %arg3: memref<1x128x128xbf16, #tpu.memory_space<vmem>>, %arg4: memref<1x128x128xbf16, #tpu.memory_space<vmem>>, %arg5: memref<1x1x128xf32, #tpu.memory_space<vmem>>, %arg6: memref<1x128x128xbf16, #tpu.memory_space<vmem>>) attributes {dimension_semantics = [#tpu.dimension_semantics<parallel>, #tpu.dimension_semantics<parallel>], iteration_bounds = array<i64: 2, 2>, scalar_prefetch = 0 : i64, scratch_operands = 0 : i64, tpu.core_type = #tpu.core_type<tc>, window_params = [{transform_indices = @transform_0, window_bounds = array<i64: 1, 128, 128>}, {transform_indices = @transform_1, window_bounds = array<i64: 1, 128, 128>}, {transform_indices = @transform_2, window_bounds = array<i64: 1, 128, 128>}, {transform_indices = @transform_3, window_bounds = array<i64: 1, 1, 128>}, {transform_indices = @transform_4, window_bounds = array<i64: 1, 128, 128>}]} {
    %c0 = arith.constant 0 : index
    %c0_0 = arith.constant 0 : index
    %c0_1 = arith.constant 0 : index
    %0 = vector.load %arg2[%c0, %c0_0, %c0_1] : memref<1x128x128xbf16, #tpu.memory_space<vmem>>, vector<1x128x128xbf16>
    %1 = vector.shape_cast %0 : vector<1x128x128xbf16> to vector<128x128xbf16>
    %c0_2 = arith.constant 0 : index
    %c0_3 = arith.constant 0 : index
    %c0_4 = arith.constant 0 : index
    %2 = vector.load %arg3[%c0_2, %c0_3, %c0_4] : memref<1x128x128xbf16, #tpu.memory_space<vmem>>, vector<1x128x128xbf16>
    %3 = vector.shape_cast %2 : vector<1x128x128xbf16> to vector<128x128xbf16>
    %c0_5 = arith.constant 0 : index
    %c0_6 = arith.constant 0 : index
    %c0_7 = arith.constant 0 : index
    %4 = vector.load %arg4[%c0_5, %c0_6, %c0_7] : memref<1x128x128xbf16, #tpu.memory_space<vmem>>, vector<1x128x128xbf16>
    %5 = vector.shape_cast %4 : vector<1x128x128xbf16> to vector<128x128xbf16>
    %cst = arith.constant dense<0.000000e+00> : vector<128x128xf32>
    %6 = tpu.matmul %1, %3, %cst {dimension_numbers = #tpu.dot_dimension_numbers<[1], [1], [0], [0], [0, 0, 1, 0], [], []>} : vector<128x128xbf16>, vector<128x128xbf16>, vector<128x128xf32> -> vector<128x128xf32>
    %cst_8 = arith.constant 0.0883883461 : f32
    %7 = vector.broadcast %cst_8 : f32 to vector<128x128xf32>
    %8 = arith.mulf %6, %7 : vector<128x128xf32>
    %c0_9 = arith.constant 0 : index
    %c0_10 = arith.constant 0 : index
    %c0_11 = arith.constant 0 : index
    %9 = vector.load %arg5[%c0_9, %c0_10, %c0_11] : memref<1x1x128xf32, #tpu.memory_space<vmem>>, vector<1x1x128xf32>
    %10 = vector.shape_cast %9 : vector<1x1x128xf32> to vector<1x128xf32>
    %cst_12 = arith.constant 1.000000e+00 : f32
    %11 = vector.broadcast %cst_12 : f32 to vector<1x128xf32>
    %12 = arith.subf %11, %10 : vector<1x128xf32>
    %cst_13 = arith.constant -1.000000e+09 : f32
    %13 = vector.broadcast %cst_13 : f32 to vector<1x128xf32>
    %14 = arith.mulf %12, %13 : vector<1x128xf32>
    %15 = vector.broadcast %14 : vector<1x128xf32> to vector<128x128xf32>
    %16 = arith.addf %8, %15 : vector<128x128xf32>
    %cst_14 = arith.constant dense<0xFF800000> : vector<128xf32>
    %17 = vector.multi_reduction <maximumf>, %16, %cst_14 [1] : vector<128x128xf32> to vector<128xf32>
    %18 = vector.shape_cast %17 : vector<128xf32> to vector<128x1xf32>
    %19 = vector.broadcast %18 : vector<128x1xf32> to vector<128x128xf32>
    %20 = arith.subf %16, %19 : vector<128x128xf32>
    %21 = math.exp %20 : vector<128x128xf32>
    %cst_15 = arith.constant dense<0.000000e+00> : vector<128xf32>
    %22 = vector.multi_reduction <add>, %21, %cst_15 [1] : vector<128x128xf32> to vector<128xf32>
    %23 = vector.shape_cast %22 : vector<128xf32> to vector<128x1xf32>
    %24 = tpu.reciprocal %23 {approx = true} : vector<128x1xf32> -> vector<128x1xf32>
    %25 = vector.broadcast %24 : vector<128x1xf32> to vector<128x128xf32>
    %26 = arith.mulf %21, %25 : vector<128x128xf32>
    %27 = arith.truncf %26 : vector<128x128xf32> to vector<128x128xbf16>
    %cst_16 = arith.constant dense<0.000000e+00> : vector<128x128xf32>
    %28 = tpu.matmul %27, %5, %cst_16 {dimension_numbers = #tpu.dot_dimension_numbers<[1], [0], [0], [1], [0, 0, 1, 1], [], []>} : vector<128x128xbf16>, vector<128x128xbf16>, vector<128x128xf32> -> vector<128x128xf32>
    %29 = arith.truncf %28 : vector<128x128xf32> to vector<128x128xbf16>
    %c0_17 = arith.constant 0 : index
    %c0_18 = arith.constant 0 : index
    %c0_19 = arith.constant 0 : index
    %30 = vector.load %arg6[%c0_17, %c0_18, %c0_19] : memref<1x128x128xbf16, #tpu.memory_space<vmem>>, vector<1x128x128xbf16>
    %31 = vector.shape_cast %30 : vector<1x128x128xbf16> to vector<128x128xbf16>
    %32 = vector.shape_cast %29 : vector<128x128xbf16> to vector<1x128x128xbf16>
    tpu.vector_store %arg6[%c0_17, %c0_18, %c0_19], %32 {strides = array<i32>} : memref<1x128x128xbf16, #tpu.memory_space<vmem>>, vector<1x128x128xbf16>,
    return
  }
  func.func @transform_0(%arg0: i32, %arg1: i32) -> (i32, i32, i32) {
    %c0_i32 = arith.constant 0 : i32
    %0 = arith.addi %c0_i32, %arg1 : i32
    %c0_i32_0 = arith.constant 0 : i32
    %c0_i32_1 = arith.constant 0 : i32
    return %arg0, %c0_i32_0, %0 : i32, i32, i32
  }
  func.func @transform_1(%arg0: i32, %arg1: i32) -> (i32, i32, i32) {
    %c2_i32 = arith.constant 2 : i32
    %0 = arith.addi %c2_i32, %arg1 : i32
    %c0_i32 = arith.constant 0 : i32
    %c0_i32_0 = arith.constant 0 : i32
    return %arg0, %c0_i32, %0 : i32, i32, i32
  }
  func.func @transform_2(%arg0: i32, %arg1: i32) -> (i32, i32, i32) {
    %c4_i32 = arith.constant 4 : i32
    %0 = arith.addi %c4_i32, %arg1 : i32
    %c0_i32 = arith.constant 0 : i32
    %c0_i32_0 = arith.constant 0 : i32
    return %arg0, %c0_i32, %0 : i32, i32, i32
  }
  func.func @transform_3(%arg0: i32, %arg1: i32) -> (i32, i32, i32) {
    %c0_i32 = arith.constant 0 : i32
    %c0_i32_0 = arith.constant 0 : i32
    %c0_i32_1 = arith.constant 0 : i32
    return %arg0, %c0_i32, %c0_i32_0 : i32, i32, i32
  }
  func.func @transform_4(%arg0: i32, %arg1: i32) -> (i32, i32, i32) {
    %c0_i32 = arith.constant 0 : i32
    %c0_i32_0 = arith.constant 0 : i32
    return %arg0, %c0_i32, %arg1 : i32, i32, i32
  }
}

module attributes {stable_mosaic.version = 11 : i64} {
  func.func @_linear_kernel(%arg0: i32, %arg1: i32, %arg2: i32, %arg3: memref<256x256xbf16, #tpu.memory_space<vmem>>, %arg4: memref<256x256xbf16, #tpu.memory_space<vmem>>, %arg5: memref<1x256xf32, #tpu.memory_space<vmem>>, %arg6: memref<256x256xbf16, #tpu.memory_space<vmem>>, %arg7: memref<256x256xf32, #tpu.memory_space<vmem>>) attributes {dimension_semantics = [#tpu.dimension_semantics<parallel>, #tpu.dimension_semantics<parallel>, #tpu.dimension_semantics<arbitrary>], iteration_bounds = array<i64: 1, 1, 1>, scalar_prefetch = 0 : i64, scratch_operands = 1 : i64, tpu.core_type = #tpu.core_type<tc>, window_params = [{transform_indices = @transform_0, window_bounds = array<i64: 256, 256>}, {transform_indices = @transform_1, window_bounds = array<i64: 256, 256>}, {transform_indices = @transform_2, window_bounds = array<i64: 1, 256>}, {transform_indices = @transform_3, window_bounds = array<i64: 256, 256>}]} {
    %c0_i32 = arith.constant 0 : i32
    %0 = arith.cmpi eq, %arg2, %c0_i32 : i32
    %1 = arith.extui %0 : i1 to i32
    %c0_i32_0 = arith.constant 0 : i32
    %2 = arith.cmpi ne, %1, %c0_i32_0 : i32
    scf.if %2 {
      %cst_10 = arith.constant 0.000000e+00 : f32
      %12 = vector.broadcast %cst_10 : f32 to vector<256x256xf32>
      %c0_11 = arith.constant 0 : index
      %c0_12 = arith.constant 0 : index
      %13 = vector.load %arg7[%c0_11, %c0_12] : memref<256x256xf32, #tpu.memory_space<vmem>>, vector<256x256xf32>
      tpu.vector_store %arg7[%c0_11, %c0_12], %12 {strides = array<i32>} : memref<256x256xf32, #tpu.memory_space<vmem>>, vector<256x256xf32>,
    } else {
    }
    %c0 = arith.constant 0 : index
    %c0_1 = arith.constant 0 : index
    %3 = vector.load %arg7[%c0, %c0_1] : memref<256x256xf32, #tpu.memory_space<vmem>>, vector<256x256xf32>
    %c0_2 = arith.constant 0 : index
    %c0_3 = arith.constant 0 : index
    %4 = vector.load %arg3[%c0_2, %c0_3] : memref<256x256xbf16, #tpu.memory_space<vmem>>, vector<256x256xbf16>
    %c0_4 = arith.constant 0 : index
    %c0_5 = arith.constant 0 : index
    %5 = vector.load %arg4[%c0_4, %c0_5] : memref<256x256xbf16, #tpu.memory_space<vmem>>, vector<256x256xbf16>
    %cst = arith.constant dense<0.000000e+00> : vector<256x256xf32>
    %6 = tpu.matmul %4, %5, %cst {dimension_numbers = #tpu.dot_dimension_numbers<[1], [0], [0], [1], [0, 0, 1, 1], [], []>} : vector<256x256xbf16>, vector<256x256xbf16>, vector<256x256xf32> -> vector<256x256xf32>
    %7 = arith.addf %3, %6 : vector<256x256xf32>
    %c0_6 = arith.constant 0 : index
    %c0_7 = arith.constant 0 : index
    %8 = vector.load %arg7[%c0_6, %c0_7] : memref<256x256xf32, #tpu.memory_space<vmem>>, vector<256x256xf32>
    tpu.vector_store %arg7[%c0_6, %c0_7], %7 {strides = array<i32>} : memref<256x256xf32, #tpu.memory_space<vmem>>, vector<256x256xf32>,
    %c0_i32_8 = arith.constant 0 : i32
    %9 = arith.cmpi eq, %arg2, %c0_i32_8 : i32
    %10 = arith.extui %9 : i1 to i32
    %c0_i32_9 = arith.constant 0 : i32
    %11 = arith.cmpi ne, %10, %c0_i32_9 : i32
    scf.if %11 {
      %c0_10 = arith.constant 0 : index
      %c0_11 = arith.constant 0 : index
      %12 = vector.load %arg7[%c0_10, %c0_11] : memref<256x256xf32, #tpu.memory_space<vmem>>, vector<256x256xf32>
      %c0_12 = arith.constant 0 : index
      %c0_13 = arith.constant 0 : index
      %13 = vector.load %arg5[%c0_12, %c0_13] : memref<1x256xf32, #tpu.memory_space<vmem>>, vector<1x256xf32>
      %14 = vector.broadcast %13 : vector<1x256xf32> to vector<256x256xf32>
      %15 = arith.addf %12, %14 : vector<256x256xf32>
      %16 = arith.truncf %15 : vector<256x256xf32> to vector<256x256xbf16>
      %c0_14 = arith.constant 0 : index
      %c0_15 = arith.constant 0 : index
      %17 = vector.load %arg6[%c0_14, %c0_15] : memref<256x256xbf16, #tpu.memory_space<vmem>>, vector<256x256xbf16>
      tpu.vector_store %arg6[%c0_14, %c0_15], %16 {strides = array<i32>} : memref<256x256xbf16, #tpu.memory_space<vmem>>, vector<256x256xbf16>,
    } else {
    }
    return
  }
  func.func @transform_0(%arg0: i32, %arg1: i32, %arg2: i32) -> (i32, i32) {
    %c0_i32 = arith.constant 0 : i32
    return %arg0, %arg2 : i32, i32
  }
  func.func @transform_1(%arg0: i32, %arg1: i32, %arg2: i32) -> (i32, i32) {
    %c0_i32 = arith.constant 0 : i32
    return %arg2, %arg1 : i32, i32
  }
  func.func @transform_2(%arg0: i32, %arg1: i32, %arg2: i32) -> (i32, i32) {
    %c0_i32 = arith.constant 0 : i32
    %c0_i32_0 = arith.constant 0 : i32
    return %c0_i32, %arg1 : i32, i32
  }
  func.func @transform_3(%arg0: i32, %arg1: i32, %arg2: i32) -> (i32, i32) {
    %c0_i32 = arith.constant 0 : i32
    return %arg0, %arg1 : i32, i32
  }
}

module attributes {stable_mosaic.version = 11 : i64} {
  func.func @_add_layernorm_kernel(%arg0: i32, %arg1: memref<256x256xbf16, #tpu.memory_space<vmem>>, %arg2: memref<256x256xbf16, #tpu.memory_space<vmem>>, %arg3: memref<1x256xf32, #tpu.memory_space<vmem>>, %arg4: memref<1x256xf32, #tpu.memory_space<vmem>>, %arg5: memref<256x256xbf16, #tpu.memory_space<vmem>>) attributes {dimension_semantics = [#tpu.dimension_semantics<parallel>], iteration_bounds = array<i64: 1>, scalar_prefetch = 0 : i64, scratch_operands = 0 : i64, tpu.core_type = #tpu.core_type<tc>, window_params = [{transform_indices = @transform_0, window_bounds = array<i64: 256, 256>}, {transform_indices = @transform_1, window_bounds = array<i64: 256, 256>}, {pipeline_mode = #tpu.pipeline_mode<synchronous>, transform_indices = @transform_2, window_bounds = array<i64: 1, 256>}, {pipeline_mode = #tpu.pipeline_mode<synchronous>, transform_indices = @transform_3, window_bounds = array<i64: 1, 256>}, {transform_indices = @transform_4, window_bounds = array<i64: 256, 256>}]} {
    %c0 = arith.constant 0 : index
    %c0_0 = arith.constant 0 : index
    %0 = vector.load %arg1[%c0, %c0_0] : memref<256x256xbf16, #tpu.memory_space<vmem>>, vector<256x256xbf16>
    %1 = arith.extf %0 : vector<256x256xbf16> to vector<256x256xf32>
    %c0_1 = arith.constant 0 : index
    %c0_2 = arith.constant 0 : index
    %2 = vector.load %arg2[%c0_1, %c0_2] : memref<256x256xbf16, #tpu.memory_space<vmem>>, vector<256x256xbf16>
    %3 = arith.extf %2 : vector<256x256xbf16> to vector<256x256xf32>
    %4 = arith.addf %1, %3 : vector<256x256xf32>
    %c0_3 = arith.constant 0 : index
    %c0_4 = arith.constant 0 : index
    %5 = vector.load %arg3[%c0_3, %c0_4] : memref<1x256xf32, #tpu.memory_space<vmem>>, vector<1x256xf32>
    %c0_5 = arith.constant 0 : index
    %c0_6 = arith.constant 0 : index
    %6 = vector.load %arg4[%c0_5, %c0_6] : memref<1x256xf32, #tpu.memory_space<vmem>>, vector<1x256xf32>
    %cst = arith.constant dense<0.000000e+00> : vector<256xf32>
    %7 = vector.multi_reduction <add>, %4, %cst [1] : vector<256x256xf32> to vector<256xf32>
    %8 = vector.shape_cast %7 : vector<256xf32> to vector<256x1xf32>
    %cst_7 = arith.constant 2.560000e+02 : f32
    %9 = vector.broadcast %cst_7 : f32 to vector<256x1xf32>
    %10 = arith.divf %8, %9 : vector<256x1xf32>
    %11 = vector.broadcast %10 : vector<256x1xf32> to vector<256x256xf32>
    %12 = arith.subf %4, %11 : vector<256x256xf32>
    %13 = arith.mulf %12, %12 : vector<256x256xf32>
    %cst_8 = arith.constant dense<0.000000e+00> : vector<256xf32>
    %14 = vector.multi_reduction <add>, %13, %cst_8 [1] : vector<256x256xf32> to vector<256xf32>
    %15 = vector.shape_cast %14 : vector<256xf32> to vector<256x1xf32>
    %cst_9 = arith.constant 2.560000e+02 : f32
    %16 = vector.broadcast %cst_9 : f32 to vector<256x1xf32>
    %17 = arith.divf %15, %16 : vector<256x1xf32>
    %18 = vector.broadcast %10 : vector<256x1xf32> to vector<256x256xf32>
    %19 = arith.subf %4, %18 : vector<256x256xf32>
    %cst_10 = arith.constant 9.99999996E-13 : f32
    %20 = vector.broadcast %cst_10 : f32 to vector<256x1xf32>
    %21 = arith.addf %17, %20 : vector<256x1xf32>
    %22 = math.rsqrt %21 : vector<256x1xf32>
    %23 = vector.broadcast %22 : vector<256x1xf32> to vector<256x256xf32>
    %24 = arith.mulf %19, %23 : vector<256x256xf32>
    %25 = vector.broadcast %5 : vector<1x256xf32> to vector<256x256xf32>
    %26 = arith.mulf %24, %25 : vector<256x256xf32>
    %27 = vector.broadcast %6 : vector<1x256xf32> to vector<256x256xf32>
    %28 = arith.addf %26, %27 : vector<256x256xf32>
    %29 = arith.truncf %28 : vector<256x256xf32> to vector<256x256xbf16>
    %c0_11 = arith.constant 0 : index
    %c0_12 = arith.constant 0 : index
    %30 = vector.load %arg5[%c0_11, %c0_12] : memref<256x256xbf16, #tpu.memory_space<vmem>>, vector<256x256xbf16>
    tpu.vector_store %arg5[%c0_11, %c0_12], %29 {strides = array<i32>} : memref<256x256xbf16, #tpu.memory_space<vmem>>, vector<256x256xbf16>,
    return
  }
  func.func @transform_0(%arg0: i32) -> (i32, i32) {
    %c0_i32 = arith.constant 0 : i32
    %c0_i32_0 = arith.constant 0 : i32
    return %arg0, %c0_i32 : i32, i32
  }
  func.func @transform_1(%arg0: i32) -> (i32, i32) {
    %c0_i32 = arith.constant 0 : i32
    %c0_i32_0 = arith.constant 0 : i32
    return %arg0, %c0_i32 : i32, i32
  }
  func.func @transform_2(%arg0: i32) -> (i32, i32) {
    %c0_i32 = arith.constant 0 : i32
    %c0_i32_0 = arith.constant 0 : i32
    %c0_i32_1 = arith.constant 0 : i32
    return %c0_i32, %c0_i32_0 : i32, i32
  }
  func.func @transform_3(%arg0: i32) -> (i32, i32) {
    %c0_i32 = arith.constant 0 : i32
    %c0_i32_0 = arith.constant 0 : i32
    %c0_i32_1 = arith.constant 0 : i32
    return %c0_i32, %c0_i32_0 : i32, i32
  }
  func.func @transform_4(%arg0: i32) -> (i32, i32) {
    %c0_i32 = arith.constant 0 : i32
    %c0_i32_0 = arith.constant 0 : i32
    return %arg0, %c0_i32 : i32, i32
  }
}

module attributes {stable_mosaic.version = 11 : i64} {
  func.func @_ffn_kernel(%arg0: i32, %arg1: i32, %arg2: memref<256x256xbf16, #tpu.memory_space<vmem>>, %arg3: memref<256x512xbf16, #tpu.memory_space<vmem>>, %arg4: memref<1x512xf32, #tpu.memory_space<vmem>>, %arg5: memref<512x256xbf16, #tpu.memory_space<vmem>>, %arg6: memref<1x256xf32, #tpu.memory_space<vmem>>, %arg7: memref<256x256xbf16, #tpu.memory_space<vmem>>, %arg8: memref<256x256xf32, #tpu.memory_space<vmem>>) attributes {dimension_semantics = [#tpu.dimension_semantics<parallel>, #tpu.dimension_semantics<arbitrary>], iteration_bounds = array<i64: 1, 1>, scalar_prefetch = 0 : i64, scratch_operands = 1 : i64, tpu.core_type = #tpu.core_type<tc>, window_params = [{transform_indices = @transform_0, window_bounds = array<i64: 256, 256>}, {transform_indices = @transform_1, window_bounds = array<i64: 256, 512>}, {transform_indices = @transform_2, window_bounds = array<i64: 1, 512>}, {transform_indices = @transform_3, window_bounds = array<i64: 512, 256>}, {pipeline_mode = #tpu.pipeline_mode<synchronous>, transform_indices = @transform_4, window_bounds = array<i64: 1, 256>}, {transform_indices = @transform_5, window_bounds = array<i64: 256, 256>}]} {
    %c0_i32 = arith.constant 0 : i32
    %0 = arith.cmpi eq, %arg1, %c0_i32 : i32
    %1 = arith.extui %0 : i1 to i32
    %c0_i32_0 = arith.constant 0 : i32
    %2 = arith.cmpi ne, %1, %c0_i32_0 : i32
    scf.if %2 {
      %cst_19 = arith.constant 0.000000e+00 : f32
      %31 = vector.broadcast %cst_19 : f32 to vector<256x256xf32>
      %c0_20 = arith.constant 0 : index
      %c0_21 = arith.constant 0 : index
      %32 = vector.load %arg8[%c0_20, %c0_21] : memref<256x256xf32, #tpu.memory_space<vmem>>, vector<256x256xf32>
      tpu.vector_store %arg8[%c0_20, %c0_21], %31 {strides = array<i32>} : memref<256x256xf32, #tpu.memory_space<vmem>>, vector<256x256xf32>,
    } else {
    }
    %c0 = arith.constant 0 : index
    %c0_1 = arith.constant 0 : index
    %3 = vector.load %arg2[%c0, %c0_1] : memref<256x256xbf16, #tpu.memory_space<vmem>>, vector<256x256xbf16>
    %c0_2 = arith.constant 0 : index
    %c0_3 = arith.constant 0 : index
    %4 = vector.load %arg3[%c0_2, %c0_3] : memref<256x512xbf16, #tpu.memory_space<vmem>>, vector<256x512xbf16>
    %cst = arith.constant dense<0.000000e+00> : vector<256x512xf32>
    %5 = tpu.matmul %3, %4, %cst {dimension_numbers = #tpu.dot_dimension_numbers<[1], [0], [0], [1], [0, 0, 1, 1], [], []>} : vector<256x256xbf16>, vector<256x512xbf16>, vector<256x512xf32> -> vector<256x512xf32>
    %c0_4 = arith.constant 0 : index
    %c0_5 = arith.constant 0 : index
    %6 = vector.load %arg4[%c0_4, %c0_5] : memref<1x512xf32, #tpu.memory_space<vmem>>, vector<1x512xf32>
    %7 = vector.broadcast %6 : vector<1x512xf32> to vector<256x512xf32>
    %8 = arith.addf %5, %7 : vector<256x512xf32>
    %cst_6 = arith.constant 5.000000e-01 : f32
    %9 = vector.broadcast %cst_6 : f32 to vector<256x512xf32>
    %10 = arith.mulf %9, %8 : vector<256x512xf32>
    %cst_7 = arith.constant 4.471500e-02 : f32
    %11 = vector.broadcast %cst_7 : f32 to vector<256x512xf32>
    %12 = arith.mulf %11, %8 : vector<256x512xf32>
    %13 = arith.mulf %12, %8 : vector<256x512xf32>
    %14 = arith.mulf %13, %8 : vector<256x512xf32>
    %15 = arith.addf %8, %14 : vector<256x512xf32>
    %cst_8 = arith.constant 0.797884583 : f32
    %16 = vector.broadcast %cst_8 : f32 to vector<256x512xf32>
    %17 = arith.mulf %16, %15 : vector<256x512xf32>
    %18 = math.tanh %17 : vector<256x512xf32>
    %cst_9 = arith.constant 1.000000e+00 : f32
    %19 = vector.broadcast %cst_9 : f32 to vector<256x512xf32>
    %20 = arith.addf %19, %18 : vector<256x512xf32>
    %21 = arith.mulf %10, %20 : vector<256x512xf32>
    %c0_10 = arith.constant 0 : index
    %c0_11 = arith.constant 0 : index
    %22 = vector.load %arg8[%c0_10, %c0_11] : memref<256x256xf32, #tpu.memory_space<vmem>>, vector<256x256xf32>
    %23 = arith.truncf %21 : vector<256x512xf32> to vector<256x512xbf16>
    %c0_12 = arith.constant 0 : index
    %c0_13 = arith.constant 0 : index
    %24 = vector.load %arg5[%c0_12, %c0_13] : memref<512x256xbf16, #tpu.memory_space<vmem>>, vector<512x256xbf16>
    %cst_14 = arith.constant dense<0.000000e+00> : vector<256x256xf32>
    %25 = tpu.matmul %23, %24, %cst_14 {dimension_numbers = #tpu.dot_dimension_numbers<[1], [0], [0], [1], [0, 0, 1, 1], [], []>} : vector<256x512xbf16>, vector<512x256xbf16>, vector<256x256xf32> -> vector<256x256xf32>
    %26 = arith.addf %22, %25 : vector<256x256xf32>
    %c0_15 = arith.constant 0 : index
    %c0_16 = arith.constant 0 : index
    %27 = vector.load %arg8[%c0_15, %c0_16] : memref<256x256xf32, #tpu.memory_space<vmem>>, vector<256x256xf32>
    tpu.vector_store %arg8[%c0_15, %c0_16], %26 {strides = array<i32>} : memref<256x256xf32, #tpu.memory_space<vmem>>, vector<256x256xf32>,
    %c0_i32_17 = arith.constant 0 : i32
    %28 = arith.cmpi eq, %arg1, %c0_i32_17 : i32
    %29 = arith.extui %28 : i1 to i32
    %c0_i32_18 = arith.constant 0 : i32
    %30 = arith.cmpi ne, %29, %c0_i32_18 : i32
    scf.if %30 {
      %c0_19 = arith.constant 0 : index
      %c0_20 = arith.constant 0 : index
      %31 = vector.load %arg8[%c0_19, %c0_20] : memref<256x256xf32, #tpu.memory_space<vmem>>, vector<256x256xf32>
      %c0_21 = arith.constant 0 : index
      %c0_22 = arith.constant 0 : index
      %32 = vector.load %arg6[%c0_21, %c0_22] : memref<1x256xf32, #tpu.memory_space<vmem>>, vector<1x256xf32>
      %33 = vector.broadcast %32 : vector<1x256xf32> to vector<256x256xf32>
      %34 = arith.addf %31, %33 : vector<256x256xf32>
      %35 = arith.truncf %34 : vector<256x256xf32> to vector<256x256xbf16>
      %c0_23 = arith.constant 0 : index
      %c0_24 = arith.constant 0 : index
      %36 = vector.load %arg7[%c0_23, %c0_24] : memref<256x256xbf16, #tpu.memory_space<vmem>>, vector<256x256xbf16>
      tpu.vector_store %arg7[%c0_23, %c0_24], %35 {strides = array<i32>} : memref<256x256xbf16, #tpu.memory_space<vmem>>, vector<256x256xbf16>,
    } else {
    }
    return
  }
  func.func @transform_0(%arg0: i32, %arg1: i32) -> (i32, i32) {
    %c0_i32 = arith.constant 0 : i32
    %c0_i32_0 = arith.constant 0 : i32
    return %arg0, %c0_i32 : i32, i32
  }
  func.func @transform_1(%arg0: i32, %arg1: i32) -> (i32, i32) {
    %c0_i32 = arith.constant 0 : i32
    %c0_i32_0 = arith.constant 0 : i32
    return %c0_i32, %arg1 : i32, i32
  }
  func.func @transform_2(%arg0: i32, %arg1: i32) -> (i32, i32) {
    %c0_i32 = arith.constant 0 : i32
    %c0_i32_0 = arith.constant 0 : i32
    return %c0_i32, %arg1 : i32, i32
  }
  func.func @transform_3(%arg0: i32, %arg1: i32) -> (i32, i32) {
    %c0_i32 = arith.constant 0 : i32
    %c0_i32_0 = arith.constant 0 : i32
    return %arg1, %c0_i32 : i32, i32
  }
  func.func @transform_4(%arg0: i32, %arg1: i32) -> (i32, i32) {
    %c0_i32 = arith.constant 0 : i32
    %c0_i32_0 = arith.constant 0 : i32
    %c0_i32_1 = arith.constant 0 : i32
    return %c0_i32, %c0_i32_0 : i32, i32
  }
  func.func @transform_5(%arg0: i32, %arg1: i32) -> (i32, i32) {
    %c0_i32 = arith.constant 0 : i32
    %c0_i32_0 = arith.constant 0 : i32
    return %arg0, %c0_i32 : i32, i32
  }
}

module attributes {stable_mosaic.version = 11 : i64} {
  func.func @_linear_kernel(%arg0: i32, %arg1: i32, %arg2: i32, %arg3: memref<2x256xbf16, #tpu.memory_space<vmem>>, %arg4: memref<256x256xbf16, #tpu.memory_space<vmem>>, %arg5: memref<1x256xf32, #tpu.memory_space<vmem>>, %arg6: memref<2x256xf32, #tpu.memory_space<vmem>>, %arg7: memref<2x256xf32, #tpu.memory_space<vmem>>) attributes {dimension_semantics = [#tpu.dimension_semantics<parallel>, #tpu.dimension_semantics<parallel>, #tpu.dimension_semantics<arbitrary>], iteration_bounds = array<i64: 1, 1, 1>, scalar_prefetch = 0 : i64, scratch_operands = 1 : i64, tpu.core_type = #tpu.core_type<tc>, window_params = [{transform_indices = @transform_0, window_bounds = array<i64: 2, 256>}, {transform_indices = @transform_1, window_bounds = array<i64: 256, 256>}, {transform_indices = @transform_2, window_bounds = array<i64: 1, 256>}, {transform_indices = @transform_3, window_bounds = array<i64: 2, 256>}]} {
    %c0_i32 = arith.constant 0 : i32
    %0 = arith.cmpi eq, %arg2, %c0_i32 : i32
    %1 = arith.extui %0 : i1 to i32
    %c0_i32_0 = arith.constant 0 : i32
    %2 = arith.cmpi ne, %1, %c0_i32_0 : i32
    scf.if %2 {
      %cst_10 = arith.constant 0.000000e+00 : f32
      %12 = vector.broadcast %cst_10 : f32 to vector<2x256xf32>
      %c0_11 = arith.constant 0 : index
      %c0_12 = arith.constant 0 : index
      %13 = vector.load %arg7[%c0_11, %c0_12] : memref<2x256xf32, #tpu.memory_space<vmem>>, vector<2x256xf32>
      tpu.vector_store %arg7[%c0_11, %c0_12], %12 {strides = array<i32>} : memref<2x256xf32, #tpu.memory_space<vmem>>, vector<2x256xf32>,
    } else {
    }
    %c0 = arith.constant 0 : index
    %c0_1 = arith.constant 0 : index
    %3 = vector.load %arg7[%c0, %c0_1] : memref<2x256xf32, #tpu.memory_space<vmem>>, vector<2x256xf32>
    %c0_2 = arith.constant 0 : index
    %c0_3 = arith.constant 0 : index
    %4 = vector.load %arg3[%c0_2, %c0_3] : memref<2x256xbf16, #tpu.memory_space<vmem>>, vector<2x256xbf16>
    %c0_4 = arith.constant 0 : index
    %c0_5 = arith.constant 0 : index
    %5 = vector.load %arg4[%c0_4, %c0_5] : memref<256x256xbf16, #tpu.memory_space<vmem>>, vector<256x256xbf16>
    %cst = arith.constant dense<0.000000e+00> : vector<2x256xf32>
    %6 = tpu.matmul %4, %5, %cst {dimension_numbers = #tpu.dot_dimension_numbers<[1], [0], [0], [1], [0, 0, 1, 1], [], []>} : vector<2x256xbf16>, vector<256x256xbf16>, vector<2x256xf32> -> vector<2x256xf32>
    %7 = arith.addf %3, %6 : vector<2x256xf32>
    %c0_6 = arith.constant 0 : index
    %c0_7 = arith.constant 0 : index
    %8 = vector.load %arg7[%c0_6, %c0_7] : memref<2x256xf32, #tpu.memory_space<vmem>>, vector<2x256xf32>
    tpu.vector_store %arg7[%c0_6, %c0_7], %7 {strides = array<i32>} : memref<2x256xf32, #tpu.memory_space<vmem>>, vector<2x256xf32>,
    %c0_i32_8 = arith.constant 0 : i32
    %9 = arith.cmpi eq, %arg2, %c0_i32_8 : i32
    %10 = arith.extui %9 : i1 to i32
    %c0_i32_9 = arith.constant 0 : i32
    %11 = arith.cmpi ne, %10, %c0_i32_9 : i32
    scf.if %11 {
      %c0_10 = arith.constant 0 : index
      %c0_11 = arith.constant 0 : index
      %12 = vector.load %arg7[%c0_10, %c0_11] : memref<2x256xf32, #tpu.memory_space<vmem>>, vector<2x256xf32>
      %c0_12 = arith.constant 0 : index
      %c0_13 = arith.constant 0 : index
      %13 = vector.load %arg5[%c0_12, %c0_13] : memref<1x256xf32, #tpu.memory_space<vmem>>, vector<1x256xf32>
      %14 = vector.broadcast %13 : vector<1x256xf32> to vector<2x256xf32>
      %15 = arith.addf %12, %14 : vector<2x256xf32>
      %16 = math.tanh %15 : vector<2x256xf32>
      %c0_14 = arith.constant 0 : index
      %c0_15 = arith.constant 0 : index
      %17 = vector.load %arg6[%c0_14, %c0_15] : memref<2x256xf32, #tpu.memory_space<vmem>>, vector<2x256xf32>
      tpu.vector_store %arg6[%c0_14, %c0_15], %16 {strides = array<i32>} : memref<2x256xf32, #tpu.memory_space<vmem>>, vector<2x256xf32>,
    } else {
    }
    return
  }
  func.func @transform_0(%arg0: i32, %arg1: i32, %arg2: i32) -> (i32, i32) {
    %c0_i32 = arith.constant 0 : i32
    return %arg0, %arg2 : i32, i32
  }
  func.func @transform_1(%arg0: i32, %arg1: i32, %arg2: i32) -> (i32, i32) {
    %c0_i32 = arith.constant 0 : i32
    return %arg2, %arg1 : i32, i32
  }
  func.func @transform_2(%arg0: i32, %arg1: i32, %arg2: i32) -> (i32, i32) {
    %c0_i32 = arith.constant 0 : i32
    %c0_i32_0 = arith.constant 0 : i32
    return %c0_i32, %arg1 : i32, i32
  }
  func.func @transform_3(%arg0: i32, %arg1: i32, %arg2: i32) -> (i32, i32) {
    %c0_i32 = arith.constant 0 : i32
    return %arg0, %arg1 : i32, i32
  }
}

</mosaic_0001>

<bundles_post_ra>
// kernel: roberta_forward.16
= control target key start
LH: loop header
LB: loop body
LE: loop exit
PB: predicated region body
PF: predicated region fallthrough
CT: control target
= control target key end

     0   :  { %s2462_s0 = inlined_call_operand.vmem [shape: bf16[2,128,768], index: 0, kind: input, shape index: {}, may-alias: {0,1,2}]   ;;  %s2463_s1 = inlined_call_operand.vmem [shape: bf16[2,128,768], index: 1, kind: input, shape index: {}, may-alias: {0,1,2}]   ;;  %s2464_s2 = inlined_call_operand.vmem [shape: bf16[2,128,768], index: 2, kind: input, shape index: {}, may-alias: {0,1,2}]   ;;  %s2465_s3 = inlined_call_operand.vmem [shape: f32[2,1,128], index: 3, kind: input, shape index: {}]   ;;  %s2466_s4 = inlined_call_operand.vmem [shape: bf16[2,128,256], index: 4, kind: output, shape index: {}]  }
   0x1   :  { %2468 = sst [smem:[#allocation8_spill]] %s2466_s4 }
   0x2   :  { %s2017_s15 = smov 0   ;;  %s2019_s16 = smov 0  }
   0x3   :  { %s2021_s17 = smov 0   ;;  %s2023_s18 = smov 0  }
   0x4   :  { %s2025_s19 = smov 0   ;;  %s2027_s20 = smov 0  }
   0x5   :  { %s2029_s21 = smov 0   ;;  %s2031_s22 = smov 0  }
   0x6   :  { %s2033_s23 = smov 0   ;;  %s2035_s24 = smov 0  }
   0x7   :  { %s2037_s25 = smov 0  }
   0x8 LB: > { %2469 = sst [smem:[#allocation6_spill]] %s1974_s21  ;;  %s23_s27 = sadd.s32 1, %s1982_s23  ;;  %s1990_s25 = sphi %s2037_s25, %s14_s25   ;;  %s1986_s24 = sphi %s2035_s24, %s2488_s24   ;;  %s1982_s23 = sphi %s2033_s23, %s2487_s23   ;;  %s1978_s22 = sphi %s2031_s22, %s2486_s22   ;;  %s1974_s21 = sphi %s2029_s21, %s2485_s21   ;;  %s1970_s20 = sphi %s2027_s20, %s2484_s20   ;;  %s1966_s19 = sphi %s2025_s19, %s2483_s19   ;;  %s1962_s18 = sphi %s2023_s18, %s2482_s18   ;;  %s1958_s17 = sphi %s2021_s17, %s2481_s17   ;;  %s1954_s16 = sphi %s2019_s16, %s2480_s16   ;;  %s1950_s15 = sphi %s2017_s15, %s2479_s15  }
   0x9   : > { %p24_p0 = scmp.ge.s32.totalorder %s23_s27, 2  ;;  %s26_s28 = sadd.s32 1, %s1986_s24 }
   0xa   : > { %s35_s29 = sadd.s32 1, %s1970_s20  ;;  %p42_p1 = scmp.ne.s32.totalorder %s1970_s20, %s1966_s19 }
   0xb   : > { %s2490_s27 = smov (%p24_p0, %s23_s27), 0  ;;  %s2492_s28 = smov (!%p24_p0, %s26_s28), %s1986_s24 }
   0xc   : > { %s31_s30 = ssub.s32 %s1982_s23, %s2490_s27  ;;  %p43_p2 = scmp.eq.s32.totalorder %s1990_s25, 0 }
   0xd   : > { %p28_p3 = scmp.ge.s32.totalorder %s2492_s28, 2  ;;  %s58_s5 = sadd.s32 2, %s1982_s23 }
   0xe   : > { %p2090_p4 = por %p43_p2, %p42_p1  ;;  %s59_s7 = sadd.s32 2, %s2490_s27 }
   0xf   : > { %s2494_s28 = smov (%p28_p3, %s2492_s28), 0  ;;  %s61_s8 = ssub.s32 %s58_s5, %s59_s7 }
  0x10   : > { %2471 = sst [smem:[#allocation7_spill]] %s2494_s28  ;;  %s65_s9 = sadd.s32 1, %s1962_s18 }
  0x11   : > { %s30_s10 = ssub.s32 %s1986_s24, %s2494_s28  ;;  %p72_p5 = scmp.ne.s32.totalorder %s1962_s18, %s1958_s17 }
  0x12   : > { %s32_s11 = sor.u32 %s31_s30, %s30_s10  ;;  %s62_s12 = sor.u32 %s61_s8, %s30_s10 }
  0x13   : > { %p33_p6 = scmp.eq.s32.totalorder %s32_s11, 0  ;;  %p63_p7 = scmp.eq.s32.totalorder %s62_s12, 0 }
  0x14   : > { %p2104_p8 = por %p72_p5, %p43_p2  ;;  %s88_s14 = sadd.s32 4, %s1982_s23 }
  0x15   : > { %s2110_s26 = scalar_select %p33_p6, %s1970_s20, %s35_s29  }
  0x16   : > { %s2113_s5 = scalar_select %p63_p7, %s1962_s18, %s65_s9  }
  0x17   : > { %s89_s7 = sadd.s32 4, %s2490_s27  ;;  %s95_s28 = sadd.s32 1, %s1954_s16 }
  0x18   : > { %s91_s4 = ssub.s32 %s88_s14, %s89_s7  ;;  %p102_p9 = scmp.ne.s32.totalorder %s1954_s16, %s1950_s15 }
  0x19   : > { %s92_s30 = sor.u32 %s91_s4, %s30_s10  ;;  %s2473_s21 = sadd.s32 4294967295, %s1990_s25  }
  0x1a   : > { %p160_p10 = scmp.eq.s32.totalorder %s2473_s21, 3  ;;  %p93_p11 = scmp.eq.s32.totalorder %s92_s30, 0 }
  0x1b   : > { %p2123_p12 = por %p102_p9, %p43_p2  ;;  %p1479_p0 = scmp.ge.s32.totalorder %s1990_s25, 4 }
  0x1c   : > { %p2130_p13 = por %p160_p10, %p42_p1 }
  0x1d   : > { %s2135_s29 = scalar_select %p93_p11, %s1954_s16, %s95_s28  }
  0x1e   : > { %182 = sbr.rel (%p1479_p0) target bundleno = 88 (0x58), region = 16 }
  0x25   : > { %185 = sbr.rel (!%p2090_p4) target bundleno = 54 (0x36), region = 20  ;;  %s187_s4 = sand.u32 (%p2090_p4), 1, %s1970_s20  }
  0x26   : > { %s1727_s21 = smul.u32 (%p2090_p4), 96, %s1986_s24  ;;  %s1480_s9 = sshll.u32 (%p2090_p4), %s187_s4, 6 }
  0x27   : > { %s189_s28 = scalar_lea.vmem (%p2090_p4), [#allocation2], %s1480_s9 }
  0x28   : > { %s191_s10 = sadd.s32 (%p2090_p4), %s1982_s23, %s1727_s21 }
  0x29   : > { %s1481_s12 = sshll.u32 (%p2090_p4), %s191_s10, 2 }
  0x2a   : > { %s2146_s30 = scalar_lea.vmem (%p2090_p4), %s2462_s0, %s1481_s12 }
  0x2b   : > { %v209_v0 = vld [vmem:[%s2146_s30] sm:$0xf] (%p2090_p4)  ;;  %v211_v1 = vld [vmem:[%s2146_s30 + $0x18] sm:$0xf] (%p2090_p4)  ;;  %v213_v2 = vld [vmem:[%s2146_s30 + $0x30] sm:$0xf] (%p2090_p4) }
  0x2c   : > { %210 = vst [vmem:[%s189_s28] sm:$0xf] %v209_v0  ;;  %212 = vst [vmem:[%s189_s28 + $0x4] sm:$0xf] %v211_v1  ;;  %v215_v3 = vld [vmem:[%s2146_s30 + $0x48] sm:$0xf] }
  0x2d   : > { %214 = vst [vmem:[%s189_s28 + $0x8] sm:$0xf] %v213_v2  ;;  %v217_v4 = vld [vmem:[%s2146_s30 + $0x60] sm:$0xf]  ;;  %v219_v5 = vld [vmem:[%s2146_s30 + $0x78] sm:$0xf] }
  0x2e   : > { %216 = vst [vmem:[%s189_s28 + $0xc] sm:$0xf] %v215_v3  ;;  %218 = vst [vmem:[%s189_s28 + $0x10] sm:$0xf] %v217_v4  ;;  %v221_v6 = vld [vmem:[%s2146_s30 + $0x90] sm:$0xf] }
  0x2f   : > { %220 = vst [vmem:[%s189_s28 + $0x14] sm:$0xf] %v219_v5  ;;  %v223_v7 = vld [vmem:[%s2146_s30 + $0xa8] sm:$0xf]  ;;  %v225_v8 = vld [vmem:[%s2146_s30 + $0xc0] sm:$0xf] }
  0x30   : > { %222 = vst [vmem:[%s189_s28 + $0x18] sm:$0xf] %v221_v6  ;;  %224 = vst [vmem:[%s189_s28 + $0x1c] sm:$0xf] %v223_v7  ;;  %v227_v9 = vld [vmem:[%s2146_s30 + $0xd8] sm:$0xf] }
  0x31   : > { %226 = vst [vmem:[%s189_s28 + $0x20] sm:$0xf] %v225_v8  ;;  %v229_v10 = vld [vmem:[%s2146_s30 + $0xf0] sm:$0xf]  ;;  %v231_v11 = vld [vmem:[%s2146_s30 + $0x108] sm:$0xf] }
  0x32   : > { %228 = vst [vmem:[%s189_s28 + $0x24] sm:$0xf] %v227_v9  ;;  %230 = vst [vmem:[%s189_s28 + $0x28] sm:$0xf] %v229_v10  ;;  %v233_v12 = vld [vmem:[%s2146_s30 + $0x120] sm:$0xf] }
  0x33   : > { %232 = vst [vmem:[%s189_s28 + $0x2c] sm:$0xf] %v231_v11  ;;  %v235_v13 = vld [vmem:[%s2146_s30 + $0x138] sm:$0xf]  ;;  %v237_v14 = vld [vmem:[%s2146_s30 + $0x150] sm:$0xf] }
  0x34   : > { %234 = vst [vmem:[%s189_s28 + $0x30] sm:$0xf] %v233_v12  ;;  %236 = vst [vmem:[%s189_s28 + $0x34] sm:$0xf] %v235_v13  ;;  %v239_v15 = vld [vmem:[%s2146_s30 + $0x168] sm:$0xf] }
  0x35   : > { %238 = vst [vmem:[%s189_s28 + $0x38] sm:$0xf] %v237_v14  ;;  %240 = vst [vmem:[%s189_s28 + $0x3c] sm:$0xf] %v239_v15 }
  0x36 PF: > { %295 = sbr.rel (!%p2104_p8) target bundleno = 71 (0x47), region = 61  ;;  %s297_s6 = sand.u32 (%p2104_p8), 1, %s1962_s18  }
  0x37   : > { %s1373_s4 = smul.u32 (%p2104_p8), 96, %s1986_s24  ;;  %s1482_s21 = sshll.u32 (%p2104_p8), %s297_s6, 6 }
  0x38   : > { %s299_s13 = scalar_lea.vmem (%p2104_p8), [#allocation3], %s1482_s21 }
  0x39   : > { %s1374_s9 = sadd.s32 (%p2104_p8), %s1982_s23, %s1373_s4 }
  0x3a   : > { %s1483_s10 = sshll.u32 (%p2104_p8), %s1374_s9, 2 }
  0x3b   : > { %s2172_s7 = scalar_lea.vmem (%p2104_p8), %s2463_s1, %s1483_s10 }
  0x3c   : > { %v1484_v16 = vld [vmem:[%s2172_s7 + $0x8] sm:$0xf] (%p2104_p8)  ;;  %v1485_v17 = vld [vmem:[%s2172_s7 + $0x20] sm:$0xf] (%p2104_p8)  ;;  %v1486_v18 = vld [vmem:[%s2172_s7 + $0x38] sm:$0xf] (%p2104_p8) }
  0x3d   : > { %321 = vst [vmem:[%s299_s13] sm:$0xf] %v1484_v16  ;;  %323 = vst [vmem:[%s299_s13 + $0x4] sm:$0xf] %v1485_v17  ;;  %v1487_v19 = vld [vmem:[%s2172_s7 + $0x50] sm:$0xf] }
  0x3e   : > { %325 = vst [vmem:[%s299_s13 + $0x8] sm:$0xf] %v1486_v18  ;;  %v1488_v20 = vld [vmem:[%s2172_s7 + $0x68] sm:$0xf]  ;;  %v1489_v21 = vld [vmem:[%s2172_s7 + $0x80] sm:$0xf] }
  0x3f   : > { %327 = vst [vmem:[%s299_s13 + $0xc] sm:$0xf] %v1487_v19  ;;  %329 = vst [vmem:[%s299_s13 + $0x10] sm:$0xf] %v1488_v20  ;;  %v1490_v22 = vld [vmem:[%s2172_s7 + $0x98] sm:$0xf] }
  0x40   : > { %331 = vst [vmem:[%s299_s13 + $0x14] sm:$0xf] %v1489_v21  ;;  %v1491_v23 = vld [vmem:[%s2172_s7 + $0xb0] sm:$0xf]  ;;  %v1492_v24 = vld [vmem:[%s2172_s7 + $0xc8] sm:$0xf] }
  0x41   : > { %333 = vst [vmem:[%s299_s13 + $0x18] sm:$0xf] %v1490_v22  ;;  %335 = vst [vmem:[%s299_s13 + $0x1c] sm:$0xf] %v1491_v23  ;;  %v1493_v25 = vld [vmem:[%s2172_s7 + $0xe0] sm:$0xf] }
  0x42   : > { %337 = vst [vmem:[%s299_s13 + $0x20] sm:$0xf] %v1492_v24  ;;  %v1494_v26 = vld [vmem:[%s2172_s7 + $0xf8] sm:$0xf]  ;;  %v1495_v27 = vld [vmem:[%s2172_s7 + $0x110] sm:$0xf] }
  0x43   : > { %339 = vst [vmem:[%s299_s13 + $0x24] sm:$0xf] %v1493_v25  ;;  %341 = vst [vmem:[%s299_s13 + $0x28] sm:$0xf] %v1494_v26  ;;  %v1496_v28 = vld [vmem:[%s2172_s7 + $0x128] sm:$0xf] }
  0x44   : > { %343 = vst [vmem:[%s299_s13 + $0x2c] sm:$0xf] %v1495_v27  ;;  %v1497_v29 = vld [vmem:[%s2172_s7 + $0x140] sm:$0xf]  ;;  %v1498_v30 = vld [vmem:[%s2172_s7 + $0x158] sm:$0xf] }
  0x45   : > { %345 = vst [vmem:[%s299_s13 + $0x30] sm:$0xf] %v1496_v28  ;;  %347 = vst [vmem:[%s299_s13 + $0x34] sm:$0xf] %v1497_v29  ;;  %v1499_v31 = vld [vmem:[%s2172_s7 + $0x170] sm:$0xf] }
  0x46   : > { %349 = vst [vmem:[%s299_s13 + $0x38] sm:$0xf] %v1498_v30  ;;  %351 = vst [vmem:[%s299_s13 + $0x3c] sm:$0xf] %v1499_v31 }
  0x47 PF: > { %406 = sbr.rel (!%p2123_p12) target bundleno = 88 (0x58), region = 102  ;;  %s408_s30 = sand.u32 (%p2123_p12), 1, %s1954_s16  }
  0x48   : > { %s1380_s28 = smul.u32 (%p2123_p12), 96, %s1986_s24  ;;  %s1500_s6 = sshll.u32 (%p2123_p12), %s408_s30, 6 }
  0x49   : > { %s410_s8 = scalar_lea.vmem (%p2123_p12), [#allocation4], %s1500_s6 }
  0x4a   : > { %s1381_s4 = sadd.s32 (%p2123_p12), %s1982_s23, %s1380_s28 }
  0x4b   : > { %s1501_s21 = sshll.u32 (%p2123_p12), %s1381_s4, 2 }
  0x4c   : > { %s2198_s12 = scalar_lea.vmem (%p2123_p12), %s2464_s2, %s1501_s21 }
  0x4d   : > { %v1502_v32 = vld [vmem:[%s2198_s12 + $0x10] sm:$0xf] (%p2123_p12)  ;;  %v1503_v33 = vld [vmem:[%s2198_s12 + $0x28] sm:$0xf] (%p2123_p12)  ;;  %v1504_v34 = vld [vmem:[%s2198_s12 + $0x40] sm:$0xf] (%p2123_p12) }
  0x4e   : > { %432 = vst [vmem:[%s410_s8] sm:$0xf] %v1502_v32  ;;  %434 = vst [vmem:[%s410_s8 + $0x4] sm:$0xf] %v1503_v33  ;;  %v1505_v35 = vld [vmem:[%s2198_s12 + $0x58] sm:$0xf] }
  0x4f   : > { %436 = vst [vmem:[%s410_s8 + $0x8] sm:$0xf] %v1504_v34  ;;  %v1506_v36 = vld [vmem:[%s2198_s12 + $0x70] sm:$0xf]  ;;  %v1507_v37 = vld [vmem:[%s2198_s12 + $0x88] sm:$0xf] }
  0x50   : > { %438 = vst [vmem:[%s410_s8 + $0xc] sm:$0xf] %v1505_v35  ;;  %440 = vst [vmem:[%s410_s8 + $0x10] sm:$0xf] %v1506_v36  ;;  %v1508_v38 = vld [vmem:[%s2198_s12 + $0xa0] sm:$0xf] }
  0x51   : > { %442 = vst [vmem:[%s410_s8 + $0x14] sm:$0xf] %v1507_v37  ;;  %v1509_v39 = vld [vmem:[%s2198_s12 + $0xb8] sm:$0xf]  ;;  %v1510_v40 = vld [vmem:[%s2198_s12 + $0xd0] sm:$0xf] }
  0x52   : > { %444 = vst [vmem:[%s410_s8 + $0x18] sm:$0xf] %v1508_v38  ;;  %446 = vst [vmem:[%s410_s8 + $0x1c] sm:$0xf] %v1509_v39  ;;  %v1511_v41 = vld [vmem:[%s2198_s12 + $0xe8] sm:$0xf] }
  0x53   : > { %448 = vst [vmem:[%s410_s8 + $0x20] sm:$0xf] %v1510_v40  ;;  %v1512_v42 = vld [vmem:[%s2198_s12 + $0x100] sm:$0xf]  ;;  %v1513_v43 = vld [vmem:[%s2198_s12 + $0x118] sm:$0xf] }
  0x54   : > { %450 = vst [vmem:[%s410_s8 + $0x24] sm:$0xf] %v1511_v41  ;;  %452 = vst [vmem:[%s410_s8 + $0x28] sm:$0xf] %v1512_v42  ;;  %v1514_v44 = vld [vmem:[%s2198_s12 + $0x130] sm:$0xf] }
  0x55   : > { %454 = vst [vmem:[%s410_s8 + $0x2c] sm:$0xf] %v1513_v43  ;;  %v1515_v45 = vld [vmem:[%s2198_s12 + $0x148] sm:$0xf]  ;;  %v1516_v46 = vld [vmem:[%s2198_s12 + $0x160] sm:$0xf] }
  0x56   : > { %456 = vst [vmem:[%s410_s8 + $0x30] sm:$0xf] %v1514_v44  ;;  %458 = vst [vmem:[%s410_s8 + $0x34] sm:$0xf] %v1515_v45  ;;  %v1517_v47 = vld [vmem:[%s2198_s12 + $0x178] sm:$0xf] }
  0x57   : > { %460 = vst [vmem:[%s410_s8 + $0x38] sm:$0xf] %v1516_v46  ;;  %462 = vst [vmem:[%s410_s8 + $0x3c] sm:$0xf] %v1517_v47 }
  0x58 PF: > { %p1518_p1 = scmp.ge.s32.totalorder %s1990_s25, 1  ;;  %p522_p2 = scmp.lt.s32.totalorder %s1990_s25, 5 }
  0x5a   : > { %p523_p3 = pnand %p1518_p1, %p522_p2 }
  0x5b   : > { %s536_s14 = sand.u32 (!%p523_p3), 1, %s1958_s17   ;;  %s529_s13 = sand.u32 (!%p523_p3), 1, %s1966_s19   ;;  %v845_v0 = vlaneseq (!%p523_p3) }
  0x5c   : > { %526 = sbr.rel (%p523_p3) target bundleno = 949 (0x3b5), region = 147  ;;  %s1520_s7 = sshll.u32 (!%p523_p3), %s536_s14, 6 }
  0x5d   : > { %s538_s30 = scalar_lea.vmem (!%p523_p3), [#allocation3], %s1520_s7  ;;  %s2220_s28 = sshll.u32 (!%p523_p3), %s529_s13, 6  ;;  %v846_v3 = vshrl.u32 (!%p523_p3), %v845_v0, 7 }
  0x5e   : > { %v1816_v48 = vld [vmem:[%s538_s30] sm:$0xff] (!%p523_p3)   ;;  %v1817_v49 = vld [vmem:[%s538_s30 + $0x8] sm:$0xff] (!%p523_p3)   ;;  %v1818_v50 = vld [vmem:[%s538_s30 + $0x10] sm:$0xff] (!%p523_p3)   ;;  %s2223_s6 = scalar_lea.vmem (!%p523_p3), [#allocation2], %s2220_s28  ;;  %p580_p4 = scmp.lt.s32.totalorder (!%p523_p3), %s1978_s22, 1 }
  0x5f   : > { %1663 = vmatprep.subr.bf16.mxu0 (!%p523_p3), %v1816_v48  ;;  %v1824_v51 = vld [vmem:[%s2223_s6] sm:$0xff] (!%p523_p3)   ;;  %v1819_v52 = vld [vmem:[%s538_s30 + $0x18] sm:$0xff] (!%p523_p3)   ;;  %v1821_v54 = vld [vmem:[%s538_s30 + $0x28] sm:$0xff] (!%p523_p3)   ;;  %v847_v5 = vsub.s32 (!%p523_p3), 0, %v846_v3  ;;  %s543_s9 = sand.u32 (!%p523_p3), 1, %s1950_s15   ;;  %s2396_s15 = scalar_lea.vmem (!%p523_p3), [#allocation5], %s2220_s28 }
  0x60   : > { %1664 = vmatpush3.bf16.xpose.msra.mxu0 (!%p523_p3), %v1816_v48  ;;  %1679 = vmatprep.mubr.bf16.mxu0 (!%p523_p3), %v1824_v51  ;;  %v1820_v53 = vld [vmem:[%s538_s30 + $0x20] sm:$0xff] (!%p523_p3)   ;;  %v1822_v55 = vld [vmem:[%s538_s30 + $0x30] sm:$0xff] (!%p523_p3)   ;;  %v1823_v56 = vld [vmem:[%s538_s30 + $0x38] sm:$0xff] (!%p523_p3)   ;;  %s1521_s10 = sshll.u32 (!%p523_p3), %s543_s9, 6 }
  0x61   : > { %1665 = vmatprep.subr.bf16.mxu0 (!%p523_p3), %v1817_v49  ;;  %v1825_v57 = vld [vmem:[%s2223_s6 + $0x8] sm:$0xff] (!%p523_p3)   ;;  %v1826_v58 = vld [vmem:[%s2223_s6 + $0x10] sm:$0xff] (!%p523_p3)   ;;  %v1827_v59 = vld [vmem:[%s2223_s6 + $0x18] sm:$0xff] (!%p523_p3)   ;;  %s2305_s12 = scalar_lea.vmem (!%p523_p3), [#allocation4], %s1521_s10 }
  0x62   : > { %v1828_v60 = vld [vmem:[%s2223_s6 + $0x20] sm:$0xff] (!%p523_p3)   ;;  %v1829_v61 = vld [vmem:[%s2223_s6 + $0x28] sm:$0xff] (!%p523_p3)   ;;  %v1830_v62 = vld [vmem:[%s2223_s6 + $0x30] sm:$0xff] (!%p523_p3)  }
  0x63   : > { %v1831_v63 = vld [vmem:[%s2223_s6 + $0x38] sm:$0xff]   ;;  %s581_s17 = scalar_select %p580_p4, %s1978_s22, 1 }
  0x64   : > { %s2476_s8 = sld [smem:[#allocation6_spill]] (%p2130_p13)  ;;  %s1564_s14 = sshll.u32 (%p2130_p13), %s1978_s22, 5 }
  0x65   : > { %s582_s21 = scalar_lea.vmem %s2465_s3, %s581_s17  ;;  %s2477_s28 = sld [smem:[#allocation8_spill]] (%p2130_p13) }
  0x66   : > { %v841_v1 = vld [vmem:[%s582_s21] sm:$0x1] }
  0x67   : > { %v842_v2 = vsub.f32 1.0, %v841_v1 }
  0x68   : > { %1666 = vmatpush3.bf16.xpose.msra.mxu0 %v1817_v49 }
  0x69   : > { %1667 = vmatprep.subr.bf16.mxu0 %v1818_v50  ;;  %v843_v4 = vmul.f32 -1e+09, %v842_v2 }
  0x6a   : > { %s1251_s7 = sadd.s32 (%p2130_p13), %s2476_s8, %s1564_s14 }
  0x6b   : > { %v2238_v6 = vrot.slane %v843_v4, %v847_v5  ;;  %s1565_s11 = sshll.u32 (%p2130_p13), %s1251_s7, 2 }
  0x6c   : > { %s1253_s6 = scalar_lea.vmem (%p2130_p13), %s2477_s28, %s1565_s11 }
  0x70   : > { %1668 = vmatpush3.bf16.xpose.msra.mxu0 %v1818_v50 }
  0x71   : > { %1669 = vmatprep.subr.bf16.mxu0 %v1819_v52 }
  0x78   : > { %1670 = vmatpush3.bf16.xpose.msra.mxu0 %v1819_v52 }
  0x79   : > { %1671 = vmatprep.subr.bf16.mxu0 %v1820_v53 }
  0x80   : > { %1672 = vmatpush3.bf16.xpose.msra.mxu0 %v1820_v53 }
  0x81   : > { %1673 = vmatprep.subr.bf16.mxu0 %v1821_v54 }
  0x88   : > { %1674 = vmatpush3.bf16.xpose.msra.mxu0 %v1821_v54 }
  0x89   : > { %1675 = vmatprep.subr.bf16.mxu0 %v1822_v55 }
  0x90   : > { %1676 = vmatpush3.bf16.xpose.msra.mxu0 %v1822_v55  ;;  %v1832_v55 = vld [vmem:[%s2305_s12] sm:$0xff]  }
  0x91   : > { %1677 = vmatprep.subr.bf16.mxu0 %v1823_v56  ;;  %1695 = vmatprep.subr.bf16.mxu1 %v1832_v55 }
  0x92   : > { %1696 = vmatpush3.bf16.msra.mxu1 %v1832_v55  ;;  %v1836_v55 = vld [vmem:[%s2305_s12 + $0x20] sm:$0xff]  }
  0x98   : > { %1678 = vmatpush3.bf16.xpose.msra.mxu0 %v1823_v56  ;;  %v1833_v56 = vld [vmem:[%s2305_s12 + $0x8] sm:$0xff]  }
  0x99   : > { %1697 = vmatprep.subr.bf16.mxu1 %v1833_v56 }
  0x9a   : > { %1698 = vmatpush3.bf16.msra.mxu1 %v1833_v56 }
  0x9f   : > { %1680 = vmatmul.mubr.bf16.vlgmr.msra.gmra.mrb[0].mxu0 %v1825_v57  ;;  %v1834_v57 = vld [vmem:[%s2305_s12 + $0x10] sm:$0xff]  }
  0xa0   : > { %1683 = vmatprep.mubr.bf16.mxu0 %v1826_v58  ;;  %1699 = vmatprep.subr.bf16.mxu1 %v1834_v57 }
  0xa1   : > { %1700 = vmatpush3.bf16.msra.mxu1 %v1834_v57  ;;  %v1837_v57 = vld [vmem:[%s2305_s12 + $0x28] sm:$0xff]  }
  0xa7   : > { %1684 = vmatmul.mubr.bf16.gmra.mrb[4].mxu0 %v1827_v59 }
  0xa8   : > { %1687 = vmatprep.mubr.bf16.mxu0 %v1828_v60 }
  0xaf   : > { %1688 = vmatmul.mubr.bf16.gmra.mrb[8].mxu0 %v1829_v61 }
  0xb0   : > { %1691 = vmatprep.mubr.bf16.mxu0 %v1830_v62 }
  0xb7   : > { %1692 = vmatmul.mubr.bf16.gmra.mrb[12].mxu0 %v1831_v63 }
 0x172   : > { %v1681_v7 = vpop.f32.mrb[0].mxu0 }
 0x173   : > { %v827_v8 = vmul.f32 0.088388346, %v1681_v7  ;;  %v762_v9 = vpop.f32.mrb[1].mxu0 }
 0x174   : > { %v825_v10 = vmul.f32 0.088388346, %v762_v9  ;;  %v1682_v11 = vpop.f32.mrb[2].mxu0 }
 0x175   : > { %v828_v12 = vmul.f32 0.088388346, %v1682_v11  ;;  %v765_v13 = vpop.f32.mrb[3].mxu0  ;;  %v2241_v14 = vadd.f32 %v2238_v6, %v827_v8 }
 0x176   : > { %v826_v15 = vmul.f32 0.088388346, %v765_v13  ;;  %v2244_v16 = vadd.f32 %v2238_v6, %v825_v10 }
 0x177   : > { %870 = vmax.xlane.f32.xlu1 %v2241_v14  ;;  %v2249_v17 = vadd.f32 %v2238_v6, %v828_v12 }
 0x178   : > { %866 = vmax.xlane.f32.xlu0 %v2244_v16  ;;  %v2252_v19 = vadd.f32 %v2238_v6, %v826_v15 }
 0x17a   : > { %v1685_v18 = vpop.f32.mrb[4].mxu0 }
 0x17b   : > { %872 = vmax.xlane.f32.xlu1 %v2249_v17  ;;  %v778_v20 = vpop.f32.mrb[5].mxu0  ;;  %v831_v24 = vmul.f32 0.088388346, %v1685_v18 }
 0x17c   : > { %v829_v21 = vmul.f32 0.088388346, %v778_v20  ;;  %868 = vmax.xlane.f32.xlu0 %v2252_v19  ;;  %v1686_v22 = vpop.f32.mrb[6].mxu0 }
 0x17d   : > { %v781_v23 = vpop.f32.mrb[7].mxu0  ;;  %v832_v27 = vmul.f32 0.088388346, %v1686_v22  ;;  %v2265_v30 = vadd.f32 %v2238_v6, %v831_v24 }
 0x17e   : > { %v830_v25 = vmul.f32 0.088388346, %v781_v23  ;;  %v2257_v26 = vadd.f32 %v2238_v6, %v829_v21 }
 0x17f   : > { %v2269_v34 = vadd.f32 %v2238_v6, %v832_v27 }
 0x180   : > { %874 = vmax.xlane.f32.xlu0 %v2257_v26  ;;  %v2261_v28 = vadd.f32 %v2238_v6, %v830_v25 }
 0x182   : > { %876 = vmax.xlane.f32.xlu1 %v2261_v28  ;;  %v1689_v29 = vpop.f32.mrb[8].mxu0 }
 0x183   : > { %v794_v31 = vpop.f32.mrb[9].mxu0  ;;  %v835_v36 = vmul.f32 0.088388346, %v1689_v29 }
 0x184   : > { %v833_v32 = vmul.f32 0.088388346, %v794_v31  ;;  %878 = vmax.xlane.f32.xlu0 %v2265_v30  ;;  %v1690_v33 = vpop.f32.mrb[10].mxu0 }
 0x185   : > { %v797_v35 = vpop.f32.mrb[11].mxu0  ;;  %v836_v39 = vmul.f32 0.088388346, %v1690_v33  ;;  %v2281_v42 = vadd.f32 %v2238_v6, %v835_v36 }
 0x186   : > { %v834_v37 = vmul.f32 0.088388346, %v797_v35  ;;  %880 = vmax.xlane.f32.xlu1 %v2269_v34  ;;  %v2273_v38 = vadd.f32 %v2238_v6, %v833_v32 }
 0x187   : > { %v2285_v46 = vadd.f32 %v2238_v6, %v836_v39 }
 0x188   : > { %882 = vmax.xlane.f32.xlu0 %v2273_v38  ;;  %v2277_v40 = vadd.f32 %v2238_v6, %v834_v37 }
 0x18a   : > { %884 = vmax.xlane.f32.xlu1 %v2277_v40  ;;  %v1693_v41 = vpop.f32.mrb[12].mxu0 }
 0x18b   : > { %v810_v43 = vpop.f32.mrb[13].mxu0  ;;  %v839_v48 = vmul.f32 0.088388346, %v1693_v41 }
 0x18c   : > { %v837_v44 = vmul.f32 0.088388346, %v810_v43  ;;  %886 = vmax.xlane.f32.xlu0 %v2281_v42  ;;  %v1694_v45 = vpop.f32.mrb[14].mxu0 }
 0x18d   : > { %v813_v47 = vpop.f32.mrb[15].mxu0  ;;  %v840_v51 = vmul.f32 0.088388346, %v1694_v45  ;;  %v2297_v53 = vadd.f32 %v2238_v6, %v839_v48 }
 0x18e   : > { %v838_v49 = vmul.f32 0.088388346, %v813_v47  ;;  %888 = vmax.xlane.f32.xlu1 %v2285_v46  ;;  %v2289_v50 = vadd.f32 %v2238_v6, %v837_v44  ;;  %v1835_v47 = vld [vmem:[%s2305_s12 + $0x18] sm:$0xff]  }
 0x18f   : > { %v2301_v54 = vadd.f32 %v2238_v6, %v840_v51  ;;  %1701 = vmatprep.subr.bf16.mxu1 %v1835_v47 }
 0x190   : > { %890 = vmax.xlane.f32.xlu0 %v2289_v50  ;;  %v2293_v52 = vadd.f32 %v2238_v6, %v838_v49  ;;  %1702 = vmatpush3.bf16.msra.mxu1 %v1835_v47 }
 0x191   : > { %1703 = vmatprep.subr.bf16.mxu1 %v1836_v55 }
 0x192   : > { %892 = vmax.xlane.f32.xlu1 %v2293_v52 }
 0x194   : > { %894 = vmax.xlane.f32.xlu0 %v2297_v53  ;;  %1704 = vmatpush3.bf16.msra.mxu1 %v1836_v55 }
 0x195   : > { %1705 = vmatprep.subr.bf16.mxu1 %v1837_v57 }
 0x196   : > { %896 = vmax.xlane.f32.xlu1 %v2301_v54 }
 0x198   : > { %1706 = vmatpush3.bf16.msra.mxu1 %v1837_v57 }
 0x204   : > { %v871_v58 = vpop.xlane.xlu1 %870 }
 0x205   : > { %v900_v59 = vsub.f32 %v2241_v14, %v871_v58  ;;  %v867_v60 = vpop.xlane.xlu0 %866 }
 0x206   : > { %v898_v61 = vsub.f32 %v2244_v16, %v867_v60  ;;  %v1838_v60 = vld [vmem:[%s2305_s12 + $0x30] sm:$0xff]  }
 0x207   : > { %v918_v0 = vmul.f32 1.442695, %v900_v59  ;;  %1707 = vmatprep.subr.bf16.mxu1 %v1838_v60 }
 0x208   : > { %v914_v62 = vmul.f32 1.442695, %v898_v61  ;;  %v873_v63 = vpop.xlane.xlu1 %872  ;;  %1708 = vmatpush3.bf16.msra.mxu1 %v1838_v60 }
 0x209   : > { %v901_v1 = vsub.f32 %v2249_v17, %v873_v63  ;;  %v869_v2 = vpop.xlane.xlu0 %868 }
 0x20a   : > { %1840 = vpow2.f32 %v914_v62  ;;  %v899_v3 = vsub.f32 %v2252_v19, %v869_v2  ;;  %v1839_v62 = vld [vmem:[%s2305_s12 + $0x38] sm:$0xff]  }
 0x20b   : > { %1842 = vpow2.f32 %v918_v0  ;;  %v920_v5 = vmul.f32 1.442695, %v901_v1  ;;  %1709 = vmatprep.subr.bf16.mxu1 %v1839_v62 }
 0x20c   : > { %v916_v4 = vmul.f32 1.442695, %v899_v3  ;;  %1710 = vmatpush3.bf16.msra.mxu1 %v1839_v62 }
 0x20d   : > { %v875_v6 = vpop.xlane.xlu0 %874 }
 0x20e   : > { %1844 = vpow2.f32 %v916_v4  ;;  %v902_v7 = vsub.f32 %v2257_v26, %v875_v6 }
 0x20f   : > { %v877_v8 = vpop.xlane.xlu1 %876  ;;  %1846 = vpow2.f32 %v920_v5 }
 0x210   : > { %v922_v9 = vmul.f32 1.442695, %v902_v7  ;;  %v903_v10 = vsub.f32 %v2261_v28, %v877_v8 }
 0x211   : > { %v879_v11 = vpop.xlane.xlu0 %878 }
 0x212   : > { %1848 = vpow2.f32 %v922_v9  ;;  %v924_v12 = vmul.f32 1.442695, %v903_v10  ;;  %v904_v13 = vsub.f32 %v2265_v30, %v879_v11 }
 0x213   : > { %v881_v14 = vpop.xlane.xlu1 %880 }
 0x214   : > { %v2317_v15 = vpop.eup %1840  ;;  %v926_v16 = vmul.f32 1.442695, %v904_v13  ;;  %v905_v17 = vsub.f32 %v2269_v34, %v881_v14  ;;  %1850 = vpow2.f32 %v924_v12 }
 0x215   : > { %v883_v18 = vpop.xlane.xlu0 %882  ;;  %946 = vadd.xlane.f32.xlu0 %v2317_v15  ;;  %v2322_v21 = vpop.eup %1842 }
 0x216   : > { %1852 = vpow2.f32 %v926_v16  ;;  %v928_v19 = vmul.f32 1.442695, %v905_v17  ;;  %v906_v20 = vsub.f32 %v2273_v38, %v883_v18 }
 0x217   : > { %v885_v22 = vpop.xlane.xlu1 %884 }
 0x218   : > { %v2324_v23 = vpop.eup %1844  ;;  %v930_v24 = vmul.f32 1.442695, %v906_v20  ;;  %v907_v25 = vsub.f32 %v2277_v40, %v885_v22  ;;  %1854 = vpow2.f32 %v928_v19 }
 0x219   : > { %v887_v26 = vpop.xlane.xlu0 %886  ;;  %950 = vadd.xlane.f32.xlu0 %v2322_v21  ;;  %948 = vadd.xlane.f32.xlu1 %v2324_v23  ;;  %v2330_v29 = vpop.eup %1846 }
 0x21a   : > { %1856 = vpow2.f32 %v930_v24  ;;  %v932_v27 = vmul.f32 1.442695, %v907_v25  ;;  %v908_v28 = vsub.f32 %v2281_v42, %v887_v26 }
 0x21b   : > { %v889_v30 = vpop.xlane.xlu1 %888 }
 0x21c   : > { %v2332_v31 = vpop.eup %1848  ;;  %v934_v32 = vmul.f32 1.442695, %v908_v28  ;;  %v909_v33 = vsub.f32 %v2285_v46, %v889_v30  ;;  %1858 = vpow2.f32 %v932_v27 }
 0x21d   : > { %954 = vadd.xlane.f32.xlu0 %v2332_v31  ;;  %v891_v34 = vpop.xlane.xlu0 %890  ;;  %952 = vadd.xlane.f32.xlu1 %v2330_v29 }
 0x21e   : > { %1860 = vpow2.f32 %v934_v32  ;;  %v936_v35 = vmul.f32 1.442695, %v909_v33  ;;  %v910_v36 = vsub.f32 %v2289_v50, %v891_v34  ;;  %v2338_v37 = vpop.eup %1850 }
 0x21f   : > { %v893_v38 = vpop.xlane.xlu1 %892 }
 0x220   : > { %v2340_v39 = vpop.eup %1852  ;;  %v938_v40 = vmul.f32 1.442695, %v910_v36  ;;  %v911_v41 = vsub.f32 %v2293_v52, %v893_v38  ;;  %1862 = vpow2.f32 %v936_v35 }
 0x221   : > { %958 = vadd.xlane.f32.xlu0 %v2340_v39  ;;  %v895_v42 = vpop.xlane.xlu0 %894  ;;  %956 = vadd.xlane.f32.xlu1 %v2338_v37 }
 0x222   : > { %1864 = vpow2.f32 %v938_v40  ;;  %v940_v43 = vmul.f32 1.442695, %v911_v41  ;;  %v912_v44 = vsub.f32 %v2297_v53, %v895_v42  ;;  %v2346_v45 = vpop.eup %1854 }
 0x223   : > { %v897_v46 = vpop.xlane.xlu1 %896 }
 0x224   : > { %v2349_v48 = vpop.eup %1856  ;;  %v942_v49 = vmul.f32 1.442695, %v912_v44  ;;  %v913_v50 = vsub.f32 %v2301_v54, %v897_v46  ;;  %1866 = vpow2.f32 %v940_v43 }
 0x225   : > { %962 = vadd.xlane.f32.xlu0 %v2349_v48  ;;  %960 = vadd.xlane.f32.xlu1 %v2346_v45 }
 0x226   : > { %1868 = vpow2.f32 %v942_v49  ;;  %v944_v51 = vmul.f32 1.442695, %v913_v50  ;;  %v2354_v52 = vpop.eup %1858 }
 0x228   : > { %v2356_v53 = vpop.eup %1860  ;;  %1870 = vpow2.f32 %v944_v51 }
 0x229   : > { %966 = vadd.xlane.f32.xlu0 %v2356_v53  ;;  %964 = vadd.xlane.f32.xlu1 %v2354_v52 }
 0x22a   : > { %v2361_v54 = vpop.eup %1862 }
 0x22c   : > { %v2363_v56 = vpop.eup %1864 }
 0x22d   : > { %970 = vadd.xlane.f32.xlu0 %v2363_v56  ;;  %968 = vadd.xlane.f32.xlu1 %v2361_v54 }
 0x22e   : > { %v2368_v58 = vpop.eup %1866 }
 0x230   : > { %v2370_v59 = vpop.eup %1868 }
 0x231   : > { %974 = vadd.xlane.f32.xlu0 %v2370_v59  ;;  %972 = vadd.xlane.f32.xlu1 %v2368_v58 }
 0x232   : > { %v2375_v61 = vpop.eup %1870 }
 0x235   : > { %976 = vadd.xlane.f32.xlu1 %v2375_v61 }
 0x2a2   : > { %v947_v63 = vpop.xlane.xlu0 %946 }
 0x2a3   : > { %1872 = vrcp.f32 %v947_v63 }
 0x2a6   : > { %v951_v0 = vpop.xlane.xlu0 %950  ;;  %v949_v1 = vpop.xlane.xlu1 %948 }
 0x2a7   : > { %1874 = vrcp.f32 %v949_v1 }
 0x2a8   : > { %1876 = vrcp.f32 %v951_v0 }
 0x2aa   : > { %v955_v2 = vpop.xlane.xlu0 %954  ;;  %v953_v3 = vpop.xlane.xlu1 %952 }
 0x2ab   : > { %1878 = vrcp.f32 %v953_v3 }
 0x2ac   : > { %1880 = vrcp.f32 %v955_v2 }
 0x2ad   : > { %v1873_v6 = vpop.eup %1872 }
 0x2ae   : > { %v959_v4 = vpop.xlane.xlu0 %958  ;;  %v957_v5 = vpop.xlane.xlu1 %956  ;;  %v994_v10 = vmul.f32 %v1873_v6, %v2317_v15 }
 0x2af   : > { %1882 = vrcp.f32 %v957_v5 }
 0x2b0   : > { %1884 = vrcp.f32 %v959_v4 }
 0x2b1   : > { %v1875_v7 = vpop.eup %1874 }
 0x2b2   : > { %v963_v8 = vpop.xlane.xlu0 %962  ;;  %v961_v9 = vpop.xlane.xlu1 %960  ;;  %v995_v11 = vmul.f32 %v1875_v7, %v2324_v23 }
 0x2b3   : > { %v1877_v12 = vpop.eup %1876  ;;  %1886 = vrcp.f32 %v961_v9 }
 0x2b4   : > { %v1010_v13 = vpack.c.bf16 %v995_v11, %v994_v10  ;;  %1888 = vrcp.f32 %v963_v8  ;;  %v996_v18 = vmul.f32 %v1877_v12, %v2322_v21 }
 0x2b5   : > { %v1879_v14 = vpop.eup %1878 }
 0x2b6   : > { %v967_v16 = vpop.xlane.xlu0 %966  ;;  %v965_v17 = vpop.xlane.xlu1 %964  ;;  %1711 = vmatprep.mubr.bf16.mxu1 %v1010_v13  ;;  %v997_v19 = vmul.f32 %v1879_v14, %v2330_v29 }
 0x2b7   : > { %v1881_v20 = vpop.eup %1880  ;;  %1890 = vrcp.f32 %v965_v17 }
 0x2b8   : > { %v1011_v22 = vpack.c.bf16 %v997_v19, %v996_v18  ;;  %1892 = vrcp.f32 %v967_v16  ;;  %v998_v23 = vmul.f32 %v1881_v20, %v2332_v31 }
 0x2b9   : > { %v1883_v24 = vpop.eup %1882 }
 0x2ba   : > { %v971_v15 = vpop.xlane.xlu0 %970  ;;  %v969_v25 = vpop.xlane.xlu1 %968  ;;  %1712 = vmatmul.mubr.bf16.vlgmr.msra.gmra.mrb[0].mxu1 %v1011_v22  ;;  %v999_v26 = vmul.f32 %v1883_v24, %v2338_v37 }
 0x2bb   : > { %v1885_v27 = vpop.eup %1884  ;;  %1894 = vrcp.f32 %v969_v25 }
 0x2bc   : > { %v1012_v28 = vpack.c.bf16 %v999_v26, %v998_v23  ;;  %1896 = vrcp.f32 %v971_v15  ;;  %v1000_v29 = vmul.f32 %v1885_v27, %v2340_v39 }
 0x2bd   : > { %v1887_v30 = vpop.eup %1886 }
 0x2be   : > { %v975_v21 = vpop.xlane.xlu0 %974  ;;  %v973_v32 = vpop.xlane.xlu1 %972  ;;  %1715 = vmatprep.mubr.bf16.mxu1 %v1012_v28  ;;  %v1001_v33 = vmul.f32 %v1887_v30, %v2346_v45 }
 0x2bf   : > { %v1889_v34 = vpop.eup %1888  ;;  %1898 = vrcp.f32 %v973_v32 }
 0x2c0   : > { %1900 = vrcp.f32 %v975_v21  ;;  %v1013_v35 = vpack.c.bf16 %v1001_v33, %v1000_v29  ;;  %v1002_v37 = vmul.f32 %v1889_v34, %v2349_v48 }
 0x2c1   : > { %v1891_v36 = vpop.eup %1890 }
 0x2c2   : > { %v977_v31 = vpop.xlane.xlu1 %976  ;;  %1716 = vmatmul.mubr.bf16.gmra.mrb[4].mxu1 %v1013_v35  ;;  %v1003_v38 = vmul.f32 %v1891_v36, %v2354_v52  ;;  %v1893_v40 = vpop.eup %1892 }
 0x2c3   : > { %1902 = vrcp.f32 %v977_v31  ;;  %v1004_v39 = vmul.f32 %v1893_v40, %v2356_v53 }
 0x2c4   : > { %v1014_v41 = vpack.c.bf16 %v1003_v38, %v1002_v37 }
 0x2c5   : > { %v1895_v42 = vpop.eup %1894 }
 0x2c6   : > { %1719 = vmatprep.mubr.bf16.mxu1 %v1014_v41  ;;  %v1005_v43 = vmul.f32 %v1895_v42, %v2361_v54  ;;  %v1897_v44 = vpop.eup %1896 }
 0x2c7   : > { %v1006_v49 = vmul.f32 %v1897_v44, %v2363_v56 }
 0x2c8   : > { %v1015_v45 = vpack.c.bf16 %v1005_v43, %v1004_v39 }
 0x2c9   : > { %v1899_v46 = vpop.eup %1898 }
 0x2ca   : > { %v1901_v47 = vpop.eup %1900  ;;  %1720 = vmatmul.mubr.bf16.gmra.mrb[8].mxu1 %v1015_v45  ;;  %v1007_v48 = vmul.f32 %v1899_v46, %v2368_v58 }
 0x2cb   : > { %v1008_v52 = vmul.f32 %v1901_v47, %v2370_v59 }
 0x2cc   : > { %v1016_v51 = vpack.c.bf16 %v1007_v48, %v1006_v49 }
 0x2cd   : > { %v1903_v50 = vpop.eup %1902 }
 0x2ce   : > { %v1009_v55 = vmul.f32 %v1903_v50, %v2375_v61  ;;  %1723 = vmatprep.mubr.bf16.mxu1 %v1016_v51 }
 0x2d0   : > { %v1017_v53 = vpack.c.bf16 %v1009_v55, %v1008_v52 }
 0x2d2   : > { %1724 = vmatmul.mubr.bf16.gmra.mrb[12].mxu1 %v1017_v53 }
 0x38d   : > { %v1713_v54 = vpop.f32.mrb[0].mxu1 }
 0x38e   : > { %v1100_v57 = vpop.f32.mrb[1].mxu1 }
 0x38f   : > { %v1714_v60 = vpop.f32.mrb[2].mxu1 }
 0x390   : > { %v1592_v62 = vpack.c.bf16 %v1714_v60, %v1713_v54  ;;  %v1103_v63 = vpop.f32.mrb[3].mxu1 }
 0x391   : > { %v1587_v0 = vpack.c.bf16 %v1103_v63, %v1100_v57 }
 0x392   : > { %1624 = vst [vmem:[%s2396_s15 + $0x8] sm:$0xff] %v1592_v62  }
 0x393   : > { %1588 = vst [vmem:[%s2396_s15] sm:$0xff] %v1587_v0  }
 0x395   : > { %v1717_v56 = vpop.f32.mrb[4].mxu1 }
 0x396   : > { %v1116_v58 = vpop.f32.mrb[5].mxu1 }
 0x397   : > { %v1718_v59 = vpop.f32.mrb[6].mxu1 }
 0x398   : > { %v1602_v61 = vpack.c.bf16 %v1718_v59, %v1717_v56  ;;  %v1119_v1 = vpop.f32.mrb[7].mxu1 }
 0x399   : > { %v1597_v2 = vpack.c.bf16 %v1119_v1, %v1116_v58  ;;  %v1273_v18 = vld [vmem:[%s2396_s15 + $0x8] sm:$0xf] (%p2130_p13)  ;;  %v1275_v19 = vld [vmem:[%s2396_s15 + $0xc] sm:$0xf] (%p2130_p13) }
 0x39a   : > { %1626 = vst [vmem:[%s2396_s15 + $0x18] sm:$0xff] %v1602_v61   ;;  %v1269_v16 = vld [vmem:[%s2396_s15] sm:$0xf] (%p2130_p13)  ;;  %v1271_v17 = vld [vmem:[%s2396_s15 + $0x4] sm:$0xf] (%p2130_p13) }
 0x39b   : > { %1625 = vst [vmem:[%s2396_s15 + $0x10] sm:$0xff] %v1597_v2   ;;  %1270 = vst [vmem:[%s1253_s6] sm:$0xf] (%p2130_p13), %v1269_v16 }
 0x39c   : > { %1272 = vst [vmem:[%s1253_s6 + $0x8] sm:$0xf] (%p2130_p13), %v1271_v17  ;;  %1274 = vst [vmem:[%s1253_s6 + $0x10] sm:$0xf] (%p2130_p13), %v1273_v18 }
 0x39d   : > { %v1721_v3 = vpop.f32.mrb[8].mxu1  ;;  %1276 = vst [vmem:[%s1253_s6 + $0x18] sm:$0xf] (%p2130_p13), %v1275_v19 }
 0x39e   : > { %v1132_v4 = vpop.f32.mrb[9].mxu1 }
 0x39f   : > { %v1722_v5 = vpop.f32.mrb[10].mxu1 }
 0x3a0   : > { %v1612_v6 = vpack.c.bf16 %v1722_v5, %v1721_v3  ;;  %v1135_v7 = vpop.f32.mrb[11].mxu1 }
 0x3a1   : > { %v1607_v8 = vpack.c.bf16 %v1135_v7, %v1132_v4  ;;  %v1281_v24 = vld [vmem:[%s2396_s15 + $0x18] sm:$0xf] (%p2130_p13)  ;;  %v1283_v15 = vld [vmem:[%s2396_s15 + $0x1c] sm:$0xf] (%p2130_p13) }
 0x3a2   : > { %1628 = vst [vmem:[%s2396_s15 + $0x28] sm:$0xff] %v1612_v6   ;;  %v1277_v20 = vld [vmem:[%s2396_s15 + $0x10] sm:$0xf] (%p2130_p13)  ;;  %v1279_v22 = vld [vmem:[%s2396_s15 + $0x14] sm:$0xf] (%p2130_p13) }
 0x3a3   : > { %1627 = vst [vmem:[%s2396_s15 + $0x20] sm:$0xff] %v1607_v8   ;;  %1278 = vst [vmem:[%s1253_s6 + $0x20] sm:$0xf] (%p2130_p13), %v1277_v20 }
 0x3a4   : > { %1280 = vst [vmem:[%s1253_s6 + $0x28] sm:$0xf] (%p2130_p13), %v1279_v22  ;;  %1282 = vst [vmem:[%s1253_s6 + $0x30] sm:$0xf] (%p2130_p13), %v1281_v24 }
 0x3a5   : > { %v1725_v9 = vpop.f32.mrb[12].mxu1  ;;  %1249 = sbr.rel (!%p2130_p13) target bundleno = 949 (0x3b5), region = 163  ;;  %1284 = vst [vmem:[%s1253_s6 + $0x38] sm:$0xf] (%p2130_p13), %v1283_v15 }
 0x3a6   : > { %v1148_v10 = vpop.f32.mrb[13].mxu1 }
 0x3a7   : > { %v1726_v11 = vpop.f32.mrb[14].mxu1 }
 0x3a8   : > { %v1622_v12 = vpack.c.bf16 %v1726_v11, %v1725_v9  ;;  %v1151_v13 = vpop.f32.mrb[15].mxu1 }
 0x3a9   : > { %v1617_v14 = vpack.c.bf16 %v1151_v13, %v1148_v10  ;;  %v1289_v26 = vld [vmem:[%s2396_s15 + $0x28] sm:$0xf] (%p2130_p13)  ;;  %v1291_v27 = vld [vmem:[%s2396_s15 + $0x2c] sm:$0xf] (%p2130_p13) }
 0x3aa   : > { %1630 = vst [vmem:[%s2396_s15 + $0x38] sm:$0xff] %v1622_v12   ;;  %v1285_v25 = vld [vmem:[%s2396_s15 + $0x20] sm:$0xf] (%p2130_p13)  ;;  %v1287_v23 = vld [vmem:[%s2396_s15 + $0x24] sm:$0xf] (%p2130_p13) }
 0x3ab   : > { %1629 = vst [vmem:[%s2396_s15 + $0x30] sm:$0xff] %v1617_v14   ;;  %1286 = vst [vmem:[%s1253_s6 + $0x40] sm:$0xf] (%p2130_p13), %v1285_v25 }
 0x3ac   : > { %1288 = vst [vmem:[%s1253_s6 + $0x48] sm:$0xf] %v1287_v23  ;;  %1290 = vst [vmem:[%s1253_s6 + $0x50] sm:$0xf] %v1289_v26 }
 0x3ad   : > { %1292 = vst [vmem:[%s1253_s6 + $0x58] sm:$0xf] %v1291_v27 }
 0x3b1   : > { %v1297_v21 = vld [vmem:[%s2396_s15 + $0x38] sm:$0xf]  ;;  %v1299_v32 = vld [vmem:[%s2396_s15 + $0x3c] sm:$0xf] }
 0x3b2   : > { %v1293_v28 = vld [vmem:[%s2396_s15 + $0x30] sm:$0xf]  ;;  %v1295_v30 = vld [vmem:[%s2396_s15 + $0x34] sm:$0xf]  ;;  %1298 = vst [vmem:[%s1253_s6 + $0x70] sm:$0xf] %v1297_v21 }
 0x3b3   : > { %1294 = vst [vmem:[%s1253_s6 + $0x60] sm:$0xf] %v1293_v28  ;;  %1296 = vst [vmem:[%s1253_s6 + $0x68] sm:$0xf] %v1295_v30 }
 0x3b4   : > { %1300 = vst [vmem:[%s1253_s6 + $0x78] sm:$0xf] %v1299_v32 }
 0x3b5 PF: > { %s14_s25 = sadd.s32 1, %s1990_s25   ;;  %s2478_s4 = sld [smem:[#allocation7_spill]] }
 0x3b6   : > { %p11_p5 = scmp.ge.s32.totalorder %s14_s25, 6   ;;  %s2479_s15 = smov %s1954_s16 }
 0x3b7   : > { %s2480_s16 = smov %s2135_s29  ;;  %s2481_s17 = smov %s1962_s18 }
 0x3b8   : > { %s2482_s18 = smov %s2113_s5  ;;  %s2483_s19 = smov %s1970_s20 }
 0x3b9   : > { %s2484_s20 = smov %s2110_s26  ;;  %s2485_s21 = smov %s1982_s23 }
 0x3ba   : > { %s2486_s22 = smov %s1986_s24  ;;  %s2487_s23 = smov %s2490_s27 }
 0x3bb   : > { %s2488_s24 = smov %s2478_s4  ;;  %13 = sbr.rel (!%p11_p5) target bundleno = 8 (0x8), region = 254 }

// kernel: roberta_forward.14
= control target key start
LH: loop header
LB: loop body
LE: loop exit
PB: predicated region body
PF: predicated region fallthrough
CT: control target
= control target key end

     0   :  { %s2137_s0 = inlined_call_operand.vmem [shape: f32[256,256], index: 0, kind: input, shape index: {}]   ;;  %s2138_s1 = inlined_call_operand.vmem [shape: f32[1,256], index: 1, kind: input, shape index: {}]   ;;  %s2139_s2 = inlined_call_operand.vmem [shape: f32[1,256], index: 2, kind: input, shape index: {}]   ;;  %s2140_s3 = inlined_call_operand.vmem [shape: bf16[256,256], index: 3, kind: output, shape index: {}]  }
   0x1   :  { %v1122_v0 = vld [vmem:[%s2137_s0] sm:$0xff]  ;;  %v1127_v1 = vld [vmem:[%s2137_s0 + $0x8] sm:$0xff]  ;;  %v1144_v5 = vld [vmem:[%s2137_s0 + $0x10] sm:$0xff] }
   0x2   :  { %v1132_v2 = vld [vmem:[%s2137_s0 + $0x20] sm:$0xff]  ;;  %v80_v3 = vadd.f32 %v1127_v1, %v1122_v0  ;;  %v1139_v4 = vld [vmem:[%s2137_s0 + $0x28] sm:$0xff]  ;;  %v1149_v6 = vld [vmem:[%s2137_s0 + $0x18] sm:$0xff] }
   0x3   :  { %v86_v7 = vadd.f32 %v1139_v4, %v1132_v2  ;;  %v1156_v8 = vld [vmem:[%s2137_s0 + $0x30] sm:$0xff]  ;;  %v1161_v9 = vld [vmem:[%s2137_s0 + $0x38] sm:$0xff]  ;;  %v83_v10 = vadd.f32 %v1149_v6, %v1144_v5  ;;  %v1170_v12 = vld [vmem:[%s2137_s0 + $0x40] sm:$0xff] }
   0x4   :  { %81 = vadd.xlane.f32.xlu0 %v80_v3  ;;  %v89_v11 = vadd.f32 %v1161_v9, %v1156_v8  ;;  %v1175_v13 = vld [vmem:[%s2137_s0 + $0x48] sm:$0xff]  ;;  %v1180_v14 = vld [vmem:[%s2137_s0 + $0x50] sm:$0xff]  ;;  %v1185_v15 = vld [vmem:[%s2137_s0 + $0x58] sm:$0xff] }
   0x5   :  { %87 = vadd.xlane.f32.xlu1 %v86_v7  ;;  %v92_v16 = vadd.f32 %v1175_v13, %v1170_v12  ;;  %v95_v17 = vadd.f32 %v1185_v15, %v1180_v14  ;;  %v1194_v18 = vld [vmem:[%s2137_s0 + $0x60] sm:$0xff]  ;;  %v1199_v19 = vld [vmem:[%s2137_s0 + $0x68] sm:$0xff]  ;;  %v1204_v20 = vld [vmem:[%s2137_s0 + $0x70] sm:$0xff] }
   0x6   :  { %v1209_v21 = vld [vmem:[%s2137_s0 + $0x78] sm:$0xff]  ;;  %v98_v22 = vadd.f32 %v1199_v19, %v1194_v18  ;;  %v1218_v24 = vld [vmem:[%s2137_s0 + $0x80] sm:$0xff]  ;;  %v1223_v25 = vld [vmem:[%s2137_s0 + $0x88] sm:$0xff] }
   0x7   :  { %v101_v23 = vadd.f32 %v1209_v21, %v1204_v20  ;;  %v1228_v26 = vld [vmem:[%s2137_s0 + $0x90] sm:$0xff]  ;;  %v1233_v27 = vld [vmem:[%s2137_s0 + $0x98] sm:$0xff]  ;;  %v104_v28 = vadd.f32 %v1223_v25, %v1218_v24  ;;  %v1242_v30 = vld [vmem:[%s2137_s0 + $0xa0] sm:$0xff] }
   0x8   :  { %84 = vadd.xlane.f32.xlu0 %v83_v10  ;;  %v107_v29 = vadd.f32 %v1233_v27, %v1228_v26  ;;  %v1247_v31 = vld [vmem:[%s2137_s0 + $0xa8] sm:$0xff]  ;;  %v1252_v32 = vld [vmem:[%s2137_s0 + $0xb0] sm:$0xff]  ;;  %v1257_v33 = vld [vmem:[%s2137_s0 + $0xb8] sm:$0xff] }
   0x9   :  { %90 = vadd.xlane.f32.xlu1 %v89_v11  ;;  %v110_v34 = vadd.f32 %v1247_v31, %v1242_v30  ;;  %v113_v35 = vadd.f32 %v1257_v33, %v1252_v32  ;;  %v1266_v36 = vld [vmem:[%s2137_s0 + $0xc0] sm:$0xff]  ;;  %v1271_v37 = vld [vmem:[%s2137_s0 + $0xc8] sm:$0xff]  ;;  %v1276_v38 = vld [vmem:[%s2137_s0 + $0xd0] sm:$0xff] }
   0xa   :  { %v1281_v39 = vld [vmem:[%s2137_s0 + $0xd8] sm:$0xff]  ;;  %v116_v40 = vadd.f32 %v1271_v37, %v1266_v36  ;;  %v1290_v42 = vld [vmem:[%s2137_s0 + $0xe0] sm:$0xff]  ;;  %v1295_v43 = vld [vmem:[%s2137_s0 + $0xe8] sm:$0xff] }
   0xb   :  { %v119_v41 = vadd.f32 %v1281_v39, %v1276_v38  ;;  %v1300_v44 = vld [vmem:[%s2137_s0 + $0xf0] sm:$0xff]  ;;  %v1305_v45 = vld [vmem:[%s2137_s0 + $0xf8] sm:$0xff]  ;;  %v122_v46 = vadd.f32 %v1295_v43, %v1290_v42  ;;  %v1314_v48 = vld [vmem:[%s2137_s0 + $0x100] sm:$0xff] }
   0xc   :  { %93 = vadd.xlane.f32.xlu0 %v92_v16  ;;  %v125_v47 = vadd.f32 %v1305_v45, %v1300_v44  ;;  %v1319_v49 = vld [vmem:[%s2137_s0 + $0x108] sm:$0xff]  ;;  %v1324_v50 = vld [vmem:[%s2137_s0 + $0x110] sm:$0xff]  ;;  %v1329_v51 = vld [vmem:[%s2137_s0 + $0x118] sm:$0xff] }
   0xd   :  { %96 = vadd.xlane.f32.xlu1 %v95_v17  ;;  %v128_v52 = vadd.f32 %v1319_v49, %v1314_v48  ;;  %v131_v53 = vadd.f32 %v1329_v51, %v1324_v50  ;;  %v1338_v54 = vld [vmem:[%s2137_s0 + $0x120] sm:$0xff]  ;;  %v1343_v55 = vld [vmem:[%s2137_s0 + $0x128] sm:$0xff]  ;;  %v1348_v56 = vld [vmem:[%s2137_s0 + $0x130] sm:$0xff] }
   0xe   :  { %v1353_v57 = vld [vmem:[%s2137_s0 + $0x138] sm:$0xff]  ;;  %v134_v58 = vadd.f32 %v1343_v55, %v1338_v54  ;;  %v1362_v60 = vld [vmem:[%s2137_s0 + $0x140] sm:$0xff]  ;;  %v1367_v61 = vld [vmem:[%s2137_s0 + $0x148] sm:$0xff] }
   0xf   :  { %v137_v59 = vadd.f32 %v1353_v57, %v1348_v56  ;;  %v1372_v62 = vld [vmem:[%s2137_s0 + $0x150] sm:$0xff]  ;;  %v1377_v63 = vld [vmem:[%s2137_s0 + $0x158] sm:$0xff]  ;;  %v140_v3 = vadd.f32 %v1367_v61, %v1362_v60  ;;  %v1386_v10 = vld [vmem:[%s2137_s0 + $0x160] sm:$0xff] }
  0x10   :  { %99 = vadd.xlane.f32.xlu0 %v98_v22  ;;  %v143_v7 = vadd.f32 %v1377_v63, %v1372_v62  ;;  %v1391_v11 = vld [vmem:[%s2137_s0 + $0x168] sm:$0xff]  ;;  %v1396_v16 = vld [vmem:[%s2137_s0 + $0x170] sm:$0xff]  ;;  %v1401_v17 = vld [vmem:[%s2137_s0 + $0x178] sm:$0xff] }
  0x11   :  { %102 = vadd.xlane.f32.xlu1 %v101_v23  ;;  %v146_v22 = vadd.f32 %v1391_v11, %v1386_v10  ;;  %v149_v23 = vadd.f32 %v1401_v17, %v1396_v16 }
  0x14   :  { %105 = vadd.xlane.f32.xlu0 %v104_v28  ;;  %v1410_v28 = vld [vmem:[%s2137_s0 + $0x180] sm:$0xff] }
  0x15   :  { %108 = vadd.xlane.f32.xlu1 %v107_v29  ;;  %v1415_v29 = vld [vmem:[%s2137_s0 + $0x188] sm:$0xff] }
  0x18   :  { %111 = vadd.xlane.f32.xlu0 %v110_v34  ;;  %v1420_v34 = vld [vmem:[%s2137_s0 + $0x190] sm:$0xff] }
  0x19   :  { %114 = vadd.xlane.f32.xlu1 %v113_v35  ;;  %2178 = vst [vmem:[#allocation2_spill] sm:$0xff] %v1420_v34  ;;  %v1425_v35 = vld [vmem:[%s2137_s0 + $0x198] sm:$0xff] }
  0x1a   :  { %2179 = vst [vmem:[#allocation3_spill] sm:$0xff] %v1425_v35 }
  0x1c   :  { %117 = vadd.xlane.f32.xlu0 %v116_v40  ;;  %v152_v40 = vadd.f32 %v1415_v29, %v1410_v28 }
  0x1d   :  { %120 = vadd.xlane.f32.xlu1 %v119_v41  ;;  %v155_v41 = vadd.f32 %v1425_v35, %v1420_v34 }
  0x20   :  { %123 = vadd.xlane.f32.xlu0 %v122_v46  ;;  %v1434_v46 = vld [vmem:[%s2137_s0 + $0x1a0] sm:$0xff] }
  0x21   :  { %126 = vadd.xlane.f32.xlu1 %v125_v47  ;;  %2180 = vst [vmem:[#allocation4_spill] sm:$0xff] %v1434_v46  ;;  %v1439_v47 = vld [vmem:[%s2137_s0 + $0x1a8] sm:$0xff] }
  0x22   :  { %2181 = vst [vmem:[#allocation5_spill] sm:$0xff] %v1439_v47 }
  0x24   :  { %129 = vadd.xlane.f32.xlu0 %v128_v52  ;;  %v1444_v52 = vld [vmem:[%s2137_s0 + $0x1b0] sm:$0xff] }
  0x25   :  { %132 = vadd.xlane.f32.xlu1 %v131_v53  ;;  %2182 = vst [vmem:[#allocation6_spill] sm:$0xff] %v1444_v52  ;;  %v1449_v53 = vld [vmem:[%s2137_s0 + $0x1b8] sm:$0xff] }
  0x26   :  { %2183 = vst [vmem:[#allocation7_spill] sm:$0xff] %v1449_v53 }
  0x28   :  { %135 = vadd.xlane.f32.xlu0 %v134_v58  ;;  %v158_v58 = vadd.f32 %v1439_v47, %v1434_v46 }
  0x29   :  { %138 = vadd.xlane.f32.xlu1 %v137_v59  ;;  %v161_v59 = vadd.f32 %v1449_v53, %v1444_v52  ;;  %v1482_v53 = vld [vmem:[%s2137_s0 + $0x1e0] sm:$0xff]  ;;  %v1487_v52 = vld [vmem:[%s2137_s0 + $0x1e8] sm:$0xff] }
  0x2a   :  { %2188 = vst [vmem:[#allocation12_spill] sm:$0xff] %v1487_v52 }
  0x2c   :  { %141 = vadd.xlane.f32.xlu0 %v140_v3  ;;  %v1458_v3 = vld [vmem:[%s2137_s0 + $0x1c0] sm:$0xff] }
  0x2d   :  { %144 = vadd.xlane.f32.xlu1 %v143_v7  ;;  %2184 = vst [vmem:[#allocation8_spill] sm:$0xff] %v1458_v3  ;;  %v1463_v7 = vld [vmem:[%s2137_s0 + $0x1c8] sm:$0xff] }
  0x2e   :  { %2185 = vst [vmem:[#allocation9_spill] sm:$0xff] %v1463_v7 }
  0x30   :  { %147 = vadd.xlane.f32.xlu0 %v146_v22  ;;  %v1468_v22 = vld [vmem:[%s2137_s0 + $0x1d0] sm:$0xff] }
  0x31   :  { %150 = vadd.xlane.f32.xlu1 %v149_v23  ;;  %2186 = vst [vmem:[#allocation10_spill] sm:$0xff] %v1468_v22  ;;  %v1473_v23 = vld [vmem:[%s2137_s0 + $0x1d8] sm:$0xff] }
  0x32   :  { %2187 = vst [vmem:[#allocation11_spill] sm:$0xff] %v1473_v23 }
  0x34   :  { %153 = vadd.xlane.f32.xlu0 %v152_v40  ;;  %v164_v40 = vadd.f32 %v1463_v7, %v1458_v3 }
  0x35   :  { %156 = vadd.xlane.f32.xlu1 %v155_v41  ;;  %v167_v41 = vadd.f32 %v1473_v23, %v1468_v22  ;;  %v170_v23 = vadd.f32 %v1487_v52, %v1482_v53 }
  0x38   :  { %159 = vadd.xlane.f32.xlu0 %v158_v58  ;;  %v1492_v58 = vld [vmem:[%s2137_s0 + $0x1f0] sm:$0xff] }
  0x39   :  { %162 = vadd.xlane.f32.xlu1 %v161_v59  ;;  %v1497_v59 = vld [vmem:[%s2137_s0 + $0x1f8] sm:$0xff] }
  0x3a   :  { %2189 = vst [vmem:[#allocation13_spill] sm:$0xff] %v1497_v59  ;;  %v173_v22 = vadd.f32 %v1497_v59, %v1492_v58 }
  0x3c   :  { %165 = vadd.xlane.f32.xlu0 %v164_v40 }
  0x3d   :  { %168 = vadd.xlane.f32.xlu1 %v167_v41 }
  0x40   :  { %171 = vadd.xlane.f32.xlu0 %v170_v23 }
  0x41   :  { %174 = vadd.xlane.f32.xlu1 %v173_v22 }
  0x91   :  { %v82_v7 = vpop.xlane.xlu0 %81 }
  0x92   :  { %v177_v3 = vmul.f32 0.00390625, %v82_v7  ;;  %v88_v47 = vpop.xlane.xlu1 %87 }
  0x93   :  { %v179_v46 = vmul.f32 0.00390625, %v88_v47 }
  0x94   :  { %v1504_v35 = vsub.f32 %v1122_v0, %v177_v3  ;;  %v1507_v34 = vsub.f32 %v1127_v1, %v177_v3 }
  0x95   :  { %v1510_v40 = vsub.f32 %v1132_v2, %v179_v46  ;;  %v1513_v41 = vsub.f32 %v1139_v4, %v179_v46  ;;  %v85_v52 = vpop.xlane.xlu0 %84 }
  0x96   :  { %2190 = vst [vmem:[#allocation14_spill] sm:$0xff] %v1504_v35  ;;  %2191 = vst [vmem:[#allocation15_spill] sm:$0xff] %v1507_v34  ;;  %v178_v59 = vmul.f32 0.00390625, %v85_v52  ;;  %v91_v23 = vpop.xlane.xlu1 %90  ;;  %v273_v7 = vmul.f32 %v1504_v35, %v1504_v35  ;;  %v274_v47 = vmul.f32 %v1507_v34, %v1507_v34 }
  0x97   :  { %2192 = vst [vmem:[#allocation16_spill] sm:$0xff] %v1510_v40  ;;  %2193 = vst [vmem:[#allocation17_spill] sm:$0xff] %v1513_v41  ;;  %v180_v0 = vmul.f32 0.00390625, %v91_v23  ;;  %v277_v1 = vmul.f32 %v1510_v40, %v1510_v40  ;;  %v278_v2 = vmul.f32 %v1513_v41, %v1513_v41 }
  0x98   :  { %v1524_v3 = vsub.f32 %v1144_v5, %v178_v59  ;;  %v1527_v4 = vsub.f32 %v1149_v6, %v178_v59  ;;  %v337_v46 = vadd.f32 %v274_v47, %v273_v7 }
  0x99   :  { %v1530_v52 = vsub.f32 %v1156_v8, %v180_v0  ;;  %v1533_v22 = vsub.f32 %v1161_v9, %v180_v0  ;;  %v94_v23 = vpop.xlane.xlu0 %93  ;;  %v343_v35 = vadd.f32 %v278_v2, %v277_v1 }
  0x9a   :  { %v181_v34 = vmul.f32 0.00390625, %v94_v23  ;;  %338 = vadd.xlane.f32.xlu0 %v337_v46  ;;  %v97_v40 = vpop.xlane.xlu1 %96  ;;  %v275_v41 = vmul.f32 %v1524_v3, %v1524_v3  ;;  %v276_v5 = vmul.f32 %v1527_v4, %v1527_v4 }
  0x9b   :  { %v182_v6 = vmul.f32 0.00390625, %v97_v40  ;;  %v279_v59 = vmul.f32 %v1530_v52, %v1530_v52  ;;  %v280_v8 = vmul.f32 %v1533_v22, %v1533_v22 }
  0x9c   :  { %v1544_v9 = vsub.f32 %v1170_v12, %v181_v34  ;;  %v1547_v7 = vsub.f32 %v1175_v13, %v181_v34  ;;  %v340_v47 = vadd.f32 %v276_v5, %v275_v41 }
  0x9d   :  { %v1550_v0 = vsub.f32 %v1180_v14, %v182_v6  ;;  %v1553_v1 = vsub.f32 %v1185_v15, %v182_v6  ;;  %v100_v40 = vpop.xlane.xlu0 %99  ;;  %v346_v23 = vadd.f32 %v280_v8, %v279_v59 }
  0x9e   :  { %v183_v2 = vmul.f32 0.00390625, %v100_v40  ;;  %344 = vadd.xlane.f32.xlu0 %v343_v35  ;;  %341 = vadd.xlane.f32.xlu1 %v340_v47  ;;  %v103_v46 = vpop.xlane.xlu1 %102  ;;  %v281_v12 = vmul.f32 %v1544_v9, %v1544_v9  ;;  %v282_v13 = vmul.f32 %v1547_v7, %v1547_v7 }
  0x9f   :  { %v184_v34 = vmul.f32 0.00390625, %v103_v46  ;;  %v283_v14 = vmul.f32 %v1550_v0, %v1550_v0  ;;  %v284_v15 = vmul.f32 %v1553_v1, %v1553_v1 }
  0xa0   :  { %v1564_v41 = vsub.f32 %v1194_v18, %v183_v2  ;;  %v1567_v35 = vsub.f32 %v1199_v19, %v183_v2  ;;  %v349_v5 = vadd.f32 %v282_v13, %v281_v12 }
  0xa1   :  { %v1570_v6 = vsub.f32 %v1204_v20, %v184_v34  ;;  %v1573_v59 = vsub.f32 %v1209_v21, %v184_v34  ;;  %v106_v8 = vpop.xlane.xlu0 %105  ;;  %v352_v46 = vadd.f32 %v284_v15, %v283_v14 }
  0xa2   :  { %v185_v47 = vmul.f32 0.00390625, %v106_v8  ;;  %347 = vadd.xlane.f32.xlu1 %v346_v23  ;;  %350 = vadd.xlane.f32.xlu0 %v349_v5  ;;  %v109_v40 = vpop.xlane.xlu1 %108  ;;  %v285_v18 = vmul.f32 %v1564_v41, %v1564_v41  ;;  %v286_v19 = vmul.f32 %v1567_v35, %v1567_v35 }
  0xa3   :  { %v186_v2 = vmul.f32 0.00390625, %v109_v40  ;;  %v287_v20 = vmul.f32 %v1570_v6, %v1570_v6  ;;  %v288_v21 = vmul.f32 %v1573_v59, %v1573_v59 }
  0xa4   :  { %v1584_v12 = vsub.f32 %v1218_v24, %v185_v47  ;;  %v1587_v23 = vsub.f32 %v1223_v25, %v185_v47  ;;  %v355_v13 = vadd.f32 %v286_v19, %v285_v18 }
  0xa5   :  { %v1590_v34 = vsub.f32 %v1228_v26, %v186_v2  ;;  %v1593_v14 = vsub.f32 %v1233_v27, %v186_v2  ;;  %v112_v15 = vpop.xlane.xlu0 %111  ;;  %v358_v40 = vadd.f32 %v288_v21, %v287_v20 }
  0xa6   :  { %v187_v5 = vmul.f32 0.00390625, %v112_v15  ;;  %353 = vadd.xlane.f32.xlu1 %v352_v46  ;;  %356 = vadd.xlane.f32.xlu0 %v355_v13  ;;  %v115_v8 = vpop.xlane.xlu1 %114  ;;  %v289_v24 = vmul.f32 %v1584_v12, %v1584_v12  ;;  %v290_v25 = vmul.f32 %v1587_v23, %v1587_v23 }
  0xa7   :  { %v188_v47 = vmul.f32 0.00390625, %v115_v8  ;;  %v291_v26 = vmul.f32 %v1590_v34, %v1590_v34  ;;  %v292_v27 = vmul.f32 %v1593_v14, %v1593_v14 }
  0xa8   :  { %v1604_v18 = vsub.f32 %v1242_v30, %v187_v5  ;;  %v1607_v46 = vsub.f32 %v1247_v31, %v187_v5  ;;  %v361_v19 = vadd.f32 %v290_v25, %v289_v24 }
  0xa9   :  { %v1610_v2 = vsub.f32 %v1252_v32, %v188_v47  ;;  %v1613_v20 = vsub.f32 %v1257_v33, %v188_v47  ;;  %v118_v21 = vpop.xlane.xlu0 %117  ;;  %v364_v8 = vadd.f32 %v292_v27, %v291_v26 }
  0xaa   :  { %v189_v13 = vmul.f32 0.00390625, %v118_v21  ;;  %359 = vadd.xlane.f32.xlu1 %v358_v40  ;;  %362 = vadd.xlane.f32.xlu0 %v361_v19  ;;  %v121_v15 = vpop.xlane.xlu1 %120  ;;  %v293_v30 = vmul.f32 %v1604_v18, %v1604_v18  ;;  %v294_v31 = vmul.f32 %v1607_v46, %v1607_v46 }
  0xab   :  { %v190_v5 = vmul.f32 0.00390625, %v121_v15  ;;  %v295_v32 = vmul.f32 %v1610_v2, %v1610_v2  ;;  %v296_v33 = vmul.f32 %v1613_v20, %v1613_v20 }
  0xac   :  { %v1624_v24 = vsub.f32 %v1266_v36, %v189_v13  ;;  %v1627_v40 = vsub.f32 %v1271_v37, %v189_v13  ;;  %v367_v25 = vadd.f32 %v294_v31, %v293_v30 }
  0xad   :  { %v1630_v47 = vsub.f32 %v1276_v38, %v190_v5  ;;  %v1633_v26 = vsub.f32 %v1281_v39, %v190_v5  ;;  %v124_v27 = vpop.xlane.xlu0 %123  ;;  %v370_v15 = vadd.f32 %v296_v33, %v295_v32 }
  0xae   :  { %v191_v19 = vmul.f32 0.00390625, %v124_v27  ;;  %365 = vadd.xlane.f32.xlu1 %v364_v8  ;;  %368 = vadd.xlane.f32.xlu0 %v367_v25  ;;  %v127_v21 = vpop.xlane.xlu1 %126  ;;  %v297_v36 = vmul.f32 %v1624_v24, %v1624_v24  ;;  %v298_v37 = vmul.f32 %v1627_v40, %v1627_v40 }
  0xaf   :  { %v192_v13 = vmul.f32 0.00390625, %v127_v21  ;;  %v299_v38 = vmul.f32 %v1630_v47, %v1630_v47  ;;  %v300_v39 = vmul.f32 %v1633_v26, %v1633_v26 }
  0xb0   :  { %v1644_v30 = vsub.f32 %v1290_v42, %v191_v19  ;;  %v1647_v8 = vsub.f32 %v1295_v43, %v191_v19  ;;  %v373_v31 = vadd.f32 %v298_v37, %v297_v36 }
  0xb1   :  { %v1650_v5 = vsub.f32 %v1300_v44, %v192_v13  ;;  %v1653_v32 = vsub.f32 %v1305_v45, %v192_v13  ;;  %v130_v33 = vpop.xlane.xlu0 %129  ;;  %v376_v21 = vadd.f32 %v300_v39, %v299_v38 }
  0xb2   :  { %v193_v25 = vmul.f32 0.00390625, %v130_v33  ;;  %371 = vadd.xlane.f32.xlu1 %v370_v15  ;;  %374 = vadd.xlane.f32.xlu0 %v373_v31  ;;  %v133_v27 = vpop.xlane.xlu1 %132  ;;  %v301_v42 = vmul.f32 %v1644_v30, %v1644_v30  ;;  %v302_v43 = vmul.f32 %v1647_v8, %v1647_v8 }
  0xb3   :  { %v194_v19 = vmul.f32 0.00390625, %v133_v27  ;;  %v303_v44 = vmul.f32 %v1650_v5, %v1650_v5  ;;  %v304_v45 = vmul.f32 %v1653_v32, %v1653_v32 }
  0xb4   :  { %v1664_v36 = vsub.f32 %v1314_v48, %v193_v25  ;;  %v1667_v15 = vsub.f32 %v1319_v49, %v193_v25  ;;  %v379_v37 = vadd.f32 %v302_v43, %v301_v42 }
  0xb5   :  { %v1670_v13 = vsub.f32 %v1324_v50, %v194_v19  ;;  %v1673_v38 = vsub.f32 %v1329_v51, %v194_v19  ;;  %v136_v39 = vpop.xlane.xlu0 %135  ;;  %v382_v27 = vadd.f32 %v304_v45, %v303_v44 }
  0xb6   :  { %v195_v31 = vmul.f32 0.00390625, %v136_v39  ;;  %377 = vadd.xlane.f32.xlu1 %v376_v21  ;;  %380 = vadd.xlane.f32.xlu0 %v379_v37  ;;  %v139_v33 = vpop.xlane.xlu1 %138  ;;  %v305_v48 = vmul.f32 %v1664_v36, %v1664_v36  ;;  %v306_v49 = vmul.f32 %v1667_v15, %v1667_v15 }
  0xb7   :  { %v196_v25 = vmul.f32 0.00390625, %v139_v33  ;;  %v307_v50 = vmul.f32 %v1670_v13, %v1670_v13  ;;  %v308_v51 = vmul.f32 %v1673_v38, %v1673_v38 }
  0xb8   :  { %v1684_v42 = vsub.f32 %v1338_v54, %v195_v31  ;;  %v1687_v21 = vsub.f32 %v1343_v55, %v195_v31  ;;  %v385_v43 = vadd.f32 %v306_v49, %v305_v48 }
  0xb9   :  { %v1690_v19 = vsub.f32 %v1348_v56, %v196_v25  ;;  %v1693_v44 = vsub.f32 %v1353_v57, %v196_v25  ;;  %v142_v45 = vpop.xlane.xlu0 %141  ;;  %v388_v33 = vadd.f32 %v308_v51, %v307_v50 }
  0xba   :  { %v197_v37 = vmul.f32 0.00390625, %v142_v45  ;;  %383 = vadd.xlane.f32.xlu1 %v382_v27  ;;  %386 = vadd.xlane.f32.xlu0 %v385_v43  ;;  %v145_v39 = vpop.xlane.xlu1 %144  ;;  %v309_v54 = vmul.f32 %v1684_v42, %v1684_v42  ;;  %v310_v55 = vmul.f32 %v1687_v21, %v1687_v21 }
  0xbb   :  { %v198_v31 = vmul.f32 0.00390625, %v145_v39  ;;  %v311_v56 = vmul.f32 %v1690_v19, %v1690_v19  ;;  %v312_v57 = vmul.f32 %v1693_v44, %v1693_v44 }
  0xbc   :  { %v1704_v48 = vsub.f32 %v1362_v60, %v197_v37  ;;  %v1707_v27 = vsub.f32 %v1367_v61, %v197_v37  ;;  %v391_v49 = vadd.f32 %v310_v55, %v309_v54 }
  0xbd   :  { %v1710_v25 = vsub.f32 %v1372_v62, %v198_v31  ;;  %v1713_v50 = vsub.f32 %v1377_v63, %v198_v31  ;;  %v148_v51 = vpop.xlane.xlu0 %147  ;;  %v394_v39 = vadd.f32 %v312_v57, %v311_v56 }
  0xbe   :  { %v199_v43 = vmul.f32 0.00390625, %v148_v51  ;;  %389 = vadd.xlane.f32.xlu1 %v388_v33  ;;  %392 = vadd.xlane.f32.xlu0 %v391_v49  ;;  %v151_v45 = vpop.xlane.xlu1 %150  ;;  %v313_v60 = vmul.f32 %v1704_v48, %v1704_v48  ;;  %v314_v61 = vmul.f32 %v1707_v27, %v1707_v27 }
  0xbf   :  { %2194 = vst [vmem:[#allocation18_spill] sm:$0xff] %v1713_v50  ;;  %v200_v37 = vmul.f32 0.00390625, %v151_v45  ;;  %v315_v62 = vmul.f32 %v1710_v25, %v1710_v25  ;;  %v316_v63 = vmul.f32 %v1713_v50, %v1713_v50 }
  0xc0   :  { %v1724_v54 = vsub.f32 %v1386_v10, %v199_v43  ;;  %v1727_v33 = vsub.f32 %v1391_v11, %v199_v43  ;;  %v397_v55 = vadd.f32 %v314_v61, %v313_v60 }
  0xc1   :  { %v1730_v31 = vsub.f32 %v1396_v16, %v200_v37  ;;  %v1733_v56 = vsub.f32 %v1401_v17, %v200_v37  ;;  %v154_v57 = vpop.xlane.xlu0 %153  ;;  %v400_v45 = vadd.f32 %v316_v63, %v315_v62  ;;  %v2201_v37 = vld [vmem:[#allocation2_spill] sm:$0xff]  ;;  %v2203_v63 = vld [vmem:[#allocation3_spill] sm:$0xff] }
  0xc2   :  { %2195 = vst [vmem:[#allocation19_spill] sm:$0xff] %v1724_v54  ;;  %2196 = vst [vmem:[#allocation20_spill] sm:$0xff] %v1727_v33  ;;  %v201_v49 = vmul.f32 0.00390625, %v154_v57  ;;  %395 = vadd.xlane.f32.xlu1 %v394_v39  ;;  %398 = vadd.xlane.f32.xlu0 %v397_v55  ;;  %v157_v51 = vpop.xlane.xlu1 %156  ;;  %v317_v10 = vmul.f32 %v1724_v54, %v1724_v54  ;;  %v318_v11 = vmul.f32 %v1727_v33, %v1727_v33 }
  0xc3   :  { %2197 = vst [vmem:[#allocation21_spill] sm:$0xff] %v1730_v31  ;;  %2198 = vst [vmem:[#allocation22_spill] sm:$0xff] %v1733_v56  ;;  %v202_v43 = vmul.f32 0.00390625, %v157_v51  ;;  %v319_v16 = vmul.f32 %v1730_v31, %v1730_v31  ;;  %v320_v17 = vmul.f32 %v1733_v56, %v1733_v56 }
  0xc4   :  { %v1744_v60 = vsub.f32 %v1410_v28, %v201_v49  ;;  %v1747_v39 = vsub.f32 %v1415_v29, %v201_v49  ;;  %v403_v61 = vadd.f32 %v318_v11, %v317_v10 }
  0xc5   :  { %v1750_v62 = vsub.f32 %v2201_v37, %v202_v43  ;;  %v1753_v55 = vsub.f32 %v2203_v63, %v202_v43  ;;  %v160_v57 = vpop.xlane.xlu0 %159  ;;  %v406_v33 = vadd.f32 %v320_v17, %v319_v16  ;;  %v2205_v43 = vld [vmem:[#allocation4_spill] sm:$0xff]  ;;  %v2209_v17 = vld [vmem:[#allocation6_spill] sm:$0xff] }
  0xc6   :  { %2199 = vst [vmem:[#allocation23_spill] sm:$0xff] %v1744_v60  ;;  %2200 = vst [vmem:[#allocation24_spill] sm:$0xff] %v1747_v39  ;;  %v203_v51 = vmul.f32 0.00390625, %v160_v57  ;;  %401 = vadd.xlane.f32.xlu1 %v400_v45  ;;  %404 = vadd.xlane.f32.xlu0 %v403_v61  ;;  %v163_v31 = vpop.xlane.xlu1 %162  ;;  %v321_v28 = vmul.f32 %v1744_v60, %v1744_v60  ;;  %v322_v29 = vmul.f32 %v1747_v39, %v1747_v39  ;;  %v2207_v45 = vld [vmem:[#allocation5_spill] sm:$0xff]  ;;  %v2211_v57 = vld [vmem:[#allocation7_spill] sm:$0xff] }
  0xc7   :  { %2202 = vst [vmem:[#allocation2_spill] sm:$0xff] %v1750_v62  ;;  %2204 = vst [vmem:[#allocation3_spill] sm:$0xff] %v1753_v55  ;;  %v204_v49 = vmul.f32 0.00390625, %v163_v31  ;;  %v323_v10 = vmul.f32 %v1750_v62, %v1750_v62  ;;  %v324_v11 = vmul.f32 %v1753_v55, %v1753_v55 }
  0xc8   :  { %v1764_v37 = vsub.f32 %v2205_v43, %v203_v51  ;;  %v1767_v61 = vsub.f32 %v2207_v45, %v203_v51  ;;  %v409_v16 = vadd.f32 %v322_v29, %v321_v28 }
  0xc9   :  { %v1770_v63 = vsub.f32 %v2209_v17, %v204_v49  ;;  %v1773_v60 = vsub.f32 %v2211_v57, %v204_v49  ;;  %v166_v31 = vpop.xlane.xlu0 %165  ;;  %v412_v56 = vadd.f32 %v324_v11, %v323_v10  ;;  %v2213_v49 = vld [vmem:[#allocation8_spill] sm:$0xff]  ;;  %v2217_v11 = vld [vmem:[#allocation10_spill] sm:$0xff] }
  0xca   :  { %2206 = vst [vmem:[#allocation4_spill] sm:$0xff] %v1764_v37  ;;  %2208 = vst [vmem:[#allocation5_spill] sm:$0xff] %v1767_v61  ;;  %v205_v39 = vmul.f32 0.00390625, %v166_v31  ;;  %407 = vadd.xlane.f32.xlu1 %v406_v33  ;;  %410 = vadd.xlane.f32.xlu0 %v409_v16  ;;  %v169_v62 = vpop.xlane.xlu1 %168  ;;  %v325_v43 = vmul.f32 %v1764_v37, %v1764_v37  ;;  %v326_v51 = vmul.f32 %v1767_v61, %v1767_v61  ;;  %v2215_v33 = vld [vmem:[#allocation9_spill] sm:$0xff]  ;;  %v2219_v31 = vld [vmem:[#allocation11_spill] sm:$0xff] }
  0xcb   :  { %2210 = vst [vmem:[#allocation6_spill] sm:$0xff] %v1770_v63  ;;  %2212 = vst [vmem:[#allocation7_spill] sm:$0xff] %v1773_v60  ;;  %v206_v45 = vmul.f32 0.00390625, %v169_v62  ;;  %v327_v28 = vmul.f32 %v1770_v63, %v1770_v63  ;;  %v328_v29 = vmul.f32 %v1773_v60, %v1773_v60 }
  0xcc   :  { %v1784_v17 = vsub.f32 %v2213_v49, %v205_v39  ;;  %v1787_v16 = vsub.f32 %v2215_v33, %v205_v39  ;;  %v415_v10 = vadd.f32 %v326_v51, %v325_v43 }
  0xcd   :  { %v1790_v57 = vsub.f32 %v2217_v11, %v206_v45  ;;  %v1793_v37 = vsub.f32 %v2219_v31, %v206_v45  ;;  %v172_v62 = vpop.xlane.xlu0 %171  ;;  %v418_v55 = vadd.f32 %v328_v29, %v327_v28  ;;  %v2225_v11 = vld [vmem:[#allocation13_spill] sm:$0xff] }
  0xce   :  { %2214 = vst [vmem:[#allocation8_spill] sm:$0xff] %v1784_v17  ;;  %2216 = vst [vmem:[#allocation9_spill] sm:$0xff] %v1787_v16  ;;  %v207_v61 = vmul.f32 0.00390625, %v172_v62  ;;  %413 = vadd.xlane.f32.xlu1 %v412_v56  ;;  %416 = vadd.xlane.f32.xlu0 %v415_v10  ;;  %v175_v63 = vpop.xlane.xlu1 %174  ;;  %v329_v49 = vmul.f32 %v1784_v17, %v1784_v17  ;;  %v330_v39 = vmul.f32 %v1787_v16, %v1787_v16  ;;  %v2222_v56 = vld [vmem:[#allocation12_spill] sm:$0xff] }
  0xcf   :  { %2218 = vst [vmem:[#allocation10_spill] sm:$0xff] %v1790_v57  ;;  %2220 = vst [vmem:[#allocation11_spill] sm:$0xff] %v1793_v37  ;;  %v208_v33 = vmul.f32 0.00390625, %v175_v63  ;;  %v331_v43 = vmul.f32 %v1790_v57, %v1790_v57  ;;  %v332_v51 = vmul.f32 %v1793_v37, %v1793_v37 }
  0xd0   :  { %v1804_v45 = vsub.f32 %v1482_v53, %v207_v61  ;;  %v1807_v10 = vsub.f32 %v2222_v56, %v207_v61  ;;  %v421_v28 = vadd.f32 %v330_v39, %v329_v49 }
  0xd1   :  { %v1810_v29 = vsub.f32 %v1492_v58, %v208_v33  ;;  %v1813_v31 = vsub.f32 %v2225_v11, %v208_v33  ;;  %v424_v63 = vadd.f32 %v332_v51, %v331_v43  ;;  %v594_v43 = vlaneseq }
  0xd2   :  { %2221 = vst [vmem:[#allocation25_spill] sm:$0xff] %v1804_v45  ;;  %2223 = vst [vmem:[#allocation12_spill] sm:$0xff] %v1807_v10  ;;  %419 = vadd.xlane.f32.xlu1 %v418_v55  ;;  %422 = vadd.xlane.f32.xlu0 %v421_v28  ;;  %v333_v62 = vmul.f32 %v1804_v45, %v1804_v45  ;;  %v334_v53 = vmul.f32 %v1807_v10, %v1807_v10 }
  0xd3   :  { %2224 = vst [vmem:[#allocation26_spill] sm:$0xff] %v1810_v29  ;;  %2226 = vst [vmem:[#allocation13_spill] sm:$0xff] %v1813_v31  ;;  %v335_v61 = vmul.f32 %v1810_v29, %v1810_v29  ;;  %v336_v49 = vmul.f32 %v1813_v31, %v1813_v31  ;;  %v595_v45 = vshrl.u32 %v594_v43, 7 }
  0xd4   :  { %v427_v58 = vadd.f32 %v334_v53, %v333_v62 }
  0xd5   :  { %v430_v39 = vadd.f32 %v336_v49, %v335_v61  ;;  %v596_v53 = vsub.s32 0, %v595_v45  ;;  %v600_v61 = vsub.s32 1, %v595_v45  ;;  %v78_v49 = vld [vmem:[%s2138_s1] sm:$0x3] }
  0xd6   :  { %425 = vadd.xlane.f32.xlu1 %v424_v63  ;;  %428 = vadd.xlane.f32.xlu0 %v427_v58 }
  0xda   :  { %431 = vadd.xlane.f32.xlu1 %v430_v39 }
 0x127   :  { %v339_v55 = vpop.xlane.xlu0 %338 }
 0x128   :  { %v433_v33 = vmul.f32 0.00390625, %v339_v55 }
 0x12a   :  { %v465_v51 = vadd.f32 1e-12, %v433_v33 }
 0x12b   :  { %v342_v56 = vpop.xlane.xlu1 %341  ;;  %v345_v28 = vpop.xlane.xlu0 %344 }
 0x12c   :  { %1035 = vrsqrt.f32 %v465_v51  ;;  %v434_v11 = vmul.f32 0.00390625, %v342_v56  ;;  %v435_v10 = vmul.f32 0.00390625, %v345_v28 }
 0x12e   :  { %v466_v37 = vadd.f32 1e-12, %v434_v11  ;;  %v467_v29 = vadd.f32 1e-12, %v435_v10  ;;  %v79_v10 = vld [vmem:[%s2139_s2] sm:$0x3] }
 0x12f   :  { %v348_v57 = vpop.xlane.xlu1 %347  ;;  %v351_v16 = vpop.xlane.xlu0 %350  ;;  %v1833_v56 = vrot.slane %v79_v10, %v596_v53  ;;  %v1835_v28 = vrot.slane %v79_v10, %v600_v61  ;;  %v2227_v11 = vld [vmem:[#allocation14_spill] sm:$0xff] }
 0x130   :  { %1037 = vrsqrt.f32 %v466_v37  ;;  %v436_v62 = vmul.f32 0.00390625, %v348_v57  ;;  %v437_v63 = vmul.f32 0.00390625, %v351_v16  ;;  %v1829_v57 = vrot.slane %v78_v49, %v596_v53 }
 0x131   :  { %1039 = vrsqrt.f32 %v467_v29  ;;  %v1831_v16 = vrot.slane %v78_v49, %v600_v61 }
 0x132   :  { %v468_v58 = vadd.f32 1e-12, %v436_v62  ;;  %v469_v39 = vadd.f32 1e-12, %v437_v63  ;;  %v2228_v63 = vld [vmem:[#allocation15_spill] sm:$0xff] }
 0x133   :  { %v354_v55 = vpop.xlane.xlu1 %353  ;;  %v357_v33 = vpop.xlane.xlu0 %356 }
 0x134   :  { %1041 = vrsqrt.f32 %v468_v58  ;;  %v438_v43 = vmul.f32 0.00390625, %v354_v55  ;;  %v439_v37 = vmul.f32 0.00390625, %v357_v33 }
 0x135   :  { %1043 = vrsqrt.f32 %v469_v39 }
 0x136   :  { %v1036_v45 = vpop.eup %1035  ;;  %v470_v29 = vadd.f32 1e-12, %v438_v43  ;;  %v471_v51 = vadd.f32 1e-12, %v439_v37 }
 0x137   :  { %v529_v62 = vmul.f32 %v1036_v45, %v2227_v11  ;;  %v530_v31 = vmul.f32 %v1036_v45, %v2228_v63  ;;  %v360_v17 = vpop.xlane.xlu1 %359  ;;  %v363_v58 = vpop.xlane.xlu0 %362  ;;  %v2229_v63 = vld [vmem:[#allocation16_spill] sm:$0xff] }
 0x138   :  { %1045 = vrsqrt.f32 %v470_v29  ;;  %v440_v55 = vmul.f32 0.00390625, %v360_v17  ;;  %v441_v33 = vmul.f32 0.00390625, %v363_v58 }
 0x139   :  { %v604_v49 = vmul.f32 %v1829_v57, %v529_v62  ;;  %v605_v39 = vmul.f32 %v1831_v16, %v530_v31  ;;  %1047 = vrsqrt.f32 %v471_v51  ;;  %v2230_v62 = vld [vmem:[#allocation17_spill] sm:$0xff] }
 0x13a   :  { %v1038_v43 = vpop.eup %1037  ;;  %v472_v37 = vadd.f32 1e-12, %v440_v55  ;;  %v473_v53 = vadd.f32 1e-12, %v441_v33 }
 0x13b   :  { %v1040_v60 = vpop.eup %1039  ;;  %v679_v61 = vadd.f32 %v1833_v56, %v604_v49  ;;  %v680_v10 = vadd.f32 %v1835_v28, %v605_v39  ;;  %v531_v45 = vmul.f32 %v1038_v43, %v1524_v3  ;;  %v532_v11 = vmul.f32 %v1038_v43, %v1527_v4  ;;  %v366_v29 = vpop.xlane.xlu1 %365 }
 0x13c   :  { %v369_v17 = vpop.xlane.xlu0 %368  ;;  %v533_v58 = vmul.f32 %v1040_v60, %v2229_v63  ;;  %v534_v54 = vmul.f32 %v1040_v60, %v2230_v62  ;;  %1049 = vrsqrt.f32 %v472_v37  ;;  %v442_v31 = vmul.f32 0.00390625, %v366_v29 }
 0x13d   :  { %v1003_v51 = vpack.c.bf16 %v680_v10, %v679_v61  ;;  %v606_v55 = vmul.f32 %v1829_v57, %v531_v45  ;;  %v607_v33 = vmul.f32 %v1831_v16, %v532_v11  ;;  %1051 = vrsqrt.f32 %v473_v53 }
 0x13e   :  { %v1042_v49 = vpop.eup %1041  ;;  %v608_v39 = vmul.f32 %v1829_v57, %v533_v58  ;;  %v609_v3 = vmul.f32 %v1831_v16, %v534_v54  ;;  %v474_v4 = vadd.f32 1e-12, %v442_v31  ;;  %v443_v43 = vmul.f32 0.00390625, %v369_v17 }
 0x13f   :  { %v1044_v50 = vpop.eup %1043  ;;  %935 = vst [vmem:[%s2140_s3] sm:$0xff] %v1003_v51  ;;  %v681_v60 = vadd.f32 %v1833_v56, %v606_v55  ;;  %v682_v37 = vadd.f32 %v1835_v28, %v607_v33  ;;  %v535_v61 = vmul.f32 %v1042_v49, %v1530_v52  ;;  %v536_v53 = vmul.f32 %v1042_v49, %v1533_v22  ;;  %v372_v10 = vpop.xlane.xlu1 %371 }
 0x140   :  { %v375_v45 = vpop.xlane.xlu0 %374  ;;  %v683_v11 = vadd.f32 %v1833_v56, %v608_v39  ;;  %v684_v54 = vadd.f32 %v1835_v28, %v609_v3  ;;  %v537_v29 = vmul.f32 %v1044_v50, %v1544_v9  ;;  %v538_v17 = vmul.f32 %v1044_v50, %v1547_v7 }
 0x141   :  { %v1004_v63 = vpack.c.bf16 %v682_v37, %v681_v60  ;;  %v610_v58 = vmul.f32 %v1829_v57, %v535_v61  ;;  %v611_v62 = vmul.f32 %v1831_v16, %v536_v53  ;;  %1053 = vrsqrt.f32 %v474_v4 }
 0x142   :  { %v1046_v31 = vpop.eup %1045  ;;  %v1005_v52 = vpack.c.bf16 %v684_v54, %v683_v11  ;;  %v612_v22 = vmul.f32 %v1829_v57, %v537_v29  ;;  %v613_v51 = vmul.f32 %v1831_v16, %v538_v17  ;;  %v475_v55 = vadd.f32 1e-12, %v443_v43 }
 0x143   :  { %v1048_v33 = vpop.eup %1047  ;;  %936 = vst [vmem:[%s2140_s3 + $0x8] sm:$0xff] %v1004_v63  ;;  %v685_v9 = vadd.f32 %v1833_v56, %v610_v58  ;;  %v686_v7 = vadd.f32 %v1835_v28, %v611_v62  ;;  %v539_v50 = vmul.f32 %v1046_v31, %v1550_v0  ;;  %v540_v49 = vmul.f32 %v1046_v31, %v1553_v1  ;;  %v378_v39 = vpop.xlane.xlu1 %377 }
 0x144   :  { %v381_v3 = vpop.xlane.xlu0 %380  ;;  %937 = vst [vmem:[%s2140_s3 + $0x10] sm:$0xff] %v1005_v52  ;;  %v687_v4 = vadd.f32 %v1833_v56, %v612_v22  ;;  %v688_v43 = vadd.f32 %v1835_v28, %v613_v51  ;;  %v541_v60 = vmul.f32 %v1048_v33, %v1564_v41  ;;  %v542_v37 = vmul.f32 %v1048_v33, %v1567_v35 }
 0x145   :  { %v1006_v61 = vpack.c.bf16 %v686_v7, %v685_v9  ;;  %v614_v53 = vmul.f32 %v1829_v57, %v539_v50  ;;  %v615_v0 = vmul.f32 %v1831_v16, %v540_v49  ;;  %1055 = vrsqrt.f32 %v475_v55 }
 0x146   :  { %v1050_v1 = vpop.eup %1049  ;;  %v1007_v11 = vpack.c.bf16 %v688_v43, %v687_v4  ;;  %v616_v54 = vmul.f32 %v1829_v57, %v541_v60  ;;  %v617_v29 = vmul.f32 %v1831_v16, %v542_v37  ;;  %v444_v17 = vmul.f32 0.00390625, %v372_v10 }
 0x147   :  { %v1052_v63 = vpop.eup %1051  ;;  %938 = vst [vmem:[%s2140_s3 + $0x18] sm:$0xff] %v1006_v61  ;;  %v689_v41 = vadd.f32 %v1833_v56, %v614_v53  ;;  %v690_v35 = vadd.f32 %v1835_v28, %v615_v0  ;;  %v543_v58 = vmul.f32 %v1050_v1, %v1570_v6  ;;  %v544_v62 = vmul.f32 %v1050_v1, %v1573_v59  ;;  %v384_v31 = vpop.xlane.xlu1 %383 }
 0x148   :  { %v387_v52 = vpop.xlane.xlu0 %386  ;;  %939 = vst [vmem:[%s2140_s3 + $0x20] sm:$0xff] %v1007_v11  ;;  %v691_v10 = vadd.f32 %v1833_v56, %v616_v54  ;;  %v692_v22 = vadd.f32 %v1835_v28, %v617_v29  ;;  %v545_v51 = vmul.f32 %v1052_v63, %v1584_v12  ;;  %v546_v55 = vmul.f32 %v1052_v63, %v1587_v23 }
 0x149   :  { %v1008_v33 = vpack.c.bf16 %v690_v35, %v689_v41  ;;  %v618_v9 = vmul.f32 %v1829_v57, %v543_v58  ;;  %v619_v6 = vmul.f32 %v1831_v16, %v544_v62  ;;  %v476_v59 = vadd.f32 1e-12, %v444_v17 }
 0x14a   :  { %v1009_v7 = vpack.c.bf16 %v692_v22, %v691_v10  ;;  %v620_v50 = vmul.f32 %v1829_v57, %v545_v51  ;;  %v621_v49 = vmul.f32 %v1831_v16, %v546_v55  ;;  %v445_v4 = vmul.f32 0.00390625, %v375_v45 }
 0x14b   :  { %v1054_v43 = vpop.eup %1053  ;;  %940 = vst [vmem:[%s2140_s3 + $0x28] sm:$0xff] %v1008_v33  ;;  %v693_v12 = vadd.f32 %v1833_v56, %v618_v9  ;;  %v694_v23 = vadd.f32 %v1835_v28, %v619_v6  ;;  %1057 = vrsqrt.f32 %v476_v59  ;;  %v446_v60 = vmul.f32 0.00390625, %v378_v39  ;;  %v390_v37 = vpop.xlane.xlu1 %389 }
 0x14c   :  { %v393_v61 = vpop.xlane.xlu0 %392  ;;  %941 = vst [vmem:[%s2140_s3 + $0x30] sm:$0xff] %v1009_v7  ;;  %v695_v53 = vadd.f32 %v1833_v56, %v620_v50  ;;  %v696_v45 = vadd.f32 %v1835_v28, %v621_v49  ;;  %v547_v0 = vmul.f32 %v1054_v43, %v1590_v34  ;;  %v548_v1 = vmul.f32 %v1054_v43, %v1593_v14 }
 0x14d   :  { %v1010_v11 = vpack.c.bf16 %v694_v23, %v693_v12  ;;  %v477_v54 = vadd.f32 1e-12, %v445_v4  ;;  %v478_v29 = vadd.f32 1e-12, %v446_v60  ;;  %v447_v17 = vmul.f32 0.00390625, %v381_v3 }
 0x14e   :  { %v1011_v63 = vpack.c.bf16 %v696_v45, %v695_v53  ;;  %v622_v39 = vmul.f32 %v1829_v57, %v547_v0  ;;  %v623_v41 = vmul.f32 %v1831_v16, %v548_v1  ;;  %v448_v35 = vmul.f32 0.00390625, %v384_v31 }
 0x14f   :  { %v1056_v58 = vpop.eup %1055  ;;  %942 = vst [vmem:[%s2140_s3 + $0x38] sm:$0xff] %v1010_v11  ;;  %1059 = vrsqrt.f32 %v477_v54  ;;  %v479_v62 = vadd.f32 1e-12, %v447_v17  ;;  %v449_v34 = vmul.f32 0.00390625, %v387_v52  ;;  %v450_v10 = vmul.f32 0.00390625, %v390_v37  ;;  %v396_v14 = vpop.xlane.xlu1 %395 }
 0x150   :  { %v399_v22 = vpop.xlane.xlu0 %398  ;;  %943 = vst [vmem:[%s2140_s3 + $0x40] sm:$0xff] %v1011_v63  ;;  %v697_v3 = vadd.f32 %v1833_v56, %v622_v39  ;;  %v698_v51 = vadd.f32 %v1835_v28, %v623_v41  ;;  %v549_v31 = vmul.f32 %v1056_v58, %v1604_v18  ;;  %v550_v55 = vmul.f32 %v1056_v58, %v1607_v46 }
 0x151   :  { %1061 = vrsqrt.f32 %v478_v29  ;;  %v480_v33 = vadd.f32 1e-12, %v448_v35  ;;  %v481_v9 = vadd.f32 1e-12, %v449_v34  ;;  %v482_v6 = vadd.f32 1e-12, %v450_v10 }
 0x152   :  { %v1012_v52 = vpack.c.bf16 %v698_v51, %v697_v3  ;;  %v624_v59 = vmul.f32 %v1829_v57, %v549_v31  ;;  %v625_v7 = vmul.f32 %v1831_v16, %v550_v55  ;;  %1063 = vrsqrt.f32 %v479_v62 }
 0x153   :  { %1065 = vrsqrt.f32 %v480_v33  ;;  %v451_v50 = vmul.f32 0.00390625, %v393_v61  ;;  %v452_v49 = vmul.f32 0.00390625, %v396_v14  ;;  %v453_v4 = vmul.f32 0.00390625, %v399_v22  ;;  %v402_v43 = vpop.xlane.xlu1 %401 }
 0x154   :  { %v405_v12 = vpop.xlane.xlu0 %404  ;;  %944 = vst [vmem:[%s2140_s3 + $0x48] sm:$0xff] %v1012_v52  ;;  %v699_v18 = vadd.f32 %v1833_v56, %v624_v59  ;;  %v700_v46 = vadd.f32 %v1835_v28, %v625_v7  ;;  %1067 = vrsqrt.f32 %v481_v9  ;;  %v454_v23 = vmul.f32 0.00390625, %v402_v43 }
 0x155   :  { %v1058_v60 = vpop.eup %1057  ;;  %1069 = vrsqrt.f32 %v482_v6  ;;  %v483_v37 = vadd.f32 1e-12, %v451_v50  ;;  %v484_v53 = vadd.f32 1e-12, %v452_v49  ;;  %v485_v45 = vadd.f32 1e-12, %v453_v4 }
 0x156   :  { %v1013_v61 = vpack.c.bf16 %v700_v46, %v699_v18  ;;  %v551_v0 = vmul.f32 %v1058_v60, %v1610_v2  ;;  %v552_v1 = vmul.f32 %v1058_v60, %v1613_v20  ;;  %v486_v11 = vadd.f32 1e-12, %v454_v23 }
 0x157   :  { %1071 = vrsqrt.f32 %v483_v37  ;;  %v455_v54 = vmul.f32 0.00390625, %v405_v12  ;;  %v408_v29 = vpop.xlane.xlu1 %407 }
 0x158   :  { %v411_v17 = vpop.xlane.xlu0 %410  ;;  %945 = vst [vmem:[%s2140_s3 + $0x50] sm:$0xff] %v1013_v61  ;;  %v626_v63 = vmul.f32 %v1829_v57, %v551_v0  ;;  %v627_v39 = vmul.f32 %v1831_v16, %v552_v1  ;;  %1073 = vrsqrt.f32 %v484_v53  ;;  %v456_v41 = vmul.f32 0.00390625, %v408_v29 }
 0x159   :  { %v1060_v35 = vpop.eup %1059  ;;  %1075 = vrsqrt.f32 %v485_v45  ;;  %v487_v2 = vadd.f32 1e-12, %v455_v54  ;;  %v457_v58 = vmul.f32 0.00390625, %v411_v17 }
 0x15a   :  { %v701_v20 = vadd.f32 %v1833_v56, %v626_v63  ;;  %v702_v62 = vadd.f32 %v1835_v28, %v627_v39  ;;  %v553_v34 = vmul.f32 %v1060_v35, %v1624_v24  ;;  %v554_v10 = vmul.f32 %v1060_v35, %v1627_v40 }
 0x15b   :  { %v1062_v14 = vpop.eup %1061  ;;  %1077 = vrsqrt.f32 %v486_v11  ;;  %v1944_v22 = vadd.f32 1e-12, %v456_v41  ;;  %v1946_v3 = vadd.f32 1e-12, %v457_v58  ;;  %v1961_v4 = vpop.xlane.xlu1 %413 }
 0x15c   :  { %v1064_v51 = vpop.eup %1063  ;;  %v1014_v31 = vpack.c.bf16 %v702_v62, %v701_v20  ;;  %v628_v55 = vmul.f32 %v1829_v57, %v553_v34  ;;  %v629_v33 = vmul.f32 %v1831_v16, %v554_v10  ;;  %v555_v9 = vmul.f32 %v1062_v14, %v1630_v47  ;;  %v1981_v54 = vpop.xlane.xlu0 %416 }
 0x15d   :  { %v1066_v6 = vpop.eup %1065  ;;  %v556_v52 = vmul.f32 %v1062_v14, %v1633_v26  ;;  %v557_v24 = vmul.f32 %v1064_v51, %v1644_v30  ;;  %v558_v40 = vmul.f32 %v1064_v51, %v1647_v8  ;;  %1079 = vrsqrt.f32 %v487_v2 }
 0x15e   :  { %v1068_v59 = vpop.eup %1067  ;;  %946 = vst [vmem:[%s2140_s3 + $0x58] sm:$0xff] %v1014_v31  ;;  %v703_v7 = vadd.f32 %v1833_v56, %v628_v55  ;;  %v704_v50 = vadd.f32 %v1835_v28, %v629_v33  ;;  %v630_v49 = vmul.f32 %v1829_v57, %v555_v9  ;;  %v559_v47 = vmul.f32 %v1066_v6, %v1650_v5 }
 0x15f   :  { %v1070_v26 = vpop.eup %1069  ;;  %v631_v30 = vmul.f32 %v1831_v16, %v556_v52  ;;  %v632_v8 = vmul.f32 %v1829_v57, %v557_v24  ;;  %v633_v43 = vmul.f32 %v1831_v16, %v558_v40  ;;  %v560_v12 = vmul.f32 %v1066_v6, %v1653_v32  ;;  %v420_v20 = vpop.xlane.xlu1 %419 }
 0x160   :  { %v1015_v18 = vpack.c.bf16 %v704_v50, %v703_v7  ;;  %v705_v46 = vadd.f32 %v1833_v56, %v630_v49  ;;  %v634_v23 = vmul.f32 %v1829_v57, %v559_v47  ;;  %v561_v60 = vmul.f32 %v1068_v59, %v1664_v36  ;;  %v423_v40 = vpop.xlane.xlu0 %422 }
 0x161   :  { %v1072_v37 = vpop.eup %1071  ;;  %v706_v5 = vadd.f32 %v1835_v28, %v631_v30  ;;  %v707_v53 = vadd.f32 %v1833_v56, %v632_v8  ;;  %v708_v45 = vadd.f32 %v1835_v28, %v633_v43  ;;  %v635_v61 = vmul.f32 %v1831_v16, %v560_v12  ;;  %v2231_v30 = vld [vmem:[#allocation18_spill] sm:$0xff] }
 0x162   :  { %v1074_v0 = vpop.eup %1073  ;;  %947 = vst [vmem:[%s2140_s3 + $0x60] sm:$0xff] %v1015_v18  ;;  %v709_v32 = vadd.f32 %v1833_v56, %v634_v23  ;;  %v562_v1 = vmul.f32 %v1068_v59, %v1667_v15  ;;  %v636_v36 = vmul.f32 %v1829_v57, %v561_v60  ;;  %v563_v11 = vmul.f32 %v1070_v26, %v1670_v13  ;;  %v2232_v18 = vld [vmem:[#allocation19_spill] sm:$0xff]  ;;  %v2233_v23 = vld [vmem:[#allocation20_spill] sm:$0xff] }
 0x163   :  { %v1076_v29 = vpop.eup %1075  ;;  %v1016_v17 = vpack.c.bf16 %v706_v5, %v705_v46  ;;  %v1017_v63 = vpack.c.bf16 %v708_v45, %v707_v53  ;;  %v710_v39 = vadd.f32 %v1835_v28, %v635_v61  ;;  %v564_v41 = vmul.f32 %v1070_v26, %v1673_v38  ;;  %v426_v8 = vpop.xlane.xlu1 %425 }
 0x164   :  { %v637_v35 = vmul.f32 %v1831_v16, %v562_v1  ;;  %v711_v2 = vadd.f32 %v1833_v56, %v636_v36  ;;  %v638_v58 = vmul.f32 %v1829_v57, %v563_v11  ;;  %v565_v15 = vmul.f32 %v1072_v37, %v1684_v42  ;;  %v429_v11 = vpop.xlane.xlu0 %428 }
 0x165   :  { %v1078_v62 = vpop.eup %1077  ;;  %948 = vst [vmem:[%s2140_s3 + $0x68] sm:$0xff] %v1016_v17  ;;  %949 = vst [vmem:[%s2140_s3 + $0x70] sm:$0xff] %v1017_v63  ;;  %v1018_v13 = vpack.c.bf16 %v710_v39, %v709_v32  ;;  %v639_v38 = vmul.f32 %v1831_v16, %v564_v41  ;;  %v566_v34 = vmul.f32 %v1072_v37, %v1687_v21  ;;  %1081 = vrsqrt.f32 %v1944_v22 }
 0x166   :  { %v567_v10 = vmul.f32 %v1074_v0, %v1690_v19  ;;  %v712_v14 = vadd.f32 %v1835_v28, %v637_v35  ;;  %v713_v42 = vadd.f32 %v1833_v56, %v638_v58  ;;  %v640_v51 = vmul.f32 %v1829_v57, %v565_v15 }
 0x167   :  { %v568_v31 = vmul.f32 %v1074_v0, %v1693_v44  ;;  %v1080_v55 = vpop.eup %1079  ;;  %950 = vst [vmem:[%s2140_s3 + $0x78] sm:$0xff] %v1018_v13  ;;  %v714_v33 = vadd.f32 %v1835_v28, %v639_v38  ;;  %v641_v9 = vmul.f32 %v1831_v16, %v566_v34  ;;  %v569_v19 = vmul.f32 %v1076_v29, %v1704_v48 }
 0x168   :  { %v642_v21 = vmul.f32 %v1829_v57, %v567_v10  ;;  %v1019_v6 = vpack.c.bf16 %v712_v14, %v711_v2  ;;  %v715_v52 = vadd.f32 %v1833_v56, %v640_v51  ;;  %v570_v44 = vmul.f32 %v1076_v29, %v1707_v27  ;;  %v432_v2 = vpop.xlane.xlu1 %431 }
 0x169   :  { %v643_v24 = vmul.f32 %v1831_v16, %v568_v31  ;;  %v1020_v59 = vpack.c.bf16 %v714_v33, %v713_v42  ;;  %v716_v7 = vadd.f32 %v1835_v28, %v641_v9  ;;  %v644_v49 = vmul.f32 %v1829_v57, %v569_v19  ;;  %v2234_v42 = vld [vmem:[#allocation21_spill] sm:$0xff]  ;;  %v2235_v31 = vld [vmem:[#allocation22_spill] sm:$0xff]  ;;  %v2236_v33 = vld [vmem:[#allocation23_spill] sm:$0xff] }
 0x16a   :  { %v717_v50 = vadd.f32 %v1833_v56, %v642_v21  ;;  %951 = vst [vmem:[%s2140_s3 + $0x80] sm:$0xff] %v1019_v6  ;;  %v645_v47 = vmul.f32 %v1831_v16, %v570_v44  ;;  %v571_v26 = vmul.f32 %v1078_v62, %v1710_v25  ;;  %v572_v27 = vmul.f32 %v1078_v62, %v2231_v30  ;;  %v2237_v21 = vld [vmem:[#allocation24_spill] sm:$0xff] }
 0x16b   :  { %v718_v48 = vadd.f32 %v1835_v28, %v643_v24  ;;  %952 = vst [vmem:[%s2140_s3 + $0x88] sm:$0xff] %v1020_v59  ;;  %v1021_v43 = vpack.c.bf16 %v716_v7, %v715_v52  ;;  %v719_v12 = vadd.f32 %v1833_v56, %v644_v49  ;;  %v573_v46 = vmul.f32 %v1080_v55, %v2232_v18 }
 0x16c   :  { %v574_v60 = vmul.f32 %v1080_v55, %v2233_v23  ;;  %v720_v5 = vadd.f32 %v1835_v28, %v645_v47  ;;  %v646_v53 = vmul.f32 %v1829_v57, %v571_v26  ;;  %v647_v25 = vmul.f32 %v1831_v16, %v572_v27 }
 0x16d   :  { %v1022_v37 = vpack.c.bf16 %v718_v48, %v717_v50  ;;  %953 = vst [vmem:[%s2140_s3 + $0x90] sm:$0xff] %v1021_v43  ;;  %v648_v45 = vmul.f32 %v1829_v57, %v573_v46  ;;  %v458_v0 = vmul.f32 0.00390625, %v1961_v4  ;;  %1083 = vrsqrt.f32 %v1946_v3  ;;  %v2238_v50 = vld [vmem:[#allocation2_spill] sm:$0xff]  ;;  %v2239_v48 = vld [vmem:[#allocation3_spill] sm:$0xff]  ;;  %v2240_v46 = vld [vmem:[#allocation4_spill] sm:$0xff] }
 0x16e   :  { %v649_v61 = vmul.f32 %v1831_v16, %v574_v60  ;;  %v1023_v32 = vpack.c.bf16 %v720_v5, %v719_v12  ;;  %v721_v1 = vadd.f32 %v1833_v56, %v646_v53  ;;  %v722_v36 = vadd.f32 %v1835_v28, %v647_v25  ;;  %v2241_v5 = vld [vmem:[#allocation5_spill] sm:$0xff]  ;;  %v2242_v25 = vld [vmem:[#allocation6_spill] sm:$0xff] }
 0x16f   :  { %954 = vst [vmem:[%s2140_s3 + $0x98] sm:$0xff] %v1022_v37  ;;  %v723_v29 = vadd.f32 %v1833_v56, %v648_v45  ;;  %v490_v63 = vadd.f32 1e-12, %v458_v0  ;;  %v459_v22 = vmul.f32 0.00390625, %v1981_v54  ;;  %v460_v39 = vmul.f32 0.00390625, %v420_v20  ;;  %v1082_v10 = vpop.eup %1081 }
 0x170   :  { %v724_v17 = vadd.f32 %v1835_v28, %v649_v61  ;;  %955 = vst [vmem:[%s2140_s3 + $0xa0] sm:$0xff] %v1023_v32  ;;  %v1024_v4 = vpack.c.bf16 %v722_v36, %v721_v1  ;;  %v461_v41 = vmul.f32 0.00390625, %v423_v40  ;;  %v462_v35 = vmul.f32 0.00390625, %v426_v8  ;;  %v2243_v61 = vld [vmem:[#allocation7_spill] sm:$0xff] }
 0x171   :  { %1085 = vrsqrt.f32 %v490_v63  ;;  %v491_v3 = vadd.f32 1e-12, %v459_v22  ;;  %v463_v15 = vmul.f32 0.00390625, %v429_v11  ;;  %v492_v62 = vadd.f32 1e-12, %v460_v39 }
 0x172   :  { %v1025_v58 = vpack.c.bf16 %v724_v17, %v723_v29  ;;  %956 = vst [vmem:[%s2140_s3 + $0xa8] sm:$0xff] %v1024_v4  ;;  %v493_v13 = vadd.f32 1e-12, %v461_v41  ;;  %v494_v54 = vadd.f32 1e-12, %v462_v35  ;;  %v464_v38 = vmul.f32 0.00390625, %v432_v2 }
 0x173   :  { %1087 = vrsqrt.f32 %v491_v3  ;;  %v495_v20 = vadd.f32 1e-12, %v463_v15  ;;  %v575_v51 = vmul.f32 %v1082_v10, %v2234_v42  ;;  %v576_v55 = vmul.f32 %v1082_v10, %v2235_v31  ;;  %v2244_v29 = vld [vmem:[#allocation8_spill] sm:$0xff]  ;;  %v2245_v41 = vld [vmem:[#allocation9_spill] sm:$0xff]  ;;  %v2246_v15 = vld [vmem:[#allocation10_spill] sm:$0xff] }
 0x174   :  { %957 = vst [vmem:[%s2140_s3 + $0xb0] sm:$0xff] %v1025_v58  ;;  %1089 = vrsqrt.f32 %v492_v62  ;;  %v496_v34 = vadd.f32 1e-12, %v464_v38  ;;  %v2248_v31 = vld [vmem:[#allocation25_spill] sm:$0xff] }
 0x175   :  { %1091 = vrsqrt.f32 %v493_v13  ;;  %v650_v6 = vmul.f32 %v1829_v57, %v575_v51  ;;  %v651_v52 = vmul.f32 %v1831_v16, %v576_v55 }
 0x176   :  { %1093 = vrsqrt.f32 %v494_v54 }
 0x177   :  { %1095 = vrsqrt.f32 %v495_v20  ;;  %v1084_v14 = vpop.eup %1083  ;;  %v725_v59 = vadd.f32 %v1833_v56, %v650_v6  ;;  %v726_v7 = vadd.f32 %v1835_v28, %v651_v52 }
 0x178   :  { %v577_v9 = vmul.f32 %v1084_v14, %v2236_v33  ;;  %v578_v19 = vmul.f32 %v1084_v14, %v2237_v21  ;;  %1097 = vrsqrt.f32 %v496_v34  ;;  %v2247_v14 = vld [vmem:[#allocation11_spill] sm:$0xff] }
 0x179   :  { %v1026_v43 = vpack.c.bf16 %v726_v7, %v725_v59 }
 0x17a   :  { %v652_v44 = vmul.f32 %v1829_v57, %v577_v9  ;;  %v653_v40 = vmul.f32 %v1831_v16, %v578_v19  ;;  %v2249_v19 = vld [vmem:[#allocation12_spill] sm:$0xff] }
 0x17b   :  { %v1086_v24 = vpop.eup %1085  ;;  %958 = vst [vmem:[%s2140_s3 + $0xb8] sm:$0xff] %v1026_v43 }
 0x17c   :  { %v579_v49 = vmul.f32 %v1086_v24, %v2238_v50  ;;  %v580_v47 = vmul.f32 %v1086_v24, %v2239_v48  ;;  %v727_v30 = vadd.f32 %v1833_v56, %v652_v44  ;;  %v728_v27 = vadd.f32 %v1835_v28, %v653_v40  ;;  %v2250_v40 = vld [vmem:[#allocation26_spill] sm:$0xff] }
 0x17d   :  { %v1088_v26 = vpop.eup %1087 }
 0x17e   :  { %v1090_v8 = vpop.eup %1089  ;;  %v654_v12 = vmul.f32 %v1829_v57, %v579_v49  ;;  %v655_v18 = vmul.f32 %v1831_v16, %v580_v47  ;;  %v581_v23 = vmul.f32 %v1088_v26, %v2240_v46  ;;  %v1027_v37 = vpack.c.bf16 %v728_v27, %v727_v30  ;;  %v2251_v49 = vld [vmem:[#allocation13_spill] sm:$0xff] }
 0x17f   :  { %v1092_v60 = vpop.eup %1091  ;;  %v582_v53 = vmul.f32 %v1088_v26, %v2241_v5  ;;  %v583_v45 = vmul.f32 %v1090_v8, %v2242_v25  ;;  %v584_v0 = vmul.f32 %v1090_v8, %v2243_v61 }
 0x180   :  { %v1094_v32 = vpop.eup %1093  ;;  %v729_v1 = vadd.f32 %v1833_v56, %v654_v12  ;;  %v730_v36 = vadd.f32 %v1835_v28, %v655_v18  ;;  %v656_v11 = vmul.f32 %v1829_v57, %v581_v23  ;;  %v585_v17 = vmul.f32 %v1092_v60, %v2244_v29  ;;  %959 = vst [vmem:[%s2140_s3 + $0xc0] sm:$0xff] %v1027_v37 }
 0x181   :  { %v1096_v63 = vpop.eup %1095  ;;  %v657_v22 = vmul.f32 %v1831_v16, %v582_v53  ;;  %v658_v4 = vmul.f32 %v1829_v57, %v583_v45  ;;  %v659_v39 = vmul.f32 %v1831_v16, %v584_v0  ;;  %v586_v35 = vmul.f32 %v1092_v60, %v2245_v41 }
 0x182   :  { %v1028_v2 = vpack.c.bf16 %v730_v36, %v729_v1  ;;  %v731_v58 = vadd.f32 %v1833_v56, %v656_v11  ;;  %v660_v3 = vmul.f32 %v1829_v57, %v585_v17  ;;  %v587_v62 = vmul.f32 %v1094_v32, %v2246_v15  ;;  %v1098_v13 = vpop.eup %1097 }
 0x183   :  { %v732_v54 = vadd.f32 %v1835_v28, %v657_v22  ;;  %v733_v20 = vadd.f32 %v1833_v56, %v658_v4  ;;  %v734_v38 = vadd.f32 %v1835_v28, %v659_v39  ;;  %v661_v34 = vmul.f32 %v1831_v16, %v586_v35 }
 0x184   :  { %960 = vst [vmem:[%s2140_s3 + $0xc8] sm:$0xff] %v1028_v2  ;;  %v735_v10 = vadd.f32 %v1833_v56, %v660_v3  ;;  %v588_v42 = vmul.f32 %v1094_v32, %v2247_v14  ;;  %v662_v51 = vmul.f32 %v1829_v57, %v587_v62  ;;  %v589_v55 = vmul.f32 %v1096_v63, %v2248_v31 }
 0x185   :  { %v1029_v33 = vpack.c.bf16 %v732_v54, %v731_v58  ;;  %v1030_v9 = vpack.c.bf16 %v734_v38, %v733_v20  ;;  %v736_v21 = vadd.f32 %v1835_v28, %v661_v34  ;;  %v590_v6 = vmul.f32 %v1096_v63, %v2249_v19 }
 0x186   :  { %v663_v52 = vmul.f32 %v1831_v16, %v588_v42  ;;  %v737_v24 = vadd.f32 %v1833_v56, %v662_v51  ;;  %v664_v44 = vmul.f32 %v1829_v57, %v589_v55  ;;  %v591_v59 = vmul.f32 %v1098_v13, %v2250_v40 }
 0x187   :  { %961 = vst [vmem:[%s2140_s3 + $0xd0] sm:$0xff] %v1029_v33  ;;  %962 = vst [vmem:[%s2140_s3 + $0xd8] sm:$0xff] %v1030_v9  ;;  %v1031_v7 = vpack.c.bf16 %v736_v21, %v735_v10  ;;  %v665_v50 = vmul.f32 %v1831_v16, %v590_v6  ;;  %v592_v48 = vmul.f32 %v1098_v13, %v2251_v49 }
 0x188   :  { %v738_v47 = vadd.f32 %v1835_v28, %v663_v52  ;;  %v739_v26 = vadd.f32 %v1833_v56, %v664_v44  ;;  %v666_v30 = vmul.f32 %v1829_v57, %v591_v59 }
 0x189   :  { %963 = vst [vmem:[%s2140_s3 + $0xe0] sm:$0xff] %v1031_v7  ;;  %v740_v27 = vadd.f32 %v1835_v28, %v665_v50  ;;  %v667_v8 = vmul.f32 %v1831_v16, %v592_v48 }
 0x18a   :  { %v1032_v43 = vpack.c.bf16 %v738_v47, %v737_v24  ;;  %v741_v12 = vadd.f32 %v1833_v56, %v666_v30 }
 0x18b   :  { %v1033_v18 = vpack.c.bf16 %v740_v27, %v739_v26  ;;  %v742_v46 = vadd.f32 %v1835_v28, %v667_v8 }
 0x18c   :  { %964 = vst [vmem:[%s2140_s3 + $0xe8] sm:$0xff] %v1032_v43 }
 0x18d   :  { %965 = vst [vmem:[%s2140_s3 + $0xf0] sm:$0xff] %v1033_v18  ;;  %v1034_v57 = vpack.c.bf16 %v742_v46, %v741_v12 }
 0x18f   :  { %966 = vst [vmem:[%s2140_s3 + $0xf8] sm:$0xff] %v1034_v57 }

// kernel: roberta_forward.15
= control target key start
LH: loop header
LB: loop body
LE: loop exit
PB: predicated region body
PF: predicated region fallthrough
CT: control target
= control target key end

     0   :  { %s3212_s12 = smov 0   ;;  %s3214_s13 = smov 0   ;;  %s3868_s0 = inlined_call_operand.vmem [shape: bf16[256,256], index: 0, kind: input, shape index: {}]   ;;  %s3869_s1 = inlined_call_operand.vmem [shape: bf16[256,768], index: 1, kind: input, shape index: {}]   ;;  %s3870_s2 = inlined_call_operand.vmem [shape: f32[1,768], index: 2, kind: input, shape index: {}]   ;;  %s3871_s3 = inlined_call_operand.vmem [shape: bf16[256,768], index: 3, kind: output, shape index: {}]  }
   0x1   :  { %s3216_s14 = smov 0   ;;  %s3218_s15 = smov 0  }
   0x2   :  { %s3220_s16 = smov 0  }
   0x3 LB: > { %s28_s17 = sadd.s32 1, %s3186_s15  ;;  %s2538_s18 = sadd.s32 4294967295, %s3190_s16   ;;  %s3190_s16 = sphi %s3220_s16, %s13_s16   ;;  %s3186_s15 = sphi %s3218_s15, %s3876_s15   ;;  %s3182_s14 = sphi %s3216_s14, %s3875_s14   ;;  %s3178_s13 = sphi %s3214_s13, %s3874_s13   ;;  %s3174_s12 = sphi %s3212_s12, %s3873_s12  }
   0x4   : > { %p30_p0 = scmp.ge.s32.totalorder %s28_s17, 2  ;;  %p76_p1 = scmp.ne.s32.totalorder %s3178_s13, %s3174_s12 }
   0x5   : > { %p77_p2 = scmp.eq.s32.totalorder %s3190_s16, 0  ;;  %p134_p4 = scmp.eq.s32.totalorder %s2538_s18, 1 }
   0x6   : > { %s3878_s17 = smov (%p30_p0, %s28_s17), 0  ;;  %s69_s20 = sadd.s32 1, %s3178_s13 }
   0x7   : > { %p78_p3 = por %p77_p2, %p76_p1  ;;  %s65_s19 = ssub.s32 %s3186_s15, %s3878_s17 }
   0x8   : > { %p67_p5 = scmp.eq.s32.totalorder %s65_s19, 0  ;;  %p3247_p6 = por %p134_p4, %p76_p1 }
   0x9   : > { %p2542_p7 = scmp.ge.s32.totalorder %s3190_s16, 2 }
   0xa   : > { %s3252_s22 = scalar_select %p67_p5, %s3178_s13, %s69_s20  }
   0xb   : > { %171 = sbr.rel (%p2542_p7) target bundleno = 60 (0x3c), region = 20 }
  0x12   : > { %174 = sbr.rel (!%p78_p3) target bundleno = 60 (0x3c), region = 24  ;;  %s176_s23 = sand.u32 (%p78_p3), 1, %s3178_s13  }
  0x13   : > { %s2820_s24 = smul.u32 (%p78_p3), 12, %s3186_s15 }
  0x14   : > { %s2998_s25 = smul.u32 (%p78_p3), 384, %s176_s23 }
  0x15   : > { %s3260_s28 = scalar_lea.vmem (%p78_p3), %s3869_s1, %s2820_s24 }
  0x16   : > { %v199_v0 = vld [vmem:[%s3260_s28] sm:$0xff] (%p78_p3)  ;;  %v201_v1 = vld [vmem:[%s3260_s28 + $0x18] sm:$0xff] (%p78_p3)  ;;  %v203_v2 = vld [vmem:[%s3260_s28 + $0x30] sm:$0xff] (%p78_p3)  ;;  %s3265_s29 = scalar_lea.vmem (%p78_p3), [#allocation3], %s2998_s25 }
  0x17   : > { %200 = vst [vmem:[%s3265_s29] sm:$0xff] (%p78_p3), %v199_v0  ;;  %202 = vst [vmem:[%s3265_s29 + $0xc] sm:$0xff] (%p78_p3), %v201_v1  ;;  %v205_v3 = vld [vmem:[%s3260_s28 + $0x48] sm:$0xff] (%p78_p3)  ;;  %v207_v4 = vld [vmem:[%s3260_s28 + $0x60] sm:$0xff] (%p78_p3) }
  0x18   : > { %204 = vst [vmem:[%s3265_s29 + $0x18] sm:$0xff] (%p78_p3), %v203_v2  ;;  %v209_v5 = vld [vmem:[%s3260_s28 + $0x78] sm:$0xff] (%p78_p3)  ;;  %206 = vst [vmem:[%s3265_s29 + $0x24] sm:$0xff] (%p78_p3), %v205_v3  ;;  %v211_v6 = vld [vmem:[%s3260_s28 + $0x90] sm:$0xff] (%p78_p3) }
  0x19   : > { %208 = vst [vmem:[%s3265_s29 + $0x30] sm:$0xff] %v207_v4  ;;  %210 = vst [vmem:[%s3265_s29 + $0x3c] sm:$0xff] %v209_v5  ;;  %v213_v7 = vld [vmem:[%s3260_s28 + $0xa8] sm:$0xff]  ;;  %v215_v8 = vld [vmem:[%s3260_s28 + $0xc0] sm:$0xff] }
  0x1a   : > { %212 = vst [vmem:[%s3265_s29 + $0x48] sm:$0xff] %v211_v6  ;;  %214 = vst [vmem:[%s3265_s29 + $0x54] sm:$0xff] %v213_v7  ;;  %v217_v9 = vld [vmem:[%s3260_s28 + $0xd8] sm:$0xff]  ;;  %v219_v10 = vld [vmem:[%s3260_s28 + $0xf0] sm:$0xff] }
  0x1b   : > { %216 = vst [vmem:[%s3265_s29 + $0x60] sm:$0xff] %v215_v8  ;;  %v221_v11 = vld [vmem:[%s3260_s28 + $0x108] sm:$0xff]  ;;  %218 = vst [vmem:[%s3265_s29 + $0x6c] sm:$0xff] %v217_v9  ;;  %v223_v12 = vld [vmem:[%s3260_s28 + $0x120] sm:$0xff] }
  0x1c   : > { %220 = vst [vmem:[%s3265_s29 + $0x78] sm:$0xff] %v219_v10  ;;  %222 = vst [vmem:[%s3265_s29 + $0x84] sm:$0xff] %v221_v11  ;;  %v225_v13 = vld [vmem:[%s3260_s28 + $0x138] sm:$0xff]  ;;  %v227_v14 = vld [vmem:[%s3260_s28 + $0x150] sm:$0xff] }
  0x1d   : > { %224 = vst [vmem:[%s3265_s29 + $0x90] sm:$0xff] %v223_v12  ;;  %226 = vst [vmem:[%s3265_s29 + $0x9c] sm:$0xff] %v225_v13  ;;  %v229_v15 = vld [vmem:[%s3260_s28 + $0x168] sm:$0xff]  ;;  %v231_v16 = vld [vmem:[%s3260_s28 + $0x180] sm:$0xff] }
  0x1e   : > { %228 = vst [vmem:[%s3265_s29 + $0xa8] sm:$0xff] %v227_v14  ;;  %v233_v17 = vld [vmem:[%s3260_s28 + $0x198] sm:$0xff]  ;;  %230 = vst [vmem:[%s3265_s29 + $0xb4] sm:$0xff] %v229_v15  ;;  %v235_v18 = vld [vmem:[%s3260_s28 + $0x1b0] sm:$0xff] }
  0x1f   : > { %232 = vst [vmem:[%s3265_s29 + $0xc0] sm:$0xff] %v231_v16  ;;  %234 = vst [vmem:[%s3265_s29 + $0xcc] sm:$0xff] %v233_v17  ;;  %v237_v19 = vld [vmem:[%s3260_s28 + $0x1c8] sm:$0xff]  ;;  %v239_v20 = vld [vmem:[%s3260_s28 + $0x1e0] sm:$0xff] }
  0x20   : > { %236 = vst [vmem:[%s3265_s29 + $0xd8] sm:$0xff] %v235_v18  ;;  %238 = vst [vmem:[%s3265_s29 + $0xe4] sm:$0xff] %v237_v19  ;;  %v241_v21 = vld [vmem:[%s3260_s28 + $0x1f8] sm:$0xff]  ;;  %v243_v22 = vld [vmem:[%s3260_s28 + $0x210] sm:$0xff] }
  0x21   : > { %240 = vst [vmem:[%s3265_s29 + $0xf0] sm:$0xff] %v239_v20  ;;  %v245_v23 = vld [vmem:[%s3260_s28 + $0x228] sm:$0xff]  ;;  %242 = vst [vmem:[%s3265_s29 + $0xfc] sm:$0xff] %v241_v21  ;;  %v247_v24 = vld [vmem:[%s3260_s28 + $0x240] sm:$0xff] }
  0x22   : > { %244 = vst [vmem:[%s3265_s29 + $0x108] sm:$0xff] %v243_v22  ;;  %246 = vst [vmem:[%s3265_s29 + $0x114] sm:$0xff] %v245_v23  ;;  %v249_v25 = vld [vmem:[%s3260_s28 + $0x258] sm:$0xff]  ;;  %v251_v26 = vld [vmem:[%s3260_s28 + $0x270] sm:$0xff] }
  0x23   : > { %248 = vst [vmem:[%s3265_s29 + $0x120] sm:$0xff] %v247_v24  ;;  %250 = vst [vmem:[%s3265_s29 + $0x12c] sm:$0xff] %v249_v25  ;;  %v253_v27 = vld [vmem:[%s3260_s28 + $0x288] sm:$0xff]  ;;  %v255_v28 = vld [vmem:[%s3260_s28 + $0x2a0] sm:$0xff] }
  0x24   : > { %252 = vst [vmem:[%s3265_s29 + $0x138] sm:$0xff] %v251_v26  ;;  %v257_v29 = vld [vmem:[%s3260_s28 + $0x2b8] sm:$0xff]  ;;  %254 = vst [vmem:[%s3265_s29 + $0x144] sm:$0xff] %v253_v27  ;;  %v259_v30 = vld [vmem:[%s3260_s28 + $0x2d0] sm:$0xff] }
  0x25   : > { %256 = vst [vmem:[%s3265_s29 + $0x150] sm:$0xff] %v255_v28  ;;  %258 = vst [vmem:[%s3265_s29 + $0x15c] sm:$0xff] %v257_v29  ;;  %v261_v31 = vld [vmem:[%s3260_s28 + $0x2e8] sm:$0xff]  ;;  %v2546_v33 = vld [vmem:[%s3260_s28 + $0x20] sm:$0xf] }
  0x26   : > { %v2544_v32 = vld [vmem:[%s3260_s28 + $0x8] sm:$0xf]  ;;  %260 = vst [vmem:[%s3265_s29 + $0x168] sm:$0xff] %v259_v30  ;;  %262 = vst [vmem:[%s3265_s29 + $0x174] sm:$0xff] %v261_v31  ;;  %v2548_v34 = vld [vmem:[%s3260_s28 + $0x38] sm:$0xf] }
  0x27   : > { %2545 = vst [vmem:[%s3265_s29 + $0x8] sm:$0xf] %v2544_v32  ;;  %v2550_v35 = vld [vmem:[%s3260_s28 + $0x50] sm:$0xf]  ;;  %2547 = vst [vmem:[%s3265_s29 + $0x14] sm:$0xf] %v2546_v33 }
  0x28   : > { %2549 = vst [vmem:[%s3265_s29 + $0x20] sm:$0xf] %v2548_v34  ;;  %2551 = vst [vmem:[%s3265_s29 + $0x2c] sm:$0xf] %v2550_v35  ;;  %v2552_v36 = vld [vmem:[%s3260_s28 + $0x68] sm:$0xf] }
  0x29   : > { %v2554_v37 = vld [vmem:[%s3260_s28 + $0x80] sm:$0xf]  ;;  %v2556_v38 = vld [vmem:[%s3260_s28 + $0x98] sm:$0xf]  ;;  %2553 = vst [vmem:[%s3265_s29 + $0x38] sm:$0xf] %v2552_v36 }
  0x2a   : > { %2555 = vst [vmem:[%s3265_s29 + $0x44] sm:$0xf] %v2554_v37  ;;  %2557 = vst [vmem:[%s3265_s29 + $0x50] sm:$0xf] %v2556_v38  ;;  %v2558_v39 = vld [vmem:[%s3260_s28 + $0xb0] sm:$0xf] }
  0x2b   : > { %v2560_v40 = vld [vmem:[%s3260_s28 + $0xc8] sm:$0xf]  ;;  %v2562_v41 = vld [vmem:[%s3260_s28 + $0xe0] sm:$0xf]  ;;  %2559 = vst [vmem:[%s3265_s29 + $0x5c] sm:$0xf] %v2558_v39 }
  0x2c   : > { %2561 = vst [vmem:[%s3265_s29 + $0x68] sm:$0xf] %v2560_v40  ;;  %2563 = vst [vmem:[%s3265_s29 + $0x74] sm:$0xf] %v2562_v41  ;;  %v2564_v42 = vld [vmem:[%s3260_s28 + $0xf8] sm:$0xf] }
  0x2d   : > { %v2566_v43 = vld [vmem:[%s3260_s28 + $0x110] sm:$0xf]  ;;  %v2568_v44 = vld [vmem:[%s3260_s28 + $0x128] sm:$0xf]  ;;  %2565 = vst [vmem:[%s3265_s29 + $0x80] sm:$0xf] %v2564_v42 }
  0x2e   : > { %2567 = vst [vmem:[%s3265_s29 + $0x8c] sm:$0xf] %v2566_v43  ;;  %2569 = vst [vmem:[%s3265_s29 + $0x98] sm:$0xf] %v2568_v44  ;;  %v2570_v45 = vld [vmem:[%s3260_s28 + $0x140] sm:$0xf] }
  0x2f   : > { %v2572_v46 = vld [vmem:[%s3260_s28 + $0x158] sm:$0xf]  ;;  %v2574_v47 = vld [vmem:[%s3260_s28 + $0x170] sm:$0xf]  ;;  %2571 = vst [vmem:[%s3265_s29 + $0xa4] sm:$0xf] %v2570_v45 }
  0x30   : > { %2573 = vst [vmem:[%s3265_s29 + $0xb0] sm:$0xf] %v2572_v46  ;;  %2575 = vst [vmem:[%s3265_s29 + $0xbc] sm:$0xf] %v2574_v47  ;;  %v2576_v48 = vld [vmem:[%s3260_s28 + $0x188] sm:$0xf] }
  0x31   : > { %v2578_v49 = vld [vmem:[%s3260_s28 + $0x1a0] sm:$0xf]  ;;  %v2580_v50 = vld [vmem:[%s3260_s28 + $0x1b8] sm:$0xf]  ;;  %2577 = vst [vmem:[%s3265_s29 + $0xc8] sm:$0xf] %v2576_v48 }
  0x32   : > { %2579 = vst [vmem:[%s3265_s29 + $0xd4] sm:$0xf] %v2578_v49  ;;  %2581 = vst [vmem:[%s3265_s29 + $0xe0] sm:$0xf] %v2580_v50  ;;  %v2582_v51 = vld [vmem:[%s3260_s28 + $0x1d0] sm:$0xf] }
  0x33   : > { %v2584_v52 = vld [vmem:[%s3260_s28 + $0x1e8] sm:$0xf]  ;;  %v2586_v53 = vld [vmem:[%s3260_s28 + $0x200] sm:$0xf]  ;;  %2583 = vst [vmem:[%s3265_s29 + $0xec] sm:$0xf] %v2582_v51 }
  0x34   : > { %2585 = vst [vmem:[%s3265_s29 + $0xf8] sm:$0xf] %v2584_v52  ;;  %2587 = vst [vmem:[%s3265_s29 + $0x104] sm:$0xf] %v2586_v53  ;;  %v2588_v54 = vld [vmem:[%s3260_s28 + $0x218] sm:$0xf] }
  0x35   : > { %v2590_v55 = vld [vmem:[%s3260_s28 + $0x230] sm:$0xf]  ;;  %v2592_v56 = vld [vmem:[%s3260_s28 + $0x248] sm:$0xf]  ;;  %2589 = vst [vmem:[%s3265_s29 + $0x110] sm:$0xf] %v2588_v54 }
  0x36   : > { %2591 = vst [vmem:[%s3265_s29 + $0x11c] sm:$0xf] %v2590_v55  ;;  %2593 = vst [vmem:[%s3265_s29 + $0x128] sm:$0xf] %v2592_v56  ;;  %v2594_v57 = vld [vmem:[%s3260_s28 + $0x260] sm:$0xf] }
  0x37   : > { %v2596_v58 = vld [vmem:[%s3260_s28 + $0x278] sm:$0xf]  ;;  %v2598_v59 = vld [vmem:[%s3260_s28 + $0x290] sm:$0xf]  ;;  %2595 = vst [vmem:[%s3265_s29 + $0x134] sm:$0xf] %v2594_v57 }
  0x38   : > { %2597 = vst [vmem:[%s3265_s29 + $0x140] sm:$0xf] %v2596_v58  ;;  %2599 = vst [vmem:[%s3265_s29 + $0x14c] sm:$0xf] %v2598_v59  ;;  %v2600_v60 = vld [vmem:[%s3260_s28 + $0x2a8] sm:$0xf] }
  0x39   : > { %v2602_v61 = vld [vmem:[%s3260_s28 + $0x2c0] sm:$0xf]  ;;  %v2604_v62 = vld [vmem:[%s3260_s28 + $0x2d8] sm:$0xf]  ;;  %2601 = vst [vmem:[%s3265_s29 + $0x158] sm:$0xf] %v2600_v60 }
  0x3a   : > { %2603 = vst [vmem:[%s3265_s29 + $0x164] sm:$0xf] %v2602_v61  ;;  %2605 = vst [vmem:[%s3265_s29 + $0x170] sm:$0xf] %v2604_v62  ;;  %v2606_v63 = vld [vmem:[%s3260_s28 + $0x2f0] sm:$0xf] }
  0x3b   : > { %2607 = vst [vmem:[%s3265_s29 + $0x17c] sm:$0xf] %v2606_v63 }
  0x3c PF: > { %p2608_p8 = scmp.ge.s32.totalorder %s3190_s16, 1  ;;  %p346_p9 = scmp.lt.s32.totalorder %s3190_s16, 3 }
  0x3e   : > { %p347_p10 = pnand %p2608_p8, %p346_p9 }
  0x3f   : > { %s353_s30 = sand.u32 (!%p347_p10), 1, %s3174_s12   ;;  %v3103_v0 = vld [vmem:[%s3868_s0 + $0x4] ss:$8 sps:$4 sm:$0xff] (!%p347_p10)   ;;  %v3101_v40 = vld [vmem:[%s3868_s0] ss:$8 sps:$4 sm:$0xff] (!%p347_p10)   ;;  %s403_s18 = smul.u32 (!%p347_p10), 3, %s3182_s14 }
  0x40   : > { %350 = sbr.rel (%p347_p10) target bundleno = 481 (0x1e1), region = 54  ;;  %1344 = vmatprep.mubr.bf16.mxu1 (!%p347_p10), %v3103_v0  ;;  %1151 = vmatprep.mubr.bf16.mxu0 (!%p347_p10), %v3103_v0  ;;  %v3107_v41 = vld [vmem:[%s3868_s0 + $0x14] ss:$8 sps:$4 sm:$0xff] (!%p347_p10)   ;;  %v3109_v46 = vld [vmem:[%s3868_s0 + $0x10] ss:$8 sps:$4 sm:$0xff] (!%p347_p10)  }
  0x41   : > { %s3395_s4 = smul.u32 (!%p347_p10), 384, %s353_s30  ;;  %v3110_v47 = vld [vmem:[%s3868_s0 + $0x24] ss:$8 sps:$4 sm:$0xff] (!%p347_p10)   ;;  %v3112_v52 = vld [vmem:[%s3868_s0 + $0x20] ss:$8 sps:$4 sm:$0xff] (!%p347_p10)   ;;  %p404_p11 = scmp.lt.s32.totalorder (!%p347_p10), %s403_s18, 5 }
  0x42   : > { %v3113_v53 = vld [vmem:[%s3868_s0 + $0x34] ss:$8 sps:$4 sm:$0xff] (!%p347_p10)   ;;  %v3115_v55 = vld [vmem:[%s3868_s0 + $0x30] ss:$8 sps:$4 sm:$0xff] (!%p347_p10)   ;;  %v3116_v56 = vld [vmem:[%s3868_s0 + $0x44] ss:$8 sps:$4 sm:$0xff] (!%p347_p10)  }
  0x43   : > { %s3401_s7 = scalar_lea.vmem (!%p347_p10), [#allocation3], %s3395_s4  ;;  %v3118_v57 = vld [vmem:[%s3868_s0 + $0x40] ss:$8 sps:$4 sm:$0xff] (!%p347_p10)   ;;  %v3119_v58 = vld [vmem:[%s3868_s0 + $0x54] ss:$8 sps:$4 sm:$0xff] (!%p347_p10)   ;;  %s3553_s24 = scalar_lea.vmem (!%p347_p10), [#allocation4], %s3395_s4 }
  0x44   : > { %v3040_v1 = vld [vmem:[%s3401_s7 + $0x4] ss:$12 sps:$4 sm:$0xff] (!%p347_p10)   ;;  %v3042_v2 = vld [vmem:[%s3401_s7] ss:$12 sps:$4 sm:$0xff] (!%p347_p10)   ;;  %v3043_v3 = vld [vmem:[%s3401_s7 + $0x1c] ss:$12 sps:$4 sm:$0xff] (!%p347_p10)  }
  0x45   : > { %1119 = vmatprep.subr.bf16.mxu0 (!%p347_p10), %v3040_v1  ;;  %v3045_v4 = vld [vmem:[%s3401_s7 + $0x18] ss:$12 sps:$4 sm:$0xff] (!%p347_p10)   ;;  %v3046_v5 = vld [vmem:[%s3401_s7 + $0x34] ss:$12 sps:$4 sm:$0xff] (!%p347_p10)   ;;  %v3048_v6 = vld [vmem:[%s3401_s7 + $0x30] ss:$12 sps:$4 sm:$0xff] (!%p347_p10)  }
  0x46   : > { %1120 = vmatpush1.bf16.msra.mxu0 (!%p347_p10), %v3042_v2  ;;  %v3049_v7 = vld [vmem:[%s3401_s7 + $0x4c] ss:$12 sps:$4 sm:$0xff] (!%p347_p10)   ;;  %v3061_v8 = vld [vmem:[%s3401_s7 + $0xc8] ss:$12 sps:$4 sm:$0xff] (!%p347_p10)   ;;  %v3052_v10 = vld [vmem:[%s3401_s7 + $0x64] ss:$12 sps:$4 sm:$0xff] (!%p347_p10)  }
  0x47   : > { %1121 = vmatprep.subr.bf16.mxu0 %v3043_v3  ;;  %v3051_v9 = vld [vmem:[%s3401_s7 + $0x48] ss:$12 sps:$4 sm:$0xff]   ;;  %2886 = vmatprep.subr.bf16.mxu1 %v3061_v8  ;;  %v3066_v12 = vld [vmem:[%s3401_s7 + $0xe0] ss:$12 sps:$4 sm:$0xff]   ;;  %v3071_v16 = vld [vmem:[%s3401_s7 + $0xf8] ss:$12 sps:$4 sm:$0xff]  }
  0x48   : > { %v3064_v11 = vld [vmem:[%s3401_s7 + $0x8] ss:$12 sps:$4 sm:$0xff]   ;;  %v3054_v13 = vld [vmem:[%s3401_s7 + $0x60] ss:$12 sps:$4 sm:$0xff]   ;;  %v3057_v17 = vld [vmem:[%s3401_s7 + $0x78] ss:$12 sps:$4 sm:$0xff]  }
  0x49   : > { %2887 = vmatpush3.bf16.msra.mxu1 %v3064_v11  ;;  %v3055_v14 = vld [vmem:[%s3401_s7 + $0x7c] ss:$12 sps:$4 sm:$0xff]   ;;  %v3069_v15 = vld [vmem:[%s3401_s7 + $0x20] ss:$12 sps:$4 sm:$0xff]   ;;  %v3074_v18 = vld [vmem:[%s3401_s7 + $0x38] ss:$12 sps:$4 sm:$0xff]  }
  0x4a   : > { %1122 = vmatpush1.bf16.msra.mxu0 %v3045_v4  ;;  %2888 = vmatprep.subr.bf16.mxu1 %v3066_v12  ;;  %v3058_v19 = vld [vmem:[%s3401_s7 + $0x94] ss:$12 sps:$4 sm:$0xff]   ;;  %v3076_v20 = vld [vmem:[%s3401_s7 + $0x110] ss:$12 sps:$4 sm:$0xff]   ;;  %v3062_v24 = vld [vmem:[%s3401_s7 + $0xac] ss:$12 sps:$4 sm:$0xff]  }
  0x4b   : > { %1123 = vmatprep.subr.bf16.mxu0 %v3046_v5  ;;  %v3060_v21 = vld [vmem:[%s3401_s7 + $0x90] ss:$12 sps:$4 sm:$0xff]   ;;  %v3081_v23 = vld [vmem:[%s3401_s7 + $0x128] ss:$12 sps:$4 sm:$0xff]   ;;  %v3086_v27 = vld [vmem:[%s3401_s7 + $0x140] ss:$12 sps:$4 sm:$0xff]  }
  0x4c   : > { %v3079_v22 = vld [vmem:[%s3401_s7 + $0x50] ss:$12 sps:$4 sm:$0xff]   ;;  %v3065_v25 = vld [vmem:[%s3401_s7 + $0xa8] ss:$12 sps:$4 sm:$0xff]   ;;  %v3070_v29 = vld [vmem:[%s3401_s7 + $0xc0] ss:$12 sps:$4 sm:$0xff]  }
  0x4d   : > { %2889 = vmatpush3.bf16.msra.mxu1 %v3069_v15  ;;  %v3084_v26 = vld [vmem:[%s3401_s7 + $0x68] ss:$12 sps:$4 sm:$0xff]   ;;  %v3067_v28 = vld [vmem:[%s3401_s7 + $0xc4] ss:$12 sps:$4 sm:$0xff]   ;;  %v3089_v30 = vld [vmem:[%s3401_s7 + $0x80] ss:$12 sps:$4 sm:$0xff]  }
  0x4e   : > { %1124 = vmatpush1.bf16.msra.mxu0 %v3048_v6  ;;  %2890 = vmatprep.subr.bf16.mxu1 %v3071_v16  ;;  %v3091_v31 = vld [vmem:[%s3401_s7 + $0x158] ss:$12 sps:$4 sm:$0xff]   ;;  %v3072_v32 = vld [vmem:[%s3401_s7 + $0xdc] ss:$12 sps:$4 sm:$0xff]   ;;  %v3077_v36 = vld [vmem:[%s3401_s7 + $0xf4] ss:$12 sps:$4 sm:$0xff]   ;;  %v1766_v16 = vlaneseq }
  0x4f   : > { %1125 = vmatprep.subr.bf16.mxu0 %v3049_v7  ;;  %v3094_v33 = vld [vmem:[%s3401_s7 + $0x98] ss:$12 sps:$4 sm:$0xff]   ;;  %v3096_v35 = vld [vmem:[%s3401_s7 + $0x170] ss:$12 sps:$4 sm:$0xff]   ;;  %v3085_v42 = vld [vmem:[%s3401_s7 + $0x108] ss:$12 sps:$4 sm:$0xff]  }
  0x50   : > { %v3075_v34 = vld [vmem:[%s3401_s7 + $0xd8] ss:$12 sps:$4 sm:$0xff]   ;;  %v3099_v37 = vld [vmem:[%s3401_s7 + $0xb0] ss:$12 sps:$4 sm:$0xff]   ;;  %v3090_v44 = vld [vmem:[%s3401_s7 + $0x120] ss:$12 sps:$4 sm:$0xff]  }
  0x51   : > { %2891 = vmatpush3.bf16.msra.mxu1 %v3074_v18  ;;  %v3080_v38 = vld [vmem:[%s3401_s7 + $0xf0] ss:$12 sps:$4 sm:$0xff]   ;;  %v3082_v39 = vld [vmem:[%s3401_s7 + $0x10c] ss:$12 sps:$4 sm:$0xff]   ;;  %v3097_v49 = vld [vmem:[%s3401_s7 + $0x154] ss:$12 sps:$4 sm:$0xff]  }
  0x52   : > { %1126 = vmatpush1.bf16.msra.mxu0 %v3051_v9  ;;  %2892 = vmatprep.subr.bf16.mxu1 %v3076_v20  ;;  %v3087_v43 = vld [vmem:[%s3401_s7 + $0x124] ss:$12 sps:$4 sm:$0xff]   ;;  %v3092_v45 = vld [vmem:[%s3401_s7 + $0x13c] ss:$12 sps:$4 sm:$0xff]   ;;  %v3104_v51 = vld [vmem:[%s3401_s7 + $0x16c] ss:$12 sps:$4 sm:$0xff]  }
  0x53   : > { %1127 = vmatprep.subr.bf16.mxu0 %v3052_v10  ;;  %v3095_v48 = vld [vmem:[%s3401_s7 + $0x138] ss:$12 sps:$4 sm:$0xff]   ;;  %v3100_v50 = vld [vmem:[%s3401_s7 + $0x150] ss:$12 sps:$4 sm:$0xff]   ;;  %v3106_v54 = vld [vmem:[%s3401_s7 + $0x168] ss:$12 sps:$4 sm:$0xff]  }
  0x54   : > { %v3121_v59 = vld [vmem:[%s3868_s0 + $0x50] ss:$8 sps:$4 sm:$0xff]   ;;  %v3122_v60 = vld [vmem:[%s3868_s0 + $0x64] ss:$8 sps:$4 sm:$0xff]   ;;  %v3124_v61 = vld [vmem:[%s3868_s0 + $0x60] ss:$8 sps:$4 sm:$0xff]  }
  0x55   : > { %2893 = vmatpush3.bf16.msra.mxu1 %v3079_v22  ;;  %v3125_v62 = vld [vmem:[%s3868_s0 + $0x74] ss:$8 sps:$4 sm:$0xff]   ;;  %v3127_v63 = vld [vmem:[%s3868_s0 + $0x70] ss:$8 sps:$4 sm:$0xff]   ;;  %v3128_v0 = vld [vmem:[%s3868_s0 + $0x84] ss:$8 sps:$4 sm:$0xff]  }
  0x56   : > { %1128 = vmatpush1.bf16.msra.mxu0 %v3054_v13  ;;  %2894 = vmatprep.subr.bf16.mxu1 %v3081_v23  ;;  %v3130_v1 = vld [vmem:[%s3868_s0 + $0x80] ss:$8 sps:$4 sm:$0xff]   ;;  %v3131_v2 = vld [vmem:[%s3868_s0 + $0x94] ss:$8 sps:$4 sm:$0xff]   ;;  %v3133_v3 = vld [vmem:[%s3868_s0 + $0x90] ss:$8 sps:$4 sm:$0xff]  }
  0x57   : > { %1129 = vmatprep.subr.bf16.mxu0 %v3055_v14  ;;  %v3134_v4 = vld [vmem:[%s3868_s0 + $0xa4] ss:$8 sps:$4 sm:$0xff]   ;;  %v3136_v5 = vld [vmem:[%s3868_s0 + $0xa0] ss:$8 sps:$4 sm:$0xff]   ;;  %v3137_v6 = vld [vmem:[%s3868_s0 + $0xb4] ss:$8 sps:$4 sm:$0xff]  }
  0x58   : > { %v3139_v7 = vld [vmem:[%s3868_s0 + $0xb0] ss:$8 sps:$4 sm:$0xff]   ;;  %v3140_v8 = vld [vmem:[%s3868_s0 + $0xc4] ss:$8 sps:$4 sm:$0xff]   ;;  %v3142_v9 = vld [vmem:[%s3868_s0 + $0xc0] ss:$8 sps:$4 sm:$0xff]  }
  0x59   : > { %2895 = vmatpush3.bf16.msra.mxu1 %v3084_v26  ;;  %v3143_v10 = vld [vmem:[%s3868_s0 + $0xd4] ss:$8 sps:$4 sm:$0xff]   ;;  %v3145_v11 = vld [vmem:[%s3868_s0 + $0xd0] ss:$8 sps:$4 sm:$0xff]   ;;  %v3146_v12 = vld [vmem:[%s3868_s0 + $0xe4] ss:$8 sps:$4 sm:$0xff]  }
  0x5a   : > { %1130 = vmatpush1.bf16.msra.mxu0 %v3057_v17  ;;  %2896 = vmatprep.subr.bf16.mxu1 %v3086_v27  ;;  %v3148_v13 = vld [vmem:[%s3868_s0 + $0xe0] ss:$8 sps:$4 sm:$0xff]   ;;  %v3149_v14 = vld [vmem:[%s3868_s0 + $0xf4] ss:$8 sps:$4 sm:$0xff]   ;;  %v3151_v15 = vld [vmem:[%s3868_s0 + $0xf0] ss:$8 sps:$4 sm:$0xff]  }
  0x5b   : > { %1131 = vmatprep.subr.bf16.mxu0 %v3058_v19  ;;  %s3880_s18 = smov (!%p404_p11, %s403_s18), 5  ;;  %v1767_v17 = vshrl.u32 %v1766_v16, 7  ;;  %s2885_s4 = smul.u32 (%p3247_p6), 12, %s3182_s14 }
  0x5c   : > { %s406_s23 = scalar_lea.vmem %s3870_s2, %s3880_s18 }
  0x5d   : > { %2897 = vmatpush3.bf16.msra.mxu1 %v3089_v30  ;;  %v1776_v18 = vsub.s32 2, %v1767_v17  ;;  %v1764_v19 = vld [vmem:[%s406_s23] sm:$0x7]  ;;  %s3729_s26 = scalar_lea.vmem (%p3247_p6), %s3871_s3, %s2885_s4 }
  0x5e   : > { %1132 = vmatpush1.bf16.msra.mxu0 %v3060_v21  ;;  %2898 = vmatprep.subr.bf16.mxu1 %v3091_v31 }
  0x5f   : > { %1133 = vmatprep.subr.bf16.mxu0 %v3062_v24  ;;  %v3548_v21 = vrot.slane %v1764_v19, %v1776_v18 }
  0x61   : > { %2899 = vmatpush3.bf16.msra.mxu1 %v3094_v33 }
  0x62   : > { %1134 = vmatpush1.bf16.msra.mxu0 %v3065_v25  ;;  %2900 = vmatprep.subr.bf16.mxu1 %v3096_v35 }
  0x63   : > { %1135 = vmatprep.subr.bf16.mxu0 %v3067_v28 }
  0x65   : > { %2901 = vmatpush3.bf16.msra.mxu1 %v3099_v37 }
  0x66   : > { %1136 = vmatpush1.bf16.msra.mxu0 %v3070_v29 }
  0x67   : > { %1137 = vmatprep.subr.bf16.mxu0 %v3072_v32 }
  0x68   : > { %1345 = vmatmul.mubr.bf16.vlgmr.msra.gmra.mrb[0].mxu1 %v3101_v40 }
  0x69   : > { %1352 = vmatprep.mubr.bf16.mxu1 %v3107_v41 }
  0x6a   : > { %1138 = vmatpush1.bf16.msra.mxu0 %v3075_v34 }
  0x6b   : > { %1139 = vmatprep.subr.bf16.mxu0 %v3077_v36 }
  0x6e   : > { %1140 = vmatpush1.bf16.msra.mxu0 %v3080_v38  ;;  %v1768_v38 = vsub.s32 0, %v1767_v17 }
  0x6f   : > { %1141 = vmatprep.subr.bf16.mxu0 %v3082_v39 }
  0x70   : > { %1353 = vmatmul.mubr.bf16.gmra.mrb[4].mxu1 %v3109_v46 }
  0x71   : > { %1360 = vmatprep.mubr.bf16.mxu1 %v3110_v47 }
  0x72   : > { %1142 = vmatpush1.bf16.msra.mxu0 %v3085_v42 }
  0x73   : > { %1143 = vmatprep.subr.bf16.mxu0 %v3087_v43 }
  0x76   : > { %1144 = vmatpush1.bf16.msra.mxu0 %v3090_v44 }
  0x77   : > { %1145 = vmatprep.subr.bf16.mxu0 %v3092_v45  ;;  %v3560_v45 = vrot.slane %v1764_v19, %v1768_v38 }
  0x78   : > { %1361 = vmatmul.mubr.bf16.gmra.mrb[8].mxu1 %v3112_v52 }
  0x79   : > { %1368 = vmatprep.mubr.bf16.mxu1 %v3113_v53 }
  0x7a   : > { %1146 = vmatpush1.bf16.msra.mxu0 %v3095_v48 }
  0x7b   : > { %1147 = vmatprep.subr.bf16.mxu0 %v3097_v49 }
  0x7e   : > { %1148 = vmatpush1.bf16.msra.mxu0 %v3100_v50 }
  0x7f   : > { %1149 = vmatprep.subr.bf16.mxu0 %v3104_v51 }
  0x80   : > { %1369 = vmatmul.mubr.bf16.gmra.mrb[12].mxu1 %v3115_v55 }
  0x81   : > { %1376 = vmatprep.mubr.bf16.mxu1 %v3116_v56 }
  0x82   : > { %1150 = vmatpush1.bf16.msra.mxu0 %v3106_v54 }
  0x85   : > { %1152 = vmatmul.mubr.bf16.vlgmr.msra.gmra.mrb[0].mxu0 %v3101_v40 }
  0x86   : > { %1161 = vmatprep.mubr.bf16.mxu0 %v3107_v41  ;;  %v1772_v41 = vsub.s32 1, %v1767_v17 }
  0x88   : > { %1377 = vmatmul.mubr.bf16.gmra.mrb[16].mxu1 %v3118_v57  ;;  %v3563_v48 = vrot.slane %v1764_v19, %v1772_v41 }
  0x89   : > { %1384 = vmatprep.mubr.bf16.mxu1 %v3119_v58 }
  0x8d   : > { %1162 = vmatmul.mubr.bf16.gmra.mrb[4].mxu0 %v3109_v46 }
  0x8e   : > { %1171 = vmatprep.mubr.bf16.mxu0 %v3110_v47 }
  0x90   : > { %1385 = vmatmul.mubr.bf16.gmra.mrb[20].mxu1 %v3121_v59 }
  0x91   : > { %1392 = vmatprep.mubr.bf16.mxu1 %v3122_v60 }
  0x95   : > { %1172 = vmatmul.mubr.bf16.gmra.mrb[8].mxu0 %v3112_v52 }
  0x96   : > { %1181 = vmatprep.mubr.bf16.mxu0 %v3113_v53 }
  0x98   : > { %1393 = vmatmul.mubr.bf16.gmra.mrb[24].mxu1 %v3124_v61 }
  0x99   : > { %1400 = vmatprep.mubr.bf16.mxu1 %v3125_v62 }
  0x9d   : > { %1182 = vmatmul.mubr.bf16.gmra.mrb[12].mxu0 %v3115_v55 }
  0x9e   : > { %1191 = vmatprep.mubr.bf16.mxu0 %v3116_v56 }
  0xa0   : > { %1401 = vmatmul.mubr.bf16.gmra.mrb[28].mxu1 %v3127_v63 }
  0xa1   : > { %1408 = vmatprep.mubr.bf16.mxu1 %v3128_v0 }
  0xa5   : > { %1192 = vmatmul.mubr.bf16.gmra.mrb[16].mxu0 %v3118_v57 }
  0xa6   : > { %1201 = vmatprep.mubr.bf16.mxu0 %v3119_v58 }
  0xa8   : > { %1409 = vmatmul.mubr.bf16.gmra.mrb[32].mxu1 %v3130_v1 }
  0xa9   : > { %1416 = vmatprep.mubr.bf16.mxu1 %v3131_v2 }
  0xad   : > { %1202 = vmatmul.mubr.bf16.gmra.mrb[20].mxu0 %v3121_v59 }
  0xae   : > { %1211 = vmatprep.mubr.bf16.mxu0 %v3122_v60 }
  0xb0   : > { %1417 = vmatmul.mubr.bf16.gmra.mrb[36].mxu1 %v3133_v3 }
  0xb1   : > { %1424 = vmatprep.mubr.bf16.mxu1 %v3134_v4 }
  0xb5   : > { %1212 = vmatmul.mubr.bf16.gmra.mrb[24].mxu0 %v3124_v61 }
  0xb6   : > { %1221 = vmatprep.mubr.bf16.mxu0 %v3125_v62 }
  0xb8   : > { %1425 = vmatmul.mubr.bf16.gmra.mrb[40].mxu1 %v3136_v5 }
  0xb9   : > { %1432 = vmatprep.mubr.bf16.mxu1 %v3137_v6 }
  0xbd   : > { %1222 = vmatmul.mubr.bf16.gmra.mrb[28].mxu0 %v3127_v63 }
  0xbe   : > { %1231 = vmatprep.mubr.bf16.mxu0 %v3128_v0 }
  0xc0   : > { %1433 = vmatmul.mubr.bf16.gmra.mrb[44].mxu1 %v3139_v7 }
  0xc1   : > { %1440 = vmatprep.mubr.bf16.mxu1 %v3140_v8 }
  0xc5   : > { %1232 = vmatmul.mubr.bf16.gmra.mrb[32].mxu0 %v3130_v1 }
  0xc6   : > { %1241 = vmatprep.mubr.bf16.mxu0 %v3131_v2 }
  0xc8   : > { %1441 = vmatmul.mubr.bf16.gmra.mrb[48].mxu1 %v3142_v9 }
  0xc9   : > { %1448 = vmatprep.mubr.bf16.mxu1 %v3143_v10 }
  0xcd   : > { %1242 = vmatmul.mubr.bf16.gmra.mrb[36].mxu0 %v3133_v3 }
  0xce   : > { %1251 = vmatprep.mubr.bf16.mxu0 %v3134_v4 }
  0xd0   : > { %1449 = vmatmul.mubr.bf16.gmra.mrb[52].mxu1 %v3145_v11 }
  0xd1   : > { %1456 = vmatprep.mubr.bf16.mxu1 %v3146_v12 }
  0xd5   : > { %1252 = vmatmul.mubr.bf16.gmra.mrb[40].mxu0 %v3136_v5 }
  0xd6   : > { %1261 = vmatprep.mubr.bf16.mxu0 %v3137_v6 }
  0xd8   : > { %1457 = vmatmul.mubr.bf16.gmra.mrb[56].mxu1 %v3148_v13 }
  0xd9   : > { %1464 = vmatprep.mubr.bf16.mxu1 %v3149_v14 }
  0xdd   : > { %1262 = vmatmul.mubr.bf16.gmra.mrb[44].mxu0 %v3139_v7 }
  0xde   : > { %1271 = vmatprep.mubr.bf16.mxu0 %v3140_v8 }
  0xe0   : > { %1465 = vmatmul.mubr.bf16.gmra.mrb[60].mxu1 %v3151_v15 }
  0xe5   : > { %1272 = vmatmul.mubr.bf16.gmra.mrb[48].mxu0 %v3142_v9 }
  0xe6   : > { %1281 = vmatprep.mubr.bf16.mxu0 %v3143_v10 }
  0xed   : > { %1282 = vmatmul.mubr.bf16.gmra.mrb[52].mxu0 %v3145_v11 }
  0xee   : > { %1291 = vmatprep.mubr.bf16.mxu0 %v3146_v12 }
  0xf5   : > { %1292 = vmatmul.mubr.bf16.gmra.mrb[56].mxu0 %v3148_v13 }
  0xf6   : > { %1301 = vmatprep.mubr.bf16.mxu0 %v3149_v14 }
  0xfd   : > { %1302 = vmatmul.mubr.bf16.gmra.mrb[60].mxu0 %v3151_v15 }
 0x13b   : > { %v2902_v20 = vpop.f32.mrb[0].mxu1 }
 0x13c   : > { %v2903_v22 = vpop.f32.mrb[1].mxu1 }
 0x13d   : > { %v2904_v23 = vadd.f32 %v2903_v22, %v2902_v20  ;;  %v2905_v24 = vpop.f32.mrb[2].mxu1 }
 0x13e   : > { %v2906_v25 = vpop.f32.mrb[3].mxu1 }
 0x13f   : > { %v1783_v26 = vadd.f32 %v2904_v23, %v3548_v21  ;;  %v2907_v27 = vadd.f32 %v2906_v25, %v2905_v24 }
 0x141   : > { %v2822_v28 = vpack.c.bf16 %v1783_v26, %v1783_v26  ;;  %v1786_v29 = vadd.f32 %v2907_v27, %v3548_v21 }
 0x143   : > { %2198 = vst [vmem:[%s3553_s24 + $0x8] sm:$0xf] %v2822_v28  ;;  %v2824_v30 = vpack.c.bf16 %v1786_v29, %v1786_v29  ;;  %v2908_v31 = vpop.f32.mrb[4].mxu1 }
 0x144   : > { %v2909_v32 = vpop.f32.mrb[5].mxu1 }
 0x145   : > { %2200 = vst [vmem:[%s3553_s24 + $0x14] sm:$0xf] %v2824_v30  ;;  %v2910_v33 = vadd.f32 %v2909_v32, %v2908_v31  ;;  %v2911_v34 = vpop.f32.mrb[6].mxu1 }
 0x146   : > { %v2912_v35 = vpop.f32.mrb[7].mxu1 }
 0x147   : > { %v1789_v36 = vadd.f32 %v2910_v33, %v3548_v21  ;;  %v2913_v37 = vadd.f32 %v2912_v35, %v2911_v34 }
 0x149   : > { %v2826_v39 = vpack.c.bf16 %v1789_v36, %v1789_v36  ;;  %v1792_v40 = vadd.f32 %v2913_v37, %v3548_v21 }
 0x14b   : > { %2202 = vst [vmem:[%s3553_s24 + $0x20] sm:$0xf] %v2826_v39  ;;  %v2828_v42 = vpack.c.bf16 %v1792_v40, %v1792_v40  ;;  %v2914_v43 = vpop.f32.mrb[8].mxu1 }
 0x14c   : > { %v2915_v44 = vpop.f32.mrb[9].mxu1 }
 0x14d   : > { %2204 = vst [vmem:[%s3553_s24 + $0x2c] sm:$0xf] %v2828_v42  ;;  %v2916_v46 = vadd.f32 %v2915_v44, %v2914_v43  ;;  %v2917_v47 = vpop.f32.mrb[10].mxu1 }
 0x14e   : > { %v2918_v49 = vpop.f32.mrb[11].mxu1 }
 0x14f   : > { %v1795_v50 = vadd.f32 %v2916_v46, %v3548_v21  ;;  %v2919_v51 = vadd.f32 %v2918_v49, %v2917_v47 }
 0x151   : > { %v2830_v55 = vpack.c.bf16 %v1795_v50, %v1795_v50  ;;  %v1798_v56 = vadd.f32 %v2919_v51, %v3548_v21 }
 0x153   : > { %2206 = vst [vmem:[%s3553_s24 + $0x38] sm:$0xf] %v2830_v55  ;;  %v2832_v61 = vpack.c.bf16 %v1798_v56, %v1798_v56  ;;  %v2920_v62 = vpop.f32.mrb[12].mxu1 }
 0x154   : > { %v2921_v1 = vpop.f32.mrb[13].mxu1 }
 0x155   : > { %2208 = vst [vmem:[%s3553_s24 + $0x44] sm:$0xf] %v2832_v61  ;;  %v2922_v2 = vadd.f32 %v2921_v1, %v2920_v62  ;;  %v2923_v3 = vpop.f32.mrb[14].mxu1 }
 0x156   : > { %v2924_v5 = vpop.f32.mrb[15].mxu1 }
 0x157   : > { %v1801_v6 = vadd.f32 %v2922_v2, %v3548_v21  ;;  %v2925_v7 = vadd.f32 %v2924_v5, %v2923_v3 }
 0x158   : > { %v1153_v52 = vpop.f32.mrb[0].mxu0 }
 0x159   : > { %v1781_v53 = vadd.f32 %v3560_v45, %v1153_v52  ;;  %v1155_v54 = vpop.f32.mrb[1].mxu0  ;;  %v2834_v11 = vpack.c.bf16 %v1801_v6, %v1801_v6  ;;  %v1804_v12 = vadd.f32 %v2925_v7, %v3548_v21 }
 0x15a   : > { %v1782_v57 = vadd.f32 %v3563_v48, %v1155_v54  ;;  %v1157_v58 = vpop.f32.mrb[2].mxu0 }
 0x15b   : > { %v1784_v59 = vadd.f32 %v3560_v45, %v1157_v58  ;;  %v1159_v60 = vpop.f32.mrb[3].mxu0  ;;  %2210 = vst [vmem:[%s3553_s24 + $0x50] sm:$0xf] %v2834_v11  ;;  %v2836_v17 = vpack.c.bf16 %v1804_v12, %v1804_v12  ;;  %v2926_v18 = vpop.f32.mrb[16].mxu1 }
 0x15c   : > { %v2821_v63 = vpack.c.bf16 %v1782_v57, %v1781_v53  ;;  %v1785_v0 = vadd.f32 %v3563_v48, %v1159_v60  ;;  %v2927_v22 = vpop.f32.mrb[17].mxu1 }
 0x15d   : > { %2212 = vst [vmem:[%s3553_s24 + $0x5c] sm:$0xf] %v2836_v17  ;;  %v2928_v23 = vadd.f32 %v2927_v22, %v2926_v18  ;;  %v2929_v24 = vpop.f32.mrb[18].mxu1 }
 0x15e   : > { %2197 = vst [vmem:[%s3553_s24] sm:$0xff] %v2821_v63  ;;  %v2823_v4 = vpack.c.bf16 %v1785_v0, %v1784_v59  ;;  %v2930_v26 = vpop.f32.mrb[19].mxu1 }
 0x15f   : > { %v1807_v27 = vadd.f32 %v2928_v23, %v3548_v21  ;;  %v2931_v28 = vadd.f32 %v2930_v26, %v2929_v24 }
 0x160   : > { %2199 = vst [vmem:[%s3553_s24 + $0xc] sm:$0xff] %v2823_v4  ;;  %v1163_v8 = vpop.f32.mrb[4].mxu0 }
 0x161   : > { %v1787_v9 = vadd.f32 %v3560_v45, %v1163_v8  ;;  %v1165_v10 = vpop.f32.mrb[5].mxu0  ;;  %v2838_v32 = vpack.c.bf16 %v1807_v27, %v1807_v27  ;;  %v1810_v33 = vadd.f32 %v2931_v28, %v3548_v21 }
 0x162   : > { %v1788_v13 = vadd.f32 %v3563_v48, %v1165_v10  ;;  %v1167_v14 = vpop.f32.mrb[6].mxu0 }
 0x163   : > { %v1790_v15 = vadd.f32 %v3560_v45, %v1167_v14  ;;  %v1169_v16 = vpop.f32.mrb[7].mxu0  ;;  %2214 = vst [vmem:[%s3553_s24 + $0x68] sm:$0xf] %v2838_v32  ;;  %v2840_v38 = vpack.c.bf16 %v1810_v33, %v1810_v33  ;;  %v2932_v39 = vpop.f32.mrb[20].mxu1 }
 0x164   : > { %v2825_v19 = vpack.c.bf16 %v1788_v13, %v1787_v9  ;;  %v1791_v20 = vadd.f32 %v3563_v48, %v1169_v16  ;;  %v2933_v42 = vpop.f32.mrb[21].mxu1 }
 0x165   : > { %2216 = vst [vmem:[%s3553_s24 + $0x74] sm:$0xf] %v2840_v38  ;;  %v2934_v43 = vadd.f32 %v2933_v42, %v2932_v39  ;;  %v2935_v44 = vpop.f32.mrb[22].mxu1 }
 0x166   : > { %2201 = vst [vmem:[%s3553_s24 + $0x18] sm:$0xff] %v2825_v19  ;;  %v2827_v25 = vpack.c.bf16 %v1791_v20, %v1790_v15  ;;  %v2936_v47 = vpop.f32.mrb[23].mxu1 }
 0x167   : > { %v1813_v49 = vadd.f32 %v2934_v43, %v3548_v21  ;;  %v2937_v50 = vadd.f32 %v2936_v47, %v2935_v44 }
 0x168   : > { %2203 = vst [vmem:[%s3553_s24 + $0x24] sm:$0xff] %v2827_v25  ;;  %v1173_v29 = vpop.f32.mrb[8].mxu0 }
 0x169   : > { %v1793_v30 = vadd.f32 %v3560_v45, %v1173_v29  ;;  %v1175_v31 = vpop.f32.mrb[9].mxu0  ;;  %v2842_v54 = vpack.c.bf16 %v1813_v49, %v1813_v49  ;;  %v1816_v55 = vadd.f32 %v2937_v50, %v3548_v21 }
 0x16a   : > { %v1794_v34 = vadd.f32 %v3563_v48, %v1175_v31  ;;  %v1177_v35 = vpop.f32.mrb[10].mxu0 }
 0x16b   : > { %v1796_v36 = vadd.f32 %v3560_v45, %v1177_v35  ;;  %v1179_v37 = vpop.f32.mrb[11].mxu0  ;;  %2218 = vst [vmem:[%s3553_s24 + $0x80] sm:$0xf] %v2842_v54  ;;  %v2844_v60 = vpack.c.bf16 %v1816_v55, %v1816_v55  ;;  %v2938_v61 = vpop.f32.mrb[24].mxu1 }
 0x16c   : > { %v2829_v40 = vpack.c.bf16 %v1794_v34, %v1793_v30  ;;  %v1797_v41 = vadd.f32 %v3563_v48, %v1179_v37  ;;  %v2939_v0 = vpop.f32.mrb[25].mxu1 }
 0x16d   : > { %2220 = vst [vmem:[%s3553_s24 + $0x8c] sm:$0xf] %v2844_v60  ;;  %v2940_v1 = vadd.f32 %v2939_v0, %v2938_v61  ;;  %v2941_v2 = vpop.f32.mrb[26].mxu1 }
 0x16e   : > { %2205 = vst [vmem:[%s3553_s24 + $0x30] sm:$0xff] %v2829_v40  ;;  %v2831_v46 = vpack.c.bf16 %v1797_v41, %v1796_v36  ;;  %v2942_v4 = vpop.f32.mrb[27].mxu1 }
 0x16f   : > { %v1819_v5 = vadd.f32 %v2940_v1, %v3548_v21  ;;  %v2943_v6 = vadd.f32 %v2942_v4, %v2941_v2 }
 0x170   : > { %2207 = vst [vmem:[%s3553_s24 + $0x3c] sm:$0xff] %v2831_v46  ;;  %v1183_v51 = vpop.f32.mrb[12].mxu0 }
 0x171   : > { %v1799_v52 = vadd.f32 %v3560_v45, %v1183_v51  ;;  %v1185_v53 = vpop.f32.mrb[13].mxu0  ;;  %v2846_v10 = vpack.c.bf16 %v1819_v5, %v1819_v5  ;;  %v1822_v11 = vadd.f32 %v2943_v6, %v3548_v21 }
 0x172   : > { %v1800_v56 = vadd.f32 %v3563_v48, %v1185_v53  ;;  %v1187_v57 = vpop.f32.mrb[14].mxu0 }
 0x173   : > { %v1802_v58 = vadd.f32 %v3560_v45, %v1187_v57  ;;  %v1189_v59 = vpop.f32.mrb[15].mxu0  ;;  %2222 = vst [vmem:[%s3553_s24 + $0x98] sm:$0xf] %v2846_v10  ;;  %v2848_v16 = vpack.c.bf16 %v1822_v11, %v1822_v11  ;;  %v2944_v17 = vpop.f32.mrb[28].mxu1 }
 0x174   : > { %v2833_v62 = vpack.c.bf16 %v1800_v56, %v1799_v52  ;;  %v1803_v63 = vadd.f32 %v3563_v48, %v1189_v59  ;;  %v2945_v20 = vpop.f32.mrb[29].mxu1 }
 0x175   : > { %2224 = vst [vmem:[%s3553_s24 + $0xa4] sm:$0xf] %v2848_v16  ;;  %v2946_v22 = vadd.f32 %v2945_v20, %v2944_v17  ;;  %v2947_v23 = vpop.f32.mrb[30].mxu1 }
 0x176   : > { %2209 = vst [vmem:[%s3553_s24 + $0x48] sm:$0xff] %v2833_v62  ;;  %v2835_v3 = vpack.c.bf16 %v1803_v63, %v1802_v58  ;;  %v2948_v25 = vpop.f32.mrb[31].mxu1 }
 0x177   : > { %v1825_v26 = vadd.f32 %v2946_v22, %v3548_v21  ;;  %v2949_v27 = vadd.f32 %v2948_v25, %v2947_v23 }
 0x178   : > { %2211 = vst [vmem:[%s3553_s24 + $0x54] sm:$0xff] %v2835_v3  ;;  %v1193_v7 = vpop.f32.mrb[16].mxu0 }
 0x179   : > { %v1805_v8 = vadd.f32 %v3560_v45, %v1193_v7  ;;  %v1195_v9 = vpop.f32.mrb[17].mxu0  ;;  %v2850_v31 = vpack.c.bf16 %v1825_v26, %v1825_v26  ;;  %v1828_v32 = vadd.f32 %v2949_v27, %v3548_v21 }
 0x17a   : > { %v1806_v12 = vadd.f32 %v3563_v48, %v1195_v9  ;;  %v1197_v13 = vpop.f32.mrb[18].mxu0 }
 0x17b   : > { %v1808_v14 = vadd.f32 %v3560_v45, %v1197_v13  ;;  %v1199_v15 = vpop.f32.mrb[19].mxu0  ;;  %2226 = vst [vmem:[%s3553_s24 + $0xb0] sm:$0xf] %v2850_v31  ;;  %v2852_v37 = vpack.c.bf16 %v1828_v32, %v1828_v32  ;;  %v2950_v38 = vpop.f32.mrb[32].mxu1 }
 0x17c   : > { %v2837_v18 = vpack.c.bf16 %v1806_v12, %v1805_v8  ;;  %v1809_v19 = vadd.f32 %v3563_v48, %v1199_v15  ;;  %v2951_v41 = vpop.f32.mrb[33].mxu1 }
 0x17d   : > { %2228 = vst [vmem:[%s3553_s24 + $0xbc] sm:$0xf] %v2852_v37  ;;  %v2952_v42 = vadd.f32 %v2951_v41, %v2950_v38  ;;  %v2953_v43 = vpop.f32.mrb[34].mxu1 }
 0x17e   : > { %2213 = vst [vmem:[%s3553_s24 + $0x60] sm:$0xff] %v2837_v18  ;;  %v2839_v24 = vpack.c.bf16 %v1809_v19, %v1808_v14  ;;  %v2954_v46 = vpop.f32.mrb[35].mxu1 }
 0x17f   : > { %v1831_v47 = vadd.f32 %v2952_v42, %v3548_v21  ;;  %v2955_v49 = vadd.f32 %v2954_v46, %v2953_v43 }
 0x180   : > { %2215 = vst [vmem:[%s3553_s24 + $0x6c] sm:$0xff] %v2839_v24  ;;  %v1203_v28 = vpop.f32.mrb[20].mxu0 }
 0x181   : > { %v1811_v29 = vadd.f32 %v3560_v45, %v1203_v28  ;;  %v1205_v30 = vpop.f32.mrb[21].mxu0  ;;  %v2854_v53 = vpack.c.bf16 %v1831_v47, %v1831_v47  ;;  %v1834_v54 = vadd.f32 %v2955_v49, %v3548_v21 }
 0x182   : > { %v1812_v33 = vadd.f32 %v3563_v48, %v1205_v30  ;;  %v1207_v34 = vpop.f32.mrb[22].mxu0 }
 0x183   : > { %v1814_v35 = vadd.f32 %v3560_v45, %v1207_v34  ;;  %v1209_v36 = vpop.f32.mrb[23].mxu0  ;;  %2230 = vst [vmem:[%s3553_s24 + $0xc8] sm:$0xf] %v2854_v53  ;;  %v2856_v59 = vpack.c.bf16 %v1834_v54, %v1834_v54  ;;  %v2956_v60 = vpop.f32.mrb[36].mxu1 }
 0x184   : > { %v2841_v39 = vpack.c.bf16 %v1812_v33, %v1811_v29  ;;  %v1815_v40 = vadd.f32 %v3563_v48, %v1209_v36  ;;  %v2957_v63 = vpop.f32.mrb[37].mxu1 }
 0x185   : > { %2232 = vst [vmem:[%s3553_s24 + $0xd4] sm:$0xf] %v2856_v59  ;;  %v2958_v0 = vadd.f32 %v2957_v63, %v2956_v60  ;;  %v2959_v1 = vpop.f32.mrb[38].mxu1 }
 0x186   : > { %2217 = vst [vmem:[%s3553_s24 + $0x78] sm:$0xff] %v2841_v39  ;;  %v2843_v44 = vpack.c.bf16 %v1815_v40, %v1814_v35  ;;  %v2960_v3 = vpop.f32.mrb[39].mxu1 }
 0x187   : > { %v1837_v4 = vadd.f32 %v2958_v0, %v3548_v21  ;;  %v2961_v5 = vadd.f32 %v2960_v3, %v2959_v1 }
 0x188   : > { %2219 = vst [vmem:[%s3553_s24 + $0x84] sm:$0xff] %v2843_v44  ;;  %v1213_v50 = vpop.f32.mrb[24].mxu0 }
 0x189   : > { %v1817_v51 = vadd.f32 %v3560_v45, %v1213_v50  ;;  %v1215_v52 = vpop.f32.mrb[25].mxu0  ;;  %v2858_v9 = vpack.c.bf16 %v1837_v4, %v1837_v4  ;;  %v1840_v10 = vadd.f32 %v2961_v5, %v3548_v21 }
 0x18a   : > { %v1818_v55 = vadd.f32 %v3563_v48, %v1215_v52  ;;  %v1217_v56 = vpop.f32.mrb[26].mxu0 }
 0x18b   : > { %v1820_v57 = vadd.f32 %v3560_v45, %v1217_v56  ;;  %v1219_v58 = vpop.f32.mrb[27].mxu0  ;;  %2234 = vst [vmem:[%s3553_s24 + $0xe0] sm:$0xf] %v2858_v9  ;;  %v2860_v15 = vpack.c.bf16 %v1840_v10, %v1840_v10  ;;  %v2962_v16 = vpop.f32.mrb[40].mxu1 }
 0x18c   : > { %v2845_v61 = vpack.c.bf16 %v1818_v55, %v1817_v51  ;;  %v1821_v62 = vadd.f32 %v3563_v48, %v1219_v58  ;;  %v2963_v19 = vpop.f32.mrb[41].mxu1 }
 0x18d   : > { %2236 = vst [vmem:[%s3553_s24 + $0xec] sm:$0xf] %v2860_v15  ;;  %v2964_v20 = vadd.f32 %v2963_v19, %v2962_v16  ;;  %v2965_v22 = vpop.f32.mrb[42].mxu1 }
 0x18e   : > { %2221 = vst [vmem:[%s3553_s24 + $0x90] sm:$0xff] %v2845_v61  ;;  %v2847_v2 = vpack.c.bf16 %v1821_v62, %v1820_v57  ;;  %v2966_v24 = vpop.f32.mrb[43].mxu1 }
 0x18f   : > { %v1843_v25 = vadd.f32 %v2964_v20, %v3548_v21  ;;  %v2967_v26 = vadd.f32 %v2966_v24, %v2965_v22 }
 0x190   : > { %2223 = vst [vmem:[%s3553_s24 + $0x9c] sm:$0xff] %v2847_v2  ;;  %v1223_v6 = vpop.f32.mrb[28].mxu0 }
 0x191   : > { %v1823_v7 = vadd.f32 %v3560_v45, %v1223_v6  ;;  %v1225_v8 = vpop.f32.mrb[29].mxu0  ;;  %v2862_v30 = vpack.c.bf16 %v1843_v25, %v1843_v25  ;;  %v1846_v31 = vadd.f32 %v2967_v26, %v3548_v21 }
 0x192   : > { %v1824_v11 = vadd.f32 %v3563_v48, %v1225_v8  ;;  %v1227_v12 = vpop.f32.mrb[30].mxu0 }
 0x193   : > { %v1826_v13 = vadd.f32 %v3560_v45, %v1227_v12  ;;  %v1229_v14 = vpop.f32.mrb[31].mxu0  ;;  %2238 = vst [vmem:[%s3553_s24 + $0xf8] sm:$0xf] %v2862_v30  ;;  %v2864_v36 = vpack.c.bf16 %v1846_v31, %v1846_v31  ;;  %v2968_v37 = vpop.f32.mrb[44].mxu1 }
 0x194   : > { %v2849_v17 = vpack.c.bf16 %v1824_v11, %v1823_v7  ;;  %v1827_v18 = vadd.f32 %v3563_v48, %v1229_v14  ;;  %v2969_v40 = vpop.f32.mrb[45].mxu1 }
 0x195   : > { %2240 = vst [vmem:[%s3553_s24 + $0x104] sm:$0xf] %v2864_v36  ;;  %v2970_v41 = vadd.f32 %v2969_v40, %v2968_v37  ;;  %v2971_v42 = vpop.f32.mrb[46].mxu1 }
 0x196   : > { %2225 = vst [vmem:[%s3553_s24 + $0xa8] sm:$0xff] %v2849_v17  ;;  %v2851_v23 = vpack.c.bf16 %v1827_v18, %v1826_v13  ;;  %v2972_v44 = vpop.f32.mrb[47].mxu1 }
 0x197   : > { %v1849_v46 = vadd.f32 %v2970_v41, %v3548_v21  ;;  %v2973_v47 = vadd.f32 %v2972_v44, %v2971_v42 }
 0x198   : > { %2227 = vst [vmem:[%s3553_s24 + $0xb4] sm:$0xff] %v2851_v23  ;;  %v1233_v27 = vpop.f32.mrb[32].mxu0 }
 0x199   : > { %v1829_v28 = vadd.f32 %v3560_v45, %v1233_v27  ;;  %v1235_v29 = vpop.f32.mrb[33].mxu0  ;;  %v2866_v52 = vpack.c.bf16 %v1849_v46, %v1849_v46  ;;  %v1852_v53 = vadd.f32 %v2973_v47, %v3548_v21 }
 0x19a   : > { %v1830_v32 = vadd.f32 %v3563_v48, %v1235_v29  ;;  %v1237_v33 = vpop.f32.mrb[34].mxu0 }
 0x19b   : > { %v1832_v34 = vadd.f32 %v3560_v45, %v1237_v33  ;;  %v1239_v35 = vpop.f32.mrb[35].mxu0  ;;  %2242 = vst [vmem:[%s3553_s24 + $0x110] sm:$0xf] %v2866_v52  ;;  %v2868_v58 = vpack.c.bf16 %v1852_v53, %v1852_v53  ;;  %v2974_v59 = vpop.f32.mrb[48].mxu1 }
 0x19c   : > { %v2853_v38 = vpack.c.bf16 %v1830_v32, %v1829_v28  ;;  %v1833_v39 = vadd.f32 %v3563_v48, %v1239_v35  ;;  %v2975_v62 = vpop.f32.mrb[49].mxu1 }
 0x19d   : > { %2244 = vst [vmem:[%s3553_s24 + $0x11c] sm:$0xf] %v2868_v58  ;;  %v2976_v63 = vadd.f32 %v2975_v62, %v2974_v59  ;;  %v2977_v0 = vpop.f32.mrb[50].mxu1 }
 0x19e   : > { %2229 = vst [vmem:[%s3553_s24 + $0xc0] sm:$0xff] %v2853_v38  ;;  %v2855_v43 = vpack.c.bf16 %v1833_v39, %v1832_v34  ;;  %v2978_v2 = vpop.f32.mrb[51].mxu1 }
 0x19f   : > { %v1855_v3 = vadd.f32 %v2976_v63, %v3548_v21  ;;  %v2979_v4 = vadd.f32 %v2978_v2, %v2977_v0 }
 0x1a0   : > { %2231 = vst [vmem:[%s3553_s24 + $0xcc] sm:$0xff] %v2855_v43  ;;  %v1243_v49 = vpop.f32.mrb[36].mxu0 }
 0x1a1   : > { %v1835_v50 = vadd.f32 %v3560_v45, %v1243_v49  ;;  %v1245_v51 = vpop.f32.mrb[37].mxu0  ;;  %v2870_v8 = vpack.c.bf16 %v1855_v3, %v1855_v3  ;;  %v1858_v9 = vadd.f32 %v2979_v4, %v3548_v21 }
 0x1a2   : > { %v1836_v54 = vadd.f32 %v3563_v48, %v1245_v51  ;;  %v1247_v55 = vpop.f32.mrb[38].mxu0 }
 0x1a3   : > { %v1838_v56 = vadd.f32 %v3560_v45, %v1247_v55  ;;  %v1249_v57 = vpop.f32.mrb[39].mxu0  ;;  %2246 = vst [vmem:[%s3553_s24 + $0x128] sm:$0xf] %v2870_v8  ;;  %v2872_v14 = vpack.c.bf16 %v1858_v9, %v1858_v9  ;;  %v2980_v15 = vpop.f32.mrb[52].mxu1 }
 0x1a4   : > { %v2857_v60 = vpack.c.bf16 %v1836_v54, %v1835_v50  ;;  %v1839_v61 = vadd.f32 %v3563_v48, %v1249_v57  ;;  %v2981_v18 = vpop.f32.mrb[53].mxu1 }
 0x1a5   : > { %2248 = vst [vmem:[%s3553_s24 + $0x134] sm:$0xf] %v2872_v14  ;;  %v2982_v19 = vadd.f32 %v2981_v18, %v2980_v15  ;;  %v2983_v20 = vpop.f32.mrb[54].mxu1 }
 0x1a6   : > { %2233 = vst [vmem:[%s3553_s24 + $0xd8] sm:$0xff] %v2857_v60  ;;  %v2859_v1 = vpack.c.bf16 %v1839_v61, %v1838_v56  ;;  %v2984_v23 = vpop.f32.mrb[55].mxu1 }
 0x1a7   : > { %v1861_v24 = vadd.f32 %v2982_v19, %v3548_v21  ;;  %v2985_v25 = vadd.f32 %v2984_v23, %v2983_v20 }
 0x1a8   : > { %2235 = vst [vmem:[%s3553_s24 + $0xe4] sm:$0xff] %v2859_v1  ;;  %v1253_v5 = vpop.f32.mrb[40].mxu0 }
 0x1a9   : > { %v1841_v6 = vadd.f32 %v3560_v45, %v1253_v5  ;;  %v1255_v7 = vpop.f32.mrb[41].mxu0  ;;  %v2874_v29 = vpack.c.bf16 %v1861_v24, %v1861_v24  ;;  %v1864_v30 = vadd.f32 %v2985_v25, %v3548_v21 }
 0x1aa   : > { %v1842_v10 = vadd.f32 %v3563_v48, %v1255_v7  ;;  %v1257_v11 = vpop.f32.mrb[42].mxu0 }
 0x1ab   : > { %v1844_v12 = vadd.f32 %v3560_v45, %v1257_v11  ;;  %v1259_v13 = vpop.f32.mrb[43].mxu0  ;;  %2250 = vst [vmem:[%s3553_s24 + $0x140] sm:$0xf] %v2874_v29  ;;  %v2876_v35 = vpack.c.bf16 %v1864_v30, %v1864_v30  ;;  %v2986_v36 = vpop.f32.mrb[56].mxu1 }
 0x1ac   : > { %v2861_v16 = vpack.c.bf16 %v1842_v10, %v1841_v6  ;;  %v1845_v17 = vadd.f32 %v3563_v48, %v1259_v13  ;;  %v2987_v39 = vpop.f32.mrb[57].mxu1 }
 0x1ad   : > { %2252 = vst [vmem:[%s3553_s24 + $0x14c] sm:$0xf] %v2876_v35  ;;  %v2988_v40 = vadd.f32 %v2987_v39, %v2986_v36  ;;  %v2989_v41 = vpop.f32.mrb[58].mxu1  ;;  %v2296_v39 = vld [vmem:[%s3553_s24 + $0x30] sm:$0xff] (%p3247_p6) }
 0x1ae   : > { %2237 = vst [vmem:[%s3553_s24 + $0xf0] sm:$0xff] %v2861_v16  ;;  %v2863_v22 = vpack.c.bf16 %v1845_v17, %v1844_v12  ;;  %v2990_v43 = vpop.f32.mrb[59].mxu1  ;;  %2297 = vst [vmem:[%s3729_s26 + $0x60] sm:$0xff] (%p3247_p6), %v2296_v39 }
 0x1af   : > { %v1867_v44 = vadd.f32 %v2988_v40, %v3548_v21  ;;  %v2991_v46 = vadd.f32 %v2990_v43, %v2989_v41  ;;  %v2298_v40 = vld [vmem:[%s3553_s24 + $0x3c] sm:$0xff] (%p3247_p6)  ;;  %v2300_v41 = vld [vmem:[%s3553_s24 + $0x48] sm:$0xff] (%p3247_p6) }
 0x1b0   : > { %2239 = vst [vmem:[%s3553_s24 + $0xfc] sm:$0xff] %v2863_v22  ;;  %v1263_v26 = vpop.f32.mrb[44].mxu0  ;;  %v2304_v43 = vld [vmem:[%s3553_s24 + $0x60] sm:$0xff] (%p3247_p6)  ;;  %2299 = vst [vmem:[%s3729_s26 + $0x78] sm:$0xff] (%p3247_p6), %v2298_v40 }
 0x1b1   : > { %v1847_v27 = vadd.f32 %v3560_v45, %v1263_v26  ;;  %v1265_v28 = vpop.f32.mrb[45].mxu0  ;;  %v2878_v51 = vpack.c.bf16 %v1867_v44, %v1867_v44  ;;  %v1870_v52 = vadd.f32 %v2991_v46, %v3548_v21  ;;  %2301 = vst [vmem:[%s3729_s26 + $0x90] sm:$0xff] (%p3247_p6), %v2300_v41  ;;  %2305 = vst [vmem:[%s3729_s26 + $0xc0] sm:$0xff] (%p3247_p6), %v2304_v43  ;;  %v2306_v44 = vld [vmem:[%s3553_s24 + $0x6c] sm:$0xff] (%p3247_p6)  ;;  %v2308_v46 = vld [vmem:[%s3553_s24 + $0x78] sm:$0xff] (%p3247_p6) }
 0x1b2   : > { %v1848_v31 = vadd.f32 %v3563_v48, %v1265_v28  ;;  %v1267_v32 = vpop.f32.mrb[46].mxu0  ;;  %2307 = vst [vmem:[%s3729_s26 + $0xd8] sm:$0xff] (%p3247_p6), %v2306_v44  ;;  %2309 = vst [vmem:[%s3729_s26 + $0xf0] sm:$0xff] (%p3247_p6), %v2308_v46 }
 0x1b3   : > { %v1850_v33 = vadd.f32 %v3560_v45, %v1267_v32  ;;  %v1269_v34 = vpop.f32.mrb[47].mxu0  ;;  %2254 = vst [vmem:[%s3553_s24 + $0x158] sm:$0xf] %v2878_v51  ;;  %v2880_v57 = vpack.c.bf16 %v1870_v52, %v1870_v52  ;;  %v2992_v58 = vpop.f32.mrb[60].mxu1  ;;  %v2316_v51 = vld [vmem:[%s3553_s24 + $0xa8] sm:$0xff] (%p3247_p6)  ;;  %v2318_v52 = vld [vmem:[%s3553_s24 + $0xb4] sm:$0xff] (%p3247_p6) }
 0x1b4   : > { %v2865_v37 = vpack.c.bf16 %v1848_v31, %v1847_v27  ;;  %v1851_v38 = vadd.f32 %v3563_v48, %v1269_v34  ;;  %v2993_v61 = vpop.f32.mrb[61].mxu1  ;;  %2317 = vst [vmem:[%s3729_s26 + $0x150] sm:$0xff] (%p3247_p6), %v2316_v51  ;;  %2319 = vst [vmem:[%s3729_s26 + $0x168] sm:$0xff] (%p3247_p6), %v2318_v52 }
 0x1b5   : > { %2256 = vst [vmem:[%s3553_s24 + $0x164] sm:$0xf] %v2880_v57  ;;  %v2994_v62 = vadd.f32 %v2993_v61, %v2992_v58  ;;  %v2995_v63 = vpop.f32.mrb[62].mxu1  ;;  %v2328_v57 = vld [vmem:[%s3553_s24 + $0xf0] sm:$0xff] (%p3247_p6) }
 0x1b6   : > { %2241 = vst [vmem:[%s3553_s24 + $0x108] sm:$0xff] %v2865_v37  ;;  %v2867_v42 = vpack.c.bf16 %v1851_v38, %v1850_v33  ;;  %v2996_v1 = vpop.f32.mrb[63].mxu1  ;;  %v2290_v37 = vld [vmem:[%s3553_s24 + $0xc] sm:$0xff] (%p3247_p6)  ;;  %v2294_v38 = vld [vmem:[%s3553_s24 + $0x24] sm:$0xff] (%p3247_p6)  ;;  %2329 = vst [vmem:[%s3729_s26 + $0x1e0] sm:$0xff] (%p3247_p6), %v2328_v57 }
 0x1b7   : > { %v1873_v2 = vadd.f32 %v2994_v62, %v3548_v21  ;;  %v2997_v3 = vadd.f32 %v2996_v1, %v2995_v63  ;;  %2291 = vst [vmem:[%s3729_s26 + $0x18] sm:$0xff] (%p3247_p6), %v2290_v37  ;;  %2295 = vst [vmem:[%s3729_s26 + $0x48] sm:$0xff] (%p3247_p6), %v2294_v38  ;;  %v2330_v58 = vld [vmem:[%s3553_s24 + $0xfc] sm:$0xff] (%p3247_p6) }
 0x1b8   : > { %2243 = vst [vmem:[%s3553_s24 + $0x114] sm:$0xff] %v2867_v42  ;;  %v1273_v47 = vpop.f32.mrb[48].mxu0  ;;  %v2302_v42 = vld [vmem:[%s3553_s24 + $0x54] sm:$0xff] (%p3247_p6)  ;;  %2331 = vst [vmem:[%s3729_s26 + $0x1f8] sm:$0xff] (%p3247_p6), %v2330_v58 }
 0x1b9   : > { %v1853_v49 = vadd.f32 %v3560_v45, %v1273_v47  ;;  %v1275_v50 = vpop.f32.mrb[49].mxu0  ;;  %v2882_v7 = vpack.c.bf16 %v1873_v2, %v1873_v2  ;;  %v1876_v8 = vadd.f32 %v2997_v3, %v3548_v21  ;;  %2303 = vst [vmem:[%s3729_s26 + $0xa8] sm:$0xff] (%p3247_p6), %v2302_v42  ;;  %v2310_v47 = vld [vmem:[%s3553_s24 + $0x84] sm:$0xff] (%p3247_p6) }
 0x1ba   : > { %v1854_v53 = vadd.f32 %v3563_v48, %v1275_v50  ;;  %v1277_v54 = vpop.f32.mrb[50].mxu0  ;;  %2311 = vst [vmem:[%s3729_s26 + $0x108] sm:$0xff] (%p3247_p6), %v2310_v47  ;;  %v2314_v50 = vld [vmem:[%s3553_s24 + $0x9c] sm:$0xff] (%p3247_p6) }
 0x1bb   : > { %v1856_v55 = vadd.f32 %v3560_v45, %v1277_v54  ;;  %v1279_v56 = vpop.f32.mrb[51].mxu0  ;;  %2258 = vst [vmem:[%s3553_s24 + $0x170] sm:$0xf] %v2882_v7  ;;  %v2884_v13 = vpack.c.bf16 %v1876_v8, %v1876_v8  ;;  %2315 = vst [vmem:[%s3729_s26 + $0x138] sm:$0xff] (%p3247_p6), %v2314_v50  ;;  %v2322_v54 = vld [vmem:[%s3553_s24 + $0xcc] sm:$0xff] (%p3247_p6) }
 0x1bc   : > { %v2869_v59 = vpack.c.bf16 %v1854_v53, %v1853_v49  ;;  %v1857_v60 = vadd.f32 %v3563_v48, %v1279_v56  ;;  %v2312_v49 = vld [vmem:[%s3553_s24 + $0x90] sm:$0xff] (%p3247_p6)  ;;  %v2320_v53 = vld [vmem:[%s3553_s24 + $0xc0] sm:$0xff] (%p3247_p6)  ;;  %2323 = vst [vmem:[%s3729_s26 + $0x198] sm:$0xff] (%p3247_p6), %v2322_v54  ;;  %v2760_v8 = vld [vmem:[%s3553_s24 + $0x2c] sm:$0xf] (%p3247_p6) }
 0x1bd   : > { %2260 = vst [vmem:[%s3553_s24 + $0x17c] sm:$0xf] %v2884_v13  ;;  %2313 = vst [vmem:[%s3729_s26 + $0x120] sm:$0xff] (%p3247_p6), %v2312_v49  ;;  %v2326_v56 = vld [vmem:[%s3553_s24 + $0xe4] sm:$0xff] (%p3247_p6)  ;;  %v2758_v7 = vld [vmem:[%s3553_s24 + $0x20] sm:$0xf] (%p3247_p6) }
 0x1be   : > { %2245 = vst [vmem:[%s3553_s24 + $0x120] sm:$0xff] %v2869_v59  ;;  %v2871_v0 = vpack.c.bf16 %v1857_v60, %v1856_v55  ;;  %2321 = vst [vmem:[%s3729_s26 + $0x180] sm:$0xff] (%p3247_p6), %v2320_v53  ;;  %v2324_v55 = vld [vmem:[%s3553_s24 + $0xd8] sm:$0xff] (%p3247_p6)  ;;  %v2332_v59 = vld [vmem:[%s3553_s24 + $0x108] sm:$0xff] (%p3247_p6) }
 0x1bf   : > { %2325 = vst [vmem:[%s3729_s26 + $0x1b0] sm:$0xff] (%p3247_p6), %v2324_v55  ;;  %2327 = vst [vmem:[%s3729_s26 + $0x1c8] sm:$0xff] (%p3247_p6), %v2326_v56  ;;  %v2334_v60 = vld [vmem:[%s3553_s24 + $0x114] sm:$0xff] (%p3247_p6)  ;;  %v2770_v13 = vld [vmem:[%s3553_s24 + $0x68] sm:$0xf] (%p3247_p6) }
 0x1c0   : > { %2247 = vst [vmem:[%s3553_s24 + $0x12c] sm:$0xff] %v2871_v0  ;;  %v1283_v4 = vpop.f32.mrb[52].mxu0  ;;  %2333 = vst [vmem:[%s3729_s26 + $0x210] sm:$0xff] (%p3247_p6), %v2332_v59 }
 0x1c1   : > { %v1859_v5 = vadd.f32 %v3560_v45, %v1283_v4  ;;  %v1285_v6 = vpop.f32.mrb[53].mxu0  ;;  %2335 = vst [vmem:[%s3729_s26 + $0x228] sm:$0xff] (%p3247_p6), %v2334_v60  ;;  %2759 = vst [vmem:[%s3729_s26 + $0x38] sm:$0xf] (%p3247_p6), %v2758_v7 }
 0x1c2   : > { %v1860_v9 = vadd.f32 %v3563_v48, %v1285_v6  ;;  %v1287_v10 = vpop.f32.mrb[54].mxu0  ;;  %v2756_v6 = vld [vmem:[%s3553_s24 + $0x14] sm:$0xf] (%p3247_p6)  ;;  %2761 = vst [vmem:[%s3729_s26 + $0x50] sm:$0xf] (%p3247_p6), %v2760_v8 }
 0x1c3   : > { %v1862_v11 = vadd.f32 %v3560_v45, %v1287_v10  ;;  %v1289_v12 = vpop.f32.mrb[55].mxu0  ;;  %2757 = vst [vmem:[%s3729_s26 + $0x20] sm:$0xf] (%p3247_p6), %v2756_v6  ;;  %v2764_v10 = vld [vmem:[%s3553_s24 + $0x44] sm:$0xf] (%p3247_p6) }
 0x1c4   : > { %v2873_v14 = vpack.c.bf16 %v1860_v9, %v1859_v5  ;;  %v1863_v15 = vadd.f32 %v3563_v48, %v1289_v12  ;;  %v2754_v5 = vld [vmem:[%s3553_s24 + $0x8] sm:$0xf] (%p3247_p6)  ;;  %v2762_v9 = vld [vmem:[%s3553_s24 + $0x38] sm:$0xf] (%p3247_p6)  ;;  %2765 = vst [vmem:[%s3729_s26 + $0x80] sm:$0xf] (%p3247_p6), %v2764_v10 }
 0x1c5   : > { %v2336_v61 = vld [vmem:[%s3553_s24 + $0x120] sm:$0xff] (%p3247_p6)  ;;  %2755 = vst [vmem:[%s3729_s26 + $0x8] sm:$0xf] (%p3247_p6), %v2754_v5  ;;  %2763 = vst [vmem:[%s3729_s26 + $0x68] sm:$0xf] (%p3247_p6), %v2762_v9 }
 0x1c6   : > { %2249 = vst [vmem:[%s3553_s24 + $0x138] sm:$0xff] %v2873_v14  ;;  %v2875_v16 = vpack.c.bf16 %v1863_v15, %v1862_v11  ;;  %2337 = vst [vmem:[%s3729_s26 + $0x240] sm:$0xff] (%p3247_p6), %v2336_v61  ;;  %v2766_v11 = vld [vmem:[%s3553_s24 + $0x50] sm:$0xf] (%p3247_p6)  ;;  %v2768_v12 = vld [vmem:[%s3553_s24 + $0x5c] sm:$0xf] (%p3247_p6) }
 0x1c7   : > { %v2338_v62 = vld [vmem:[%s3553_s24 + $0x12c] sm:$0xff] (%p3247_p6)  ;;  %2767 = vst [vmem:[%s3729_s26 + $0x98] sm:$0xf] (%p3247_p6), %v2766_v11  ;;  %v2772_v14 = vld [vmem:[%s3553_s24 + $0x74] sm:$0xf] (%p3247_p6) }
 0x1c8   : > { %2251 = vst [vmem:[%s3553_s24 + $0x144] sm:$0xff] %v2875_v16  ;;  %v1293_v17 = vpop.f32.mrb[56].mxu0  ;;  %2339 = vst [vmem:[%s3729_s26 + $0x258] sm:$0xff] (%p3247_p6), %v2338_v62  ;;  %v2774_v15 = vld [vmem:[%s3553_s24 + $0x80] sm:$0xf] (%p3247_p6) }
 0x1c9   : > { %v1865_v21 = vadd.f32 %v3560_v45, %v1293_v17  ;;  %v1295_v18 = vpop.f32.mrb[57].mxu0  ;;  %2769 = vst [vmem:[%s3729_s26 + $0xb0] sm:$0xf] (%p3247_p6), %v2768_v12  ;;  %2771 = vst [vmem:[%s3729_s26 + $0xc8] sm:$0xf] (%p3247_p6), %v2770_v13 }
 0x1ca   : > { %v1866_v19 = vadd.f32 %v3563_v48, %v1295_v18  ;;  %v1297_v20 = vpop.f32.mrb[58].mxu0  ;;  %2773 = vst [vmem:[%s3729_s26 + $0xe0] sm:$0xf] (%p3247_p6), %v2772_v14  ;;  %v2776_v16 = vld [vmem:[%s3553_s24 + $0x8c] sm:$0xf] (%p3247_p6) }
 0x1cb   : > { %v1868_v22 = vadd.f32 %v3560_v45, %v1297_v20  ;;  %v1299_v23 = vpop.f32.mrb[59].mxu0  ;;  %v2778_v17 = vld [vmem:[%s3553_s24 + $0x98] sm:$0xf] (%p3247_p6)  ;;  %2775 = vst [vmem:[%s3729_s26 + $0xf8] sm:$0xf] (%p3247_p6), %v2774_v15 }
 0x1cc   : > { %v2877_v24 = vpack.c.bf16 %v1866_v19, %v1865_v21  ;;  %v1869_v25 = vadd.f32 %v3563_v48, %v1299_v23  ;;  %2777 = vst [vmem:[%s3729_s26 + $0x110] sm:$0xf] (%p3247_p6), %v2776_v16  ;;  %2779 = vst [vmem:[%s3729_s26 + $0x128] sm:$0xf] (%p3247_p6), %v2778_v17  ;;  %v2780_v21 = vld [vmem:[%s3553_s24 + $0xa4] sm:$0xf] (%p3247_p6) }
 0x1cd   : > { %v2340_v63 = vld [vmem:[%s3553_s24 + $0x138] sm:$0xff] (%p3247_p6)  ;;  %v2782_v18 = vld [vmem:[%s3553_s24 + $0xb0] sm:$0xf] (%p3247_p6)  ;;  %2781 = vst [vmem:[%s3729_s26 + $0x140] sm:$0xf] (%p3247_p6), %v2780_v21 }
 0x1ce   : > { %2253 = vst [vmem:[%s3553_s24 + $0x150] sm:$0xff] %v2877_v24  ;;  %v2879_v26 = vpack.c.bf16 %v1869_v25, %v1868_v22  ;;  %2341 = vst [vmem:[%s3729_s26 + $0x270] sm:$0xff] (%p3247_p6), %v2340_v63  ;;  %v2784_v19 = vld [vmem:[%s3553_s24 + $0xbc] sm:$0xf] (%p3247_p6)  ;;  %v2786_v20 = vld [vmem:[%s3553_s24 + $0xc8] sm:$0xf] (%p3247_p6) }
 0x1cf   : > { %v2342_v0 = vld [vmem:[%s3553_s24 + $0x144] sm:$0xff] (%p3247_p6)  ;;  %2783 = vst [vmem:[%s3729_s26 + $0x158] sm:$0xf] (%p3247_p6), %v2782_v18  ;;  %2785 = vst [vmem:[%s3729_s26 + $0x170] sm:$0xf] (%p3247_p6), %v2784_v19 }
 0x1d0   : > { %2255 = vst [vmem:[%s3553_s24 + $0x15c] sm:$0xff] %v2879_v26  ;;  %v1303_v27 = vpop.f32.mrb[60].mxu0  ;;  %2343 = vst [vmem:[%s3729_s26 + $0x288] sm:$0xff] (%p3247_p6), %v2342_v0  ;;  %v2788_v22 = vld [vmem:[%s3553_s24 + $0xd4] sm:$0xf] (%p3247_p6) }
 0x1d1   : > { %v1871_v28 = vadd.f32 %v3560_v45, %v1303_v27  ;;  %v1305_v29 = vpop.f32.mrb[61].mxu0  ;;  %v2790_v23 = vld [vmem:[%s3553_s24 + $0xe0] sm:$0xf] (%p3247_p6)  ;;  %2787 = vst [vmem:[%s3729_s26 + $0x188] sm:$0xf] (%p3247_p6), %v2786_v20 }
 0x1d2   : > { %v1872_v30 = vadd.f32 %v3563_v48, %v1305_v29  ;;  %v1307_v31 = vpop.f32.mrb[62].mxu0  ;;  %2267 = sbr.rel (!%p3247_p6) target bundleno = 481 (0x1e1), region = 70  ;;  %2789 = vst [vmem:[%s3729_s26 + $0x1a0] sm:$0xf] (%p3247_p6), %v2788_v22  ;;  %2791 = vst [vmem:[%s3729_s26 + $0x1b8] sm:$0xf] (%p3247_p6), %v2790_v23 }
 0x1d3   : > { %v1874_v32 = vadd.f32 %v3560_v45, %v1307_v31  ;;  %v1309_v33 = vpop.f32.mrb[63].mxu0  ;;  %v2288_v45 = vld [vmem:[%s3553_s24] sm:$0xff] (%p3247_p6)  ;;  %v2792_v24 = vld [vmem:[%s3553_s24 + $0xec] sm:$0xf] (%p3247_p6)  ;;  %v2794_v25 = vld [vmem:[%s3553_s24 + $0xf8] sm:$0xf] (%p3247_p6) }
 0x1d4   : > { %v2881_v34 = vpack.c.bf16 %v1872_v30, %v1871_v28  ;;  %v1875_v35 = vadd.f32 %v3563_v48, %v1309_v33  ;;  %v2292_v48 = vld [vmem:[%s3553_s24 + $0x18] sm:$0xff] (%p3247_p6)  ;;  %2289 = vst [vmem:[%s3729_s26] sm:$0xff] (%p3247_p6), %v2288_v45  ;;  %v2796_v26 = vld [vmem:[%s3553_s24 + $0x104] sm:$0xf] (%p3247_p6)  ;;  %2793 = vst [vmem:[%s3729_s26 + $0x1d0] sm:$0xf] (%p3247_p6), %v2792_v24 }
 0x1d5   : > { %2293 = vst [vmem:[%s3729_s26 + $0x30] sm:$0xff] (%p3247_p6), %v2292_v48  ;;  %v2344_v1 = vld [vmem:[%s3553_s24 + $0x150] sm:$0xff] (%p3247_p6)  ;;  %2795 = vst [vmem:[%s3729_s26 + $0x1e8] sm:$0xf] (%p3247_p6), %v2794_v25  ;;  %v2800_v28 = vld [vmem:[%s3553_s24 + $0x11c] sm:$0xf] (%p3247_p6) }
 0x1d6   : > { %2257 = vst [vmem:[%s3553_s24 + $0x168] sm:$0xff] %v2881_v34  ;;  %v2883_v36 = vpack.c.bf16 %v1875_v35, %v1874_v32  ;;  %2345 = vst [vmem:[%s3729_s26 + $0x2a0] sm:$0xff] (%p3247_p6), %v2344_v1  ;;  %v2798_v27 = vld [vmem:[%s3553_s24 + $0x110] sm:$0xf] (%p3247_p6)  ;;  %v2802_v29 = vld [vmem:[%s3553_s24 + $0x128] sm:$0xf] (%p3247_p6) }
 0x1d7   : > { %v2346_v2 = vld [vmem:[%s3553_s24 + $0x15c] sm:$0xff] (%p3247_p6)  ;;  %2797 = vst [vmem:[%s3729_s26 + $0x200] sm:$0xf] (%p3247_p6), %v2796_v26  ;;  %2799 = vst [vmem:[%s3729_s26 + $0x218] sm:$0xf] (%p3247_p6), %v2798_v27 }
 0x1d8   : > { %2259 = vst [vmem:[%s3553_s24 + $0x174] sm:$0xff] %v2883_v36  ;;  %2347 = vst [vmem:[%s3729_s26 + $0x2b8] sm:$0xff] (%p3247_p6), %v2346_v2  ;;  %v2804_v30 = vld [vmem:[%s3553_s24 + $0x134] sm:$0xf] (%p3247_p6)  ;;  %v2806_v31 = vld [vmem:[%s3553_s24 + $0x140] sm:$0xf] (%p3247_p6) }
 0x1d9   : > { %2801 = vst [vmem:[%s3729_s26 + $0x230] sm:$0xf] %v2800_v28  ;;  %2803 = vst [vmem:[%s3729_s26 + $0x248] sm:$0xf] %v2802_v29  ;;  %v2808_v32 = vld [vmem:[%s3553_s24 + $0x14c] sm:$0xf] }
 0x1da   : > { %2805 = vst [vmem:[%s3729_s26 + $0x260] sm:$0xf] %v2804_v30  ;;  %2807 = vst [vmem:[%s3729_s26 + $0x278] sm:$0xf] %v2806_v31  ;;  %v2810_v33 = vld [vmem:[%s3553_s24 + $0x158] sm:$0xf] }
 0x1db   : > { %2809 = vst [vmem:[%s3729_s26 + $0x290] sm:$0xf] %v2808_v32  ;;  %v2812_v34 = vld [vmem:[%s3553_s24 + $0x164] sm:$0xf]  ;;  %v2814_v35 = vld [vmem:[%s3553_s24 + $0x170] sm:$0xf] }
 0x1dc   : > { %2811 = vst [vmem:[%s3729_s26 + $0x2a8] sm:$0xf] %v2810_v33  ;;  %2813 = vst [vmem:[%s3729_s26 + $0x2c0] sm:$0xf] %v2812_v34  ;;  %v2816_v36 = vld [vmem:[%s3553_s24 + $0x17c] sm:$0xf] }
 0x1dd   : > { %v2348_v3 = vld [vmem:[%s3553_s24 + $0x168] sm:$0xff]  ;;  %2815 = vst [vmem:[%s3729_s26 + $0x2d8] sm:$0xf] %v2814_v35  ;;  %2817 = vst [vmem:[%s3729_s26 + $0x2f0] sm:$0xf] %v2816_v36 }
 0x1de   : > { %2349 = vst [vmem:[%s3729_s26 + $0x2d0] sm:$0xff] %v2348_v3 }
 0x1df   : > { %v2350_v4 = vld [vmem:[%s3553_s24 + $0x174] sm:$0xff] }
 0x1e0   : > { %2351 = vst [vmem:[%s3729_s26 + $0x2e8] sm:$0xff] %v2350_v4 }
 0x1e1 PF: > { %s13_s16 = sadd.s32 1, %s3190_s16   ;;  %s3873_s12 = smov %s3178_s13 }
 0x1e2   : > { %p10_p12 = scmp.ge.s32.totalorder %s13_s16, 4   ;;  %s3874_s13 = smov %s3252_s22 }
 0x1e3   : > { %s3875_s14 = smov %s3186_s15  ;;  %s3876_s15 = smov %s3878_s17 }
 0x1e4   :  { %12 = sbr.rel (!%p10_p12) target bundleno = 3 (0x3), region = 145 }

// kernel: roberta_forward.18
= control target key start
LH: loop header
LB: loop body
LE: loop exit
PB: predicated region body
PF: predicated region fallthrough
CT: control target
= control target key end

     0   :  { %s2337_s0 = inlined_call_operand.vmem [shape: bf16[256,256], index: 0, kind: input, shape index: {}]   ;;  %s2338_s1 = inlined_call_operand.vmem [shape: bf16[256,256], index: 1, kind: input, shape index: {}]   ;;  %s2339_s2 = inlined_call_operand.vmem [shape: f32[1,256], index: 2, kind: input, shape index: {}]   ;;  %s2340_s3 = inlined_call_operand.vmem [shape: f32[1,256], index: 3, kind: input, shape index: {}]   ;;  %s2341_s4 = inlined_call_operand.vmem [shape: bf16[256,256], index: 4, kind: output, shape index: {}]  }
   0x1   :  { %v17_v0 = vld [vmem:[%s2337_s0] sm:$0xff]  ;;  %v19_v2 = vld [vmem:[%s2337_s0 + $0x10] sm:$0xff]  ;;  %v18_v8 = vld [vmem:[%s2337_s0 + $0x8] sm:$0xff] }
   0x2   :  { %v113_v1 = vld [vmem:[%s2338_s1] sm:$0xff]  ;;  %v49_v3 = vunpack.c.l.bf16 %v17_v0  ;;  %v50_v4 = vunpack.c.h.bf16 %v17_v0  ;;  %v115_v7 = vld [vmem:[%s2338_s1 + $0x10] sm:$0xff]  ;;  %v114_v9 = vld [vmem:[%s2338_s1 + $0x8] sm:$0xff]  ;;  %v53_v10 = vunpack.c.l.bf16 %v19_v2  ;;  %v54_v11 = vunpack.c.h.bf16 %v19_v2 }
   0x3   :  { %v145_v5 = vunpack.c.l.bf16 %v113_v1  ;;  %v146_v6 = vunpack.c.h.bf16 %v113_v1  ;;  %v149_v12 = vunpack.c.l.bf16 %v115_v7  ;;  %v150_v13 = vunpack.c.h.bf16 %v115_v7  ;;  %v20_v14 = vld [vmem:[%s2337_s0 + $0x18] sm:$0xff]  ;;  %v21_v24 = vld [vmem:[%s2337_s0 + $0x20] sm:$0xff]  ;;  %v22_v30 = vld [vmem:[%s2337_s0 + $0x28] sm:$0xff] }
   0x4   :  { %v116_v15 = vld [vmem:[%s2338_s1 + $0x18] sm:$0xff]  ;;  %v51_v18 = vunpack.c.l.bf16 %v18_v8  ;;  %v52_v19 = vunpack.c.h.bf16 %v18_v8  ;;  %v147_v22 = vunpack.c.l.bf16 %v114_v9  ;;  %v148_v23 = vunpack.c.h.bf16 %v114_v9  ;;  %v117_v25 = vld [vmem:[%s2338_s1 + $0x20] sm:$0xff]  ;;  %v118_v35 = vld [vmem:[%s2338_s1 + $0x28] sm:$0xff] }
   0x5   :  { %v1343_v16 = vadd.f32 %v145_v5, %v49_v3  ;;  %v1345_v17 = vadd.f32 %v146_v6, %v50_v4  ;;  %v1347_v20 = vadd.f32 %v149_v12, %v53_v10  ;;  %v1349_v21 = vadd.f32 %v150_v13, %v54_v11  ;;  %v23_v40 = vld [vmem:[%s2337_s0 + $0x30] sm:$0xff]  ;;  %v24_v50 = vld [vmem:[%s2337_s0 + $0x38] sm:$0xff]  ;;  %v25_v60 = vld [vmem:[%s2337_s0 + $0x40] sm:$0xff] }
   0x6   :  { %v55_v27 = vunpack.c.l.bf16 %v20_v14  ;;  %v56_v28 = vunpack.c.h.bf16 %v20_v14  ;;  %v151_v29 = vunpack.c.l.bf16 %v116_v15  ;;  %v1364_v32 = vadd.f32 %v147_v22, %v51_v18  ;;  %v119_v45 = vld [vmem:[%s2338_s1 + $0x30] sm:$0xff]  ;;  %v120_v51 = vld [vmem:[%s2338_s1 + $0x38] sm:$0xff]  ;;  %v121_v61 = vld [vmem:[%s2338_s1 + $0x40] sm:$0xff] }
   0x7   :  { %v275_v26 = vadd.f32 %v1345_v17, %v1343_v16  ;;  %v281_v31 = vadd.f32 %v1349_v21, %v1347_v20  ;;  %v1366_v33 = vadd.f32 %v148_v23, %v52_v19  ;;  %v152_v34 = vunpack.c.h.bf16 %v116_v15  ;;  %v26_v2 = vld [vmem:[%s2337_s0 + $0x48] sm:$0xff]  ;;  %v27_v12 = vld [vmem:[%s2337_s0 + $0x50] sm:$0xff] }
   0x8   :  { %v1371_v36 = vadd.f32 %v151_v29, %v55_v27  ;;  %v57_v37 = vunpack.c.l.bf16 %v21_v24  ;;  %v58_v38 = vunpack.c.h.bf16 %v21_v24  ;;  %v153_v39 = vunpack.c.l.bf16 %v117_v25  ;;  %v122_v7 = vld [vmem:[%s2338_s1 + $0x48] sm:$0xff]  ;;  %v123_v19 = vld [vmem:[%s2338_s1 + $0x50] sm:$0xff]  ;;  %v124_v27 = vld [vmem:[%s2338_s1 + $0x58] sm:$0xff] }
   0x9   :  { %276 = vadd.xlane.f32.xlu0 %v275_v26  ;;  %282 = vadd.xlane.f32.xlu1 %v281_v31  ;;  %v278_v41 = vadd.f32 %v1366_v33, %v1364_v32  ;;  %v1378_v42 = vadd.f32 %v152_v34, %v56_v28  ;;  %v154_v43 = vunpack.c.h.bf16 %v117_v25  ;;  %v59_v44 = vunpack.c.l.bf16 %v22_v30  ;;  %v28_v26 = vld [vmem:[%s2337_s0 + $0x58] sm:$0xff] }
   0xa   :  { %v1383_v46 = vadd.f32 %v153_v39, %v57_v37  ;;  %v60_v47 = vunpack.c.h.bf16 %v22_v30  ;;  %v155_v48 = vunpack.c.l.bf16 %v118_v35  ;;  %v156_v49 = vunpack.c.h.bf16 %v118_v35  ;;  %v29_v39 = vld [vmem:[%s2337_s0 + $0x60] sm:$0xff] }
   0xb   :  { %v284_v52 = vadd.f32 %v1378_v42, %v1371_v36  ;;  %v1393_v53 = vadd.f32 %v154_v43, %v58_v38  ;;  %v61_v54 = vunpack.c.l.bf16 %v23_v40  ;;  %v62_v55 = vunpack.c.h.bf16 %v23_v40  ;;  %v125_v40 = vld [vmem:[%s2338_s1 + $0x60] sm:$0xff] }
   0xc   :  { %v1395_v56 = vadd.f32 %v155_v48, %v59_v44  ;;  %v1397_v57 = vadd.f32 %v156_v49, %v60_v47  ;;  %v157_v58 = vunpack.c.l.bf16 %v119_v45  ;;  %v158_v59 = vunpack.c.h.bf16 %v119_v45  ;;  %v30_v47 = vld [vmem:[%s2337_s0 + $0x68] sm:$0xff] }
   0xd   :  { %279 = vadd.xlane.f32.xlu0 %v278_v41  ;;  %285 = vadd.xlane.f32.xlu1 %v284_v52  ;;  %v287_v62 = vadd.f32 %v1393_v53, %v1383_v46  ;;  %v63_v63 = vunpack.c.l.bf16 %v24_v50  ;;  %v64_v0 = vunpack.c.h.bf16 %v24_v50  ;;  %v159_v1 = vunpack.c.l.bf16 %v120_v51  ;;  %v126_v52 = vld [vmem:[%s2338_s1 + $0x68] sm:$0xff] }
   0xe   :  { %v290_v3 = vadd.f32 %v1397_v57, %v1395_v56  ;;  %v1412_v4 = vadd.f32 %v157_v58, %v61_v54  ;;  %v1414_v5 = vadd.f32 %v158_v59, %v62_v55  ;;  %v160_v6 = vunpack.c.h.bf16 %v120_v51 }
   0xf   :  { %v1419_v8 = vadd.f32 %v159_v1, %v63_v63  ;;  %v65_v9 = vunpack.c.l.bf16 %v25_v60  ;;  %v66_v10 = vunpack.c.h.bf16 %v25_v60  ;;  %v161_v11 = vunpack.c.l.bf16 %v121_v61  ;;  %v31_v60 = vld [vmem:[%s2337_s0 + $0x70] sm:$0xff] }
  0x10   :  { %v293_v13 = vadd.f32 %v1414_v5, %v1412_v4  ;;  %v1426_v14 = vadd.f32 %v160_v6, %v64_v0  ;;  %v162_v15 = vunpack.c.h.bf16 %v121_v61  ;;  %v67_v18 = vunpack.c.l.bf16 %v26_v2  ;;  %v127_v1 = vld [vmem:[%s2338_s1 + $0x70] sm:$0xff] }
  0x11   :  { %288 = vadd.xlane.f32.xlu0 %v287_v62  ;;  %291 = vadd.xlane.f32.xlu1 %v290_v3  ;;  %v1431_v22 = vadd.f32 %v161_v11, %v65_v9  ;;  %v68_v23 = vunpack.c.h.bf16 %v26_v2  ;;  %v163_v24 = vunpack.c.l.bf16 %v122_v7  ;;  %v164_v25 = vunpack.c.h.bf16 %v122_v7  ;;  %v32_v9 = vld [vmem:[%s2337_s0 + $0x78] sm:$0xff] }
  0x12   :  { %v296_v28 = vadd.f32 %v1426_v14, %v1419_v8  ;;  %v1441_v29 = vadd.f32 %v162_v15, %v66_v10  ;;  %v69_v30 = vunpack.c.l.bf16 %v27_v12  ;;  %v70_v31 = vunpack.c.h.bf16 %v27_v12  ;;  %v128_v10 = vld [vmem:[%s2338_s1 + $0x78] sm:$0xff] }
  0x13   :  { %v1443_v34 = vadd.f32 %v163_v24, %v67_v18  ;;  %v1445_v35 = vadd.f32 %v164_v25, %v68_v23  ;;  %v165_v37 = vunpack.c.l.bf16 %v123_v19  ;;  %v166_v38 = vunpack.c.h.bf16 %v123_v19  ;;  %v33_v25 = vld [vmem:[%s2337_s0 + $0x80] sm:$0xff] }
  0x14   :  { %v299_v41 = vadd.f32 %v1441_v29, %v1431_v22  ;;  %v71_v43 = vunpack.c.l.bf16 %v28_v26  ;;  %v72_v44 = vunpack.c.h.bf16 %v28_v26  ;;  %v167_v45 = vunpack.c.l.bf16 %v124_v27  ;;  %v129_v26 = vld [vmem:[%s2338_s1 + $0x80] sm:$0xff] }
  0x15   :  { %294 = vadd.xlane.f32.xlu0 %v293_v13  ;;  %297 = vadd.xlane.f32.xlu1 %v296_v28  ;;  %v302_v48 = vadd.f32 %v1445_v35, %v1443_v34  ;;  %v1460_v49 = vadd.f32 %v165_v37, %v69_v30  ;;  %v1462_v50 = vadd.f32 %v166_v38, %v70_v31  ;;  %v168_v51 = vunpack.c.h.bf16 %v124_v27  ;;  %v34_v37 = vld [vmem:[%s2337_s0 + $0x88] sm:$0xff] }
  0x16   :  { %v1467_v54 = vadd.f32 %v167_v45, %v71_v43  ;;  %v73_v55 = vunpack.c.l.bf16 %v29_v39  ;;  %v74_v58 = vunpack.c.h.bf16 %v29_v39  ;;  %v169_v59 = vunpack.c.l.bf16 %v125_v40  ;;  %v130_v43 = vld [vmem:[%s2338_s1 + $0x88] sm:$0xff] }
  0x17   :  { %v305_v61 = vadd.f32 %v1462_v50, %v1460_v49  ;;  %v1474_v62 = vadd.f32 %v168_v51, %v72_v44  ;;  %v170_v63 = vunpack.c.h.bf16 %v125_v40  ;;  %v75_v0 = vunpack.c.l.bf16 %v30_v47  ;;  %v35_v51 = vld [vmem:[%s2337_s0 + $0x90] sm:$0xff] }
  0x18   :  { %v1479_v2 = vadd.f32 %v169_v59, %v73_v55  ;;  %v76_v3 = vunpack.c.h.bf16 %v30_v47  ;;  %v171_v6 = vunpack.c.l.bf16 %v126_v52  ;;  %v172_v7 = vunpack.c.h.bf16 %v126_v52 }
  0x19   :  { %300 = vadd.xlane.f32.xlu0 %v299_v41  ;;  %303 = vadd.xlane.f32.xlu1 %v302_v48  ;;  %v308_v11 = vadd.f32 %v1474_v62, %v1467_v54  ;;  %v1489_v12 = vadd.f32 %v170_v63, %v74_v58  ;;  %v77_v13 = vunpack.c.l.bf16 %v31_v60  ;;  %v78_v15 = vunpack.c.h.bf16 %v31_v60  ;;  %v131_v60 = vld [vmem:[%s2338_s1 + $0x90] sm:$0xff] }
  0x1a   :  { %v1491_v18 = vadd.f32 %v171_v6, %v75_v0  ;;  %v1493_v19 = vadd.f32 %v172_v7, %v76_v3  ;;  %v173_v23 = vunpack.c.l.bf16 %v127_v1  ;;  %v174_v24 = vunpack.c.h.bf16 %v127_v1  ;;  %v36_v3 = vld [vmem:[%s2337_s0 + $0x98] sm:$0xff] }
  0x1b   :  { %v311_v27 = vadd.f32 %v1489_v12, %v1479_v2  ;;  %v79_v28 = vunpack.c.l.bf16 %v32_v9  ;;  %v80_v30 = vunpack.c.h.bf16 %v32_v9  ;;  %v175_v31 = vunpack.c.l.bf16 %v128_v10  ;;  %v132_v6 = vld [vmem:[%s2338_s1 + $0x98] sm:$0xff] }
  0x1c   :  { %v314_v38 = vadd.f32 %v1493_v19, %v1491_v18  ;;  %v1508_v39 = vadd.f32 %v173_v23, %v77_v13  ;;  %v1510_v40 = vadd.f32 %v174_v24, %v78_v15  ;;  %v176_v41 = vunpack.c.h.bf16 %v128_v10 }
  0x1d   :  { %306 = vadd.xlane.f32.xlu0 %v305_v61  ;;  %309 = vadd.xlane.f32.xlu1 %v308_v11  ;;  %v1515_v44 = vadd.f32 %v175_v31, %v79_v28  ;;  %v81_v45 = vunpack.c.l.bf16 %v33_v25  ;;  %v82_v47 = vunpack.c.h.bf16 %v33_v25  ;;  %v177_v48 = vunpack.c.l.bf16 %v129_v26  ;;  %v37_v25 = vld [vmem:[%s2337_s0 + $0xa0] sm:$0xff]  ;;  %v38_v31 = vld [vmem:[%s2337_s0 + $0xa8] sm:$0xff] }
  0x1e   :  { %v317_v52 = vadd.f32 %v1510_v40, %v1508_v39  ;;  %v1522_v55 = vadd.f32 %v176_v41, %v80_v30  ;;  %v178_v58 = vunpack.c.h.bf16 %v129_v26  ;;  %v83_v59 = vunpack.c.l.bf16 %v34_v37  ;;  %v133_v26 = vld [vmem:[%s2338_s1 + $0xa0] sm:$0xff] }
  0x1f   :  { %v1527_v61 = vadd.f32 %v177_v48, %v81_v45  ;;  %v84_v63 = vunpack.c.h.bf16 %v34_v37  ;;  %v179_v0 = vunpack.c.l.bf16 %v130_v43  ;;  %v180_v1 = vunpack.c.h.bf16 %v130_v43  ;;  %v134_v45 = vld [vmem:[%s2338_s1 + $0xa8] sm:$0xff] }
  0x20   :  { %v320_v7 = vadd.f32 %v1522_v55, %v1515_v44  ;;  %v1537_v9 = vadd.f32 %v178_v58, %v82_v47  ;;  %v85_v10 = vunpack.c.l.bf16 %v35_v51  ;;  %v86_v11 = vunpack.c.h.bf16 %v35_v51 }
  0x21   :  { %312 = vadd.xlane.f32.xlu0 %v311_v27  ;;  %315 = vadd.xlane.f32.xlu1 %v314_v38  ;;  %v1539_v13 = vadd.f32 %v179_v0, %v83_v59  ;;  %v1541_v15 = vadd.f32 %v180_v1, %v84_v63  ;;  %v181_v23 = vunpack.c.l.bf16 %v131_v60  ;;  %v182_v24 = vunpack.c.h.bf16 %v131_v60  ;;  %v39_v59 = vld [vmem:[%s2337_s0 + $0xb0] sm:$0xff] }
  0x22   :  { %v87_v27 = vunpack.c.l.bf16 %v36_v3  ;;  %v88_v28 = vunpack.c.h.bf16 %v36_v3  ;;  %v183_v30 = vunpack.c.l.bf16 %v132_v6  ;;  %v323_v37 = vadd.f32 %v1537_v9, %v1527_v61 }
  0x23   :  { %2382 = vst [vmem:[#allocation2_spill] sm:$0xff] %v1541_v15  ;;  %v1554_v38 = vadd.f32 %v181_v23, %v85_v10  ;;  %v1556_v41 = vadd.f32 %v182_v24, %v86_v11  ;;  %v184_v43 = vunpack.c.h.bf16 %v132_v6  ;;  %v326_v47 = vadd.f32 %v1541_v15, %v1539_v13  ;;  %v40_v23 = vld [vmem:[%s2337_s0 + $0xb8] sm:$0xff] }
  0x24   :  { %v89_v48 = vunpack.c.l.bf16 %v37_v25  ;;  %v90_v51 = vunpack.c.h.bf16 %v37_v25  ;;  %v185_v58 = vunpack.c.l.bf16 %v133_v26  ;;  %v1566_v60 = vadd.f32 %v183_v30, %v87_v27 }
  0x25   :  { %2383 = vst [vmem:[#allocation3_spill] sm:$0xff] %v1554_v38  ;;  %2384 = vst [vmem:[#allocation4_spill] sm:$0xff] %v1556_v41  ;;  %318 = vadd.xlane.f32.xlu0 %v317_v52  ;;  %321 = vadd.xlane.f32.xlu1 %v320_v7  ;;  %v1568_v63 = vadd.f32 %v184_v43, %v88_v28  ;;  %v186_v0 = vunpack.c.h.bf16 %v133_v26  ;;  %v91_v1 = vunpack.c.l.bf16 %v38_v31  ;;  %v135_v52 = vld [vmem:[%s2338_s1 + $0xb0] sm:$0xff]  ;;  %v92_v6 = vunpack.c.h.bf16 %v38_v31  ;;  %v136_v7 = vld [vmem:[%s2338_s1 + $0xb8] sm:$0xff] }
  0x26   :  { %2385 = vst [vmem:[#allocation5_spill] sm:$0xff] %v1566_v60  ;;  %v1573_v3 = vadd.f32 %v185_v58, %v89_v48  ;;  %v187_v10 = vunpack.c.l.bf16 %v134_v45  ;;  %v188_v11 = vunpack.c.h.bf16 %v134_v45  ;;  %v329_v24 = vadd.f32 %v1556_v41, %v1554_v38  ;;  %v41_v45 = vld [vmem:[%s2337_s0 + $0xc0] sm:$0xff]  ;;  %v43_v41 = vld [vmem:[%s2337_s0 + $0xd0] sm:$0xff]  ;;  %v46_v38 = vld [vmem:[%s2337_s0 + $0xe8] sm:$0xff] }
  0x27   :  { %2386 = vst [vmem:[#allocation6_spill] sm:$0xff] %v1568_v63  ;;  %v1583_v25 = vadd.f32 %v186_v0, %v90_v51  ;;  %v93_v26 = vunpack.c.l.bf16 %v39_v59  ;;  %v94_v27 = vunpack.c.h.bf16 %v39_v59  ;;  %v189_v31 = vunpack.c.l.bf16 %v135_v52  ;;  %v137_v48 = vld [vmem:[%s2338_s1 + $0xc0] sm:$0xff]  ;;  %v42_v0 = vld [vmem:[%s2337_s0 + $0xc8] sm:$0xff] }
  0x28   :  { %2387 = vst [vmem:[#allocation7_spill] sm:$0xff] %v1573_v3  ;;  %v1585_v28 = vadd.f32 %v187_v10, %v91_v1  ;;  %v1587_v30 = vadd.f32 %v188_v11, %v92_v6  ;;  %v190_v43 = vunpack.c.h.bf16 %v135_v52  ;;  %v332_v51 = vadd.f32 %v1568_v63, %v1566_v60 }
  0x29   :  { %2388 = vst [vmem:[#allocation8_spill] sm:$0xff] %v1583_v25  ;;  %324 = vadd.xlane.f32.xlu0 %v323_v37  ;;  %327 = vadd.xlane.f32.xlu1 %v326_v47  ;;  %v95_v58 = vunpack.c.l.bf16 %v40_v23  ;;  %v96_v37 = vunpack.c.h.bf16 %v40_v23  ;;  %v191_v59 = vunpack.c.l.bf16 %v136_v7  ;;  %v335_v1 = vadd.f32 %v1583_v25, %v1573_v3  ;;  %v138_v47 = vld [vmem:[%s2338_s1 + $0xc8] sm:$0xff] }
  0x2a   :  { %2389 = vst [vmem:[#allocation9_spill] sm:$0xff] %v1585_v28  ;;  %2390 = vst [vmem:[#allocation10_spill] sm:$0xff] %v1587_v30  ;;  %v338_v52 = vadd.f32 %v1587_v30, %v1585_v28  ;;  %v1604_v6 = vadd.f32 %v189_v31, %v93_v26  ;;  %v192_v10 = vunpack.c.h.bf16 %v136_v7  ;;  %v1609_v11 = vadd.f32 %v190_v43, %v94_v27  ;;  %v139_v31 = vld [vmem:[%s2338_s1 + $0xd0] sm:$0xff] }
  0x2b   :  { %v97_v23 = vunpack.c.l.bf16 %v41_v45  ;;  %v98_v63 = vunpack.c.h.bf16 %v41_v45  ;;  %v193_v60 = vunpack.c.l.bf16 %v137_v48  ;;  %v1614_v25 = vadd.f32 %v191_v59, %v95_v58  ;;  %v140_v58 = vld [vmem:[%s2338_s1 + $0xd8] sm:$0xff] }
  0x2c   :  { %2391 = vst [vmem:[#allocation11_spill] sm:$0xff] %v1604_v6  ;;  %2392 = vst [vmem:[#allocation12_spill] sm:$0xff] %v1609_v11  ;;  %v1616_v30 = vadd.f32 %v192_v10, %v96_v37  ;;  %v194_v26 = vunpack.c.h.bf16 %v137_v48  ;;  %v99_v7 = vunpack.c.l.bf16 %v42_v0  ;;  %v100_v43 = vunpack.c.h.bf16 %v42_v0  ;;  %v45_v0 = vld [vmem:[%s2337_s0 + $0xe0] sm:$0xff] }
  0x2d   :  { %330 = vadd.xlane.f32.xlu0 %v329_v24  ;;  %2393 = vst [vmem:[#allocation13_spill] sm:$0xff] %v1614_v25  ;;  %333 = vadd.xlane.f32.xlu1 %v332_v51  ;;  %v1621_v27 = vadd.f32 %v193_v60, %v97_v23  ;;  %v195_v45 = vunpack.c.l.bf16 %v138_v47  ;;  %v196_v28 = vunpack.c.h.bf16 %v138_v47  ;;  %v44_v24 = vld [vmem:[%s2337_s0 + $0xd8] sm:$0xff]  ;;  %v101_v37 = vunpack.c.l.bf16 %v43_v41  ;;  %v141_v47 = vld [vmem:[%s2338_s1 + $0xe0] sm:$0xff] }
  0x2e   :  { %2394 = vst [vmem:[#allocation14_spill] sm:$0xff] %v1616_v30  ;;  %v1629_v48 = vadd.f32 %v194_v26, %v98_v63  ;;  %v102_v59 = vunpack.c.h.bf16 %v43_v41  ;;  %v341_v51 = vadd.f32 %v1609_v11, %v1604_v6  ;;  %v197_v60 = vunpack.c.l.bf16 %v139_v31 }
  0x2f   :  { %2395 = vst [vmem:[#allocation15_spill] sm:$0xff] %v1621_v27  ;;  %v198_v10 = vunpack.c.h.bf16 %v139_v31  ;;  %v344_v63 = vadd.f32 %v1616_v30, %v1614_v25  ;;  %v103_v23 = vunpack.c.l.bf16 %v44_v24  ;;  %v104_v26 = vunpack.c.h.bf16 %v44_v24 }
  0x30   :  { %2396 = vst [vmem:[#allocation16_spill] sm:$0xff] %v1629_v48  ;;  %v199_v41 = vunpack.c.l.bf16 %v140_v58  ;;  %v347_v11 = vadd.f32 %v1629_v48, %v1621_v27  ;;  %v1643_v31 = vadd.f32 %v195_v45, %v99_v7  ;;  %v1645_v6 = vadd.f32 %v196_v28, %v100_v43 }
  0x31   :  { %336 = vadd.xlane.f32.xlu0 %v335_v1  ;;  %339 = vadd.xlane.f32.xlu1 %v338_v52  ;;  %v200_v3 = vunpack.c.h.bf16 %v140_v58  ;;  %v142_v1 = vld [vmem:[%s2338_s1 + $0xe8] sm:$0xff]  ;;  %v1653_v30 = vadd.f32 %v197_v60, %v101_v37  ;;  %v1655_v24 = vadd.f32 %v198_v10, %v102_v59  ;;  %v105_v52 = vunpack.c.l.bf16 %v45_v0  ;;  %v47_v37 = vld [vmem:[%s2337_s0 + $0xf0] sm:$0xff]  ;;  %v144_v10 = vld [vmem:[%s2338_s1 + $0xf8] sm:$0xff] }
  0x32   :  { %2397 = vst [vmem:[#allocation17_spill] sm:$0xff] %v1645_v6  ;;  %v201_v25 = vunpack.c.l.bf16 %v141_v47  ;;  %v1657_v48 = vadd.f32 %v199_v41, %v103_v23  ;;  %v106_v28 = vunpack.c.h.bf16 %v45_v0  ;;  %v202_v43 = vunpack.c.h.bf16 %v141_v47 }
  0x33   :  { %2398 = vst [vmem:[#allocation18_spill] sm:$0xff] %v1653_v30  ;;  %2399 = vst [vmem:[#allocation19_spill] sm:$0xff] %v1655_v24  ;;  %v1659_v7 = vadd.f32 %v200_v3, %v104_v26  ;;  %v107_v45 = vunpack.c.l.bf16 %v46_v38  ;;  %v108_v58 = vunpack.c.h.bf16 %v46_v38  ;;  %v203_v27 = vunpack.c.l.bf16 %v142_v1  ;;  %v143_v3 = vld [vmem:[%s2338_s1 + $0xf0] sm:$0xff]  ;;  %v48_v38 = vld [vmem:[%s2337_s0 + $0xf8] sm:$0xff] }
  0x34   :  { %v204_v15 = vunpack.c.h.bf16 %v142_v1  ;;  %v350_v59 = vadd.f32 %v1645_v6, %v1643_v31  ;;  %v353_v60 = vadd.f32 %v1655_v24, %v1653_v30  ;;  %v1681_v47 = vadd.f32 %v202_v43, %v106_v28 }
  0x35   :  { %2400 = vst [vmem:[#allocation20_spill] sm:$0xff] %v1659_v7  ;;  %342 = vadd.xlane.f32.xlu0 %v341_v51  ;;  %345 = vadd.xlane.f32.xlu1 %v344_v63  ;;  %v1671_v51 = vadd.f32 %v201_v25, %v105_v52  ;;  %v356_v0 = vadd.f32 %v1659_v7, %v1657_v48  ;;  %v109_v63 = vunpack.c.l.bf16 %v47_v37  ;;  %v110_v23 = vunpack.c.h.bf16 %v47_v37 }
  0x36   :  { %v1683_v26 = vadd.f32 %v203_v27, %v107_v45  ;;  %v1685_v25 = vadd.f32 %v204_v15, %v108_v58  ;;  %v205_v41 = vunpack.c.l.bf16 %v143_v3  ;;  %v206_v1 = vunpack.c.h.bf16 %v143_v3 }
  0x37   :  { %v111_v52 = vunpack.c.l.bf16 %v48_v38  ;;  %v112_v24 = vunpack.c.h.bf16 %v48_v38  ;;  %v207_v30 = vunpack.c.l.bf16 %v144_v10  ;;  %v208_v6 = vunpack.c.h.bf16 %v144_v10 }
  0x38   :  { %v359_v7 = vadd.f32 %v1681_v47, %v1671_v51  ;;  %v1689_v28 = vadd.f32 %v205_v41, %v109_v63  ;;  %v1691_v43 = vadd.f32 %v206_v1, %v110_v23  ;;  %v362_v15 = vadd.f32 %v1685_v25, %v1683_v26 }
  0x39   :  { %348 = vadd.xlane.f32.xlu0 %v347_v11  ;;  %351 = vadd.xlane.f32.xlu1 %v350_v59  ;;  %v1695_v11 = vadd.f32 %v207_v30, %v111_v52  ;;  %v1697_v27 = vadd.f32 %v208_v6, %v112_v24 }
  0x3a   :  { %v365_v45 = vadd.f32 %v1691_v43, %v1689_v28 }
  0x3b   :  { %v368_v58 = vadd.f32 %v1697_v27, %v1695_v11 }
  0x3d   :  { %354 = vadd.xlane.f32.xlu0 %v353_v60  ;;  %357 = vadd.xlane.f32.xlu1 %v356_v0 }
  0x41   :  { %360 = vadd.xlane.f32.xlu0 %v359_v7  ;;  %363 = vadd.xlane.f32.xlu1 %v362_v15 }
  0x45   :  { %366 = vadd.xlane.f32.xlu0 %v365_v45  ;;  %369 = vadd.xlane.f32.xlu1 %v368_v58 }
  0x96   :  { %v277_v37 = vpop.xlane.xlu0 %276  ;;  %v283_v3 = vpop.xlane.xlu1 %282 }
  0x97   :  { %v372_v59 = vmul.f32 0.00390625, %v277_v37  ;;  %v374_v60 = vmul.f32 0.00390625, %v283_v3 }
  0x99   :  { %v1704_v38 = vsub.f32 %v1343_v16, %v372_v59  ;;  %v1707_v30 = vsub.f32 %v1345_v17, %v372_v59  ;;  %v1710_v6 = vsub.f32 %v1347_v20, %v374_v60  ;;  %v1713_v24 = vsub.f32 %v1349_v21, %v374_v60 }
  0x9a   :  { %v280_v7 = vpop.xlane.xlu0 %279  ;;  %v286_v0 = vpop.xlane.xlu1 %285 }
  0x9b   :  { %v373_v10 = vmul.f32 0.00390625, %v280_v7  ;;  %v468_v63 = vmul.f32 %v1704_v38, %v1704_v38  ;;  %v469_v23 = vmul.f32 %v1707_v30, %v1707_v30  ;;  %v375_v16 = vmul.f32 0.00390625, %v286_v0 }
  0x9c   :  { %v472_v17 = vmul.f32 %v1710_v6, %v1710_v6  ;;  %v473_v20 = vmul.f32 %v1713_v24, %v1713_v24 }
  0x9d   :  { %v1724_v41 = vsub.f32 %v1364_v32, %v373_v10  ;;  %v1727_v21 = vsub.f32 %v1366_v33, %v373_v10  ;;  %v532_v1 = vadd.f32 %v469_v23, %v468_v63  ;;  %v1730_v52 = vsub.f32 %v1371_v36, %v375_v16 }
  0x9e   :  { %v1733_v15 = vsub.f32 %v1378_v42, %v375_v16  ;;  %v289_v45 = vpop.xlane.xlu0 %288  ;;  %v292_v37 = vpop.xlane.xlu1 %291  ;;  %v538_v59 = vadd.f32 %v473_v20, %v472_v17 }
  0x9f   :  { %v376_v58 = vmul.f32 0.00390625, %v289_v45  ;;  %533 = vadd.xlane.f32.xlu0 %v532_v1  ;;  %v470_v3 = vmul.f32 %v1724_v41, %v1724_v41  ;;  %v471_v32 = vmul.f32 %v1727_v21, %v1727_v21  ;;  %v377_v33 = vmul.f32 0.00390625, %v292_v37 }
  0xa0   :  { %v474_v60 = vmul.f32 %v1730_v52, %v1730_v52  ;;  %v475_v36 = vmul.f32 %v1733_v15, %v1733_v15 }
  0xa1   :  { %v1744_v42 = vsub.f32 %v1383_v46, %v376_v58  ;;  %v1747_v7 = vsub.f32 %v1393_v53, %v376_v58  ;;  %v535_v10 = vadd.f32 %v471_v32, %v470_v3  ;;  %v1750_v0 = vsub.f32 %v1395_v56, %v377_v33 }
  0xa2   :  { %v1753_v63 = vsub.f32 %v1397_v57, %v377_v33  ;;  %v295_v23 = vpop.xlane.xlu0 %294  ;;  %v298_v17 = vpop.xlane.xlu1 %297  ;;  %v541_v20 = vadd.f32 %v475_v36, %v474_v60 }
  0xa3   :  { %v378_v16 = vmul.f32 0.00390625, %v295_v23  ;;  %539 = vadd.xlane.f32.xlu0 %v538_v59  ;;  %536 = vadd.xlane.f32.xlu1 %v535_v10  ;;  %v476_v46 = vmul.f32 %v1744_v42, %v1744_v42  ;;  %v477_v53 = vmul.f32 %v1747_v7, %v1747_v7  ;;  %v379_v1 = vmul.f32 0.00390625, %v298_v17 }
  0xa4   :  { %v478_v56 = vmul.f32 %v1750_v0, %v1750_v0  ;;  %v479_v57 = vmul.f32 %v1753_v63, %v1753_v63 }
  0xa5   :  { %v1764_v45 = vsub.f32 %v1412_v4, %v378_v16  ;;  %v1767_v58 = vsub.f32 %v1414_v5, %v378_v16  ;;  %v544_v37 = vadd.f32 %v477_v53, %v476_v46  ;;  %v1770_v59 = vsub.f32 %v1419_v8, %v379_v1 }
  0xa6   :  { %v1773_v3 = vsub.f32 %v1426_v14, %v379_v1  ;;  %v301_v32 = vpop.xlane.xlu0 %300  ;;  %v304_v60 = vpop.xlane.xlu1 %303  ;;  %v547_v36 = vadd.f32 %v479_v57, %v478_v56 }
  0xa7   :  { %v380_v33 = vmul.f32 0.00390625, %v301_v32  ;;  %542 = vadd.xlane.f32.xlu1 %v541_v20  ;;  %545 = vadd.xlane.f32.xlu0 %v544_v37  ;;  %v480_v4 = vmul.f32 %v1764_v45, %v1764_v45  ;;  %v481_v5 = vmul.f32 %v1767_v58, %v1767_v58  ;;  %v381_v10 = vmul.f32 0.00390625, %v304_v60 }
  0xa8   :  { %v482_v8 = vmul.f32 %v1770_v59, %v1770_v59  ;;  %v483_v14 = vmul.f32 %v1773_v3, %v1773_v3 }
  0xa9   :  { %v1784_v23 = vsub.f32 %v1431_v22, %v380_v33  ;;  %v1787_v16 = vsub.f32 %v1441_v29, %v380_v33  ;;  %v550_v17 = vadd.f32 %v481_v5, %v480_v4  ;;  %v1790_v20 = vsub.f32 %v1443_v34, %v381_v10 }
  0xaa   :  { %v1793_v46 = vsub.f32 %v1445_v35, %v381_v10  ;;  %v307_v53 = vpop.xlane.xlu0 %306  ;;  %v310_v56 = vpop.xlane.xlu1 %309  ;;  %v553_v57 = vadd.f32 %v483_v14, %v482_v8 }
  0xab   :  { %v382_v1 = vmul.f32 0.00390625, %v307_v53  ;;  %548 = vadd.xlane.f32.xlu1 %v547_v36  ;;  %551 = vadd.xlane.f32.xlu0 %v550_v17  ;;  %v484_v22 = vmul.f32 %v1784_v23, %v1784_v23  ;;  %v485_v29 = vmul.f32 %v1787_v16, %v1787_v16  ;;  %v383_v37 = vmul.f32 0.00390625, %v310_v56 }
  0xac   :  { %v486_v34 = vmul.f32 %v1790_v20, %v1790_v20  ;;  %v487_v35 = vmul.f32 %v1793_v46, %v1793_v46 }
  0xad   :  { %v1804_v32 = vsub.f32 %v1460_v49, %v382_v1  ;;  %v1807_v33 = vsub.f32 %v1462_v50, %v382_v1  ;;  %v556_v60 = vadd.f32 %v485_v29, %v484_v22  ;;  %v1810_v36 = vsub.f32 %v1467_v54, %v383_v37 }
  0xae   :  { %v1813_v4 = vsub.f32 %v1474_v62, %v383_v37  ;;  %v313_v5 = vpop.xlane.xlu0 %312  ;;  %v316_v8 = vpop.xlane.xlu1 %315  ;;  %v559_v14 = vadd.f32 %v487_v35, %v486_v34 }
  0xaf   :  { %v384_v10 = vmul.f32 0.00390625, %v313_v5  ;;  %554 = vadd.xlane.f32.xlu1 %v553_v57  ;;  %557 = vadd.xlane.f32.xlu0 %v556_v60  ;;  %v488_v49 = vmul.f32 %v1804_v32, %v1804_v32  ;;  %v489_v50 = vmul.f32 %v1807_v33, %v1807_v33  ;;  %v385_v17 = vmul.f32 0.00390625, %v316_v8 }
  0xb0   :  { %v490_v54 = vmul.f32 %v1810_v36, %v1810_v36  ;;  %v491_v62 = vmul.f32 %v1813_v4, %v1813_v4 }
  0xb1   :  { %v1824_v53 = vsub.f32 %v1479_v2, %v384_v10  ;;  %v1827_v1 = vsub.f32 %v1489_v12, %v384_v10  ;;  %v562_v56 = vadd.f32 %v489_v50, %v488_v49  ;;  %v1830_v57 = vsub.f32 %v1491_v18, %v385_v17 }
  0xb2   :  { %v1833_v22 = vsub.f32 %v1493_v19, %v385_v17  ;;  %v319_v29 = vpop.xlane.xlu0 %318  ;;  %v322_v34 = vpop.xlane.xlu1 %321  ;;  %v565_v35 = vadd.f32 %v491_v62, %v490_v54 }
  0xb3   :  { %v386_v37 = vmul.f32 0.00390625, %v319_v29  ;;  %560 = vadd.xlane.f32.xlu1 %v559_v14  ;;  %563 = vadd.xlane.f32.xlu0 %v562_v56  ;;  %v492_v2 = vmul.f32 %v1824_v53, %v1824_v53  ;;  %v493_v12 = vmul.f32 %v1827_v1, %v1827_v1  ;;  %v387_v60 = vmul.f32 0.00390625, %v322_v34 }
  0xb4   :  { %v494_v18 = vmul.f32 %v1830_v57, %v1830_v57  ;;  %v495_v19 = vmul.f32 %v1833_v22, %v1833_v22 }
  0xb5   :  { %v1844_v5 = vsub.f32 %v1508_v39, %v386_v37  ;;  %v1847_v10 = vsub.f32 %v1510_v40, %v386_v37  ;;  %v568_v8 = vadd.f32 %v493_v12, %v492_v2  ;;  %v1850_v14 = vsub.f32 %v1515_v44, %v387_v60  ;;  %v2403_v2 = vld [vmem:[#allocation2_spill] sm:$0xff] }
  0xb6   :  { %v1853_v49 = vsub.f32 %v1522_v55, %v387_v60  ;;  %v325_v50 = vpop.xlane.xlu0 %324  ;;  %v328_v54 = vpop.xlane.xlu1 %327  ;;  %v571_v62 = vadd.f32 %v495_v19, %v494_v18 }
  0xb7   :  { %v388_v17 = vmul.f32 0.00390625, %v325_v50  ;;  %566 = vadd.xlane.f32.xlu1 %v565_v35  ;;  %569 = vadd.xlane.f32.xlu0 %v568_v8  ;;  %v496_v39 = vmul.f32 %v1844_v5, %v1844_v5  ;;  %v497_v40 = vmul.f32 %v1847_v10, %v1847_v10  ;;  %v389_v56 = vmul.f32 0.00390625, %v328_v54  ;;  %v2405_v54 = vld [vmem:[#allocation3_spill] sm:$0xff] }
  0xb8   :  { %v498_v44 = vmul.f32 %v1850_v14, %v1850_v14  ;;  %v499_v55 = vmul.f32 %v1853_v49, %v1853_v49 }
  0xb9   :  { %v1864_v29 = vsub.f32 %v1527_v61, %v388_v17  ;;  %v1867_v37 = vsub.f32 %v1537_v9, %v388_v17  ;;  %v574_v34 = vadd.f32 %v497_v40, %v496_v39  ;;  %v1870_v35 = vsub.f32 %v1539_v13, %v389_v56 }
  0xba   :  { %v1873_v12 = vsub.f32 %v2403_v2, %v389_v56  ;;  %v331_v60 = vpop.xlane.xlu0 %330  ;;  %v334_v19 = vpop.xlane.xlu1 %333  ;;  %v577_v8 = vadd.f32 %v499_v55, %v498_v44  ;;  %v2409_v44 = vld [vmem:[#allocation5_spill] sm:$0xff] }
  0xbb   :  { %2401 = vst [vmem:[#allocation21_spill] sm:$0xff] %v1867_v37  ;;  %2402 = vst [vmem:[#allocation22_spill] sm:$0xff] %v1870_v35  ;;  %v390_v18 = vmul.f32 0.00390625, %v331_v60  ;;  %572 = vadd.xlane.f32.xlu1 %v571_v62  ;;  %575 = vadd.xlane.f32.xlu0 %v574_v34  ;;  %v500_v61 = vmul.f32 %v1864_v29, %v1864_v29  ;;  %v501_v9 = vmul.f32 %v1867_v37, %v1867_v37  ;;  %v2407_v62 = vld [vmem:[#allocation4_spill] sm:$0xff]  ;;  %v2411_v34 = vld [vmem:[#allocation6_spill] sm:$0xff] }
  0xbc   :  { %2404 = vst [vmem:[#allocation2_spill] sm:$0xff] %v1873_v12  ;;  %v391_v50 = vmul.f32 0.00390625, %v334_v19  ;;  %v502_v13 = vmul.f32 %v1870_v35, %v1870_v35  ;;  %v503_v17 = vmul.f32 %v1873_v12, %v1873_v12 }
  0xbd   :  { %v1884_v39 = vsub.f32 %v2405_v54, %v390_v18  ;;  %v1887_v40 = vsub.f32 %v2407_v62, %v390_v18  ;;  %v580_v56 = vadd.f32 %v501_v9, %v500_v61 }
  0xbe   :  { %v1890_v55 = vsub.f32 %v2409_v44, %v391_v50  ;;  %v1893_v2 = vsub.f32 %v2411_v34, %v391_v50  ;;  %v337_v60 = vpop.xlane.xlu0 %336  ;;  %v340_v35 = vpop.xlane.xlu1 %339  ;;  %v583_v37 = vadd.f32 %v503_v17, %v502_v13  ;;  %v2413_v50 = vld [vmem:[#allocation7_spill] sm:$0xff]  ;;  %v2417_v17 = vld [vmem:[#allocation9_spill] sm:$0xff] }
  0xbf   :  { %2406 = vst [vmem:[#allocation3_spill] sm:$0xff] %v1884_v39  ;;  %2408 = vst [vmem:[#allocation4_spill] sm:$0xff] %v1887_v40  ;;  %v392_v19 = vmul.f32 0.00390625, %v337_v60  ;;  %578 = vadd.xlane.f32.xlu1 %v577_v8  ;;  %581 = vadd.xlane.f32.xlu0 %v580_v56  ;;  %v504_v54 = vmul.f32 %v1884_v39, %v1884_v39  ;;  %v505_v18 = vmul.f32 %v1887_v40, %v1887_v40  ;;  %v2415_v8 = vld [vmem:[#allocation8_spill] sm:$0xff]  ;;  %v2419_v60 = vld [vmem:[#allocation10_spill] sm:$0xff] }
  0xc0   :  { %2410 = vst [vmem:[#allocation5_spill] sm:$0xff] %v1890_v55  ;;  %2412 = vst [vmem:[#allocation6_spill] sm:$0xff] %v1893_v2  ;;  %v393_v62 = vmul.f32 0.00390625, %v340_v35  ;;  %v506_v61 = vmul.f32 %v1890_v55, %v1890_v55  ;;  %v507_v9 = vmul.f32 %v1893_v2, %v1893_v2 }
  0xc1   :  { %v1904_v44 = vsub.f32 %v2413_v50, %v392_v19  ;;  %v1907_v56 = vsub.f32 %v2415_v8, %v392_v19  ;;  %v586_v13 = vadd.f32 %v505_v18, %v504_v54 }
  0xc2   :  { %v1910_v34 = vsub.f32 %v2417_v17, %v393_v62  ;;  %v1913_v39 = vsub.f32 %v2419_v60, %v393_v62  ;;  %v343_v35 = vpop.xlane.xlu0 %342  ;;  %v346_v55 = vpop.xlane.xlu1 %345  ;;  %v589_v12 = vadd.f32 %v507_v9, %v506_v61  ;;  %v2420_v62 = vld [vmem:[#allocation11_spill] sm:$0xff]  ;;  %v2424_v9 = vld [vmem:[#allocation13_spill] sm:$0xff] }
  0xc3   :  { %2414 = vst [vmem:[#allocation7_spill] sm:$0xff] %v1904_v44  ;;  %2416 = vst [vmem:[#allocation8_spill] sm:$0xff] %v1907_v56  ;;  %v394_v40 = vmul.f32 0.00390625, %v343_v35  ;;  %584 = vadd.xlane.f32.xlu1 %v583_v37  ;;  %587 = vadd.xlane.f32.xlu0 %v586_v13  ;;  %v508_v50 = vmul.f32 %v1904_v44, %v1904_v44  ;;  %v509_v19 = vmul.f32 %v1907_v56, %v1907_v56  ;;  %v2422_v37 = vld [vmem:[#allocation12_spill] sm:$0xff]  ;;  %v2426_v35 = vld [vmem:[#allocation14_spill] sm:$0xff] }
  0xc4   :  { %2418 = vst [vmem:[#allocation9_spill] sm:$0xff] %v1910_v34  ;;  %v395_v8 = vmul.f32 0.00390625, %v346_v55  ;;  %v510_v54 = vmul.f32 %v1910_v34, %v1910_v34  ;;  %v511_v18 = vmul.f32 %v1913_v39, %v1913_v39 }
  0xc5   :  { %v1924_v17 = vsub.f32 %v2420_v62, %v394_v40  ;;  %v1927_v13 = vsub.f32 %v2422_v37, %v394_v40  ;;  %v592_v61 = vadd.f32 %v509_v19, %v508_v50 }
  0xc6   :  { %v1930_v60 = vsub.f32 %v2424_v9, %v395_v8  ;;  %v1933_v44 = vsub.f32 %v2426_v35, %v395_v8  ;;  %v349_v55 = vpop.xlane.xlu0 %348  ;;  %v352_v34 = vpop.xlane.xlu1 %351  ;;  %v595_v2 = vadd.f32 %v511_v18, %v510_v54  ;;  %v2427_v8 = vld [vmem:[#allocation15_spill] sm:$0xff]  ;;  %v2432_v35 = vld [vmem:[#allocation17_spill] sm:$0xff] }
  0xc7   :  { %2421 = vst [vmem:[#allocation10_spill] sm:$0xff] %v1924_v17  ;;  %2423 = vst [vmem:[#allocation11_spill] sm:$0xff] %v1927_v13  ;;  %v396_v56 = vmul.f32 0.00390625, %v349_v55  ;;  %590 = vadd.xlane.f32.xlu1 %v589_v12  ;;  %593 = vadd.xlane.f32.xlu0 %v592_v61  ;;  %v512_v62 = vmul.f32 %v1924_v17, %v1924_v17  ;;  %v513_v40 = vmul.f32 %v1927_v13, %v1927_v13  ;;  %v2429_v12 = vld [vmem:[#allocation16_spill] sm:$0xff] }
  0xc8   :  { %2425 = vst [vmem:[#allocation12_spill] sm:$0xff] %v1930_v60  ;;  %v397_v37 = vmul.f32 0.00390625, %v352_v34  ;;  %v514_v50 = vmul.f32 %v1930_v60, %v1930_v60  ;;  %v515_v19 = vmul.f32 %v1933_v44, %v1933_v44 }
  0xc9   :  { %v1944_v9 = vsub.f32 %v2427_v8, %v396_v56  ;;  %v1947_v61 = vsub.f32 %v2429_v12, %v396_v56  ;;  %v598_v54 = vadd.f32 %v513_v40, %v512_v62  ;;  %v2433_v40 = vld [vmem:[#allocation18_spill] sm:$0xff] }
  0xca   :  { %v1950_v18 = vsub.f32 %v1643_v31, %v397_v37  ;;  %v1953_v55 = vsub.f32 %v2432_v35, %v397_v37  ;;  %v355_v34 = vpop.xlane.xlu0 %354  ;;  %v358_v60 = vpop.xlane.xlu1 %357  ;;  %v601_v17 = vadd.f32 %v515_v19, %v514_v50  ;;  %v2435_v35 = vld [vmem:[#allocation20_spill] sm:$0xff] }
  0xcb   :  { %2428 = vst [vmem:[#allocation13_spill] sm:$0xff] %v1944_v9  ;;  %2430 = vst [vmem:[#allocation14_spill] sm:$0xff] %v1947_v61  ;;  %v398_v13 = vmul.f32 0.00390625, %v355_v34  ;;  %596 = vadd.xlane.f32.xlu1 %v595_v2  ;;  %599 = vadd.xlane.f32.xlu0 %v598_v54  ;;  %v516_v8 = vmul.f32 %v1944_v9, %v1944_v9  ;;  %v517_v56 = vmul.f32 %v1947_v61, %v1947_v61  ;;  %v2434_v2 = vld [vmem:[#allocation19_spill] sm:$0xff] }
  0xcc   :  { %2431 = vst [vmem:[#allocation15_spill] sm:$0xff] %v1950_v18  ;;  %v399_v12 = vmul.f32 0.00390625, %v358_v60  ;;  %v518_v31 = vmul.f32 %v1950_v18, %v1950_v18  ;;  %v519_v62 = vmul.f32 %v1953_v55, %v1953_v55 }
  0xcd   :  { %v1964_v37 = vsub.f32 %v2433_v40, %v398_v13  ;;  %v1967_v54 = vsub.f32 %v2434_v2, %v398_v13  ;;  %v604_v50 = vadd.f32 %v517_v56, %v516_v8 }
  0xce   :  { %v1970_v19 = vsub.f32 %v1657_v48, %v399_v12  ;;  %v1973_v34 = vsub.f32 %v2435_v35, %v399_v12  ;;  %v361_v60 = vpop.xlane.xlu0 %360  ;;  %v364_v18 = vpop.xlane.xlu1 %363  ;;  %v607_v9 = vadd.f32 %v519_v62, %v518_v31 }
  0xcf   :  { %v400_v61 = vmul.f32 0.00390625, %v361_v60  ;;  %602 = vadd.xlane.f32.xlu1 %v601_v17  ;;  %605 = vadd.xlane.f32.xlu0 %v604_v50  ;;  %v520_v40 = vmul.f32 %v1964_v37, %v1964_v37  ;;  %v521_v13 = vmul.f32 %v1967_v54, %v1967_v54  ;;  %v401_v2 = vmul.f32 0.00390625, %v364_v18 }
  0xd0   :  { %v522_v48 = vmul.f32 %v1970_v19, %v1970_v19  ;;  %v523_v8 = vmul.f32 %v1973_v34, %v1973_v34 }
  0xd1   :  { %v1984_v56 = vsub.f32 %v1671_v51, %v400_v61  ;;  %v1987_v17 = vsub.f32 %v1681_v47, %v400_v61  ;;  %v610_v12 = vadd.f32 %v521_v13, %v520_v40  ;;  %v1990_v31 = vsub.f32 %v1683_v26, %v401_v2 }
  0xd2   :  { %v1993_v62 = vsub.f32 %v1685_v25, %v401_v2  ;;  %v367_v18 = vpop.xlane.xlu0 %366  ;;  %v370_v35 = vpop.xlane.xlu1 %369  ;;  %v613_v60 = vadd.f32 %v523_v8, %v522_v48 }
  0xd3   :  { %v402_v50 = vmul.f32 0.00390625, %v367_v18  ;;  %608 = vadd.xlane.f32.xlu1 %v607_v9  ;;  %611 = vadd.xlane.f32.xlu0 %v610_v12  ;;  %v524_v51 = vmul.f32 %v1984_v56, %v1984_v56  ;;  %v525_v47 = vmul.f32 %v1987_v17, %v1987_v17  ;;  %v403_v61 = vmul.f32 0.00390625, %v370_v35 }
  0xd4   :  { %2436 = vst [vmem:[#allocation16_spill] sm:$0xff] %v1993_v62  ;;  %v526_v26 = vmul.f32 %v1990_v31, %v1990_v31  ;;  %v527_v25 = vmul.f32 %v1993_v62, %v1993_v62 }
  0xd5   :  { %v2004_v40 = vsub.f32 %v1689_v28, %v402_v50  ;;  %v2007_v9 = vsub.f32 %v1691_v43, %v402_v50  ;;  %v616_v13 = vadd.f32 %v525_v47, %v524_v51  ;;  %v2010_v2 = vsub.f32 %v1695_v11, %v403_v61 }
  0xd6   :  { %v2013_v48 = vsub.f32 %v1697_v27, %v403_v61  ;;  %v619_v8 = vadd.f32 %v527_v25, %v526_v26 }
  0xd7   :  { %2437 = vst [vmem:[#allocation17_spill] sm:$0xff] %v2004_v40  ;;  %2438 = vst [vmem:[#allocation18_spill] sm:$0xff] %v2007_v9  ;;  %614 = vadd.xlane.f32.xlu1 %v613_v60  ;;  %617 = vadd.xlane.f32.xlu0 %v616_v13  ;;  %v528_v12 = vmul.f32 %v2004_v40, %v2004_v40  ;;  %v529_v28 = vmul.f32 %v2007_v9, %v2007_v9  ;;  %v789_v60 = vlaneseq }
  0xd8   :  { %2439 = vst [vmem:[#allocation19_spill] sm:$0xff] %v2010_v2  ;;  %2440 = vst [vmem:[#allocation20_spill] sm:$0xff] %v2013_v48  ;;  %v530_v43 = vmul.f32 %v2010_v2, %v2010_v2  ;;  %v531_v18 = vmul.f32 %v2013_v48, %v2013_v48 }
  0xd9   :  { %v622_v11 = vadd.f32 %v529_v28, %v528_v12  ;;  %v790_v13 = vshrl.u32 %v789_v60, 7  ;;  %v274_v60 = vld [vmem:[%s2340_s3] sm:$0x3] }
  0xda   :  { %v625_v27 = vadd.f32 %v531_v18, %v530_v43  ;;  %v273_v18 = vld [vmem:[%s2339_s2] sm:$0x3] }
  0xdb   :  { %620 = vadd.xlane.f32.xlu1 %v619_v8  ;;  %623 = vadd.xlane.f32.xlu0 %v622_v11  ;;  %v791_v28 = vsub.s32 0, %v790_v13  ;;  %v795_v43 = vsub.s32 1, %v790_v13 }
  0xdf   :  { %626 = vadd.xlane.f32.xlu1 %v625_v27 }
 0x12c   :  { %v534_v50 = vpop.xlane.xlu0 %533 }
 0x12d   :  { %v628_v35 = vmul.f32 0.00390625, %v534_v50 }
 0x12f   :  { %v660_v51 = vadd.f32 1e-12, %v628_v35 }
 0x130   :  { %v537_v47 = vpop.xlane.xlu1 %536  ;;  %v540_v61 = vpop.xlane.xlu0 %539 }
 0x131   :  { %1230 = vrsqrt.f32 %v660_v51  ;;  %v629_v26 = vmul.f32 0.00390625, %v537_v47  ;;  %v630_v25 = vmul.f32 0.00390625, %v540_v61 }
 0x133   :  { %v661_v9 = vadd.f32 1e-12, %v629_v26  ;;  %v662_v2 = vadd.f32 1e-12, %v630_v25  ;;  %v2033_v26 = vrot.slane %v274_v60, %v791_v28  ;;  %v2035_v25 = vrot.slane %v274_v60, %v795_v43 }
 0x134   :  { %v543_v40 = vpop.xlane.xlu1 %542  ;;  %v546_v62 = vpop.xlane.xlu0 %545 }
 0x135   :  { %1232 = vrsqrt.f32 %v661_v9  ;;  %v631_v12 = vmul.f32 0.00390625, %v543_v40  ;;  %v632_v8 = vmul.f32 0.00390625, %v546_v62  ;;  %v2029_v40 = vrot.slane %v273_v18, %v791_v28 }
 0x136   :  { %1234 = vrsqrt.f32 %v662_v2  ;;  %v2031_v62 = vrot.slane %v273_v18, %v795_v43 }
 0x137   :  { %v663_v11 = vadd.f32 1e-12, %v631_v12  ;;  %v664_v27 = vadd.f32 1e-12, %v632_v8 }
 0x138   :  { %v549_v50 = vpop.xlane.xlu1 %548  ;;  %v552_v35 = vpop.xlane.xlu0 %551 }
 0x139   :  { %1236 = vrsqrt.f32 %v663_v11  ;;  %v633_v51 = vmul.f32 0.00390625, %v549_v50  ;;  %v634_v9 = vmul.f32 0.00390625, %v552_v35 }
 0x13a   :  { %1238 = vrsqrt.f32 %v664_v27 }
 0x13b   :  { %v1231_v2 = vpop.eup %1230  ;;  %v665_v47 = vadd.f32 1e-12, %v633_v51  ;;  %v666_v61 = vadd.f32 1e-12, %v634_v9 }
 0x13c   :  { %v724_v13 = vmul.f32 %v1231_v2, %v1704_v38  ;;  %v725_v12 = vmul.f32 %v1231_v2, %v1707_v30  ;;  %v555_v8 = vpop.xlane.xlu1 %554  ;;  %v558_v11 = vpop.xlane.xlu0 %557 }
 0x13d   :  { %1240 = vrsqrt.f32 %v665_v47  ;;  %v635_v50 = vmul.f32 0.00390625, %v555_v8  ;;  %v636_v35 = vmul.f32 0.00390625, %v558_v11 }
 0x13e   :  { %v799_v18 = vmul.f32 %v2029_v40, %v724_v13  ;;  %v800_v27 = vmul.f32 %v2031_v62, %v725_v12  ;;  %1242 = vrsqrt.f32 %v666_v61 }
 0x13f   :  { %v1233_v51 = vpop.eup %1232  ;;  %v667_v9 = vadd.f32 1e-12, %v635_v50  ;;  %v668_v28 = vadd.f32 1e-12, %v636_v35 }
 0x140   :  { %v1235_v48 = vpop.eup %1234  ;;  %v874_v43 = vadd.f32 %v2033_v26, %v799_v18  ;;  %v875_v38 = vadd.f32 %v2035_v25, %v800_v27  ;;  %v726_v30 = vmul.f32 %v1233_v51, %v1724_v41  ;;  %v727_v60 = vmul.f32 %v1233_v51, %v1727_v21  ;;  %v561_v2 = vpop.xlane.xlu1 %560 }
 0x141   :  { %v564_v47 = vpop.xlane.xlu0 %563  ;;  %v728_v8 = vmul.f32 %v1235_v48, %v1710_v6  ;;  %v729_v13 = vmul.f32 %v1235_v48, %v1713_v24  ;;  %1244 = vrsqrt.f32 %v667_v9  ;;  %v637_v61 = vmul.f32 0.00390625, %v561_v2 }
 0x142   :  { %v1198_v12 = vpack.c.bf16 %v875_v38, %v874_v43  ;;  %v801_v11 = vmul.f32 %v2029_v40, %v726_v30  ;;  %v802_v50 = vmul.f32 %v2031_v62, %v727_v60  ;;  %1246 = vrsqrt.f32 %v668_v28 }
 0x143   :  { %v1237_v35 = vpop.eup %1236  ;;  %v803_v18 = vmul.f32 %v2029_v40, %v728_v8  ;;  %v804_v41 = vmul.f32 %v2031_v62, %v729_v13  ;;  %v669_v21 = vadd.f32 1e-12, %v637_v61  ;;  %v638_v27 = vmul.f32 0.00390625, %v564_v47 }
 0x144   :  { %v1239_v51 = vpop.eup %1238  ;;  %1130 = vst [vmem:[%s2341_s4] sm:$0xff] %v1198_v12  ;;  %v876_v6 = vadd.f32 %v2033_v26, %v801_v11  ;;  %v877_v24 = vadd.f32 %v2035_v25, %v802_v50  ;;  %v730_v48 = vmul.f32 %v1237_v35, %v1730_v52  ;;  %v731_v9 = vmul.f32 %v1237_v35, %v1733_v15  ;;  %v567_v28 = vpop.xlane.xlu1 %566 }
 0x145   :  { %v570_v43 = vpop.xlane.xlu0 %569  ;;  %v878_v38 = vadd.f32 %v2033_v26, %v803_v18  ;;  %v879_v30 = vadd.f32 %v2035_v25, %v804_v41  ;;  %v732_v60 = vmul.f32 %v1239_v51, %v1744_v42  ;;  %v733_v2 = vmul.f32 %v1239_v51, %v1747_v7 }
 0x146   :  { %v1199_v47 = vpack.c.bf16 %v877_v24, %v876_v6  ;;  %v805_v8 = vmul.f32 %v2029_v40, %v730_v48  ;;  %v806_v13 = vmul.f32 %v2031_v62, %v731_v9  ;;  %1248 = vrsqrt.f32 %v669_v21 }
 0x147   :  { %v1241_v61 = vpop.eup %1240  ;;  %v1200_v52 = vpack.c.bf16 %v879_v30, %v878_v38  ;;  %v807_v15 = vmul.f32 %v2029_v40, %v732_v60  ;;  %v808_v12 = vmul.f32 %v2031_v62, %v733_v2  ;;  %v670_v11 = vadd.f32 1e-12, %v638_v27 }
 0x148   :  { %v1243_v50 = vpop.eup %1242  ;;  %1131 = vst [vmem:[%s2341_s4 + $0x8] sm:$0xff] %v1199_v47  ;;  %v880_v42 = vadd.f32 %v2033_v26, %v805_v8  ;;  %v881_v7 = vadd.f32 %v2035_v25, %v806_v13  ;;  %v734_v35 = vmul.f32 %v1241_v61, %v1750_v0  ;;  %v735_v18 = vmul.f32 %v1241_v61, %v1753_v63  ;;  %v573_v41 = vpop.xlane.xlu1 %572 }
 0x149   :  { %v576_v21 = vpop.xlane.xlu0 %575  ;;  %1132 = vst [vmem:[%s2341_s4 + $0x10] sm:$0xff] %v1200_v52  ;;  %v882_v27 = vadd.f32 %v2033_v26, %v807_v15  ;;  %v883_v51 = vadd.f32 %v2035_v25, %v808_v12  ;;  %v736_v6 = vmul.f32 %v1243_v50, %v1764_v45  ;;  %v737_v24 = vmul.f32 %v1243_v50, %v1767_v58 }
 0x14a   :  { %v1201_v48 = vpack.c.bf16 %v881_v7, %v880_v42  ;;  %v809_v9 = vmul.f32 %v2029_v40, %v734_v35  ;;  %v810_v0 = vmul.f32 %v2031_v62, %v735_v18  ;;  %1250 = vrsqrt.f32 %v670_v11 }
 0x14b   :  { %v1245_v63 = vpop.eup %1244  ;;  %v1202_v38 = vpack.c.bf16 %v883_v51, %v882_v27  ;;  %v811_v30 = vmul.f32 %v2029_v40, %v736_v6  ;;  %v812_v60 = vmul.f32 %v2031_v62, %v737_v24  ;;  %v639_v2 = vmul.f32 0.00390625, %v567_v28 }
 0x14c   :  { %v1247_v47 = vpop.eup %1246  ;;  %1133 = vst [vmem:[%s2341_s4 + $0x18] sm:$0xff] %v1201_v48  ;;  %v884_v45 = vadd.f32 %v2033_v26, %v809_v9  ;;  %v885_v58 = vadd.f32 %v2035_v25, %v810_v0  ;;  %v738_v8 = vmul.f32 %v1245_v63, %v1770_v59  ;;  %v739_v13 = vmul.f32 %v1245_v63, %v1773_v3  ;;  %v579_v61 = vpop.xlane.xlu1 %578 }
 0x14d   :  { %v582_v52 = vpop.xlane.xlu0 %581  ;;  %1134 = vst [vmem:[%s2341_s4 + $0x20] sm:$0xff] %v1202_v38  ;;  %v886_v28 = vadd.f32 %v2033_v26, %v811_v30  ;;  %v887_v15 = vadd.f32 %v2035_v25, %v812_v60  ;;  %v740_v12 = vmul.f32 %v1247_v47, %v1784_v23  ;;  %v741_v11 = vmul.f32 %v1247_v47, %v1787_v16 }
 0x14e   :  { %v1203_v50 = vpack.c.bf16 %v885_v58, %v884_v45  ;;  %v813_v42 = vmul.f32 %v2029_v40, %v738_v8  ;;  %v814_v59 = vmul.f32 %v2031_v62, %v739_v13  ;;  %v671_v3 = vadd.f32 1e-12, %v639_v2 }
 0x14f   :  { %v1204_v7 = vpack.c.bf16 %v887_v15, %v886_v28  ;;  %v815_v35 = vmul.f32 %v2029_v40, %v740_v12  ;;  %v816_v18 = vmul.f32 %v2031_v62, %v741_v11  ;;  %v640_v27 = vmul.f32 0.00390625, %v570_v43 }
 0x150   :  { %v1249_v51 = vpop.eup %1248  ;;  %1135 = vst [vmem:[%s2341_s4 + $0x28] sm:$0xff] %v1203_v50  ;;  %v888_v23 = vadd.f32 %v2033_v26, %v813_v42  ;;  %v889_v16 = vadd.f32 %v2035_v25, %v814_v59  ;;  %1252 = vrsqrt.f32 %v671_v3  ;;  %v641_v6 = vmul.f32 0.00390625, %v573_v41  ;;  %v585_v24 = vpop.xlane.xlu1 %584 }
 0x151   :  { %v588_v48 = vpop.xlane.xlu0 %587  ;;  %1136 = vst [vmem:[%s2341_s4 + $0x30] sm:$0xff] %v1204_v7  ;;  %v890_v9 = vadd.f32 %v2033_v26, %v815_v35  ;;  %v891_v43 = vadd.f32 %v2035_v25, %v816_v18  ;;  %v742_v0 = vmul.f32 %v1249_v51, %v1790_v20  ;;  %v743_v63 = vmul.f32 %v1249_v51, %v1793_v46 }
 0x152   :  { %v1205_v38 = vpack.c.bf16 %v889_v16, %v888_v23  ;;  %v672_v30 = vadd.f32 1e-12, %v640_v27  ;;  %v673_v60 = vadd.f32 1e-12, %v641_v6  ;;  %v642_v2 = vmul.f32 0.00390625, %v576_v21 }
 0x153   :  { %v1206_v47 = vpack.c.bf16 %v891_v43, %v890_v9  ;;  %v817_v41 = vmul.f32 %v2029_v40, %v742_v0  ;;  %v818_v45 = vmul.f32 %v2031_v62, %v743_v63  ;;  %v643_v58 = vmul.f32 0.00390625, %v579_v61 }
 0x154   :  { %v1251_v8 = vpop.eup %1250  ;;  %1137 = vst [vmem:[%s2341_s4 + $0x38] sm:$0xff] %v1205_v38  ;;  %1254 = vrsqrt.f32 %v672_v30  ;;  %v674_v13 = vadd.f32 1e-12, %v642_v2  ;;  %v644_v20 = vmul.f32 0.00390625, %v582_v52  ;;  %v645_v28 = vmul.f32 0.00390625, %v585_v24  ;;  %v591_v46 = vpop.xlane.xlu1 %590 }
 0x155   :  { %v594_v15 = vpop.xlane.xlu0 %593  ;;  %1138 = vst [vmem:[%s2341_s4 + $0x40] sm:$0xff] %v1206_v47  ;;  %v892_v21 = vadd.f32 %v2033_v26, %v817_v41  ;;  %v893_v12 = vadd.f32 %v2035_v25, %v818_v45  ;;  %v744_v61 = vmul.f32 %v1251_v8, %v1804_v32  ;;  %v745_v11 = vmul.f32 %v1251_v8, %v1807_v33 }
 0x156   :  { %1256 = vrsqrt.f32 %v673_v60  ;;  %v675_v50 = vadd.f32 1e-12, %v643_v58  ;;  %v676_v42 = vadd.f32 1e-12, %v644_v20  ;;  %v677_v59 = vadd.f32 1e-12, %v645_v28 }
 0x157   :  { %v1207_v52 = vpack.c.bf16 %v893_v12, %v892_v21  ;;  %v819_v3 = vmul.f32 %v2029_v40, %v744_v61  ;;  %v820_v7 = vmul.f32 %v2031_v62, %v745_v11  ;;  %1258 = vrsqrt.f32 %v674_v13 }
 0x158   :  { %1260 = vrsqrt.f32 %v675_v50  ;;  %v646_v35 = vmul.f32 0.00390625, %v588_v48  ;;  %v647_v18 = vmul.f32 0.00390625, %v591_v46  ;;  %v648_v27 = vmul.f32 0.00390625, %v594_v15  ;;  %v597_v51 = vpop.xlane.xlu1 %596 }
 0x159   :  { %v600_v23 = vpop.xlane.xlu0 %599  ;;  %1139 = vst [vmem:[%s2341_s4 + $0x48] sm:$0xff] %v1207_v52  ;;  %v894_v32 = vadd.f32 %v2033_v26, %v819_v3  ;;  %v895_v33 = vadd.f32 %v2035_v25, %v820_v7  ;;  %1262 = vrsqrt.f32 %v676_v42  ;;  %v649_v16 = vmul.f32 0.00390625, %v597_v51 }
 0x15a   :  { %v1253_v6 = vpop.eup %1252  ;;  %1264 = vrsqrt.f32 %v677_v59  ;;  %v678_v24 = vadd.f32 1e-12, %v646_v35  ;;  %v679_v9 = vadd.f32 1e-12, %v647_v18  ;;  %v680_v43 = vadd.f32 1e-12, %v648_v27 }
 0x15b   :  { %v1208_v48 = vpack.c.bf16 %v895_v33, %v894_v32  ;;  %v746_v0 = vmul.f32 %v1253_v6, %v1810_v36  ;;  %v747_v63 = vmul.f32 %v1253_v6, %v1813_v4  ;;  %v681_v38 = vadd.f32 1e-12, %v649_v16 }
 0x15c   :  { %1266 = vrsqrt.f32 %v678_v24  ;;  %v650_v30 = vmul.f32 0.00390625, %v600_v23  ;;  %v603_v60 = vpop.xlane.xlu1 %602 }
 0x15d   :  { %v606_v2 = vpop.xlane.xlu0 %605  ;;  %1140 = vst [vmem:[%s2341_s4 + $0x50] sm:$0xff] %v1208_v48  ;;  %v821_v47 = vmul.f32 %v2029_v40, %v746_v0  ;;  %v822_v41 = vmul.f32 %v2031_v62, %v747_v63  ;;  %1268 = vrsqrt.f32 %v679_v9  ;;  %v651_v45 = vmul.f32 0.00390625, %v603_v60  ;;  %v2441_v63 = vld [vmem:[#allocation21_spill] sm:$0xff] }
 0x15e   :  { %v1255_v58 = vpop.eup %1254  ;;  %1270 = vrsqrt.f32 %v680_v43  ;;  %v682_v36 = vadd.f32 1e-12, %v650_v30  ;;  %v652_v8 = vmul.f32 0.00390625, %v606_v2  ;;  %v2442_v30 = vld [vmem:[#allocation22_spill] sm:$0xff] }
 0x15f   :  { %v896_v4 = vadd.f32 %v2033_v26, %v821_v47  ;;  %v897_v13 = vadd.f32 %v2035_v25, %v822_v41  ;;  %v748_v20 = vmul.f32 %v1255_v58, %v1824_v53  ;;  %v749_v28 = vmul.f32 %v1255_v58, %v1827_v1 }
 0x160   :  { %v1257_v46 = vpop.eup %1256  ;;  %1272 = vrsqrt.f32 %v681_v38  ;;  %v2144_v15 = vadd.f32 1e-12, %v651_v45  ;;  %v2146_v21 = vadd.f32 1e-12, %v652_v8  ;;  %v2161_v27 = vpop.xlane.xlu1 %608 }
 0x161   :  { %v1259_v12 = vpop.eup %1258  ;;  %v1209_v61 = vpack.c.bf16 %v897_v13, %v896_v4  ;;  %v823_v11 = vmul.f32 %v2029_v40, %v748_v20  ;;  %v824_v50 = vmul.f32 %v2031_v62, %v749_v28  ;;  %v750_v42 = vmul.f32 %v1257_v46, %v1830_v57  ;;  %v2181_v2 = vpop.xlane.xlu0 %611  ;;  %v2444_v28 = vld [vmem:[#allocation3_spill] sm:$0xff] }
 0x162   :  { %v1261_v59 = vpop.eup %1260  ;;  %v751_v52 = vmul.f32 %v1257_v46, %v1833_v22  ;;  %v752_v53 = vmul.f32 %v1259_v12, %v1844_v5  ;;  %v753_v1 = vmul.f32 %v1259_v12, %v1847_v10  ;;  %1274 = vrsqrt.f32 %v682_v36  ;;  %v2443_v36 = vld [vmem:[#allocation2_spill] sm:$0xff] }
 0x163   :  { %v1263_v3 = vpop.eup %1262  ;;  %1141 = vst [vmem:[%s2341_s4 + $0x58] sm:$0xff] %v1209_v61  ;;  %v898_v7 = vadd.f32 %v2033_v26, %v823_v11  ;;  %v899_v35 = vadd.f32 %v2035_v25, %v824_v50  ;;  %v825_v18 = vmul.f32 %v2029_v40, %v750_v42  ;;  %v754_v57 = vmul.f32 %v1261_v59, %v1850_v14  ;;  %v2445_v42 = vld [vmem:[#allocation4_spill] sm:$0xff] }
 0x164   :  { %v1265_v22 = vpop.eup %1264  ;;  %v826_v5 = vmul.f32 %v2031_v62, %v751_v52  ;;  %v827_v10 = vmul.f32 %v2029_v40, %v752_v53  ;;  %v828_v51 = vmul.f32 %v2031_v62, %v753_v1  ;;  %v755_v23 = vmul.f32 %v1261_v59, %v1853_v49  ;;  %v615_v12 = vpop.xlane.xlu1 %614  ;;  %v2446_v52 = vld [vmem:[#allocation5_spill] sm:$0xff] }
 0x165   :  { %v1210_v32 = vpack.c.bf16 %v899_v35, %v898_v7  ;;  %v900_v33 = vadd.f32 %v2033_v26, %v825_v18  ;;  %v829_v16 = vmul.f32 %v2029_v40, %v754_v57  ;;  %v756_v6 = vmul.f32 %v1263_v3, %v1864_v29  ;;  %v2447_v35 = vld [vmem:[#allocation6_spill] sm:$0xff] }
 0x166   :  { %v1267_v24 = vpop.eup %1266  ;;  %v901_v14 = vadd.f32 %v2035_v25, %v826_v5  ;;  %v902_v9 = vadd.f32 %v2033_v26, %v827_v10  ;;  %v903_v43 = vadd.f32 %v2035_v25, %v828_v51  ;;  %v830_v48 = vmul.f32 %v2031_v62, %v755_v23  ;;  %v2448_v51 = vld [vmem:[#allocation7_spill] sm:$0xff] }
 0x167   :  { %v1269_v0 = vpop.eup %1268  ;;  %1142 = vst [vmem:[%s2341_s4 + $0x60] sm:$0xff] %v1210_v32  ;;  %v904_v49 = vadd.f32 %v2033_v26, %v829_v16  ;;  %v757_v38 = vmul.f32 %v1263_v3, %v2441_v63  ;;  %v831_v29 = vmul.f32 %v2029_v40, %v756_v6  ;;  %v758_v60 = vmul.f32 %v1265_v22, %v2442_v30  ;;  %v2449_v6 = vld [vmem:[#allocation8_spill] sm:$0xff] }
 0x168   :  { %v1271_v47 = vpop.eup %1270  ;;  %v1211_v41 = vpack.c.bf16 %v901_v14, %v900_v33  ;;  %v1212_v45 = vpack.c.bf16 %v903_v43, %v902_v9  ;;  %v905_v58 = vadd.f32 %v2035_v25, %v830_v48  ;;  %v759_v8 = vmul.f32 %v1265_v22, %v2443_v36  ;;  %v618_v14 = vpop.xlane.xlu0 %617  ;;  %v2452_v36 = vld [vmem:[#allocation11_spill] sm:$0xff] }
 0x169   :  { %v832_v4 = vmul.f32 %v2031_v62, %v757_v38  ;;  %v906_v13 = vadd.f32 %v2033_v26, %v831_v29  ;;  %v833_v20 = vmul.f32 %v2029_v40, %v758_v60  ;;  %v760_v46 = vmul.f32 %v1267_v24, %v2444_v28  ;;  %v2450_v38 = vld [vmem:[#allocation9_spill] sm:$0xff]  ;;  %v621_v60 = vpop.xlane.xlu1 %620 }
 0x16a   :  { %v1273_v61 = vpop.eup %1272  ;;  %1143 = vst [vmem:[%s2341_s4 + $0x68] sm:$0xff] %v1211_v41  ;;  %1144 = vst [vmem:[%s2341_s4 + $0x70] sm:$0xff] %v1212_v45  ;;  %v1213_v11 = vpack.c.bf16 %v905_v58, %v904_v49  ;;  %v834_v50 = vmul.f32 %v2031_v62, %v759_v8  ;;  %v761_v59 = vmul.f32 %v1267_v24, %v2445_v42  ;;  %v2451_v45 = vld [vmem:[#allocation10_spill] sm:$0xff]  ;;  %1276 = vrsqrt.f32 %v2144_v15 }
 0x16b   :  { %v762_v53 = vmul.f32 %v1269_v0, %v2446_v52  ;;  %v907_v1 = vadd.f32 %v2035_v25, %v832_v4  ;;  %v908_v3 = vadd.f32 %v2033_v26, %v833_v20  ;;  %v835_v7 = vmul.f32 %v2029_v40, %v760_v46 }
 0x16c   :  { %v763_v18 = vmul.f32 %v1269_v0, %v2447_v35  ;;  %v1275_v57 = vpop.eup %1274  ;;  %1145 = vst [vmem:[%s2341_s4 + $0x78] sm:$0xff] %v1213_v11  ;;  %v909_v22 = vadd.f32 %v2035_v25, %v834_v50  ;;  %v836_v5 = vmul.f32 %v2031_v62, %v761_v59  ;;  %v764_v23 = vmul.f32 %v1271_v47, %v2448_v51  ;;  %v624_v59 = vpop.xlane.xlu0 %623 }
 0x16d   :  { %v837_v10 = vmul.f32 %v2029_v40, %v762_v53  ;;  %v1214_v32 = vpack.c.bf16 %v907_v1, %v906_v13  ;;  %v910_v33 = vadd.f32 %v2033_v26, %v835_v7  ;;  %v765_v24 = vmul.f32 %v1271_v47, %v2449_v6 }
 0x16e   :  { %v838_v16 = vmul.f32 %v2031_v62, %v763_v18  ;;  %v1215_v9 = vpack.c.bf16 %v909_v22, %v908_v3  ;;  %v911_v43 = vadd.f32 %v2035_v25, %v836_v5  ;;  %v839_v0 = vmul.f32 %v2029_v40, %v764_v23  ;;  %v627_v18 = vpop.xlane.xlu1 %626 }
 0x16f   :  { %v912_v48 = vadd.f32 %v2033_v26, %v837_v10  ;;  %1146 = vst [vmem:[%s2341_s4 + $0x80] sm:$0xff] %v1214_v32  ;;  %v840_v63 = vmul.f32 %v2031_v62, %v765_v24  ;;  %v766_v29 = vmul.f32 %v1273_v61, %v2450_v38  ;;  %v767_v30 = vmul.f32 %v1273_v61, %v1913_v39 }
 0x170   :  { %v913_v49 = vadd.f32 %v2035_v25, %v838_v16  ;;  %1147 = vst [vmem:[%s2341_s4 + $0x88] sm:$0xff] %v1215_v9  ;;  %v1216_v47 = vpack.c.bf16 %v911_v43, %v910_v33  ;;  %v914_v41 = vadd.f32 %v2033_v26, %v839_v0  ;;  %v768_v58 = vmul.f32 %v1275_v57, %v2451_v45  ;;  %v2453_v16 = vld [vmem:[#allocation12_spill] sm:$0xff]  ;;  %v2455_v43 = vld [vmem:[#allocation14_spill] sm:$0xff] }
 0x171   :  { %v769_v8 = vmul.f32 %v1275_v57, %v2452_v36  ;;  %v915_v13 = vadd.f32 %v2035_v25, %v840_v63  ;;  %v841_v20 = vmul.f32 %v2029_v40, %v766_v29  ;;  %v842_v28 = vmul.f32 %v2031_v62, %v767_v30 }
 0x172   :  { %v1217_v4 = vpack.c.bf16 %v913_v49, %v912_v48  ;;  %1148 = vst [vmem:[%s2341_s4 + $0x90] sm:$0xff] %v1216_v47  ;;  %v843_v39 = vmul.f32 %v2029_v40, %v768_v58  ;;  %v653_v61 = vmul.f32 0.00390625, %v2161_v27  ;;  %1278 = vrsqrt.f32 %v2146_v21  ;;  %v2456_v47 = vld [vmem:[#allocation15_spill] sm:$0xff] }
 0x173   :  { %v844_v46 = vmul.f32 %v2031_v62, %v769_v8  ;;  %v1218_v11 = vpack.c.bf16 %v915_v13, %v914_v41  ;;  %v916_v50 = vadd.f32 %v2033_v26, %v841_v20  ;;  %v917_v42 = vadd.f32 %v2035_v25, %v842_v28 }
 0x174   :  { %1149 = vst [vmem:[%s2341_s4 + $0x98] sm:$0xff] %v1217_v4  ;;  %v918_v52 = vadd.f32 %v2033_v26, %v843_v39  ;;  %v685_v1 = vadd.f32 1e-12, %v653_v61  ;;  %v654_v15 = vmul.f32 0.00390625, %v2181_v2  ;;  %v655_v3 = vmul.f32 0.00390625, %v615_v12  ;;  %v1277_v32 = vpop.eup %1276 }
 0x175   :  { %v919_v53 = vadd.f32 %v2035_v25, %v844_v46  ;;  %1150 = vst [vmem:[%s2341_s4 + $0xa0] sm:$0xff] %v1218_v11  ;;  %v1219_v27 = vpack.c.bf16 %v917_v42, %v916_v50  ;;  %v656_v7 = vmul.f32 0.00390625, %v618_v14  ;;  %v657_v35 = vmul.f32 0.00390625, %v621_v60  ;;  %v2454_v14 = vld [vmem:[#allocation13_spill] sm:$0xff] }
 0x176   :  { %1280 = vrsqrt.f32 %v685_v1  ;;  %v686_v21 = vadd.f32 1e-12, %v654_v15  ;;  %v658_v22 = vmul.f32 0.00390625, %v624_v59  ;;  %v687_v5 = vadd.f32 1e-12, %v655_v3 }
 0x177   :  { %v1220_v57 = vpack.c.bf16 %v919_v53, %v918_v52  ;;  %1151 = vst [vmem:[%s2341_s4 + $0xa8] sm:$0xff] %v1219_v27  ;;  %v688_v10 = vadd.f32 1e-12, %v656_v7  ;;  %v689_v2 = vadd.f32 1e-12, %v657_v35  ;;  %v659_v51 = vmul.f32 0.00390625, %v627_v18 }
 0x178   :  { %1282 = vrsqrt.f32 %v686_v21  ;;  %v690_v12 = vadd.f32 1e-12, %v658_v22  ;;  %v770_v6 = vmul.f32 %v1277_v32, %v2453_v16  ;;  %v771_v24 = vmul.f32 %v1277_v32, %v1933_v44  ;;  %v2457_v22 = vld [vmem:[#allocation16_spill] sm:$0xff]  ;;  %v2459_v32 = vld [vmem:[#allocation18_spill] sm:$0xff] }
 0x179   :  { %1152 = vst [vmem:[%s2341_s4 + $0xb0] sm:$0xff] %v1220_v57  ;;  %1284 = vrsqrt.f32 %v687_v5  ;;  %v691_v23 = vadd.f32 1e-12, %v659_v51 }
 0x17a   :  { %1286 = vrsqrt.f32 %v688_v10  ;;  %v845_v0 = vmul.f32 %v2029_v40, %v770_v6  ;;  %v846_v49 = vmul.f32 %v2031_v62, %v771_v24 }
 0x17b   :  { %1288 = vrsqrt.f32 %v689_v2 }
 0x17c   :  { %1290 = vrsqrt.f32 %v690_v12  ;;  %v1279_v33 = vpop.eup %1278  ;;  %v920_v30 = vadd.f32 %v2033_v26, %v845_v0  ;;  %v921_v60 = vadd.f32 %v2035_v25, %v846_v49  ;;  %v2461_v0 = vld [vmem:[#allocation20_spill] sm:$0xff] }
 0x17d   :  { %v772_v9 = vmul.f32 %v1279_v33, %v2454_v14  ;;  %v773_v48 = vmul.f32 %v1279_v33, %v2455_v43  ;;  %1292 = vrsqrt.f32 %v691_v23  ;;  %v2460_v14 = vld [vmem:[#allocation19_spill] sm:$0xff] }
 0x17e   :  { %v1221_v4 = vpack.c.bf16 %v921_v60, %v920_v30 }
 0x17f   :  { %v847_v38 = vmul.f32 %v2029_v40, %v772_v9  ;;  %v848_v29 = vmul.f32 %v2031_v62, %v773_v48 }
 0x180   :  { %v1281_v63 = vpop.eup %1280  ;;  %1153 = vst [vmem:[%s2341_s4 + $0xb8] sm:$0xff] %v1221_v4 }
 0x181   :  { %v774_v44 = vmul.f32 %v1281_v63, %v2456_v47  ;;  %v775_v41 = vmul.f32 %v1281_v63, %v1953_v55  ;;  %v922_v58 = vadd.f32 %v2033_v26, %v847_v38  ;;  %v923_v36 = vadd.f32 %v2035_v25, %v848_v29 }
 0x182   :  { %v1283_v45 = vpop.eup %1282 }
 0x183   :  { %v1285_v8 = vpop.eup %1284  ;;  %v849_v13 = vmul.f32 %v2029_v40, %v774_v44  ;;  %v850_v20 = vmul.f32 %v2031_v62, %v775_v41  ;;  %v776_v28 = vmul.f32 %v1283_v45, %v1964_v37  ;;  %v1222_v46 = vpack.c.bf16 %v923_v36, %v922_v58 }
 0x184   :  { %v1287_v39 = vpop.eup %1286  ;;  %v777_v61 = vmul.f32 %v1283_v45, %v1967_v54  ;;  %v778_v11 = vmul.f32 %v1285_v8, %v1970_v19  ;;  %v779_v55 = vmul.f32 %v1285_v8, %v1973_v34 }
 0x185   :  { %v1289_v50 = vpop.eup %1288  ;;  %v924_v42 = vadd.f32 %v2033_v26, %v849_v13  ;;  %v925_v59 = vadd.f32 %v2035_v25, %v850_v20  ;;  %v851_v52 = vmul.f32 %v2029_v40, %v776_v28  ;;  %v780_v37 = vmul.f32 %v1287_v39, %v1984_v56  ;;  %1154 = vst [vmem:[%s2341_s4 + $0xc0] sm:$0xff] %v1222_v46 }
 0x186   :  { %v1291_v53 = vpop.eup %1290  ;;  %v852_v54 = vmul.f32 %v2031_v62, %v777_v61  ;;  %v853_v19 = vmul.f32 %v2029_v40, %v778_v11  ;;  %v854_v34 = vmul.f32 %v2031_v62, %v779_v55  ;;  %v781_v1 = vmul.f32 %v1287_v39, %v1987_v17 }
 0x187   :  { %v1223_v15 = vpack.c.bf16 %v925_v59, %v924_v42  ;;  %v926_v27 = vadd.f32 %v2033_v26, %v851_v52  ;;  %v855_v3 = vmul.f32 %v2029_v40, %v780_v37  ;;  %v782_v56 = vmul.f32 %v1289_v50, %v1990_v31  ;;  %v1293_v7 = vpop.eup %1292  ;;  %v2458_v31 = vld [vmem:[#allocation17_spill] sm:$0xff] }
 0x188   :  { %v927_v35 = vadd.f32 %v2035_v25, %v852_v54  ;;  %v928_v18 = vadd.f32 %v2033_v26, %v853_v19  ;;  %v929_v57 = vadd.f32 %v2035_v25, %v854_v34  ;;  %v856_v21 = vmul.f32 %v2031_v62, %v781_v1 }
 0x189   :  { %1155 = vst [vmem:[%s2341_s4 + $0xc8] sm:$0xff] %v1223_v15  ;;  %v930_v17 = vadd.f32 %v2033_v26, %v855_v3  ;;  %v783_v5 = vmul.f32 %v1289_v50, %v2457_v22  ;;  %v857_v10 = vmul.f32 %v2029_v40, %v782_v56  ;;  %v784_v2 = vmul.f32 %v1291_v53, %v2458_v31 }
 0x18a   :  { %v1224_v12 = vpack.c.bf16 %v927_v35, %v926_v27  ;;  %v1225_v51 = vpack.c.bf16 %v929_v57, %v928_v18  ;;  %v931_v23 = vadd.f32 %v2035_v25, %v856_v21  ;;  %v785_v33 = vmul.f32 %v1291_v53, %v2459_v32 }
 0x18b   :  { %v858_v16 = vmul.f32 %v2031_v62, %v783_v5  ;;  %v932_v6 = vadd.f32 %v2033_v26, %v857_v10  ;;  %v859_v24 = vmul.f32 %v2029_v40, %v784_v2  ;;  %v786_v9 = vmul.f32 %v1293_v7, %v2460_v14 }
 0x18c   :  { %1156 = vst [vmem:[%s2341_s4 + $0xd0] sm:$0xff] %v1224_v12  ;;  %1157 = vst [vmem:[%s2341_s4 + $0xd8] sm:$0xff] %v1225_v51  ;;  %v1226_v43 = vpack.c.bf16 %v931_v23, %v930_v17  ;;  %v860_v48 = vmul.f32 %v2031_v62, %v785_v33  ;;  %v787_v49 = vmul.f32 %v1293_v7, %v2461_v0 }
 0x18d   :  { %v933_v63 = vadd.f32 %v2035_v25, %v858_v16  ;;  %v934_v38 = vadd.f32 %v2033_v26, %v859_v24  ;;  %v861_v29 = vmul.f32 %v2029_v40, %v786_v9 }
 0x18e   :  { %1158 = vst [vmem:[%s2341_s4 + $0xe0] sm:$0xff] %v1226_v43  ;;  %v935_v30 = vadd.f32 %v2035_v25, %v860_v48  ;;  %v862_v60 = vmul.f32 %v2031_v62, %v787_v49 }
 0x18f   :  { %v1227_v47 = vpack.c.bf16 %v933_v63, %v932_v6  ;;  %v936_v44 = vadd.f32 %v2033_v26, %v861_v29 }
 0x190   :  { %v1228_v41 = vpack.c.bf16 %v935_v30, %v934_v38  ;;  %v937_v45 = vadd.f32 %v2035_v25, %v862_v60 }
 0x191   :  { %1159 = vst [vmem:[%s2341_s4 + $0xe8] sm:$0xff] %v1227_v47 }
 0x192   :  { %1160 = vst [vmem:[%s2341_s4 + $0xf0] sm:$0xff] %v1228_v41  ;;  %v1229_v40 = vpack.c.bf16 %v937_v45, %v936_v44 }
 0x194   :  { %1161 = vst [vmem:[%s2341_s4 + $0xf8] sm:$0xff] %v1229_v40 }

// kernel: roberta_forward.17
= control target key start
LH: loop header
LB: loop body
LE: loop exit
PB: predicated region body
PF: predicated region fallthrough
CT: control target
= control target key end

     0   :  { %s1857_s1 = inlined_call_operand.vmem [shape: bf16[256,256], index: 1, kind: input, shape index: {}]   ;;  %s1858_s0 = inlined_call_operand.vmem [shape: bf16[256,256], index: 0, kind: input, shape index: {}]   ;;  %s1859_s2 = inlined_call_operand.vmem [shape: f32[1,256], index: 2, kind: input, shape index: {}]   ;;  %s1860_s3 = inlined_call_operand.vmem [shape: bf16[256,256], index: 3, kind: output, shape index: {}]  }
   0x1   :  { %v1382_v0 = vld [vmem:[%s1857_s1 + $0x4] ss:$8 sps:$4 sm:$0xff]   ;;  %v1384_v1 = vld [vmem:[%s1857_s1] ss:$8 sps:$4 sm:$0xff]   ;;  %v1385_v2 = vld [vmem:[%s1857_s1 + $0x14] ss:$8 sps:$4 sm:$0xff]  }
   0x2   :  { %530 = vmatprep.subr.bf16.mxu0 %v1382_v0  ;;  %1350 = vmatprep.subr.bf16.mxu1 %v1382_v0  ;;  %v1387_v3 = vld [vmem:[%s1857_s1 + $0x10] ss:$8 sps:$4 sm:$0xff]   ;;  %v1388_v4 = vld [vmem:[%s1857_s1 + $0x24] ss:$8 sps:$4 sm:$0xff]   ;;  %v1390_v5 = vld [vmem:[%s1857_s1 + $0x20] ss:$8 sps:$4 sm:$0xff]   ;;  %v920_v0 = vlaneseq }
   0x3   :  { %531 = vmatpush1.bf16.msra.mxu0 %v1384_v1  ;;  %1366 = vmatpush1.bf16.msra.mxu1 %v1384_v1  ;;  %v1391_v6 = vld [vmem:[%s1857_s1 + $0x34] ss:$8 sps:$4 sm:$0xff]   ;;  %v1393_v7 = vld [vmem:[%s1857_s1 + $0x30] ss:$8 sps:$4 sm:$0xff]   ;;  %v1394_v8 = vld [vmem:[%s1857_s1 + $0x44] ss:$8 sps:$4 sm:$0xff]  }
   0x4   :  { %532 = vmatprep.subr.bf16.mxu0 %v1385_v2  ;;  %1351 = vmatprep.subr.bf16.mxu1 %v1385_v2  ;;  %v1396_v9 = vld [vmem:[%s1857_s1 + $0x40] ss:$8 sps:$4 sm:$0xff]   ;;  %v1397_v10 = vld [vmem:[%s1857_s1 + $0x54] ss:$8 sps:$4 sm:$0xff]   ;;  %v1399_v11 = vld [vmem:[%s1857_s1 + $0x50] ss:$8 sps:$4 sm:$0xff]  }
   0x5   :  { %v1400_v12 = vld [vmem:[%s1857_s1 + $0x64] ss:$8 sps:$4 sm:$0xff]   ;;  %v1402_v14 = vld [vmem:[%s1857_s1 + $0x60] ss:$8 sps:$4 sm:$0xff]   ;;  %v1403_v16 = vld [vmem:[%s1857_s1 + $0x74] ss:$8 sps:$4 sm:$0xff]  }
   0x6   :  { %v1432_v13 = vld [vmem:[%s1858_s0 + $0x4] ss:$8 sps:$4 sm:$0xff]   ;;  %v1405_v17 = vld [vmem:[%s1857_s1 + $0x70] ss:$8 sps:$4 sm:$0xff]   ;;  %v1408_v19 = vld [vmem:[%s1857_s1 + $0x80] ss:$8 sps:$4 sm:$0xff]  }
   0x7   :  { %533 = vmatpush1.bf16.msra.mxu0 %v1387_v3  ;;  %1367 = vmatpush1.bf16.msra.mxu1 %v1387_v3  ;;  %v1435_v15 = vld [vmem:[%s1858_s0 + $0x84] ss:$8 sps:$4 sm:$0xff]   ;;  %v1409_v20 = vld [vmem:[%s1857_s1 + $0x94] ss:$8 sps:$4 sm:$0xff]   ;;  %v1411_v21 = vld [vmem:[%s1857_s1 + $0x90] ss:$8 sps:$4 sm:$0xff]  }
   0x8   :  { %534 = vmatprep.subr.bf16.mxu0 %v1388_v4  ;;  %1352 = vmatprep.subr.bf16.mxu1 %v1388_v4  ;;  %v1406_v18 = vld [vmem:[%s1857_s1 + $0x84] ss:$8 sps:$4 sm:$0xff]   ;;  %v1414_v23 = vld [vmem:[%s1857_s1 + $0xa0] ss:$8 sps:$4 sm:$0xff]   ;;  %v1415_v24 = vld [vmem:[%s1857_s1 + $0xb4] ss:$8 sps:$4 sm:$0xff]  }
   0x9   :  { %562 = vmatprep.mubr.bf16.mxu0 %v1432_v13  ;;  %642 = vmatprep.mubr.bf16.mxu1 %v1435_v15  ;;  %v1412_v22 = vld [vmem:[%s1857_s1 + $0xa4] ss:$8 sps:$4 sm:$0xff]   ;;  %v1417_v25 = vld [vmem:[%s1857_s1 + $0xb0] ss:$8 sps:$4 sm:$0xff]   ;;  %v1420_v27 = vld [vmem:[%s1857_s1 + $0xc0] ss:$8 sps:$4 sm:$0xff]  }
   0xa   :  { %v1418_v26 = vld [vmem:[%s1857_s1 + $0xc4] ss:$8 sps:$4 sm:$0xff]   ;;  %v1421_v28 = vld [vmem:[%s1857_s1 + $0xd4] ss:$8 sps:$4 sm:$0xff]   ;;  %v1423_v29 = vld [vmem:[%s1857_s1 + $0xd0] ss:$8 sps:$4 sm:$0xff]  }
   0xb   :  { %535 = vmatpush1.bf16.msra.mxu0 %v1390_v5  ;;  %1368 = vmatpush1.bf16.msra.mxu1 %v1390_v5  ;;  %v1424_v30 = vld [vmem:[%s1857_s1 + $0xe4] ss:$8 sps:$4 sm:$0xff]   ;;  %v1426_v31 = vld [vmem:[%s1857_s1 + $0xe0] ss:$8 sps:$4 sm:$0xff]   ;;  %v1427_v32 = vld [vmem:[%s1857_s1 + $0xf4] ss:$8 sps:$4 sm:$0xff]  }
   0xc   :  { %536 = vmatprep.subr.bf16.mxu0 %v1391_v6  ;;  %1353 = vmatprep.subr.bf16.mxu1 %v1391_v6  ;;  %v1429_v33 = vld [vmem:[%s1857_s1 + $0xf0] ss:$8 sps:$4 sm:$0xff]   ;;  %v1430_v34 = vld [vmem:[%s1858_s0] ss:$8 sps:$4 sm:$0xff]   ;;  %v1436_v36 = vld [vmem:[%s1858_s0 + $0x14] ss:$8 sps:$4 sm:$0xff]  }
   0xd   :  { %v1433_v35 = vld [vmem:[%s1858_s0 + $0x80] ss:$8 sps:$4 sm:$0xff]   ;;  %v1438_v37 = vld [vmem:[%s1858_s0 + $0x94] ss:$8 sps:$4 sm:$0xff]   ;;  %v1440_v38 = vld [vmem:[%s1858_s0 + $0x10] ss:$8 sps:$4 sm:$0xff]  }
   0xe   :  { %v1441_v39 = vld [vmem:[%s1858_s0 + $0x90] ss:$8 sps:$4 sm:$0xff]   ;;  %v1442_v40 = vld [vmem:[%s1858_s0 + $0x24] ss:$8 sps:$4 sm:$0xff]   ;;  %v1446_v42 = vld [vmem:[%s1858_s0 + $0x20] ss:$8 sps:$4 sm:$0xff]  }
   0xf   :  { %537 = vmatpush1.bf16.msra.mxu0 %v1393_v7  ;;  %1369 = vmatpush1.bf16.msra.mxu1 %v1393_v7  ;;  %v1444_v41 = vld [vmem:[%s1858_s0 + $0xa4] ss:$8 sps:$4 sm:$0xff]   ;;  %v1447_v43 = vld [vmem:[%s1858_s0 + $0xa0] ss:$8 sps:$4 sm:$0xff]   ;;  %v1448_v44 = vld [vmem:[%s1858_s0 + $0x34] ss:$8 sps:$4 sm:$0xff]  }
  0x10   :  { %538 = vmatprep.subr.bf16.mxu0 %v1394_v8  ;;  %1354 = vmatprep.subr.bf16.mxu1 %v1394_v8  ;;  %v1450_v45 = vld [vmem:[%s1858_s0 + $0xb4] ss:$8 sps:$4 sm:$0xff]   ;;  %v1452_v46 = vld [vmem:[%s1858_s0 + $0x30] ss:$8 sps:$4 sm:$0xff]   ;;  %v1454_v48 = vld [vmem:[%s1858_s0 + $0x44] ss:$8 sps:$4 sm:$0xff]  }
  0x11   :  { %v1453_v47 = vld [vmem:[%s1858_s0 + $0xb0] ss:$8 sps:$4 sm:$0xff]   ;;  %v1456_v49 = vld [vmem:[%s1858_s0 + $0xc4] ss:$8 sps:$4 sm:$0xff]   ;;  %v1458_v50 = vld [vmem:[%s1858_s0 + $0x40] ss:$8 sps:$4 sm:$0xff]  }
  0x12   :  { %v1459_v51 = vld [vmem:[%s1858_s0 + $0xc0] ss:$8 sps:$4 sm:$0xff]   ;;  %v1460_v52 = vld [vmem:[%s1858_s0 + $0x54] ss:$8 sps:$4 sm:$0xff]   ;;  %v1464_v54 = vld [vmem:[%s1858_s0 + $0x50] ss:$8 sps:$4 sm:$0xff]  }
  0x13   :  { %539 = vmatpush1.bf16.msra.mxu0 %v1396_v9  ;;  %1370 = vmatpush1.bf16.msra.mxu1 %v1396_v9  ;;  %v1462_v53 = vld [vmem:[%s1858_s0 + $0xd4] ss:$8 sps:$4 sm:$0xff]   ;;  %v1465_v55 = vld [vmem:[%s1858_s0 + $0xd0] ss:$8 sps:$4 sm:$0xff]   ;;  %v1466_v56 = vld [vmem:[%s1858_s0 + $0x64] ss:$8 sps:$4 sm:$0xff]  }
  0x14   :  { %540 = vmatprep.subr.bf16.mxu0 %v1397_v10  ;;  %1355 = vmatprep.subr.bf16.mxu1 %v1397_v10  ;;  %v1468_v57 = vld [vmem:[%s1858_s0 + $0xe4] ss:$8 sps:$4 sm:$0xff]   ;;  %v1470_v58 = vld [vmem:[%s1858_s0 + $0x60] ss:$8 sps:$4 sm:$0xff]   ;;  %v1472_v60 = vld [vmem:[%s1858_s0 + $0x74] ss:$8 sps:$4 sm:$0xff]  }
  0x15   :  { %v1471_v59 = vld [vmem:[%s1858_s0 + $0xe0] ss:$8 sps:$4 sm:$0xff]   ;;  %v1474_v61 = vld [vmem:[%s1858_s0 + $0xf4] ss:$8 sps:$4 sm:$0xff]   ;;  %v1476_v62 = vld [vmem:[%s1858_s0 + $0x70] ss:$8 sps:$4 sm:$0xff]  }
  0x16   :  { %v1477_v63 = vld [vmem:[%s1858_s0 + $0xf0] ss:$8 sps:$4 sm:$0xff]   ;;  %v921_v1 = vshrl.u32 %v920_v0, 7  ;;  %v918_v3 = vld [vmem:[%s1859_s2] sm:$0x3] }
  0x17   :  { %541 = vmatpush1.bf16.msra.mxu0 %v1399_v11  ;;  %1371 = vmatpush1.bf16.msra.mxu1 %v1399_v11 }
  0x18   :  { %542 = vmatprep.subr.bf16.mxu0 %v1400_v12  ;;  %1356 = vmatprep.subr.bf16.mxu1 %v1400_v12  ;;  %v922_v2 = vsub.s32 0, %v921_v1  ;;  %v926_v4 = vsub.s32 1, %v921_v1 }
  0x1a   :  { %v1693_v5 = vrot.slane %v918_v3, %v922_v2  ;;  %v1695_v6 = vrot.slane %v918_v3, %v926_v4 }
  0x1b   :  { %543 = vmatpush1.bf16.msra.mxu0 %v1402_v14  ;;  %1372 = vmatpush1.bf16.msra.mxu1 %v1402_v14 }
  0x1c   :  { %544 = vmatprep.subr.bf16.mxu0 %v1403_v16  ;;  %1357 = vmatprep.subr.bf16.mxu1 %v1403_v16 }
  0x1f   :  { %545 = vmatpush1.bf16.msra.mxu0 %v1405_v17  ;;  %1373 = vmatpush1.bf16.msra.mxu1 %v1405_v17 }
  0x20   :  { %546 = vmatprep.subr.bf16.mxu0 %v1406_v18  ;;  %1358 = vmatprep.subr.bf16.mxu1 %v1406_v18 }
  0x23   :  { %547 = vmatpush1.bf16.msra.mxu0 %v1408_v19  ;;  %1374 = vmatpush1.bf16.msra.mxu1 %v1408_v19 }
  0x24   :  { %548 = vmatprep.subr.bf16.mxu0 %v1409_v20  ;;  %1359 = vmatprep.subr.bf16.mxu1 %v1409_v20 }
  0x27   :  { %549 = vmatpush1.bf16.msra.mxu0 %v1411_v21  ;;  %1375 = vmatpush1.bf16.msra.mxu1 %v1411_v21 }
  0x28   :  { %550 = vmatprep.subr.bf16.mxu0 %v1412_v22  ;;  %1360 = vmatprep.subr.bf16.mxu1 %v1412_v22 }
  0x2b   :  { %551 = vmatpush1.bf16.msra.mxu0 %v1414_v23  ;;  %1376 = vmatpush1.bf16.msra.mxu1 %v1414_v23 }
  0x2c   :  { %552 = vmatprep.subr.bf16.mxu0 %v1415_v24  ;;  %1361 = vmatprep.subr.bf16.mxu1 %v1415_v24 }
  0x2f   :  { %553 = vmatpush1.bf16.msra.mxu0 %v1417_v25  ;;  %1377 = vmatpush1.bf16.msra.mxu1 %v1417_v25 }
  0x30   :  { %554 = vmatprep.subr.bf16.mxu0 %v1418_v26  ;;  %1362 = vmatprep.subr.bf16.mxu1 %v1418_v26 }
  0x33   :  { %555 = vmatpush1.bf16.msra.mxu0 %v1420_v27  ;;  %1378 = vmatpush1.bf16.msra.mxu1 %v1420_v27 }
  0x34   :  { %556 = vmatprep.subr.bf16.mxu0 %v1421_v28  ;;  %1363 = vmatprep.subr.bf16.mxu1 %v1421_v28 }
  0x37   :  { %557 = vmatpush1.bf16.msra.mxu0 %v1423_v29  ;;  %1379 = vmatpush1.bf16.msra.mxu1 %v1423_v29 }
  0x38   :  { %558 = vmatprep.subr.bf16.mxu0 %v1424_v30  ;;  %1364 = vmatprep.subr.bf16.mxu1 %v1424_v30 }
  0x3b   :  { %559 = vmatpush1.bf16.msra.mxu0 %v1426_v31  ;;  %1380 = vmatpush1.bf16.msra.mxu1 %v1426_v31 }
  0x3c   :  { %560 = vmatprep.subr.bf16.mxu0 %v1427_v32  ;;  %1365 = vmatprep.subr.bf16.mxu1 %v1427_v32 }
  0x3f   :  { %561 = vmatpush1.bf16.msra.mxu0 %v1429_v33  ;;  %1381 = vmatpush1.bf16.msra.mxu1 %v1429_v33 }
  0x42   :  { %563 = vmatmul.mubr.bf16.vlgmr.msra.gmra.mrb[0].mxu0 %v1430_v34  ;;  %643 = vmatmul.mubr.bf16.vlgmr.msra.gmra.mrb[0].mxu1 %v1433_v35 }
  0x43   :  { %572 = vmatprep.mubr.bf16.mxu0 %v1436_v36  ;;  %652 = vmatprep.mubr.bf16.mxu1 %v1438_v37 }
  0x4a   :  { %573 = vmatmul.mubr.bf16.gmra.mrb[4].mxu0 %v1440_v38  ;;  %653 = vmatmul.mubr.bf16.gmra.mrb[4].mxu1 %v1441_v39 }
  0x4b   :  { %582 = vmatprep.mubr.bf16.mxu0 %v1442_v40  ;;  %662 = vmatprep.mubr.bf16.mxu1 %v1444_v41 }
  0x52   :  { %583 = vmatmul.mubr.bf16.gmra.mrb[8].mxu0 %v1446_v42  ;;  %663 = vmatmul.mubr.bf16.gmra.mrb[8].mxu1 %v1447_v43 }
  0x53   :  { %592 = vmatprep.mubr.bf16.mxu0 %v1448_v44  ;;  %672 = vmatprep.mubr.bf16.mxu1 %v1450_v45 }
  0x5a   :  { %593 = vmatmul.mubr.bf16.gmra.mrb[12].mxu0 %v1452_v46  ;;  %673 = vmatmul.mubr.bf16.gmra.mrb[12].mxu1 %v1453_v47 }
  0x5b   :  { %602 = vmatprep.mubr.bf16.mxu0 %v1454_v48  ;;  %682 = vmatprep.mubr.bf16.mxu1 %v1456_v49 }
  0x62   :  { %603 = vmatmul.mubr.bf16.gmra.mrb[16].mxu0 %v1458_v50  ;;  %683 = vmatmul.mubr.bf16.gmra.mrb[16].mxu1 %v1459_v51 }
  0x63   :  { %612 = vmatprep.mubr.bf16.mxu0 %v1460_v52  ;;  %692 = vmatprep.mubr.bf16.mxu1 %v1462_v53 }
  0x6a   :  { %613 = vmatmul.mubr.bf16.gmra.mrb[20].mxu0 %v1464_v54  ;;  %693 = vmatmul.mubr.bf16.gmra.mrb[20].mxu1 %v1465_v55 }
  0x6b   :  { %622 = vmatprep.mubr.bf16.mxu0 %v1466_v56  ;;  %702 = vmatprep.mubr.bf16.mxu1 %v1468_v57 }
  0x72   :  { %623 = vmatmul.mubr.bf16.gmra.mrb[24].mxu0 %v1470_v58  ;;  %703 = vmatmul.mubr.bf16.gmra.mrb[24].mxu1 %v1471_v59 }
  0x73   :  { %632 = vmatprep.mubr.bf16.mxu0 %v1472_v60  ;;  %712 = vmatprep.mubr.bf16.mxu1 %v1474_v61 }
  0x7a   :  { %633 = vmatmul.mubr.bf16.gmra.mrb[28].mxu0 %v1476_v62  ;;  %713 = vmatmul.mubr.bf16.gmra.mrb[28].mxu1 %v1477_v63 }
 0x115   :  { %v564_v7 = vpop.f32.mrb[0].mxu0  ;;  %v644_v8 = vpop.f32.mrb[0].mxu1 }
 0x116   :  { %v930_v9 = vadd.f32 %v1693_v5, %v564_v7  ;;  %v962_v10 = vadd.f32 %v1693_v5, %v644_v8  ;;  %v566_v11 = vpop.f32.mrb[1].mxu0  ;;  %v646_v12 = vpop.f32.mrb[1].mxu1 }
 0x117   :  { %v931_v13 = vadd.f32 %v1695_v6, %v566_v11  ;;  %v963_v14 = vadd.f32 %v1695_v6, %v646_v12  ;;  %v568_v15 = vpop.f32.mrb[2].mxu0  ;;  %v648_v16 = vpop.f32.mrb[2].mxu1 }
 0x118   :  { %v932_v17 = vadd.f32 %v1693_v5, %v568_v15  ;;  %v964_v18 = vadd.f32 %v1693_v5, %v648_v16  ;;  %v570_v19 = vpop.f32.mrb[3].mxu0  ;;  %v650_v20 = vpop.f32.mrb[3].mxu1 }
 0x119   :  { %v1318_v21 = vpack.c.bf16 %v931_v13, %v930_v9  ;;  %v1334_v22 = vpack.c.bf16 %v963_v14, %v962_v10  ;;  %v933_v23 = vadd.f32 %v1695_v6, %v570_v19  ;;  %v965_v24 = vadd.f32 %v1695_v6, %v650_v20 }
 0x11b   :  { %1186 = vst [vmem:[%s1860_s3] sm:$0xff] %v1318_v21  ;;  %1202 = vst [vmem:[%s1860_s3 + $0x80] sm:$0xff] %v1334_v22  ;;  %v1319_v25 = vpack.c.bf16 %v933_v23, %v932_v17  ;;  %v1335_v26 = vpack.c.bf16 %v965_v24, %v964_v18 }
 0x11d   :  { %1187 = vst [vmem:[%s1860_s3 + $0x8] sm:$0xff] %v1319_v25  ;;  %1203 = vst [vmem:[%s1860_s3 + $0x88] sm:$0xff] %v1335_v26  ;;  %v574_v27 = vpop.f32.mrb[4].mxu0  ;;  %v654_v28 = vpop.f32.mrb[4].mxu1 }
 0x11e   :  { %v934_v29 = vadd.f32 %v1693_v5, %v574_v27  ;;  %v966_v30 = vadd.f32 %v1693_v5, %v654_v28  ;;  %v576_v31 = vpop.f32.mrb[5].mxu0  ;;  %v656_v32 = vpop.f32.mrb[5].mxu1 }
 0x11f   :  { %v935_v33 = vadd.f32 %v1695_v6, %v576_v31  ;;  %v967_v34 = vadd.f32 %v1695_v6, %v656_v32  ;;  %v578_v35 = vpop.f32.mrb[6].mxu0  ;;  %v658_v36 = vpop.f32.mrb[6].mxu1 }
 0x120   :  { %v936_v37 = vadd.f32 %v1693_v5, %v578_v35  ;;  %v968_v38 = vadd.f32 %v1693_v5, %v658_v36  ;;  %v580_v39 = vpop.f32.mrb[7].mxu0  ;;  %v660_v40 = vpop.f32.mrb[7].mxu1 }
 0x121   :  { %v1320_v41 = vpack.c.bf16 %v935_v33, %v934_v29  ;;  %v1336_v42 = vpack.c.bf16 %v967_v34, %v966_v30  ;;  %v937_v43 = vadd.f32 %v1695_v6, %v580_v39  ;;  %v969_v44 = vadd.f32 %v1695_v6, %v660_v40 }
 0x123   :  { %1188 = vst [vmem:[%s1860_s3 + $0x10] sm:$0xff] %v1320_v41  ;;  %1204 = vst [vmem:[%s1860_s3 + $0x90] sm:$0xff] %v1336_v42  ;;  %v1321_v45 = vpack.c.bf16 %v937_v43, %v936_v37  ;;  %v1337_v46 = vpack.c.bf16 %v969_v44, %v968_v38 }
 0x125   :  { %1189 = vst [vmem:[%s1860_s3 + $0x18] sm:$0xff] %v1321_v45  ;;  %1205 = vst [vmem:[%s1860_s3 + $0x98] sm:$0xff] %v1337_v46  ;;  %v584_v47 = vpop.f32.mrb[8].mxu0  ;;  %v664_v48 = vpop.f32.mrb[8].mxu1 }
 0x126   :  { %v938_v49 = vadd.f32 %v1693_v5, %v584_v47  ;;  %v970_v50 = vadd.f32 %v1693_v5, %v664_v48  ;;  %v586_v51 = vpop.f32.mrb[9].mxu0  ;;  %v666_v52 = vpop.f32.mrb[9].mxu1 }
 0x127   :  { %v939_v53 = vadd.f32 %v1695_v6, %v586_v51  ;;  %v971_v54 = vadd.f32 %v1695_v6, %v666_v52  ;;  %v588_v55 = vpop.f32.mrb[10].mxu0  ;;  %v668_v56 = vpop.f32.mrb[10].mxu1 }
 0x128   :  { %v940_v57 = vadd.f32 %v1693_v5, %v588_v55  ;;  %v972_v58 = vadd.f32 %v1693_v5, %v668_v56  ;;  %v590_v59 = vpop.f32.mrb[11].mxu0  ;;  %v670_v60 = vpop.f32.mrb[11].mxu1 }
 0x129   :  { %v1322_v61 = vpack.c.bf16 %v939_v53, %v938_v49  ;;  %v1338_v62 = vpack.c.bf16 %v971_v54, %v970_v50  ;;  %v941_v63 = vadd.f32 %v1695_v6, %v590_v59  ;;  %v973_v0 = vadd.f32 %v1695_v6, %v670_v60 }
 0x12b   :  { %1190 = vst [vmem:[%s1860_s3 + $0x20] sm:$0xff] %v1322_v61  ;;  %1206 = vst [vmem:[%s1860_s3 + $0xa0] sm:$0xff] %v1338_v62  ;;  %v1323_v1 = vpack.c.bf16 %v941_v63, %v940_v57  ;;  %v1339_v2 = vpack.c.bf16 %v973_v0, %v972_v58 }
 0x12d   :  { %1191 = vst [vmem:[%s1860_s3 + $0x28] sm:$0xff] %v1323_v1  ;;  %1207 = vst [vmem:[%s1860_s3 + $0xa8] sm:$0xff] %v1339_v2  ;;  %v594_v3 = vpop.f32.mrb[12].mxu0  ;;  %v674_v4 = vpop.f32.mrb[12].mxu1 }
 0x12e   :  { %v942_v7 = vadd.f32 %v1693_v5, %v594_v3  ;;  %v974_v8 = vadd.f32 %v1693_v5, %v674_v4  ;;  %v596_v9 = vpop.f32.mrb[13].mxu0  ;;  %v676_v10 = vpop.f32.mrb[13].mxu1 }
 0x12f   :  { %v943_v11 = vadd.f32 %v1695_v6, %v596_v9  ;;  %v975_v12 = vadd.f32 %v1695_v6, %v676_v10  ;;  %v598_v13 = vpop.f32.mrb[14].mxu0  ;;  %v678_v14 = vpop.f32.mrb[14].mxu1 }
 0x130   :  { %v944_v15 = vadd.f32 %v1693_v5, %v598_v13  ;;  %v976_v16 = vadd.f32 %v1693_v5, %v678_v14  ;;  %v600_v17 = vpop.f32.mrb[15].mxu0  ;;  %v680_v18 = vpop.f32.mrb[15].mxu1 }
 0x131   :  { %v1324_v19 = vpack.c.bf16 %v943_v11, %v942_v7  ;;  %v1340_v20 = vpack.c.bf16 %v975_v12, %v974_v8  ;;  %v945_v21 = vadd.f32 %v1695_v6, %v600_v17  ;;  %v977_v22 = vadd.f32 %v1695_v6, %v680_v18 }
 0x133   :  { %1192 = vst [vmem:[%s1860_s3 + $0x30] sm:$0xff] %v1324_v19  ;;  %1208 = vst [vmem:[%s1860_s3 + $0xb0] sm:$0xff] %v1340_v20  ;;  %v1325_v23 = vpack.c.bf16 %v945_v21, %v944_v15  ;;  %v1341_v24 = vpack.c.bf16 %v977_v22, %v976_v16 }
 0x135   :  { %1193 = vst [vmem:[%s1860_s3 + $0x38] sm:$0xff] %v1325_v23  ;;  %1209 = vst [vmem:[%s1860_s3 + $0xb8] sm:$0xff] %v1341_v24  ;;  %v604_v25 = vpop.f32.mrb[16].mxu0  ;;  %v684_v26 = vpop.f32.mrb[16].mxu1 }
 0x136   :  { %v946_v27 = vadd.f32 %v1693_v5, %v604_v25  ;;  %v978_v28 = vadd.f32 %v1693_v5, %v684_v26  ;;  %v606_v29 = vpop.f32.mrb[17].mxu0  ;;  %v686_v30 = vpop.f32.mrb[17].mxu1 }
 0x137   :  { %v947_v31 = vadd.f32 %v1695_v6, %v606_v29  ;;  %v979_v32 = vadd.f32 %v1695_v6, %v686_v30  ;;  %v608_v33 = vpop.f32.mrb[18].mxu0  ;;  %v688_v34 = vpop.f32.mrb[18].mxu1 }
 0x138   :  { %v948_v35 = vadd.f32 %v1693_v5, %v608_v33  ;;  %v980_v36 = vadd.f32 %v1693_v5, %v688_v34  ;;  %v610_v37 = vpop.f32.mrb[19].mxu0  ;;  %v690_v38 = vpop.f32.mrb[19].mxu1 }
 0x139   :  { %v1326_v39 = vpack.c.bf16 %v947_v31, %v946_v27  ;;  %v1342_v40 = vpack.c.bf16 %v979_v32, %v978_v28  ;;  %v949_v41 = vadd.f32 %v1695_v6, %v610_v37  ;;  %v981_v42 = vadd.f32 %v1695_v6, %v690_v38 }
 0x13b   :  { %1194 = vst [vmem:[%s1860_s3 + $0x40] sm:$0xff] %v1326_v39  ;;  %1210 = vst [vmem:[%s1860_s3 + $0xc0] sm:$0xff] %v1342_v40  ;;  %v1327_v43 = vpack.c.bf16 %v949_v41, %v948_v35  ;;  %v1343_v44 = vpack.c.bf16 %v981_v42, %v980_v36 }
 0x13d   :  { %1195 = vst [vmem:[%s1860_s3 + $0x48] sm:$0xff] %v1327_v43  ;;  %1211 = vst [vmem:[%s1860_s3 + $0xc8] sm:$0xff] %v1343_v44  ;;  %v614_v45 = vpop.f32.mrb[20].mxu0  ;;  %v694_v46 = vpop.f32.mrb[20].mxu1 }
 0x13e   :  { %v950_v47 = vadd.f32 %v1693_v5, %v614_v45  ;;  %v982_v48 = vadd.f32 %v1693_v5, %v694_v46  ;;  %v616_v49 = vpop.f32.mrb[21].mxu0  ;;  %v696_v50 = vpop.f32.mrb[21].mxu1 }
 0x13f   :  { %v951_v51 = vadd.f32 %v1695_v6, %v616_v49  ;;  %v983_v52 = vadd.f32 %v1695_v6, %v696_v50  ;;  %v618_v53 = vpop.f32.mrb[22].mxu0  ;;  %v698_v54 = vpop.f32.mrb[22].mxu1 }
 0x140   :  { %v952_v55 = vadd.f32 %v1693_v5, %v618_v53  ;;  %v984_v56 = vadd.f32 %v1693_v5, %v698_v54  ;;  %v620_v57 = vpop.f32.mrb[23].mxu0  ;;  %v700_v58 = vpop.f32.mrb[23].mxu1 }
 0x141   :  { %v1328_v59 = vpack.c.bf16 %v951_v51, %v950_v47  ;;  %v1344_v60 = vpack.c.bf16 %v983_v52, %v982_v48  ;;  %v953_v61 = vadd.f32 %v1695_v6, %v620_v57  ;;  %v985_v62 = vadd.f32 %v1695_v6, %v700_v58 }
 0x143   :  { %1196 = vst [vmem:[%s1860_s3 + $0x50] sm:$0xff] %v1328_v59  ;;  %1212 = vst [vmem:[%s1860_s3 + $0xd0] sm:$0xff] %v1344_v60  ;;  %v1329_v63 = vpack.c.bf16 %v953_v61, %v952_v55  ;;  %v1345_v0 = vpack.c.bf16 %v985_v62, %v984_v56 }
 0x145   :  { %1197 = vst [vmem:[%s1860_s3 + $0x58] sm:$0xff] %v1329_v63  ;;  %1213 = vst [vmem:[%s1860_s3 + $0xd8] sm:$0xff] %v1345_v0  ;;  %v624_v1 = vpop.f32.mrb[24].mxu0  ;;  %v704_v2 = vpop.f32.mrb[24].mxu1 }
 0x146   :  { %v954_v3 = vadd.f32 %v1693_v5, %v624_v1  ;;  %v986_v4 = vadd.f32 %v1693_v5, %v704_v2  ;;  %v626_v7 = vpop.f32.mrb[25].mxu0  ;;  %v706_v8 = vpop.f32.mrb[25].mxu1 }
 0x147   :  { %v955_v9 = vadd.f32 %v1695_v6, %v626_v7  ;;  %v987_v10 = vadd.f32 %v1695_v6, %v706_v8  ;;  %v628_v11 = vpop.f32.mrb[26].mxu0  ;;  %v708_v12 = vpop.f32.mrb[26].mxu1 }
 0x148   :  { %v956_v13 = vadd.f32 %v1693_v5, %v628_v11  ;;  %v988_v14 = vadd.f32 %v1693_v5, %v708_v12  ;;  %v630_v15 = vpop.f32.mrb[27].mxu0  ;;  %v710_v16 = vpop.f32.mrb[27].mxu1 }
 0x149   :  { %v1330_v17 = vpack.c.bf16 %v955_v9, %v954_v3  ;;  %v1346_v18 = vpack.c.bf16 %v987_v10, %v986_v4  ;;  %v957_v19 = vadd.f32 %v1695_v6, %v630_v15  ;;  %v989_v20 = vadd.f32 %v1695_v6, %v710_v16 }
 0x14b   :  { %1198 = vst [vmem:[%s1860_s3 + $0x60] sm:$0xff] %v1330_v17  ;;  %1214 = vst [vmem:[%s1860_s3 + $0xe0] sm:$0xff] %v1346_v18  ;;  %v1331_v21 = vpack.c.bf16 %v957_v19, %v956_v13  ;;  %v1347_v22 = vpack.c.bf16 %v989_v20, %v988_v14 }
 0x14d   :  { %1199 = vst [vmem:[%s1860_s3 + $0x68] sm:$0xff] %v1331_v21  ;;  %1215 = vst [vmem:[%s1860_s3 + $0xe8] sm:$0xff] %v1347_v22  ;;  %v634_v23 = vpop.f32.mrb[28].mxu0  ;;  %v714_v24 = vpop.f32.mrb[28].mxu1 }
 0x14e   :  { %v958_v25 = vadd.f32 %v1693_v5, %v634_v23  ;;  %v990_v26 = vadd.f32 %v1693_v5, %v714_v24  ;;  %v636_v27 = vpop.f32.mrb[29].mxu0  ;;  %v716_v28 = vpop.f32.mrb[29].mxu1 }
 0x14f   :  { %v959_v29 = vadd.f32 %v1695_v6, %v636_v27  ;;  %v991_v30 = vadd.f32 %v1695_v6, %v716_v28  ;;  %v638_v31 = vpop.f32.mrb[30].mxu0  ;;  %v718_v32 = vpop.f32.mrb[30].mxu1 }
 0x150   :  { %v960_v33 = vadd.f32 %v1693_v5, %v638_v31  ;;  %v992_v34 = vadd.f32 %v1693_v5, %v718_v32  ;;  %v640_v35 = vpop.f32.mrb[31].mxu0  ;;  %v720_v36 = vpop.f32.mrb[31].mxu1 }
 0x151   :  { %v1332_v37 = vpack.c.bf16 %v959_v29, %v958_v25  ;;  %v1348_v38 = vpack.c.bf16 %v991_v30, %v990_v26  ;;  %v961_v39 = vadd.f32 %v1695_v6, %v640_v35  ;;  %v993_v40 = vadd.f32 %v1695_v6, %v720_v36 }
 0x153   :  { %1200 = vst [vmem:[%s1860_s3 + $0x70] sm:$0xff] %v1332_v37  ;;  %1216 = vst [vmem:[%s1860_s3 + $0xf0] sm:$0xff] %v1348_v38  ;;  %v1333_v41 = vpack.c.bf16 %v961_v39, %v960_v33  ;;  %v1349_v42 = vpack.c.bf16 %v993_v40, %v992_v34 }
 0x155   :  { %1201 = vst [vmem:[%s1860_s3 + $0x78] sm:$0xff] %v1333_v41  ;;  %1217 = vst [vmem:[%s1860_s3 + $0xf8] sm:$0xff] %v1349_v42 }

// kernel: roberta_forward.27
= control target key start
LH: loop header
LB: loop body
LE: loop exit
PB: predicated region body
PF: predicated region fallthrough
CT: control target
= control target key end

     0   :  { %v444_v9 = vmov 1966171168   ;;  %v66_v11 = vlaneseq  ;;  %s588_s0 = inlined_call_operand.vmem [shape: bf16[2,256], index: 0, kind: input, shape index: {}]   ;;  %s589_s1 = inlined_call_operand.vmem [shape: bf16[256,256], index: 1, kind: input, shape index: {}]   ;;  %s590_s2 = inlined_call_operand.vmem [shape: f32[1,256], index: 2, kind: input, shape index: {}]   ;;  %s591_s3 = inlined_call_operand.hbm [shape: f32[2,256], index: 3, kind: output, shape index: {}]  }
   0x1   :  { %v370_v0 = vld [vmem:[%s589_s1 + $0x4] ss:$8 sps:$4 sm:$0xff]   ;;  %v372_v1 = vld [vmem:[%s589_s1] ss:$8 sps:$4 sm:$0xff]   ;;  %v373_v2 = vld [vmem:[%s589_s1 + $0x14] ss:$8 sps:$4 sm:$0xff]   ;;  %v64_v10 = vunpack.c.l.s4 %v444_v9 }
   0x2   :  { %239 = vmatprep.subr.bf16.mxu0 %v370_v0  ;;  %v375_v3 = vld [vmem:[%s589_s1 + $0x10] ss:$8 sps:$4 sm:$0xff]   ;;  %v376_v4 = vld [vmem:[%s589_s1 + $0x24] ss:$8 sps:$4 sm:$0xff]   ;;  %v378_v5 = vld [vmem:[%s589_s1 + $0x20] ss:$8 sps:$4 sm:$0xff]  }
   0x3   :  { %240 = vmatpush1.bf16.msra.mxu0 %v372_v1  ;;  %v379_v6 = vld [vmem:[%s589_s1 + $0x34] ss:$8 sps:$4 sm:$0xff]   ;;  %v381_v7 = vld [vmem:[%s589_s1 + $0x30] ss:$8 sps:$4 sm:$0xff]   ;;  %v382_v8 = vld [vmem:[%s589_s1 + $0x44] ss:$8 sps:$4 sm:$0xff]   ;;  %v65_v14 = vunpack.c.0.s8 %v64_v10 }
   0x4   :  { %241 = vmatprep.subr.bf16.mxu0 %v373_v2  ;;  %v384_v12 = vld [vmem:[%s589_s1 + $0x40] ss:$8 sps:$4 sm:$0xff]   ;;  %v385_v13 = vld [vmem:[%s589_s1 + $0x54] ss:$8 sps:$4 sm:$0xff]   ;;  %v501_v15 = vshrl.u32 %v66_v11, 7 }
   0x5   :  { %v387_v16 = vld [vmem:[%s589_s1 + $0x50] ss:$8 sps:$4 sm:$0xff]   ;;  %v388_v17 = vld [vmem:[%s589_s1 + $0x64] ss:$8 sps:$4 sm:$0xff]  }
   0x6   :  { %v68_v18 = vsub.s32 %v65_v14, %v501_v15  ;;  %v333_v19 = vld.sshfl [vmem:[%s588_s0] sm:$0x11 pattern:$0x75316420] }
   0x7   :  { %242 = vmatpush1.bf16.msra.mxu0 %v375_v3  ;;  %v62_v20 = vcombine.high %v333_v19, %v333_v19 }
   0x8   :  { %243 = vmatprep.subr.bf16.mxu0 %v376_v4 }
   0xb   :  { %244 = vmatpush1.bf16.msra.mxu0 %v378_v5 }
   0xc   :  { %245 = vmatprep.subr.bf16.mxu0 %v379_v6 }
   0xf   :  { %246 = vmatpush1.bf16.msra.mxu0 %v381_v7 }
  0x10   :  { %247 = vmatprep.subr.bf16.mxu0 %v382_v8 }
  0x13   :  { %248 = vmatpush1.bf16.msra.mxu0 %v384_v12 }
  0x14   :  { %249 = vmatprep.subr.bf16.mxu0 %v385_v13 }
  0x15   :  { %8 = vsyncpa [#allocation4], 0  ;;  %v390_v21 = vld [vmem:[%s589_s1 + $0x60] ss:$8 sps:$4 sm:$0xff]   ;;  %v391_v22 = vld [vmem:[%s589_s1 + $0x74] ss:$8 sps:$4 sm:$0xff]   ;;  %v76_v23 = vrot.slane %v62_v20, %v68_v18  ;;  %v69_v41 = vrot.slane %v333_v19, %v68_v18 }
  0x16   :  { %v393_v24 = vld [vmem:[%s589_s1 + $0x70] ss:$8 sps:$4 sm:$0xff]   ;;  %v394_v25 = vld [vmem:[%s589_s1 + $0x84] ss:$8 sps:$4 sm:$0xff]   ;;  %v396_v26 = vld [vmem:[%s589_s1 + $0x80] ss:$8 sps:$4 sm:$0xff]  }
  0x17   :  { %250 = vmatpush1.bf16.msra.mxu0 %v387_v16  ;;  %271 = vmatprep.mubr.bf16.mxu0 %v76_v23  ;;  %v397_v27 = vld [vmem:[%s589_s1 + $0x94] ss:$8 sps:$4 sm:$0xff]   ;;  %v399_v28 = vld [vmem:[%s589_s1 + $0x90] ss:$8 sps:$4 sm:$0xff]   ;;  %v400_v29 = vld [vmem:[%s589_s1 + $0xa4] ss:$8 sps:$4 sm:$0xff]  }
  0x18   :  { %251 = vmatprep.subr.bf16.mxu0 %v388_v17  ;;  %v402_v30 = vld [vmem:[%s589_s1 + $0xa0] ss:$8 sps:$4 sm:$0xff]   ;;  %v403_v31 = vld [vmem:[%s589_s1 + $0xb4] ss:$8 sps:$4 sm:$0xff]   ;;  %v405_v32 = vld [vmem:[%s589_s1 + $0xb0] ss:$8 sps:$4 sm:$0xff]  }
  0x19   :  { %v406_v33 = vld [vmem:[%s589_s1 + $0xc4] ss:$8 sps:$4 sm:$0xff]   ;;  %v408_v34 = vld [vmem:[%s589_s1 + $0xc0] ss:$8 sps:$4 sm:$0xff]   ;;  %v409_v35 = vld [vmem:[%s589_s1 + $0xd4] ss:$8 sps:$4 sm:$0xff]  }
  0x1a   :  { %v411_v36 = vld [vmem:[%s589_s1 + $0xd0] ss:$8 sps:$4 sm:$0xff]   ;;  %v412_v37 = vld [vmem:[%s589_s1 + $0xe4] ss:$8 sps:$4 sm:$0xff]   ;;  %v414_v38 = vld [vmem:[%s589_s1 + $0xe0] ss:$8 sps:$4 sm:$0xff]  }
  0x1b   :  { %252 = vmatpush1.bf16.msra.mxu0 %v390_v21  ;;  %v415_v39 = vld [vmem:[%s589_s1 + $0xf4] ss:$8 sps:$4 sm:$0xff]   ;;  %v417_v40 = vld [vmem:[%s589_s1 + $0xf0] ss:$8 sps:$4 sm:$0xff]   ;;  %v445_v42 = vmov 0.0   ;;  %v301_v48 = vsub.s32 0, %v501_v15 }
  0x1c   :  { %253 = vmatprep.subr.bf16.mxu0 %v391_v22  ;;  %19 = vst [vmem:[#allocation2] sm:$0xf] %v445_v42  ;;  %v446_v43 = vmov 1983009808   ;;  %v305_v49 = vsub.s32 1, %v501_v15  ;;  %s447_s1 = smov [#allocation3]  }
  0x1d   :  { %v284_v44 = vunpack.c.l.s4 %v446_v43  ;;  %v297_v51 = vld [vmem:[%s590_s2] sm:$0x3]  ;;  %s325_s24 = sshll.u32 %s447_s1, 4  ;;  %s326_s24 = int_to_ptr.vmem [resolvable:$true] %s325_s24 }
  0x1e   :  { %v302_v57 = vrot.slane %v297_v51, %v301_v48  ;;  %v306_v58 = vrot.slane %v297_v51, %v305_v49  ;;  %s420_s2 = scalar_lea.vmem %s326_s24, 64  ;;  %p425_p1 = scmp.lt.s32.totalorder %s326_s24, %s326_s24 }
  0x1f   :  { %254 = vmatpush1.bf16.msra.mxu0 %v393_v24  ;;  %v285_v45 = vunpack.c.0.s8 %v284_v44  ;;  %p421_p0 = scmp.ne.s32.totalorder %s326_s24, %s420_s2  ;;  %p426_p2 = scmp.lt.s32.totalorder %s420_s2, %s420_s2 }
  0x20   :  { %255 = vmatprep.subr.bf16.mxu0 %v394_v25  ;;  %v307_v60 = vcombine.low %v302_v57, %v306_v58 }
  0x21   :  { %v288_v47 = vsub.s32 %v285_v45, %v501_v15  ;;  %p427_p3 = por %p426_p2, %p425_p1 }
  0x23   :  { %256 = vmatpush1.bf16.msra.mxu0 %v396_v26  ;;  %v20_v54 = vld [vmem:[#allocation2] sm:$0xf]  ;;  %v314_v61 = vrot.slane %v307_v60, %v288_v47  ;;  %p428_p4 = pnand %p427_p3, %p421_p0 }
  0x24   :  { %257 = vmatprep.subr.bf16.mxu0 %v397_v27 }
  0x27   :  { %258 = vmatpush1.bf16.msra.mxu0 %v399_v28 }
  0x28   :  { %259 = vmatprep.subr.bf16.mxu0 %v400_v29 }
  0x2b   :  { %260 = vmatpush1.bf16.msra.mxu0 %v402_v30 }
  0x2c   :  { %261 = vmatprep.subr.bf16.mxu0 %v403_v31 }
  0x2f   :  { %262 = vmatpush1.bf16.msra.mxu0 %v405_v32 }
  0x30   :  { %263 = vmatprep.subr.bf16.mxu0 %v406_v33 }
  0x33   :  { %264 = vmatpush1.bf16.msra.mxu0 %v408_v34 }
  0x34   :  { %265 = vmatprep.subr.bf16.mxu0 %v409_v35 }
  0x37   :  { %266 = vmatpush1.bf16.msra.mxu0 %v411_v36 }
  0x38   :  { %267 = vmatprep.subr.bf16.mxu0 %v412_v37 }
  0x3b   :  { %268 = vmatpush1.bf16.msra.mxu0 %v414_v38 }
  0x3c   :  { %269 = vmatprep.subr.bf16.mxu0 %v415_v39 }
  0x3f   :  { %270 = vmatpush1.bf16.msra.mxu0 %v417_v40 }
  0x42   :  { %272 = vmatmul.mubr.bf16.vlgmr.msra.gmra.mrb[0].mxu0 %v69_v41 }
 0x115   :  { %v273_v46 = vpop.f32.mrb[0].mxu0 }
 0x116   :  { %v275_v50 = vpop.f32.mrb[1].mxu0 }
 0x117   :  { %v282_v52 = vcombine.low %v273_v46, %v275_v50  ;;  %v277_v53 = vpop.f32.mrb[2].mxu0 }
 0x118   :  { %v278_v55 = vpop.f32.mrb[3].mxu0 }
 0x119   :  { %v289_v56 = vrot.slane %v282_v52, %v288_v47 }
 0x11b   :  { %v291_v59 = vadd.f32 %v289_v56, %v20_v54 }
 0x11d   :  { %292 = vst [vmem:[#allocation2] sm:$0xf] %v291_v59 }
 0x124   :  { %v296_v62 = vld [vmem:[#allocation2] sm:$0xf] }
 0x125   :  { %v316_v63 = vadd.f32 %v314_v61, %v296_v62 }
 0x127   :  { %418 = vtanh.f32 %v316_v63 }
 0x131   :  { %v419_v0 = vpop.eup %418 }
 0x132   :  { %318 = vst [vmem:[#allocation3] sm:$0xf] %v419_v0 }
 0x133   :  { %431 = shalt.err (!%p428_p4)
}
 0x134   :  { %s432_s27 = scalar_lea.hbm %s591_s3, 64 }
 0x135   :  { %p433_p5 = scmp.ne.s32.totalorder %s591_s3, %s432_s27  ;;  %p436_p6 = scmp.lt.u32.totalorder %s432_s27, %s591_s3 }
 0x137   :  { %p438_p7 = pnand %p436_p6, %p433_p5 }
 0x139   :  { %441 = shalt.err (!%p438_p7)
}
 0x13a   :  { %328 = dma.vmem_to_hbm [thread:$0]  %s326_s24, 64, %s591_s3, [#allocation4]  }
 0x13b   :  { %442 = dma.done.wait [#allocation4], 64  }
 0x13c   :  { %443 = vsyncadd [#allocation4], 4294967232 }
 0x13d   :  { %332 = vsyncpa [#allocation4], 1 }

// kernel: roberta_forward.19
= control target key start
LH: loop header
LB: loop body
LE: loop exit
PB: predicated region body
PF: predicated region fallthrough
CT: control target
= control target key end

     0   :  { %s6920_s1 = inlined_call_operand.vmem [shape: bf16[256,512], index: 1, kind: input, shape index: {}]   ;;  %s6921_s0 = inlined_call_operand.vmem [shape: bf16[256,256], index: 0, kind: input, shape index: {}]   ;;  %s6922_s3 = inlined_call_operand.vmem [shape: bf16[512,256], index: 3, kind: input, shape index: {}]   ;;  %s6923_s2 = inlined_call_operand.vmem [shape: f32[1,512], index: 2, kind: input, shape index: {}]   ;;  %s6924_s4 = inlined_call_operand.vmem [shape: f32[1,256], index: 4, kind: input, shape index: {}]   ;;  %s6925_s5 = inlined_call_operand.vmem [shape: bf16[256,256], index: 5, kind: output, shape index: {}]  }
   0x1   :  { %v3909_v0 = vld [vmem:[%s6920_s1 + $0x4] ss:$16 sps:$4 sm:$0xff]   ;;  %v3911_v1 = vld [vmem:[%s6920_s1] ss:$16 sps:$4 sm:$0xff]   ;;  %v3962_v33 = vld [vmem:[%s6920_s1 + $0xc] ss:$16 sps:$4 sm:$0xff]  }
   0x2   :  { %686 = vmatprep.subr.bf16.mxu1 %v3909_v0  ;;  %v3912_v2 = vld [vmem:[%s6920_s1 + $0x24] ss:$16 sps:$4 sm:$0xff]   ;;  %v3914_v3 = vld [vmem:[%s6920_s1 + $0x20] ss:$16 sps:$4 sm:$0xff]   ;;  %v3960_v35 = vld [vmem:[%s6920_s1 + $0x8] ss:$16 sps:$4 sm:$0xff]  }
   0x3   :  { %687 = vmatpush1.bf16.msra.mxu1 %v3911_v1  ;;  %v3915_v4 = vld [vmem:[%s6920_s1 + $0x44] ss:$16 sps:$4 sm:$0xff]   ;;  %v3917_v5 = vld [vmem:[%s6920_s1 + $0x40] ss:$16 sps:$4 sm:$0xff]   ;;  %v3968_v37 = vld [vmem:[%s6920_s1 + $0x2c] ss:$16 sps:$4 sm:$0xff]  }
   0x4   :  { %688 = vmatprep.subr.bf16.mxu1 %v3912_v2  ;;  %v3918_v6 = vld [vmem:[%s6920_s1 + $0x64] ss:$16 sps:$4 sm:$0xff]   ;;  %v3920_v7 = vld [vmem:[%s6920_s1 + $0x60] ss:$16 sps:$4 sm:$0xff]   ;;  %v3966_v38 = vld [vmem:[%s6920_s1 + $0x28] ss:$16 sps:$4 sm:$0xff]  }
   0x5   :  { %v3921_v8 = vld [vmem:[%s6920_s1 + $0x84] ss:$16 sps:$4 sm:$0xff]   ;;  %v3923_v9 = vld [vmem:[%s6920_s1 + $0x80] ss:$16 sps:$4 sm:$0xff]   ;;  %v3974_v39 = vld [vmem:[%s6920_s1 + $0x4c] ss:$16 sps:$4 sm:$0xff]  }
   0x6   :  { %v3924_v10 = vld [vmem:[%s6920_s1 + $0xa4] ss:$16 sps:$4 sm:$0xff]   ;;  %v3926_v11 = vld [vmem:[%s6920_s1 + $0xa0] ss:$16 sps:$4 sm:$0xff]   ;;  %v3972_v42 = vld [vmem:[%s6920_s1 + $0x48] ss:$16 sps:$4 sm:$0xff]  }
   0x7   :  { %689 = vmatpush1.bf16.msra.mxu1 %v3914_v3  ;;  %v3927_v12 = vld [vmem:[%s6920_s1 + $0xc4] ss:$16 sps:$4 sm:$0xff]   ;;  %v3929_v14 = vld [vmem:[%s6920_s1 + $0xc0] ss:$16 sps:$4 sm:$0xff]   ;;  %v3980_v43 = vld [vmem:[%s6920_s1 + $0x6c] ss:$16 sps:$4 sm:$0xff]  }
   0x8   :  { %690 = vmatprep.subr.bf16.mxu1 %v3915_v4  ;;  %v4478_v13 = vld [vmem:[%s6921_s0 + $0x4] ss:$8 sps:$4 sm:$0xff]   ;;  %v3932_v16 = vld [vmem:[%s6920_s1 + $0xe0] ss:$16 sps:$4 sm:$0xff]   ;;  %v4552_v36 = vld [vmem:[%s6921_s0 + $0x14] ss:$8 sps:$4 sm:$0xff]  }
   0x9   :  { %v3930_v15 = vld [vmem:[%s6920_s1 + $0xe4] ss:$16 sps:$4 sm:$0xff]   ;;  %718 = vmatprep.mubr.bf16.mxu1 %v4478_v13  ;;  %v3935_v18 = vld [vmem:[%s6920_s1 + $0x100] ss:$16 sps:$4 sm:$0xff]   ;;  %v3978_v44 = vld [vmem:[%s6920_s1 + $0x68] ss:$16 sps:$4 sm:$0xff]  }
   0xa   :  { %v3933_v17 = vld [vmem:[%s6920_s1 + $0x104] ss:$16 sps:$4 sm:$0xff]   ;;  %v3938_v20 = vld [vmem:[%s6920_s1 + $0x120] ss:$16 sps:$4 sm:$0xff]   ;;  %v3986_v45 = vld [vmem:[%s6920_s1 + $0x8c] ss:$16 sps:$4 sm:$0xff]  }
   0xb   :  { %691 = vmatpush1.bf16.msra.mxu1 %v3917_v5  ;;  %v3936_v19 = vld [vmem:[%s6920_s1 + $0x124] ss:$16 sps:$4 sm:$0xff]   ;;  %v3941_v22 = vld [vmem:[%s6920_s1 + $0x140] ss:$16 sps:$4 sm:$0xff]   ;;  %v3984_v48 = vld [vmem:[%s6920_s1 + $0x88] ss:$16 sps:$4 sm:$0xff]  }
   0xc   :  { %692 = vmatprep.subr.bf16.mxu1 %v3918_v6  ;;  %v3939_v21 = vld [vmem:[%s6920_s1 + $0x144] ss:$16 sps:$4 sm:$0xff]   ;;  %v3944_v24 = vld [vmem:[%s6920_s1 + $0x160] ss:$16 sps:$4 sm:$0xff]   ;;  %v3992_v49 = vld [vmem:[%s6920_s1 + $0xac] ss:$16 sps:$4 sm:$0xff]  }
   0xd   :  { %v3942_v23 = vld [vmem:[%s6920_s1 + $0x164] ss:$16 sps:$4 sm:$0xff]   ;;  %v3947_v26 = vld [vmem:[%s6920_s1 + $0x180] ss:$16 sps:$4 sm:$0xff]   ;;  %v3990_v50 = vld [vmem:[%s6920_s1 + $0xa8] ss:$16 sps:$4 sm:$0xff]  }
   0xe   :  { %v3945_v25 = vld [vmem:[%s6920_s1 + $0x184] ss:$16 sps:$4 sm:$0xff]   ;;  %v3950_v28 = vld [vmem:[%s6920_s1 + $0x1a0] ss:$16 sps:$4 sm:$0xff]   ;;  %v3998_v51 = vld [vmem:[%s6920_s1 + $0xcc] ss:$16 sps:$4 sm:$0xff]  }
   0xf   :  { %693 = vmatpush1.bf16.msra.mxu1 %v3920_v7  ;;  %v3948_v27 = vld [vmem:[%s6920_s1 + $0x1a4] ss:$16 sps:$4 sm:$0xff]   ;;  %v3953_v30 = vld [vmem:[%s6920_s1 + $0x1c0] ss:$16 sps:$4 sm:$0xff]   ;;  %v3996_v54 = vld [vmem:[%s6920_s1 + $0xc8] ss:$16 sps:$4 sm:$0xff]  }
  0x10   :  { %694 = vmatprep.subr.bf16.mxu1 %v3921_v8  ;;  %v3951_v29 = vld [vmem:[%s6920_s1 + $0x1c4] ss:$16 sps:$4 sm:$0xff]   ;;  %v3956_v32 = vld [vmem:[%s6920_s1 + $0x1e0] ss:$16 sps:$4 sm:$0xff]   ;;  %v4004_v55 = vld [vmem:[%s6920_s1 + $0xec] ss:$16 sps:$4 sm:$0xff]  }
  0x11   :  { %v3954_v31 = vld [vmem:[%s6920_s1 + $0x1e4] ss:$16 sps:$4 sm:$0xff]   ;;  %v4544_v34 = vld [vmem:[%s6921_s0] ss:$8 sps:$4 sm:$0xff]   ;;  %v4568_v40 = vld [vmem:[%s6921_s0 + $0x10] ss:$8 sps:$4 sm:$0xff]  }
  0x12   :  { %v4573_v41 = vld [vmem:[%s6921_s0 + $0x24] ss:$8 sps:$4 sm:$0xff]   ;;  %v4592_v46 = vld [vmem:[%s6921_s0 + $0x20] ss:$8 sps:$4 sm:$0xff]   ;;  %v4597_v47 = vld [vmem:[%s6921_s0 + $0x34] ss:$8 sps:$4 sm:$0xff]  }
  0x13   :  { %695 = vmatpush1.bf16.msra.mxu1 %v3923_v9  ;;  %v4616_v52 = vld [vmem:[%s6921_s0 + $0x30] ss:$8 sps:$4 sm:$0xff]   ;;  %v4621_v53 = vld [vmem:[%s6921_s0 + $0x44] ss:$8 sps:$4 sm:$0xff]   ;;  %v4640_v58 = vld [vmem:[%s6921_s0 + $0x40] ss:$8 sps:$4 sm:$0xff]  }
  0x14   :  { %696 = vmatprep.subr.bf16.mxu1 %v3924_v10  ;;  %v4002_v56 = vld [vmem:[%s6920_s1 + $0xe8] ss:$16 sps:$4 sm:$0xff]   ;;  %v4010_v57 = vld [vmem:[%s6920_s1 + $0x10c] ss:$16 sps:$4 sm:$0xff]  }
  0x15   :  { %v4645_v59 = vld [vmem:[%s6921_s0 + $0x54] ss:$8 sps:$4 sm:$0xff]   ;;  %v4008_v60 = vld [vmem:[%s6920_s1 + $0x108] ss:$16 sps:$4 sm:$0xff]   ;;  %v4669_v1 = vld [vmem:[%s6921_s0 + $0x64] ss:$8 sps:$4 sm:$0xff]  }
  0x16   :  { %v4016_v61 = vld [vmem:[%s6920_s1 + $0x12c] ss:$16 sps:$4 sm:$0xff]   ;;  %v4014_v62 = vld [vmem:[%s6920_s1 + $0x128] ss:$16 sps:$4 sm:$0xff]  }
  0x17   :  { %697 = vmatpush1.bf16.msra.mxu1 %v3926_v11  ;;  %v4022_v63 = vld [vmem:[%s6920_s1 + $0x14c] ss:$16 sps:$4 sm:$0xff]   ;;  %v4664_v0 = vld [vmem:[%s6921_s0 + $0x50] ss:$8 sps:$4 sm:$0xff]   ;;  %v4688_v6 = vld [vmem:[%s6921_s0 + $0x60] ss:$8 sps:$4 sm:$0xff]  }
  0x18   :  { %698 = vmatprep.subr.bf16.mxu1 %v3927_v12  ;;  %v4020_v2 = vld [vmem:[%s6920_s1 + $0x148] ss:$16 sps:$4 sm:$0xff]   ;;  %v4028_v3 = vld [vmem:[%s6920_s1 + $0x16c] ss:$16 sps:$4 sm:$0xff]  }
  0x19   :  { %v4026_v4 = vld [vmem:[%s6920_s1 + $0x168] ss:$16 sps:$4 sm:$0xff]   ;;  %v4034_v5 = vld [vmem:[%s6920_s1 + $0x18c] ss:$16 sps:$4 sm:$0xff]  }
  0x1a   :  { %v4693_v7 = vld [vmem:[%s6921_s0 + $0x74] ss:$8 sps:$4 sm:$0xff]   ;;  %v4032_v8 = vld [vmem:[%s6920_s1 + $0x188] ss:$16 sps:$4 sm:$0xff]   ;;  %v4053_v12 = vld [vmem:[%s6922_s3 + $0x4] ss:$8 sps:$4 sm:$0xff]  }
  0x1b   :  { %699 = vmatpush1.bf16.msra.mxu1 %v3929_v14  ;;  %v4040_v9 = vld [vmem:[%s6920_s1 + $0x1ac] ss:$16 sps:$4 sm:$0xff]   ;;  %v4038_v10 = vld [vmem:[%s6920_s1 + $0x1a8] ss:$16 sps:$4 sm:$0xff]   ;;  %2736 = vmatprep.subr.bf16.mxu0 %v4053_v12 }
  0x1c   :  { %700 = vmatprep.subr.bf16.mxu1 %v3930_v15  ;;  %v4046_v11 = vld [vmem:[%s6920_s1 + $0x1cc] ss:$16 sps:$4 sm:$0xff]   ;;  %v4715_v14 = vld [vmem:[%s6921_s0 + $0x70] ss:$8 sps:$4 sm:$0xff]   ;;  %v4055_v15 = vld [vmem:[%s6922_s3] ss:$8 sps:$4 sm:$0xff]  }
  0x1d   :  { %2737 = vmatpush1.bf16.msra.mxu0 %v4055_v15  ;;  %v4098_v12 = vld [vmem:[%s6922_s3 + $0xf4] ss:$8 sps:$4 sm:$0xff]   ;;  %v4100_v15 = vld [vmem:[%s6922_s3 + $0xf0] ss:$8 sps:$4 sm:$0xff]  }
  0x1f   :  { %701 = vmatpush1.bf16.msra.mxu1 %v3932_v16  ;;  %v4723_v16 = vld [vmem:[%s6921_s0 + $0x84] ss:$8 sps:$4 sm:$0xff]  }
  0x20   :  { %702 = vmatprep.subr.bf16.mxu1 %v3933_v17  ;;  %v4044_v17 = vld [vmem:[%s6920_s1 + $0x1c8] ss:$16 sps:$4 sm:$0xff]  }
  0x23   :  { %703 = vmatpush1.bf16.msra.mxu1 %v3935_v18  ;;  %v4052_v18 = vld [vmem:[%s6920_s1 + $0x1ec] ss:$16 sps:$4 sm:$0xff]  }
  0x24   :  { %704 = vmatprep.subr.bf16.mxu1 %v3936_v19  ;;  %v4056_v19 = vld [vmem:[%s6922_s3 + $0x14] ss:$8 sps:$4 sm:$0xff]  }
  0x25   :  { %2738 = vmatprep.subr.bf16.mxu0 %v4056_v19 }
  0x27   :  { %705 = vmatpush1.bf16.msra.mxu1 %v3938_v20  ;;  %v4050_v20 = vld [vmem:[%s6920_s1 + $0x1e8] ss:$16 sps:$4 sm:$0xff]  }
  0x28   :  { %706 = vmatprep.subr.bf16.mxu1 %v3939_v21  ;;  %v4058_v21 = vld [vmem:[%s6922_s3 + $0x10] ss:$8 sps:$4 sm:$0xff]  }
  0x29   :  { %2739 = vmatpush1.bf16.msra.mxu0 %v4058_v21 }
  0x2b   :  { %707 = vmatpush1.bf16.msra.mxu1 %v3941_v22  ;;  %v4059_v22 = vld [vmem:[%s6922_s3 + $0x24] ss:$8 sps:$4 sm:$0xff]  }
  0x2c   :  { %708 = vmatprep.subr.bf16.mxu1 %v3942_v23  ;;  %v4061_v23 = vld [vmem:[%s6922_s3 + $0x20] ss:$8 sps:$4 sm:$0xff]   ;;  %2740 = vmatprep.subr.bf16.mxu0 %v4059_v22 }
  0x2d   :  { %2741 = vmatpush1.bf16.msra.mxu0 %v4061_v23 }
  0x2f   :  { %709 = vmatpush1.bf16.msra.mxu1 %v3944_v24  ;;  %v4751_v24 = vld [vmem:[%s6921_s0 + $0x80] ss:$8 sps:$4 sm:$0xff]  }
  0x30   :  { %710 = vmatprep.subr.bf16.mxu1 %v3945_v25  ;;  %v4756_v25 = vld [vmem:[%s6921_s0 + $0x94] ss:$8 sps:$4 sm:$0xff]  }
  0x33   :  { %711 = vmatpush1.bf16.msra.mxu1 %v3947_v26  ;;  %v4062_v26 = vld [vmem:[%s6922_s3 + $0x34] ss:$8 sps:$4 sm:$0xff]  }
  0x34   :  { %712 = vmatprep.subr.bf16.mxu1 %v3948_v27  ;;  %v4064_v27 = vld [vmem:[%s6922_s3 + $0x30] ss:$8 sps:$4 sm:$0xff]   ;;  %2742 = vmatprep.subr.bf16.mxu0 %v4062_v26 }
  0x35   :  { %2743 = vmatpush1.bf16.msra.mxu0 %v4064_v27 }
  0x37   :  { %713 = vmatpush1.bf16.msra.mxu1 %v3950_v28  ;;  %v4065_v28 = vld [vmem:[%s6922_s3 + $0x44] ss:$8 sps:$4 sm:$0xff]  }
  0x38   :  { %714 = vmatprep.subr.bf16.mxu1 %v3951_v29  ;;  %v4067_v29 = vld [vmem:[%s6922_s3 + $0x40] ss:$8 sps:$4 sm:$0xff]   ;;  %2744 = vmatprep.subr.bf16.mxu0 %v4065_v28 }
  0x39   :  { %2745 = vmatpush1.bf16.msra.mxu0 %v4067_v29 }
  0x3b   :  { %715 = vmatpush1.bf16.msra.mxu1 %v3953_v30  ;;  %v4775_v30 = vld [vmem:[%s6921_s0 + $0x90] ss:$8 sps:$4 sm:$0xff]  }
  0x3c   :  { %716 = vmatprep.subr.bf16.mxu1 %v3954_v31  ;;  %v4780_v31 = vld [vmem:[%s6921_s0 + $0xa4] ss:$8 sps:$4 sm:$0xff]  }
  0x3f   :  { %717 = vmatpush1.bf16.msra.mxu1 %v3956_v32  ;;  %v4068_v32 = vld [vmem:[%s6922_s3 + $0x54] ss:$8 sps:$4 sm:$0xff]  }
  0x40   :  { %879 = vmatprep.subr.bf16.mxu1 %v3962_v33  ;;  %v4070_v33 = vld [vmem:[%s6922_s3 + $0x50] ss:$8 sps:$4 sm:$0xff]   ;;  %2746 = vmatprep.subr.bf16.mxu0 %v4068_v32 }
  0x41   :  { %2747 = vmatpush1.bf16.msra.mxu0 %v4070_v33 }
  0x42   :  { %719 = vmatmul.mubr.bf16.vlgmr.msra.gmra.mrb[0].mxu1 %v4544_v34 }
  0x43   :  { %880 = vmatpush1.bf16.msra.mxu1 %v3960_v35  ;;  %728 = vmatprep.mubr.bf16.mxu1 %v4552_v36  ;;  %v4071_v35 = vld [vmem:[%s6922_s3 + $0x64] ss:$8 sps:$4 sm:$0xff]  }
  0x44   :  { %881 = vmatprep.subr.bf16.mxu1 %v3968_v37  ;;  %v4073_v37 = vld [vmem:[%s6922_s3 + $0x60] ss:$8 sps:$4 sm:$0xff]   ;;  %2748 = vmatprep.subr.bf16.mxu0 %v4071_v35 }
  0x45   :  { %2749 = vmatpush1.bf16.msra.mxu0 %v4073_v37 }
  0x47   :  { %882 = vmatpush1.bf16.msra.mxu1 %v3966_v38  ;;  %v4799_v38 = vld [vmem:[%s6921_s0 + $0xa0] ss:$8 sps:$4 sm:$0xff]  }
  0x48   :  { %883 = vmatprep.subr.bf16.mxu1 %v3974_v39  ;;  %v4804_v39 = vld [vmem:[%s6921_s0 + $0xb4] ss:$8 sps:$4 sm:$0xff]  }
  0x4a   :  { %729 = vmatmul.mubr.bf16.gmra.mrb[4].mxu1 %v4568_v40 }
  0x4b   :  { %738 = vmatprep.mubr.bf16.mxu1 %v4573_v41  ;;  %884 = vmatpush1.bf16.msra.mxu1 %v3972_v42  ;;  %v4074_v42 = vld [vmem:[%s6922_s3 + $0x74] ss:$8 sps:$4 sm:$0xff]  }
  0x4c   :  { %885 = vmatprep.subr.bf16.mxu1 %v3980_v43  ;;  %v4076_v43 = vld [vmem:[%s6922_s3 + $0x70] ss:$8 sps:$4 sm:$0xff]   ;;  %2750 = vmatprep.subr.bf16.mxu0 %v4074_v42 }
  0x4d   :  { %2751 = vmatpush1.bf16.msra.mxu0 %v4076_v43 }
  0x4f   :  { %886 = vmatpush1.bf16.msra.mxu1 %v3978_v44  ;;  %v4077_v44 = vld [vmem:[%s6922_s3 + $0x84] ss:$8 sps:$4 sm:$0xff]  }
  0x50   :  { %887 = vmatprep.subr.bf16.mxu1 %v3986_v45  ;;  %v4820_v45 = vld [vmem:[%s6921_s0 + $0xb0] ss:$8 sps:$4 sm:$0xff]   ;;  %2752 = vmatprep.subr.bf16.mxu0 %v4077_v44 }
  0x52   :  { %739 = vmatmul.mubr.bf16.gmra.mrb[8].mxu1 %v4592_v46 }
  0x53   :  { %748 = vmatprep.mubr.bf16.mxu1 %v4597_v47  ;;  %888 = vmatpush1.bf16.msra.mxu1 %v3984_v48  ;;  %v4079_v48 = vld [vmem:[%s6922_s3 + $0x80] ss:$8 sps:$4 sm:$0xff]  }
  0x54   :  { %889 = vmatprep.subr.bf16.mxu1 %v3992_v49  ;;  %v4828_v49 = vld [vmem:[%s6921_s0 + $0xc4] ss:$8 sps:$4 sm:$0xff]   ;;  %2753 = vmatpush1.bf16.msra.mxu0 %v4079_v48 }
  0x57   :  { %890 = vmatpush1.bf16.msra.mxu1 %v3990_v50  ;;  %v4080_v50 = vld [vmem:[%s6922_s3 + $0x94] ss:$8 sps:$4 sm:$0xff]  }
  0x58   :  { %891 = vmatprep.subr.bf16.mxu1 %v3998_v51  ;;  %v4082_v51 = vld [vmem:[%s6922_s3 + $0x90] ss:$8 sps:$4 sm:$0xff]   ;;  %2754 = vmatprep.subr.bf16.mxu0 %v4080_v50 }
  0x59   :  { %2755 = vmatpush1.bf16.msra.mxu0 %v4082_v51 }
  0x5a   :  { %749 = vmatmul.mubr.bf16.gmra.mrb[12].mxu1 %v4616_v52 }
  0x5b   :  { %758 = vmatprep.mubr.bf16.mxu1 %v4621_v53  ;;  %892 = vmatpush1.bf16.msra.mxu1 %v3996_v54  ;;  %v4083_v54 = vld [vmem:[%s6922_s3 + $0xa4] ss:$8 sps:$4 sm:$0xff]  }
  0x5c   :  { %893 = vmatprep.subr.bf16.mxu1 %v4004_v55  ;;  %v4844_v55 = vld [vmem:[%s6921_s0 + $0xc0] ss:$8 sps:$4 sm:$0xff]   ;;  %2756 = vmatprep.subr.bf16.mxu0 %v4083_v54 }
  0x5f   :  { %894 = vmatpush1.bf16.msra.mxu1 %v4002_v56  ;;  %v4085_v56 = vld [vmem:[%s6922_s3 + $0xa0] ss:$8 sps:$4 sm:$0xff]  }
  0x60   :  { %895 = vmatprep.subr.bf16.mxu1 %v4010_v57  ;;  %v4852_v57 = vld [vmem:[%s6921_s0 + $0xd4] ss:$8 sps:$4 sm:$0xff]   ;;  %2757 = vmatpush1.bf16.msra.mxu0 %v4085_v56 }
  0x62   :  { %759 = vmatmul.mubr.bf16.gmra.mrb[16].mxu1 %v4640_v58 }
  0x63   :  { %768 = vmatprep.mubr.bf16.mxu1 %v4645_v59  ;;  %896 = vmatpush1.bf16.msra.mxu1 %v4008_v60  ;;  %v4086_v60 = vld [vmem:[%s6922_s3 + $0xb4] ss:$8 sps:$4 sm:$0xff]  }
  0x64   :  { %897 = vmatprep.subr.bf16.mxu1 %v4016_v61  ;;  %v4088_v61 = vld [vmem:[%s6922_s3 + $0xb0] ss:$8 sps:$4 sm:$0xff]   ;;  %2758 = vmatprep.subr.bf16.mxu0 %v4086_v60 }
  0x65   :  { %2759 = vmatpush1.bf16.msra.mxu0 %v4088_v61 }
  0x67   :  { %898 = vmatpush1.bf16.msra.mxu1 %v4014_v62  ;;  %v4089_v62 = vld [vmem:[%s6922_s3 + $0xc4] ss:$8 sps:$4 sm:$0xff]  }
  0x68   :  { %899 = vmatprep.subr.bf16.mxu1 %v4022_v63  ;;  %v4868_v63 = vld [vmem:[%s6921_s0 + $0xd0] ss:$8 sps:$4 sm:$0xff]   ;;  %2760 = vmatprep.subr.bf16.mxu0 %v4089_v62 }
  0x6a   :  { %769 = vmatmul.mubr.bf16.gmra.mrb[20].mxu1 %v4664_v0 }
  0x6b   :  { %778 = vmatprep.mubr.bf16.mxu1 %v4669_v1  ;;  %900 = vmatpush1.bf16.msra.mxu1 %v4020_v2  ;;  %v4091_v2 = vld [vmem:[%s6922_s3 + $0xc0] ss:$8 sps:$4 sm:$0xff]  }
  0x6c   :  { %901 = vmatprep.subr.bf16.mxu1 %v4028_v3  ;;  %v4876_v3 = vld [vmem:[%s6921_s0 + $0xe4] ss:$8 sps:$4 sm:$0xff]   ;;  %2761 = vmatpush1.bf16.msra.mxu0 %v4091_v2 }
  0x6f   :  { %902 = vmatpush1.bf16.msra.mxu1 %v4026_v4  ;;  %v4092_v4 = vld [vmem:[%s6922_s3 + $0xd4] ss:$8 sps:$4 sm:$0xff]  }
  0x70   :  { %903 = vmatprep.subr.bf16.mxu1 %v4034_v5  ;;  %v4094_v5 = vld [vmem:[%s6922_s3 + $0xd0] ss:$8 sps:$4 sm:$0xff]   ;;  %2762 = vmatprep.subr.bf16.mxu0 %v4092_v4 }
  0x71   :  { %2763 = vmatpush1.bf16.msra.mxu0 %v4094_v5 }
  0x72   :  { %779 = vmatmul.mubr.bf16.gmra.mrb[24].mxu1 %v4688_v6 }
  0x73   :  { %788 = vmatprep.mubr.bf16.mxu1 %v4693_v7  ;;  %904 = vmatpush1.bf16.msra.mxu1 %v4032_v8  ;;  %v4095_v8 = vld [vmem:[%s6922_s3 + $0xe4] ss:$8 sps:$4 sm:$0xff]  }
  0x74   :  { %905 = vmatprep.subr.bf16.mxu1 %v4040_v9  ;;  %v4892_v9 = vld [vmem:[%s6921_s0 + $0xe0] ss:$8 sps:$4 sm:$0xff]   ;;  %2764 = vmatprep.subr.bf16.mxu0 %v4095_v8 }
  0x77   :  { %906 = vmatpush1.bf16.msra.mxu1 %v4038_v10  ;;  %v4097_v10 = vld [vmem:[%s6922_s3 + $0xe0] ss:$8 sps:$4 sm:$0xff]  }
  0x78   :  { %907 = vmatprep.subr.bf16.mxu1 %v4046_v11  ;;  %v4900_v11 = vld [vmem:[%s6921_s0 + $0xf4] ss:$8 sps:$4 sm:$0xff]   ;;  %2765 = vmatpush1.bf16.msra.mxu0 %v4097_v10 }
  0x79   :  { %2766 = vmatprep.subr.bf16.mxu0 %v4098_v12 }
  0x7a   :  { %789 = vmatmul.mubr.bf16.gmra.mrb[28].mxu1 %v4715_v14 }
  0x7b   :  { %798 = vmatprep.mubr.bf16.mxu1 %v4723_v16  ;;  %908 = vmatpush1.bf16.msra.mxu1 %v4044_v17  ;;  %v4913_v17 = vld [vmem:[%s6921_s0 + $0xf0] ss:$8 sps:$4 sm:$0xff]  }
  0x7c   :  { %909 = vmatprep.subr.bf16.mxu1 %v4052_v18  ;;  %2767 = vmatpush1.bf16.msra.mxu0 %v4100_v15  ;;  %v4103_v18 = vld [vmem:[%s6922_s3 + $0x104] ss:$8 sps:$4 sm:$0xff]  }
  0x7d   :  { %2929 = vmatprep.subr.bf16.mxu0 %v4103_v18 }
  0x7f   :  { %910 = vmatpush1.bf16.msra.mxu1 %v4050_v20 }
  0x82   :  { %799 = vmatmul.mubr.bf16.gmra.mrb[32].mxu1 %v4751_v24 }
  0x83   :  { %808 = vmatprep.mubr.bf16.mxu1 %v4756_v25 }
  0x8a   :  { %809 = vmatmul.mubr.bf16.gmra.mrb[36].mxu1 %v4775_v30 }
  0x8b   :  { %818 = vmatprep.mubr.bf16.mxu1 %v4780_v31 }
  0x92   :  { %819 = vmatmul.mubr.bf16.gmra.mrb[40].mxu1 %v4799_v38 }
  0x93   :  { %828 = vmatprep.mubr.bf16.mxu1 %v4804_v39 }
  0x9a   :  { %829 = vmatmul.mubr.bf16.gmra.mrb[44].mxu1 %v4820_v45 }
  0x9b   :  { %838 = vmatprep.mubr.bf16.mxu1 %v4828_v49 }
  0xa2   :  { %839 = vmatmul.mubr.bf16.gmra.mrb[48].mxu1 %v4844_v55 }
  0xa3   :  { %848 = vmatprep.mubr.bf16.mxu1 %v4852_v57 }
  0xaa   :  { %849 = vmatmul.mubr.bf16.gmra.mrb[52].mxu1 %v4868_v63 }
  0xab   :  { %858 = vmatprep.mubr.bf16.mxu1 %v4876_v3 }
  0xb2   :  { %859 = vmatmul.mubr.bf16.gmra.mrb[56].mxu1 %v4892_v9 }
  0xb3   :  { %868 = vmatprep.mubr.bf16.mxu1 %v4900_v11 }
  0xba   :  { %869 = vmatmul.mubr.bf16.gmra.mrb[60].mxu1 %v4913_v17 }
  0xbb   :  { %911 = vmatprep.mubr.bf16.mxu1 %v4478_v13  ;;  %v186_v13 = vlaneseq }
  0xc2   :  { %912 = vmatmul.mubr.bf16.vlgmr.msra.gmra.mrb[64].mxu1 %v4544_v34  ;;  %v4939_v34 = vshrl.u32 %v186_v13, 7 }
  0xc3   :  { %921 = vmatprep.mubr.bf16.mxu1 %v4552_v36 }
  0xc4   :  { %6934 = vst [vmem:[#allocation3_spill] sm:$0xff] %v4939_v34  ;;  %v6927_v36 = vsub.s32 0, %v4939_v34 }
  0xca   :  { %922 = vmatmul.mubr.bf16.gmra.mrb[68].mxu1 %v4568_v40  ;;  %v184_v40 = vld [vmem:[%s6923_s2] sm:$0xf] }
  0xcb   :  { %931 = vmatprep.mubr.bf16.mxu1 %v4573_v41  ;;  %v6926_v41 = vsub.s32 1, %v4939_v34 }
  0xd2   :  { %932 = vmatmul.mubr.bf16.gmra.mrb[72].mxu1 %v4592_v46  ;;  %v4950_v46 = vrot.slane %v184_v40, %v6927_v36 }
  0xd3   :  { %941 = vmatprep.mubr.bf16.mxu1 %v4597_v47  ;;  %v4954_v47 = vrot.slane %v184_v40, %v6926_v41 }
  0xda   :  { %942 = vmatmul.mubr.bf16.gmra.mrb[76].mxu1 %v4616_v52 }
  0xdb   :  { %951 = vmatprep.mubr.bf16.mxu1 %v4621_v53 }
  0xe2   :  { %952 = vmatmul.mubr.bf16.gmra.mrb[80].mxu1 %v4640_v58 }
  0xe3   :  { %961 = vmatprep.mubr.bf16.mxu1 %v4645_v59 }
  0xea   :  { %962 = vmatmul.mubr.bf16.gmra.mrb[84].mxu1 %v4664_v0 }
  0xeb   :  { %971 = vmatprep.mubr.bf16.mxu1 %v4669_v1 }
  0xf2   :  { %972 = vmatmul.mubr.bf16.gmra.mrb[88].mxu1 %v4688_v6 }
  0xf3   :  { %981 = vmatprep.mubr.bf16.mxu1 %v4693_v7 }
  0xfa   :  { %982 = vmatmul.mubr.bf16.gmra.mrb[92].mxu1 %v4715_v14 }
  0xfb   :  { %991 = vmatprep.mubr.bf16.mxu1 %v4723_v16 }
 0x102   :  { %992 = vmatmul.mubr.bf16.gmra.mrb[96].mxu1 %v4751_v24 }
 0x103   :  { %1001 = vmatprep.mubr.bf16.mxu1 %v4756_v25 }
 0x10a   :  { %1002 = vmatmul.mubr.bf16.gmra.mrb[100].mxu1 %v4775_v30 }
 0x10b   :  { %1011 = vmatprep.mubr.bf16.mxu1 %v4780_v31 }
 0x112   :  { %1012 = vmatmul.mubr.bf16.gmra.mrb[104].mxu1 %v4799_v38 }
 0x113   :  { %1021 = vmatprep.mubr.bf16.mxu1 %v4804_v39 }
 0x115   :  { %v720_v52 = vpop.f32.mrb[0].mxu1 }
 0x116   :  { %v4958_v53 = vadd.f32 %v720_v52, %v4950_v46  ;;  %v722_v58 = vpop.f32.mrb[1].mxu1 }
 0x117   :  { %v723_v59 = vadd.f32 %v722_v58, %v4954_v47  ;;  %v724_v0 = vpop.f32.mrb[2].mxu1 }
 0x118   :  { %v1200_v1 = vmul.f32 0.044715, %v4958_v53  ;;  %v4963_v6 = vadd.f32 %v724_v0, %v4950_v46  ;;  %v726_v7 = vpop.f32.mrb[3].mxu1 }
 0x119   :  { %v1201_v14 = vmul.f32 0.044715, %v723_v59  ;;  %v4966_v16 = vadd.f32 %v726_v7, %v4954_v47  ;;  %v1072_v7 = vmul.f32 0.5, %v4958_v53 }
 0x11a   :  { %v1328_v19 = vmul.f32 %v1200_v1, %v4958_v53  ;;  %v1204_v20 = vmul.f32 0.044715, %v4963_v6  ;;  %1022 = vmatmul.mubr.bf16.gmra.mrb[108].mxu1 %v4820_v45  ;;  %v1073_v1 = vmul.f32 0.5, %v723_v59 }
 0x11b   :  { %v1205_v21 = vmul.f32 0.044715, %v4966_v16  ;;  %1031 = vmatprep.mubr.bf16.mxu1 %v4828_v49  ;;  %v1329_v22 = vmul.f32 %v1201_v14, %v723_v59 }
 0x11c   :  { %v1456_v23 = vmul.f32 %v1328_v19, %v4958_v53  ;;  %v1332_v24 = vmul.f32 %v1204_v20, %v4963_v6 }
 0x11d   :  { %v730_v25 = vpop.f32.mrb[4].mxu1  ;;  %v1333_v26 = vmul.f32 %v1205_v21, %v4966_v16  ;;  %v1457_v27 = vmul.f32 %v1329_v22, %v723_v59 }
 0x11e   :  { %v1460_v28 = vmul.f32 %v1332_v24, %v4963_v6  ;;  %v4978_v29 = vadd.f32 %v730_v25, %v4950_v46  ;;  %v732_v30 = vpop.f32.mrb[5].mxu1  ;;  %v1584_v31 = vadd.f32 %v1456_v23, %v4958_v53 }
 0x11f   :  { %v733_v32 = vadd.f32 %v732_v30, %v4954_v47  ;;  %v734_v33 = vpop.f32.mrb[6].mxu1  ;;  %v1461_v35 = vmul.f32 %v1333_v26, %v4966_v16  ;;  %v1585_v37 = vadd.f32 %v1457_v27, %v723_v59  ;;  %v1076_v30 = vmul.f32 0.5, %v4963_v6 }
 0x120   :  { %v1208_v38 = vmul.f32 0.044715, %v4978_v29  ;;  %v4985_v39 = vadd.f32 %v734_v33, %v4950_v46  ;;  %v736_v42 = vpop.f32.mrb[7].mxu1  ;;  %v1588_v43 = vadd.f32 %v1460_v28, %v4963_v6  ;;  %v1712_v44 = vmul.f32 0.7978846, %v1584_v31 }
 0x121   :  { %v1209_v45 = vmul.f32 0.044715, %v733_v32  ;;  %v737_v48 = vadd.f32 %v736_v42, %v4954_v47  ;;  %v1589_v49 = vadd.f32 %v1461_v35, %v4966_v16  ;;  %v1713_v50 = vmul.f32 0.7978846, %v1585_v37 }
 0x122   :  { %v1336_v51 = vmul.f32 %v1208_v38, %v4978_v29  ;;  %v1212_v54 = vmul.f32 0.044715, %v4985_v39  ;;  %1032 = vmatmul.mubr.bf16.gmra.mrb[112].mxu1 %v4844_v55  ;;  %v1716_v56 = vmul.f32 0.7978846, %v1588_v43  ;;  %4149 = vtanh.f32 %v1712_v44 }
 0x123   :  { %v1337_v60 = vmul.f32 %v1209_v45, %v733_v32  ;;  %v1213_v61 = vmul.f32 0.044715, %v737_v48  ;;  %1041 = vmatprep.mubr.bf16.mxu1 %v4852_v57  ;;  %v1717_v62 = vmul.f32 0.7978846, %v1589_v49  ;;  %4151 = vtanh.f32 %v1713_v50 }
 0x124   :  { %v1464_v2 = vmul.f32 %v1336_v51, %v4978_v29  ;;  %v1340_v4 = vmul.f32 %v1212_v54, %v4985_v39  ;;  %4153 = vtanh.f32 %v1716_v56  ;;  %v1077_v28 = vmul.f32 0.5, %v4966_v16 }
 0x125   :  { %v1465_v5 = vmul.f32 %v1337_v60, %v733_v32  ;;  %v1341_v8 = vmul.f32 %v1213_v61, %v737_v48  ;;  %v740_v10 = vpop.f32.mrb[8].mxu1  ;;  %4155 = vtanh.f32 %v1717_v62  ;;  %v5020_v31 = vmul.f32 0.5, %v733_v32 }
 0x126   :  { %v1468_v12 = vmul.f32 %v1340_v4, %v4985_v39  ;;  %v4998_v55 = vadd.f32 %v740_v10, %v4950_v46  ;;  %v742_v15 = vpop.f32.mrb[9].mxu1  ;;  %v1592_v52 = vadd.f32 %v1464_v2, %v4978_v29  ;;  %v5025_v45 = vmul.f32 0.5, %v737_v48 }
 0x127   :  { %v1469_v18 = vmul.f32 %v1341_v8, %v737_v48  ;;  %v5001_v57 = vadd.f32 %v742_v15, %v4954_v47  ;;  %v744_v13 = vpop.f32.mrb[10].mxu1  ;;  %v1593_v40 = vadd.f32 %v1465_v5, %v733_v32  ;;  %v1080_v61 = vmul.f32 0.5, %v4978_v29 }
 0x128   :  { %v5005_v58 = vadd.f32 %v744_v13, %v4950_v46  ;;  %v746_v0 = vpop.f32.mrb[11].mxu1  ;;  %v1596_v14 = vadd.f32 %v1468_v12, %v4985_v39  ;;  %v1216_v23 = vmul.f32 0.044715, %v4998_v55  ;;  %v1720_v24 = vmul.f32 0.7978846, %v1592_v52 }
 0x129   :  { %v1217_v19 = vmul.f32 0.044715, %v5001_v57  ;;  %v5011_v20 = vadd.f32 %v746_v0, %v4954_v47  ;;  %v1597_v21 = vadd.f32 %v1469_v18, %v737_v48  ;;  %v1721_v22 = vmul.f32 0.7978846, %v1593_v40  ;;  %v4101_v13 = vld [vmem:[%s6922_s3 + $0x100] ss:$8 sps:$4 sm:$0xff]  }
 0x12a   :  { %1042 = vmatmul.mubr.bf16.gmra.mrb[116].mxu1 %v4868_v63  ;;  %v1724_v25 = vmul.f32 0.7978846, %v1596_v14  ;;  %v1220_v63 = vmul.f32 0.044715, %v5005_v58  ;;  %v1344_v16 = vmul.f32 %v1216_v23, %v4998_v55  ;;  %v1084_v48 = vmul.f32 0.5, %v4985_v39 }
 0x12b   :  { %v1345_v26 = vmul.f32 %v1217_v19, %v5001_v57  ;;  %v1221_v59 = vmul.f32 0.044715, %v5011_v20  ;;  %1051 = vmatprep.mubr.bf16.mxu1 %v4876_v3  ;;  %v1725_v53 = vmul.f32 0.7978846, %v1597_v21  ;;  %4157 = vtanh.f32 %v1721_v22  ;;  %v4106_v22 = vld [vmem:[%s6922_s3 + $0x114] ss:$8 sps:$4 sm:$0xff]  }
 0x12c   :  { %v4150_v27 = vpop.eup %4149  ;;  %4159 = vtanh.f32 %v1720_v24  ;;  %v1348_v62 = vmul.f32 %v1220_v63, %v5005_v58  ;;  %v5044_v15 = vmul.f32 0.5, %v4998_v55  ;;  %v1472_v29 = vmul.f32 %v1344_v16, %v4998_v55 }
 0x12d   :  { %v4152_v33 = vpop.eup %4151  ;;  %v1349_v35 = vmul.f32 %v1221_v59, %v5011_v20  ;;  %v750_v37 = vpop.f32.mrb[12].mxu1  ;;  %v1968_v38 = vadd.f32 1.0, %v4150_v27  ;;  %4161 = vtanh.f32 %v1725_v53  ;;  %v1473_v3 = vmul.f32 %v1345_v26, %v5001_v57 }
 0x12e   :  { %v4154_v42 = vpop.eup %4153  ;;  %v752_v43 = vpop.f32.mrb[13].mxu1  ;;  %v1969_v44 = vadd.f32 1.0, %v4152_v33  ;;  %4163 = vtanh.f32 %v1724_v25  ;;  %v5030_v49 = vadd.f32 %v750_v37, %v4950_v46  ;;  %v1476_v14 = vmul.f32 %v1348_v62, %v5005_v58 }
 0x12f   :  { %v4156_v6 = vpop.eup %4155  ;;  %v1477_v32 = vmul.f32 %v1349_v35, %v5011_v20  ;;  %v754_v50 = vpop.f32.mrb[14].mxu1  ;;  %v1972_v51 = vadd.f32 1.0, %v4154_v42  ;;  %v5033_v54 = vadd.f32 %v752_v43, %v4954_v47  ;;  %v2096_v4 = vmul.f32 %v1968_v38, %v1072_v7  ;;  %v4109_v43 = vld [vmem:[%s6922_s3 + $0x124] ss:$8 sps:$4 sm:$0xff]  }
 0x130   :  { %v756_v56 = vpop.f32.mrb[15].mxu1  ;;  %v1973_v60 = vadd.f32 1.0, %v4156_v6  ;;  %v2097_v8 = vmul.f32 %v1969_v44, %v1073_v1  ;;  %v1601_v12 = vadd.f32 %v1473_v3, %v5001_v57  ;;  %v1224_v39 = vmul.f32 0.044715, %v5030_v49  ;;  %v4104_v3 = vld [vmem:[%s6922_s3 + $0x110] ss:$8 sps:$4 sm:$0xff]  }
 0x131   :  { %v5039_v2 = vadd.f32 %v756_v56, %v4954_v47  ;;  %v2100_v5 = vmul.f32 %v1972_v51, %v1076_v30  ;;  %v1225_v40 = vmul.f32 0.044715, %v5033_v54  ;;  %v5057_v19 = vadd.f32 %v754_v50, %v4950_v46 }
 0x132   :  { %1052 = vmatmul.mubr.bf16.gmra.mrb[120].mxu1 %v4892_v9  ;;  %v2101_v10 = vmul.f32 %v1973_v60, %v1077_v28  ;;  %v1605_v9 = vadd.f32 %v1477_v32, %v5011_v20  ;;  %v1729_v1 = vmul.f32 0.7978846, %v1601_v12  ;;  %v5069_v53 = vmul.f32 0.5, %v5011_v20 }
 0x133   :  { %v2288_v18 = vpack.c.bf16 %v2100_v5, %v2096_v4  ;;  %1061 = vmatprep.mubr.bf16.mxu1 %v4900_v11  ;;  %v1229_v52 = vmul.f32 0.044715, %v5039_v2  ;;  %v5063_v11 = vmul.f32 0.5, %v5001_v57  ;;  %v1352_v28 = vmul.f32 %v1224_v39, %v5030_v49 }
 0x134   :  { %v2289_v0 = vpack.c.bf16 %v2101_v10, %v2097_v8  ;;  %v1733_v23 = vmul.f32 0.7978846, %v1605_v9  ;;  %4165 = vtanh.f32 %v1729_v1  ;;  %v1353_v35 = vmul.f32 %v1225_v40, %v5033_v54 }
 0x135   :  { %v4158_v7 = vpop.eup %4157  ;;  %v760_v21 = vpop.f32.mrb[16].mxu1  ;;  %v1357_v37 = vmul.f32 %v1229_v52, %v5039_v2  ;;  %v1228_v44 = vmul.f32 0.044715, %v5057_v19  ;;  %v1600_v60 = vadd.f32 %v1472_v29, %v4998_v55  ;;  %v1604_v8 = vadd.f32 %v1476_v14, %v5005_v58  ;;  %v4112_v55 = vld [vmem:[%s6922_s3 + $0x134] ss:$8 sps:$4 sm:$0xff]  }
 0x136   :  { %v4160_v24 = vpop.eup %4159  ;;  %v5066_v25 = vadd.f32 %v760_v21, %v4950_v46  ;;  %v762_v26 = vpop.f32.mrb[17].mxu1  ;;  %2768 = vmatprep.mubr.bf16.mxu0 %v2289_v0  ;;  %v1977_v59 = vadd.f32 1.0, %v4158_v7  ;;  %4167 = vtanh.f32 %v1733_v23  ;;  %v1481_v10 = vmul.f32 %v1353_v35, %v5033_v54 }
 0x137   :  { %v4162_v27 = vpop.eup %4161  ;;  %v5073_v30 = vadd.f32 %v762_v26, %v4954_v47  ;;  %v764_v57 = vpop.f32.mrb[18].mxu1  ;;  %2769 = vmatmul.mubr.bf16.vlgmr.msra.gmra.mrb[0].mxu0 %v2288_v18  ;;  %v1976_v33 = vadd.f32 1.0, %v4160_v24  ;;  %v1485_v12 = vmul.f32 %v1357_v37, %v5039_v2  ;;  %v1728_v18 = vmul.f32 0.7978846, %v1600_v60  ;;  %v4113_v60 = vld [vmem:[%s6922_s3 + $0x140] ss:$8 sps:$4 sm:$0xff]  }
 0x138   :  { %v4164_v63 = vpop.eup %4163  ;;  %v5078_v38 = vadd.f32 %v764_v57, %v4950_v46  ;;  %v766_v20 = vpop.f32.mrb[19].mxu1  ;;  %2930 = vmatpush1.bf16.msra.mxu0 %v4101_v13  ;;  %v1981_v42 = vadd.f32 1.0, %v4162_v27  ;;  %v1232_v6 = vmul.f32 0.044715, %v5066_v25  ;;  %v2105_v51 = vmul.f32 %v1977_v59, %v5020_v31  ;;  %v4110_v27 = vld [vmem:[%s6922_s3 + $0x130] ss:$8 sps:$4 sm:$0xff]  }
 0x139   :  { %v5089_v16 = vadd.f32 %v766_v20, %v4954_v47  ;;  %v1980_v32 = vadd.f32 1.0, %v4164_v63  ;;  %2931 = vmatprep.subr.bf16.mxu0 %v4106_v22  ;;  %v1233_v50 = vmul.f32 0.044715, %v5073_v30  ;;  %v2104_v4 = vmul.f32 %v1976_v33, %v1080_v61 }
 0x13a   :  { %1062 = vmatmul.mubr.bf16.gmra.mrb[124].mxu1 %v4913_v17  ;;  %v2109_v56 = vmul.f32 %v1981_v42, %v5025_v45  ;;  %v1236_v62 = vmul.f32 0.044715, %v5078_v38  ;;  %v4107_v17 = vld [vmem:[%s6922_s3 + $0x120] ss:$8 sps:$4 sm:$0xff]   ;;  %v1356_v31 = vmul.f32 %v1228_v44, %v5057_v19  ;;  %v1732_v29 = vmul.f32 0.7978846, %v1604_v8 }
 0x13b   :  { %v2108_v5 = vmul.f32 %v1980_v32, %v1084_v48  ;;  %v1237_v45 = vmul.f32 0.044715, %v5089_v16  ;;  %v1480_v13 = vmul.f32 %v1352_v28, %v5030_v49  ;;  %v1360_v9 = vmul.f32 %v1232_v6, %v5066_v25 }
 0x13c   :  { %v2293_v39 = vpack.c.bf16 %v2109_v56, %v2105_v51  ;;  %2932 = vmatpush1.bf16.msra.mxu0 %v4104_v3  ;;  %4169 = vtanh.f32 %v1728_v18  ;;  %v1361_v0 = vmul.f32 %v1233_v50, %v5073_v30  ;;  %v1364_v1 = vmul.f32 %v1236_v62, %v5078_v38 }
 0x13d   :  { %v770_v61 = vpop.f32.mrb[20].mxu1  ;;  %v2292_v48 = vpack.c.bf16 %v2108_v5, %v2104_v4  ;;  %2933 = vmatprep.subr.bf16.mxu0 %v4109_v43  ;;  %4171 = vtanh.f32 %v1732_v29  ;;  %v5122_v24 = vmul.f32 0.5, %v5005_v58  ;;  %v1609_v26 = vadd.f32 %v1481_v10, %v5033_v54  ;;  %v4115_v58 = vld [vmem:[%s6922_s3 + $0x144] ss:$8 sps:$4 sm:$0xff]  }
 0x13e   :  { %v5111_v40 = vadd.f32 %v770_v61, %v4950_v46  ;;  %v772_v52 = vpop.f32.mrb[21].mxu1  ;;  %2778 = vmatprep.mubr.bf16.mxu0 %v2293_v39  ;;  %v4166_v21 = vpop.eup %4165  ;;  %v1613_v59 = vadd.f32 %v1485_v12, %v5039_v2  ;;  %v1484_v57 = vmul.f32 %v1356_v31, %v5057_v19  ;;  %v1365_v33 = vmul.f32 %v1237_v45, %v5089_v16 }
 0x13f   :  { %v5116_v7 = vadd.f32 %v772_v52, %v4954_v47  ;;  %v774_v14 = vpop.f32.mrb[22].mxu1  ;;  %2779 = vmatmul.mubr.bf16.gmra.mrb[4].mxu0 %v2292_v48  ;;  %v1985_v35 = vadd.f32 1.0, %v4166_v21  ;;  %v5138_v37 = vmul.f32 %v1360_v9, %v5066_v25  ;;  %v1737_v3 = vmul.f32 0.7978846, %v1609_v26 }
 0x140   :  { %v5119_v22 = vadd.f32 %v774_v14, %v4950_v46  ;;  %v776_v23 = vpop.f32.mrb[23].mxu1  ;;  %2934 = vmatpush1.bf16.msra.mxu0 %v4107_v17  ;;  %v4168_v28 = vpop.eup %4167  ;;  %v1240_v20 = vmul.f32 0.044715, %v5111_v40  ;;  %v1489_v43 = vmul.f32 %v1361_v0, %v5073_v30  ;;  %v5143_v44 = vmul.f32 %v1364_v1, %v5078_v38 }
 0x141   :  { %v5132_v63 = vadd.f32 %v776_v23, %v4954_v47  ;;  %2935 = vmatprep.subr.bf16.mxu0 %v4112_v55  ;;  %v1989_v42 = vadd.f32 1.0, %v4168_v28  ;;  %v1241_v6 = vmul.f32 0.044715, %v5116_v7  ;;  %v1741_v32 = vmul.f32 0.7978846, %v1613_v59 }
 0x142   :  { %v1244_v50 = vmul.f32 0.044715, %v5119_v22  ;;  %v2113_v51 = vmul.f32 %v1985_v35, %v5063_v11  ;;  %4173 = vtanh.f32 %v1737_v3  ;;  %v1493_v62 = vmul.f32 %v1365_v33, %v5089_v16  ;;  %v4118_v11 = vld [vmem:[%s6922_s3 + $0x154] ss:$8 sps:$4 sm:$0xff]  }
 0x143   :  { %v2117_v56 = vmul.f32 %v1989_v42, %v5069_v53  ;;  %v1245_v4 = vmul.f32 0.044715, %v5132_v63  ;;  %v5155_v8 = vmul.f32 0.5, %v5033_v54  ;;  %4175 = vtanh.f32 %v1741_v32 }
 0x144   :  { %2936 = vmatpush1.bf16.msra.mxu0 %v4110_v27  ;;  %v1368_v53 = vmul.f32 %v1240_v20, %v5111_v40  ;;  %v1608_v18 = vadd.f32 %v1480_v13, %v5030_v49  ;;  %v1369_v17 = vmul.f32 %v1241_v6, %v5116_v7  ;;  %v5170_v31 = vmul.f32 0.5, %v5039_v2  ;;  %v4116_v2 = vld [vmem:[%s6922_s3 + $0x150] ss:$8 sps:$4 sm:$0xff]  }
 0x145   :  { %v780_v5 = vpop.f32.mrb[24].mxu1  ;;  %2937 = vmatprep.subr.bf16.mxu0 %v4115_v58  ;;  %v2297_v39 = vpack.c.bf16 %v2117_v56, %v2113_v51  ;;  %v1612_v45 = vadd.f32 %v1484_v57, %v5057_v19  ;;  %v1372_v48 = vmul.f32 %v1244_v50, %v5119_v22  ;;  %v5178_v13 = vmul.f32 0.5, %v5030_v49  ;;  %v4121_v49 = vld [vmem:[%s6922_s3 + $0x164] ss:$8 sps:$4 sm:$0xff]  }
 0x146   :  { %v5162_v10 = vadd.f32 %v780_v5, %v4950_v46  ;;  %v782_v12 = vpop.f32.mrb[25].mxu1  ;;  %v4170_v61 = vpop.eup %4169  ;;  %v1736_v52 = vmul.f32 0.7978846, %v1608_v18  ;;  %v1373_v1 = vmul.f32 %v1245_v4, %v5132_v63  ;;  %v5191_v26 = vmul.f32 %v1368_v53, %v5111_v40 }
 0x147   :  { %v5167_v54 = vadd.f32 %v782_v12, %v4954_v47  ;;  %v784_v55 = vpop.f32.mrb[26].mxu1  ;;  %2788 = vmatprep.mubr.bf16.mxu0 %v2297_v39  ;;  %v4172_v0 = vpop.eup %4171  ;;  %v1984_v14 = vadd.f32 1.0, %v4170_v61  ;;  %v1740_v23 = vmul.f32 0.7978846, %v1612_v45  ;;  %v5195_v28 = vmul.f32 %v1369_v17, %v5116_v7 }
 0x148   :  { %v5175_v29 = vadd.f32 %v784_v55, %v4950_v46  ;;  %v786_v9 = vpop.f32.mrb[27].mxu1  ;;  %2938 = vmatpush1.bf16.msra.mxu0 %v4113_v60  ;;  %v1248_v59 = vmul.f32 0.044715, %v5162_v10  ;;  %v1988_v27 = vadd.f32 1.0, %v4172_v0  ;;  %4177 = vtanh.f32 %v1736_v52 }
 0x149   :  { %v5185_v21 = vadd.f32 %v786_v9, %v4954_v47  ;;  %2939 = vmatprep.subr.bf16.mxu0 %v4118_v11  ;;  %v1249_v57 = vmul.f32 0.044715, %v5167_v54  ;;  %4179 = vtanh.f32 %v1740_v23  ;;  %v2112_v35 = vmul.f32 %v1984_v14, %v5044_v15  ;;  %v4119_v15 = vld [vmem:[%s6922_s3 + $0x160] ss:$8 sps:$4 sm:$0xff]  }
 0x14a   :  { %v1252_v33 = vmul.f32 0.044715, %v5175_v29  ;;  %v2116_v58 = vmul.f32 %v1988_v27, %v5122_v24  ;;  %v1617_v42 = vadd.f32 %v1489_v43, %v5073_v30  ;;  %v5204_v3 = vmul.f32 %v1372_v48, %v5119_v22 }
 0x14b   :  { %v1253_v20 = vmul.f32 0.044715, %v5185_v21  ;;  %v5207_v6 = vmul.f32 %v1373_v1, %v5132_v63  ;;  %v5210_v50 = vmul.f32 0.5, %v5057_v19  ;;  %v1621_v51 = vadd.f32 %v1493_v62, %v5089_v16  ;;  %v4124_v19 = vld [vmem:[%s6922_s3 + $0x174] ss:$8 sps:$4 sm:$0xff]  }
 0x14c   :  { %2940 = vmatpush1.bf16.msra.mxu0 %v4116_v2  ;;  %v4174_v24 = vpop.eup %4173  ;;  %v1376_v43 = vmul.f32 %v1248_v59, %v5162_v10  ;;  %v2296_v56 = vpack.c.bf16 %v2116_v58, %v2112_v35  ;;  %v1745_v5 = vmul.f32 0.7978846, %v1617_v42  ;;  %v1377_v62 = vmul.f32 %v1249_v57, %v5167_v54  ;;  %v4122_v2 = vld [vmem:[%s6922_s3 + $0x170] ss:$8 sps:$4 sm:$0xff]   ;;  %v4125_v58 = vld [vmem:[%s6922_s3 + $0x180] ss:$8 sps:$4 sm:$0xff]  }
 0x14d   :  { %v790_v32 = vpop.f32.mrb[28].mxu1  ;;  %2941 = vmatprep.subr.bf16.mxu0 %v4121_v49  ;;  %v4176_v11 = vpop.eup %4175  ;;  %v1993_v12 = vadd.f32 1.0, %v4174_v24  ;;  %v1749_v18 = vmul.f32 0.7978846, %v1621_v51  ;;  %v1380_v17 = vmul.f32 %v1252_v33, %v5175_v29  ;;  %v1381_v55 = vmul.f32 %v1253_v20, %v5185_v21 }
 0x14e   :  { %v5218_v60 = vadd.f32 %v790_v32, %v4950_v46  ;;  %v792_v4 = vpop.f32.mrb[29].mxu1  ;;  %2789 = vmatmul.mubr.bf16.gmra.mrb[8].mxu0 %v2296_v56  ;;  %v1997_v45 = vadd.f32 1.0, %v4176_v11  ;;  %4181 = vtanh.f32 %v1745_v5  ;;  %v5233_v9 = vmul.f32 0.5, %v5073_v30  ;;  %v4127_v30 = vld [vmem:[%s6922_s3 + $0x184] ss:$8 sps:$4 sm:$0xff]  }
 0x14f   :  { %v5225_v53 = vadd.f32 %v792_v4, %v4954_v47  ;;  %v794_v39 = vpop.f32.mrb[30].mxu1  ;;  %v5236_v52 = vmul.f32 0.5, %v5089_v16  ;;  %4183 = vtanh.f32 %v1749_v18  ;;  %v5242_v0 = vmul.f32 %v1376_v43, %v5162_v10  ;;  %v4130_v4 = vld [vmem:[%s6922_s3 + $0x194] ss:$8 sps:$4 sm:$0xff]  }
 0x150   :  { %v796_v61 = vpop.f32.mrb[31].mxu1  ;;  %v5230_v48 = vadd.f32 %v794_v39, %v4950_v46  ;;  %2942 = vmatpush1.bf16.msra.mxu0 %v4119_v15  ;;  %v1256_v1 = vmul.f32 0.044715, %v5218_v60  ;;  %v2121_v14 = vmul.f32 %v1993_v12, %v5155_v8  ;;  %v2125_v23 = vmul.f32 %v1997_v45, %v5170_v31 }
 0x151   :  { %2943 = vmatprep.subr.bf16.mxu0 %v4124_v19  ;;  %v5251_v16 = vmul.f32 %v1377_v62, %v5167_v54  ;;  %v1257_v49 = vmul.f32 0.044715, %v5225_v53  ;;  %v1616_v59 = vadd.f32 %v5138_v37, %v5066_v25  ;;  %v1620_v27 = vadd.f32 %v5143_v44, %v5078_v38 }
 0x152   :  { %v4178_v57 = vpop.eup %4177  ;;  %v5259_v8 = vmul.f32 %v1380_v17, %v5175_v29  ;;  %v5262_v31 = vmul.f32 %v1381_v55, %v5185_v21  ;;  %v2301_v33 = vpack.c.bf16 %v2125_v23, %v2121_v14  ;;  %v5265_v35 = vmul.f32 0.5, %v5066_v25 }
 0x153   :  { %v4180_v20 = vpop.eup %4179  ;;  %v1260_v37 = vmul.f32 0.044715, %v5230_v48  ;;  %v1992_v42 = vadd.f32 1.0, %v4178_v57  ;;  %v5272_v44 = vadd.f32 %v796_v61, %v4954_v47  ;;  %v1744_v51 = vmul.f32 0.7978846, %v1616_v59 }
 0x154   :  { %2944 = vmatpush1.bf16.msra.mxu0 %v4122_v2  ;;  %v1384_v15 = vmul.f32 %v1256_v1, %v5218_v60  ;;  %2798 = vmatprep.mubr.bf16.mxu0 %v2301_v33  ;;  %v1996_v24 = vadd.f32 1.0, %v4180_v20  ;;  %v1748_v56 = vmul.f32 0.7978846, %v1620_v27  ;;  %v1385_v5 = vmul.f32 %v1257_v49, %v5225_v53 }
 0x155   :  { %v800_v32 = vpop.f32.mrb[32].mxu1  ;;  %2945 = vmatprep.subr.bf16.mxu0 %v4127_v30  ;;  %v5286_v62 = vmul.f32 0.5, %v5078_v38  ;;  %4185 = vtanh.f32 %v1744_v51  ;;  %v2120_v12 = vmul.f32 %v1992_v42, %v5178_v13  ;;  %v1388_v55 = vmul.f32 %v1260_v37, %v5230_v48  ;;  %v4128_v13 = vld [vmem:[%s6922_s3 + $0x190] ss:$8 sps:$4 sm:$0xff]   ;;  %v4133_v30 = vld [vmem:[%s6922_s3 + $0x1a4] ss:$8 sps:$4 sm:$0xff]  }
 0x156   :  { %v5276_v25 = vadd.f32 %v800_v32, %v4950_v46  ;;  %v802_v43 = vpop.f32.mrb[33].mxu1  ;;  %v2124_v39 = vmul.f32 %v1996_v24, %v5210_v50  ;;  %4187 = vtanh.f32 %v1748_v56  ;;  %v1261_v45 = vmul.f32 0.044715, %v5272_v44 }
 0x157   :  { %v5283_v19 = vadd.f32 %v802_v43, %v4954_v47  ;;  %v804_v11 = vpop.f32.mrb[34].mxu1  ;;  %v1625_v38 = vadd.f32 %v5195_v28, %v5116_v7  ;;  %v1629_v23 = vadd.f32 %v5207_v6, %v5132_v63  ;;  %v5311_v49 = vmul.f32 %v1384_v15, %v5218_v60  ;;  %v4131_v15 = vld [vmem:[%s6922_s3 + $0x1a0] ss:$8 sps:$4 sm:$0xff]  }
 0x158   :  { %v5291_v18 = vadd.f32 %v804_v11, %v4950_v46  ;;  %v806_v17 = vpop.f32.mrb[35].mxu1  ;;  %2946 = vmatpush1.bf16.msra.mxu0 %v4125_v58  ;;  %v4182_v50 = vpop.eup %4181  ;;  %v2300_v2 = vpack.c.bf16 %v2124_v39, %v2120_v12  ;;  %v1264_v1 = vmul.f32 0.044715, %v5276_v25  ;;  %v5316_v20 = vmul.f32 0.5, %v5116_v7 }
 0x159   :  { %v5296_v61 = vadd.f32 %v806_v17, %v4954_v47  ;;  %v1265_v14 = vmul.f32 0.044715, %v5283_v19  ;;  %2947 = vmatprep.subr.bf16.mxu0 %v4130_v4  ;;  %v4184_v28 = vpop.eup %4183  ;;  %v2001_v59 = vadd.f32 1.0, %v4182_v50  ;;  %v1753_v57 = vmul.f32 0.7978846, %v1625_v38 }
 0x15a   :  { %v1268_v27 = vmul.f32 0.044715, %v5291_v18  ;;  %2799 = vmatmul.mubr.bf16.gmra.mrb[12].mxu0 %v2300_v2  ;;  %v2005_v33 = vadd.f32 1.0, %v4184_v28  ;;  %v1757_v6 = vmul.f32 0.7978846, %v1629_v23  ;;  %v5319_v37 = vmul.f32 %v1385_v5, %v5225_v53 }
 0x15b   :  { %v1269_v58 = vmul.f32 0.044715, %v5296_v61  ;;  %v5322_v42 = vmul.f32 %v1388_v55, %v5230_v48  ;;  %v1389_v32 = vmul.f32 %v1261_v45, %v5272_v44  ;;  %4189 = vtanh.f32 %v1753_v57  ;;  %v4136_v4 = vld [vmem:[%s6922_s3 + $0x1b4] ss:$8 sps:$4 sm:$0xff]   ;;  %v4134_v23 = vld [vmem:[%s6922_s3 + $0x1b0] ss:$8 sps:$4 sm:$0xff]  }
 0x15c   :  { %2948 = vmatpush1.bf16.msra.mxu0 %v4128_v13  ;;  %v2129_v24 = vmul.f32 %v2001_v59, %v5233_v9  ;;  %v2133_v7 = vmul.f32 %v2005_v33, %v5236_v52  ;;  %4191 = vtanh.f32 %v1757_v6  ;;  %v1392_v5 = vmul.f32 %v1264_v1, %v5276_v25 }
 0x15d   :  { %v810_v51 = vpop.f32.mrb[36].mxu1  ;;  %2949 = vmatprep.subr.bf16.mxu0 %v4133_v30  ;;  %v1393_v11 = vmul.f32 %v1265_v14, %v5283_v19  ;;  %v1396_v12 = vmul.f32 %v1268_v27, %v5291_v18  ;;  %v1397_v17 = vmul.f32 %v1269_v58, %v5296_v61  ;;  %v1624_v45 = vadd.f32 %v5191_v26, %v5111_v40  ;;  %v4139_v26 = vld [vmem:[%s6922_s3 + $0x1c4] ss:$8 sps:$4 sm:$0xff]  }
 0x15e   :  { %v5331_v43 = vadd.f32 %v810_v51, %v4950_v46  ;;  %v812_v56 = vpop.f32.mrb[37].mxu1  ;;  %v2305_v39 = vpack.c.bf16 %v2133_v7, %v2129_v24  ;;  %v5349_v50 = vmul.f32 %v1389_v32, %v5272_v44  ;;  %v1628_v1 = vadd.f32 %v5204_v3, %v5119_v22 }
 0x15f   :  { %v5340_v9 = vadd.f32 %v812_v56, %v4954_v47  ;;  %v814_v52 = vpop.f32.mrb[38].mxu1  ;;  %v4186_v13 = vpop.eup %4185  ;;  %v1117_v27 = vmul.f32 0.5, %v5132_v63  ;;  %v1752_v3 = vmul.f32 0.7978846, %v1624_v45  ;;  %v5366_v57 = vmul.f32 %v1392_v5, %v5276_v25 }
 0x160   :  { %v5344_v55 = vadd.f32 %v814_v52, %v4950_v46  ;;  %v816_v38 = vpop.f32.mrb[39].mxu1  ;;  %v1272_v2 = vmul.f32 0.044715, %v5331_v43  ;;  %2950 = vmatpush1.bf16.msra.mxu0 %v4131_v15  ;;  %v4188_v30 = vpop.eup %4187  ;;  %2808 = vmatprep.mubr.bf16.mxu0 %v2305_v39  ;;  %v2000_v28 = vadd.f32 1.0, %v4186_v13  ;;  %v5369_v33 = vmul.f32 %v1393_v11, %v5283_v19 }
 0x161   :  { %v5355_v14 = vadd.f32 %v816_v38, %v4954_v47  ;;  %v1273_v59 = vmul.f32 0.044715, %v5340_v9  ;;  %2951 = vmatprep.subr.bf16.mxu0 %v4136_v4  ;;  %v2004_v58 = vadd.f32 1.0, %v4188_v30  ;;  %v1756_v6 = vmul.f32 0.7978846, %v1628_v1 }
 0x162   :  { %v5372_v32 = vmul.f32 %v1396_v12, %v5291_v18  ;;  %v5375_v51 = vmul.f32 %v1397_v17, %v5296_v61  ;;  %v1276_v15 = vmul.f32 0.044715, %v5344_v55  ;;  %4193 = vtanh.f32 %v1752_v3 }
 0x163   :  { %v2128_v63 = vmul.f32 %v2000_v28, %v5265_v35  ;;  %v2132_v24 = vmul.f32 %v2004_v58, %v5286_v62  ;;  %4195 = vtanh.f32 %v1756_v6  ;;  %v1277_v7 = vmul.f32 0.044715, %v5355_v14  ;;  %v4137_v35 = vld [vmem:[%s6922_s3 + $0x1c0] ss:$8 sps:$4 sm:$0xff]  }
 0x164   :  { %2952 = vmatpush1.bf16.msra.mxu0 %v4134_v23  ;;  %v1400_v4 = vmul.f32 %v1272_v2, %v5331_v43  ;;  %v1401_v5 = vmul.f32 %v1273_v59, %v5340_v9  ;;  %v1633_v52 = vadd.f32 %v5251_v16, %v5167_v54  ;;  %v5392_v17 = vmul.f32 0.5, %v5111_v40  ;;  %v4142_v16 = vld [vmem:[%s6922_s3 + $0x1d4] ss:$8 sps:$4 sm:$0xff]  }
 0x165   :  { %v820_v56 = vpop.f32.mrb[40].mxu1  ;;  %2953 = vmatprep.subr.bf16.mxu0 %v4139_v26  ;;  %v4190_v62 = vpop.eup %4189  ;;  %v2304_v39 = vpack.c.bf16 %v2132_v24, %v2128_v63  ;;  %v5395_v45 = vmul.f32 0.5, %v5119_v22  ;;  %v1637_v38 = vadd.f32 %v5262_v31, %v5185_v21  ;;  %v1404_v23 = vmul.f32 %v1276_v15, %v5344_v55  ;;  %v4140_v15 = vld [vmem:[%s6922_s3 + $0x1d0] ss:$8 sps:$4 sm:$0xff]  }
 0x166   :  { %v5384_v11 = vadd.f32 %v820_v56, %v4950_v46  ;;  %v822_v12 = vpop.f32.mrb[41].mxu1  ;;  %v4192_v2 = vpop.eup %4191  ;;  %v2009_v1 = vadd.f32 1.0, %v4190_v62  ;;  %v1761_v40 = vmul.f32 0.7978846, %v1633_v52  ;;  %v1405_v28 = vmul.f32 %v1277_v7, %v5355_v14  ;;  %v4145_v7 = vld [vmem:[%s6922_s3 + $0x1e4] ss:$8 sps:$4 sm:$0xff]  }
 0x167   :  { %v824_v13 = vpop.f32.mrb[42].mxu1  ;;  %v5404_v26 = vadd.f32 %v822_v12, %v4954_v47  ;;  %2809 = vmatmul.mubr.bf16.gmra.mrb[16].mxu0 %v2304_v39  ;;  %v2013_v22 = vadd.f32 1.0, %v4192_v2  ;;  %v5408_v31 = vmul.f32 0.5, %v5167_v54  ;;  %v1765_v59 = vmul.f32 0.7978846, %v1637_v38 }
 0x168   :  { %v826_v30 = vpop.f32.mrb[43].mxu1  ;;  %v5411_v3 = vmul.f32 %v1400_v4, %v5331_v43  ;;  %v5414_v58 = vmul.f32 %v1401_v5, %v5340_v9  ;;  %v1280_v6 = vmul.f32 0.044715, %v5384_v11  ;;  %4197 = vtanh.f32 %v1761_v40  ;;  %2954 = vmatpush1.bf16.msra.mxu0 %v4137_v35  ;;  %v4143_v39 = vld [vmem:[%s6922_s3 + $0x1e0] ss:$8 sps:$4 sm:$0xff]  }
 0x169   :  { %v2137_v63 = vmul.f32 %v2009_v1, %v5316_v20  ;;  %v2141_v24 = vmul.f32 %v2013_v22, %v1117_v27  ;;  %4199 = vtanh.f32 %v1765_v59  ;;  %v5422_v54 = vadd.f32 %v824_v13, %v4950_v46  ;;  %2955 = vmatprep.subr.bf16.mxu0 %v4142_v16 }
 0x16a   :  { %v5428_v56 = vmul.f32 %v1404_v23, %v5344_v55  ;;  %v1281_v4 = vmul.f32 0.044715, %v5404_v26  ;;  %v1632_v5 = vadd.f32 %v5242_v0, %v5162_v10  ;;  %v1636_v20 = vadd.f32 %v5259_v8, %v5175_v29 }
 0x16b   :  { %v2309_v27 = vpack.c.bf16 %v2141_v24, %v2137_v63  ;;  %v5436_v12 = vmul.f32 %v1405_v28, %v5355_v14  ;;  %v5439_v52 = vmul.f32 0.5, %v5185_v21  ;;  %v5442_v35 = vadd.f32 %v826_v30, %v4954_v47 }
 0x16c   :  { %v4194_v38 = vpop.eup %4193  ;;  %v5448_v0 = vmul.f32 0.5, %v5162_v10  ;;  %v1760_v8 = vmul.f32 0.7978846, %v1632_v5  ;;  %v1764_v13 = vmul.f32 0.7978846, %v1636_v20  ;;  %2956 = vmatpush1.bf16.msra.mxu0 %v4140_v15  ;;  %v1408_v23 = vmul.f32 %v1280_v6, %v5384_v11 }
 0x16d   :  { %v830_v62 = vpop.f32.mrb[44].mxu1  ;;  %v4196_v21 = vpop.eup %4195  ;;  %2818 = vmatprep.mubr.bf16.mxu0 %v2309_v27  ;;  %v2008_v1 = vadd.f32 1.0, %v4194_v38  ;;  %v1284_v40 = vmul.f32 0.044715, %v5422_v54  ;;  %2957 = vmatprep.subr.bf16.mxu0 %v4145_v7  ;;  %v4148_v10 = vld [vmem:[%s6922_s3 + $0x1f4] ss:$8 sps:$4 sm:$0xff]   ;;  %v1409_v59 = vmul.f32 %v1281_v4, %v5404_v26  ;;  %v1641_v15 = vadd.f32 %v5319_v37, %v5225_v53 }
 0x16e   :  { %v5451_v16 = vadd.f32 %v830_v62, %v4950_v46  ;;  %v832_v2 = vpop.f32.mrb[45].mxu1  ;;  %v2012_v28 = vadd.f32 1.0, %v4196_v21  ;;  %4201 = vtanh.f32 %v1760_v8  ;;  %v5465_v6 = vmul.f32 0.5, %v5175_v29 }
 0x16f   :  { %v5456_v30 = vadd.f32 %v832_v2, %v4954_v47  ;;  %v834_v22 = vpop.f32.mrb[46].mxu1  ;;  %4203 = vtanh.f32 %v1764_v13  ;;  %v1285_v24 = vmul.f32 0.044715, %v5442_v35  ;;  %v2136_v5 = vmul.f32 %v2008_v1, %v5392_v17  ;;  %v4146_v17 = vld [vmem:[%s6922_s3 + $0x1f0] ss:$8 sps:$4 sm:$0xff]  }
 0x170   :  { %v836_v63 = vpop.f32.mrb[47].mxu1  ;;  %v1288_v7 = vmul.f32 0.044715, %v5451_v16  ;;  %v2140_v20 = vmul.f32 %v2012_v28, %v5395_v45  ;;  %v1645_v4 = vadd.f32 %v5349_v50, %v5272_v44  ;;  %v1769_v27 = vmul.f32 0.7978846, %v1641_v15  ;;  %2958 = vmatpush1.bf16.msra.mxu0 %v4143_v39 }
 0x171   :  { %v5474_v37 = vmul.f32 %v1408_v23, %v5384_v11  ;;  %v1412_v29 = vmul.f32 %v1284_v40, %v5422_v54  ;;  %v1289_v62 = vmul.f32 0.044715, %v5456_v30  ;;  %v5479_v38 = vadd.f32 %v834_v22, %v4950_v46  ;;  %2959 = vmatprep.subr.bf16.mxu0 %v4148_v10 }
 0x172   :  { %v4198_v45 = vpop.eup %4197  ;;  %v2308_v8 = vpack.c.bf16 %v2140_v20, %v2136_v5  ;;  %v5485_v50 = vmul.f32 %v1409_v59, %v5404_v26  ;;  %v1773_v39 = vmul.f32 0.7978846, %v1645_v4  ;;  %4205 = vtanh.f32 %v1769_v27 }
 0x173   :  { %v4200_v13 = vpop.eup %4199  ;;  %v2017_v2 = vadd.f32 1.0, %v4198_v45  ;;  %v1413_v21 = vmul.f32 %v1285_v24, %v5442_v35  ;;  %v1416_v1 = vmul.f32 %v1288_v7, %v5451_v16  ;;  %v5490_v23 = vmul.f32 0.5, %v5225_v53 }
 0x174   :  { %2819 = vmatmul.mubr.bf16.gmra.mrb[20].mxu0 %v2308_v8  ;;  %v2021_v22 = vadd.f32 1.0, %v4200_v13  ;;  %4207 = vtanh.f32 %v1773_v39  ;;  %v1640_v10 = vadd.f32 %v5311_v49, %v5218_v60  ;;  %v1644_v28 = vadd.f32 %v5322_v42, %v5230_v48 }
 0x175   :  { %v840_v40 = vpop.f32.mrb[48].mxu1  ;;  %v5497_v15 = vmul.f32 %v1412_v29, %v5422_v54  ;;  %v1417_v24 = vmul.f32 %v1289_v62, %v5456_v30  ;;  %v1292_v7 = vmul.f32 0.044715, %v5479_v38  ;;  %v5502_v53 = vadd.f32 %v836_v63, %v4954_v47  ;;  %2960 = vmatpush1.bf16.msra.mxu0 %v4146_v17 }
 0x176   :  { %v842_v59 = vpop.f32.mrb[49].mxu1  ;;  %v2145_v20 = vmul.f32 %v2017_v2, %v5408_v31  ;;  %v2149_v49 = vmul.f32 %v2021_v22, %v5439_v52  ;;  %v1768_v4 = vmul.f32 0.7978846, %v1640_v10  ;;  %v1772_v27 = vmul.f32 0.7978846, %v1644_v28 }
 0x177   :  { %v844_v5 = vpop.f32.mrb[50].mxu1  ;;  %v5507_v45 = vmul.f32 %v1413_v21, %v5442_v35  ;;  %v1133_v29 = vmul.f32 0.5, %v5272_v44  ;;  %v5511_v62 = vadd.f32 %v840_v40, %v4950_v46  ;;  %v5514_v63 = vadd.f32 %v842_v59, %v4954_v47 }
 0x178   :  { %v846_v42 = vpop.f32.mrb[51].mxu1  ;;  %v4202_v8 = vpop.eup %4201  ;;  %v2313_v17 = vpack.c.bf16 %v2149_v49, %v2145_v20  ;;  %v5517_v31 = vmul.f32 %v1416_v1, %v5451_v16  ;;  %v5520_v52 = vmul.f32 0.5, %v5218_v60  ;;  %4209 = vtanh.f32 %v1768_v4 }
 0x179   :  { %v4204_v39 = vpop.eup %4203  ;;  %v2016_v13 = vadd.f32 1.0, %v4202_v8  ;;  %v1420_v2 = vmul.f32 %v1292_v7, %v5479_v38  ;;  %4211 = vtanh.f32 %v1772_v27  ;;  %v1293_v44 = vmul.f32 0.044715, %v5502_v53 }
 0x17a   :  { %2828 = vmatprep.mubr.bf16.mxu0 %v2313_v17  ;;  %v2020_v21 = vadd.f32 1.0, %v4204_v39  ;;  %v5525_v40 = vmul.f32 %v1417_v24, %v5456_v30  ;;  %v1649_v1 = vadd.f32 %v5369_v33, %v5283_v19  ;;  %v1653_v60 = vadd.f32 %v5375_v51, %v5296_v61 }
 0x17b   :  { %v1132_v22 = vmul.f32 0.5, %v5230_v48  ;;  %v1296_v10 = vmul.f32 0.044715, %v5511_v62  ;;  %v1297_v28 = vmul.f32 0.044715, %v5514_v63  ;;  %v5535_v59 = vadd.f32 %v844_v5, %v4950_v46 }
 0x17c   :  { %v4206_v20 = vpop.eup %4205  ;;  %v2144_v24 = vmul.f32 %v2016_v13, %v5448_v0  ;;  %v2148_v49 = vmul.f32 %v2020_v21, %v5465_v6  ;;  %v1777_v4 = vmul.f32 0.7978846, %v1649_v1  ;;  %v1781_v33 = vmul.f32 0.7978846, %v1653_v60 }
 0x17d   :  { %v850_v7 = vpop.f32.mrb[52].mxu1  ;;  %v2025_v8 = vadd.f32 1.0, %v4206_v20  ;;  %v5540_v51 = vmul.f32 %v1420_v2, %v5479_v38  ;;  %v1421_v48 = vmul.f32 %v1293_v44, %v5502_v53  ;;  %v1300_v17 = vmul.f32 0.044715, %v5535_v59 }
 0x17e   :  { %v852_v27 = vpop.f32.mrb[53].mxu1  ;;  %v4208_v5 = vpop.eup %4207  ;;  %v2312_v41 = vpack.c.bf16 %v2148_v49, %v2144_v24  ;;  %4213 = vtanh.f32 %v1777_v4  ;;  %v1648_v0 = vadd.f32 %v5366_v57, %v5276_v25  ;;  %v1652_v6 = vadd.f32 %v5372_v32, %v5291_v18 }
 0x17f   :  { %v854_v39 = vpop.f32.mrb[54].mxu1  ;;  %v2029_v21 = vadd.f32 1.0, %v4208_v5  ;;  %v1424_v1 = vmul.f32 %v1296_v10, %v5511_v62  ;;  %v5550_v2 = vmul.f32 0.5, %v5283_v19  ;;  %4215 = vtanh.f32 %v1781_v33 }
 0x180   :  { %v856_v13 = vpop.f32.mrb[55].mxu1  ;;  %2829 = vmatmul.mubr.bf16.gmra.mrb[24].mxu0 %v2312_v41  ;;  %v1425_v44 = vmul.f32 %v1297_v28, %v5514_v63  ;;  %v1776_v60 = vmul.f32 0.7978846, %v1648_v0  ;;  %v1780_v20 = vmul.f32 0.7978846, %v1652_v6  ;;  %v5554_v24 = vadd.f32 %v846_v42, %v4954_v47 }
 0x181   :  { %v2153_v57 = vmul.f32 %v2025_v8, %v5490_v23  ;;  %v2157_v49 = vmul.f32 %v2029_v21, %v1133_v29  ;;  %v5558_v32 = vmul.f32 %v1421_v48, %v5502_v53  ;;  %v1141_v10 = vmul.f32 0.5, %v5296_v61 }
 0x182   :  { %v4210_v4 = vpop.eup %4209  ;;  %v1428_v19 = vmul.f32 %v1300_v17, %v5535_v59  ;;  %4217 = vtanh.f32 %v1776_v60  ;;  %v5563_v41 = vadd.f32 %v850_v7, %v4950_v46  ;;  %v5566_v28 = vadd.f32 %v852_v27, %v4954_v47 }
 0x183   :  { %v4212_v42 = vpop.eup %4211  ;;  %v2317_v33 = vpack.c.bf16 %v2157_v49, %v2153_v57  ;;  %v2024_v5 = vadd.f32 1.0, %v4210_v4  ;;  %4219 = vtanh.f32 %v1780_v20  ;;  %v1301_v23 = vmul.f32 0.044715, %v5554_v24 }
 0x184   :  { %v2028_v8 = vadd.f32 1.0, %v4212_v42  ;;  %v5570_v61 = vmul.f32 %v1424_v1, %v5511_v62  ;;  %v5573_v48 = vmul.f32 %v1425_v44, %v5514_v63  ;;  %v1657_v7 = vadd.f32 %v5414_v58, %v5340_v9 }
 0x185   :  { %v860_v29 = vpop.f32.mrb[56].mxu1  ;;  %2838 = vmatprep.mubr.bf16.mxu0 %v2317_v33  ;;  %v1136_v27 = vmul.f32 0.5, %v5276_v25  ;;  %v1140_v0 = vmul.f32 0.5, %v5291_v18  ;;  %v1661_v6 = vadd.f32 %v5436_v12, %v5355_v14  ;;  %v5582_v21 = vadd.f32 %v854_v39, %v4950_v46 }
 0x186   :  { %v862_v17 = vpop.f32.mrb[57].mxu1  ;;  %v2152_v60 = vmul.f32 %v2024_v5, %v5520_v52  ;;  %v2156_v44 = vmul.f32 %v2028_v8, %v1132_v22  ;;  %v1304_v20 = vmul.f32 0.044715, %v5563_v41  ;;  %v1785_v57 = vmul.f32 0.7978846, %v1657_v7 }
 0x187   :  { %6935 = vst [vmem:[#allocation4_spill] sm:$0xff] %v5582_v21  ;;  %v864_v1 = vpop.f32.mrb[58].mxu1  ;;  %v5589_v49 = vmul.f32 %v1428_v19, %v5535_v59  ;;  %v1429_v25 = vmul.f32 %v1301_v23, %v5554_v24  ;;  %v1305_v18 = vmul.f32 0.044715, %v5566_v28  ;;  %v1789_v12 = vmul.f32 0.7978846, %v1661_v6 }
 0x188   :  { %v5586_v58 = vpop.f32.mrb[59].mxu1  ;;  %v4214_v4 = vpop.eup %4213  ;;  %v2316_v39 = vpack.c.bf16 %v2156_v44, %v2152_v60  ;;  %4221 = vtanh.f32 %v1785_v57  ;;  %v1308_v42 = vmul.f32 0.044715, %v5582_v21  ;;  %v1656_v52 = vadd.f32 %v5411_v3, %v5331_v43 }
 0x189   :  { %v4216_v22 = vpop.eup %4215  ;;  %v2033_v33 = vadd.f32 1.0, %v4214_v4  ;;  %v5597_v5 = vmul.f32 0.5, %v5340_v9  ;;  %4223 = vtanh.f32 %v1789_v12  ;;  %v1660_v19 = vadd.f32 %v5428_v56, %v5344_v55 }
 0x18a   :  { %2839 = vmatmul.mubr.bf16.gmra.mrb[28].mxu0 %v2316_v39  ;;  %v2037_v23 = vadd.f32 1.0, %v4216_v22  ;;  %v1432_v8 = vmul.f32 %v1304_v20, %v5563_v41  ;;  %v1784_v7 = vmul.f32 0.7978846, %v1656_v52  ;;  %v5603_v6 = vadd.f32 %v856_v13, %v4954_v47 }
 0x18b   :  { %v5606_v60 = vmul.f32 %v1429_v25, %v5554_v24  ;;  %v1433_v3 = vmul.f32 %v1305_v18, %v5566_v28  ;;  %v1149_v9 = vmul.f32 0.5, %v5355_v14  ;;  %v1788_v44 = vmul.f32 0.7978846, %v1660_v19 }
 0x18c   :  { %v4218_v12 = vpop.eup %4217  ;;  %v2161_v56 = vmul.f32 %v2033_v33, %v5550_v2  ;;  %v2165_v4 = vmul.f32 %v2037_v23, %v1141_v10  ;;  %v1436_v39 = vmul.f32 %v1308_v42, %v5582_v21  ;;  %4225 = vtanh.f32 %v1784_v7 }
 0x18d   :  { %v870_v57 = vpop.f32.mrb[60].mxu1  ;;  %v4220_v52 = vpop.eup %4219  ;;  %v2032_v13 = vadd.f32 1.0, %v4218_v12  ;;  %4227 = vtanh.f32 %v1788_v44  ;;  %v5613_v25 = vadd.f32 %v860_v29, %v4950_v46  ;;  %v5616_v18 = vadd.f32 %v862_v17, %v4954_v47 }
 0x18e   :  { %v872_v20 = vpop.f32.mrb[61].mxu1  ;;  %v2321_v22 = vpack.c.bf16 %v2165_v4, %v2161_v56  ;;  %v2036_v19 = vadd.f32 1.0, %v4220_v52  ;;  %v5621_v2 = vmul.f32 %v1432_v8, %v5563_v41  ;;  %v1309_v10 = vmul.f32 0.044715, %v5603_v6 }
 0x18f   :  { %v5618_v14 = vpop.f32.mrb[62].mxu1  ;;  %v5627_v33 = vmul.f32 %v1433_v3, %v5566_v28  ;;  %v1144_v29 = vmul.f32 0.5, %v5331_v43  ;;  %v1148_v23 = vmul.f32 0.5, %v5344_v55  ;;  %v1665_v17 = vadd.f32 %v5485_v50, %v5404_v26 }
 0x190   :  { %v5624_v42 = vpop.f32.mrb[63].mxu1  ;;  %2848 = vmatprep.mubr.bf16.mxu0 %v2321_v22  ;;  %v2160_v7 = vmul.f32 %v2032_v13, %v1136_v27  ;;  %v2164_v44 = vmul.f32 %v2036_v19, %v1140_v0  ;;  %v5634_v8 = vmul.f32 %v1436_v39, %v5582_v21  ;;  %v1669_v12 = vadd.f32 %v5507_v45, %v5442_v35 }
 0x191   :  { %v1312_v56 = vmul.f32 0.044715, %v5613_v25  ;;  %v1313_v3 = vmul.f32 0.044715, %v5616_v18  ;;  %v1793_v4 = vmul.f32 0.7978846, %v1665_v17  ;;  %v5641_v43 = vadd.f32 %v864_v1, %v4950_v46 }
 0x192   :  { %6936 = vst [vmem:[#allocation5_spill] sm:$0xff] %v5634_v8  ;;  %v4222_v55 = vpop.eup %4221  ;;  %v2320_v52 = vpack.c.bf16 %v2164_v44, %v2160_v7  ;;  %v1437_v50 = vmul.f32 %v1309_v10, %v5603_v6  ;;  %v1797_v27 = vmul.f32 0.7978846, %v1669_v12  ;;  %v1664_v0 = vadd.f32 %v5474_v37, %v5384_v11 }
 0x193   :  { %v4224_v39 = vpop.eup %4223  ;;  %v2041_v13 = vadd.f32 1.0, %v4222_v55  ;;  %4229 = vtanh.f32 %v1793_v4  ;;  %v1316_v45 = vmul.f32 0.044715, %v5641_v43  ;;  %v1668_v22 = vadd.f32 %v5497_v15, %v5422_v54 }
 0x194   :  { %2849 = vmatmul.mubr.bf16.gmra.mrb[32].mxu0 %v2320_v52  ;;  %v2045_v1 = vadd.f32 1.0, %v4224_v39  ;;  %4231 = vtanh.f32 %v1797_v27  ;;  %v1792_v17 = vmul.f32 0.7978846, %v1664_v0  ;;  %v5653_v10 = vadd.f32 %v5586_v58, %v4954_v47 }
 0x195   :  { %v5649_v19 = vpop.f32.mrb[64].mxu1  ;;  %v1440_v37 = vmul.f32 %v1312_v56, %v5613_v25  ;;  %v1441_v44 = vmul.f32 %v1313_v3, %v5616_v18  ;;  %v1796_v12 = vmul.f32 0.7978846, %v1668_v22  ;;  %v5660_v4 = vadd.f32 %v870_v57, %v4950_v46 }
 0x196   :  { %v5655_v7 = vpop.f32.mrb[65].mxu1  ;;  %v4226_v55 = vpop.eup %4225  ;;  %v2169_v52 = vmul.f32 %v2041_v13, %v5597_v5  ;;  %v2173_v27 = vmul.f32 %v2045_v1, %v1149_v9  ;;  %v1153_v0 = vmul.f32 0.5, %v5404_v26  ;;  %4233 = vtanh.f32 %v1792_v17 }
 0x197   :  { %v5662_v15 = vpop.f32.mrb[66].mxu1  ;;  %v4228_v39 = vpop.eup %4227  ;;  %v2040_v36 = vadd.f32 1.0, %v4226_v55  ;;  %v1444_v56 = vmul.f32 %v1316_v45, %v5641_v43  ;;  %4235 = vtanh.f32 %v1796_v12  ;;  %v1317_v3 = vmul.f32 0.044715, %v5653_v10 }
 0x198   :  { %v5666_v58 = vpop.f32.mrb[67].mxu1  ;;  %v2325_v57 = vpack.c.bf16 %v2173_v27, %v2169_v52  ;;  %v2044_v22 = vadd.f32 1.0, %v4228_v39  ;;  %v1320_v8 = vmul.f32 0.044715, %v5660_v4  ;;  %v5672_v21 = vadd.f32 %v872_v20, %v4954_v47 }
 0x199   :  { %v5675_v5 = vmul.f32 %v1437_v50, %v5603_v6  ;;  %v5678_v26 = vmul.f32 %v1440_v37, %v5613_v25  ;;  %v5681_v9 = vmul.f32 %v1441_v44, %v5616_v18  ;;  %v1157_v13 = vmul.f32 0.5, %v5442_v35 }
 0x19a   :  { %2858 = vmatprep.mubr.bf16.mxu0 %v2325_v57  ;;  %v2168_v45 = vmul.f32 %v2040_v36, %v1144_v29  ;;  %v2172_v1 = vmul.f32 %v2044_v22, %v1148_v23  ;;  %v1152_v17 = vmul.f32 0.5, %v5384_v11  ;;  %v1673_v20 = vadd.f32 %v5525_v40, %v5456_v30 }
 0x19b   :  { %v5688_v12 = vmul.f32 %v1444_v56, %v5641_v43  ;;  %v1156_v50 = vmul.f32 0.5, %v5422_v54  ;;  %v1445_v37 = vmul.f32 %v1317_v3, %v5653_v10  ;;  %v1677_v44 = vadd.f32 %v5558_v32, %v5502_v53 }
 0x19c   :  { %v2324_v35 = vpack.c.bf16 %v2172_v1, %v2168_v45  ;;  %v1448_v36 = vmul.f32 %v1320_v8, %v5660_v4  ;;  %v1321_v11 = vmul.f32 0.044715, %v5672_v21  ;;  %v1801_v29 = vmul.f32 0.7978846, %v1673_v20 }
 0x19d   :  { %v5694_v55 = vpop.f32.mrb[68].mxu1  ;;  %v4230_v40 = vpop.eup %4229  ;;  %v5701_v52 = vmul.f32 0.5, %v5456_v30  ;;  %v1805_v54 = vmul.f32 0.7978846, %v1677_v44  ;;  %v1672_v27 = vadd.f32 %v5517_v31, %v5451_v16  ;;  %v1676_v32 = vadd.f32 %v5540_v51, %v5479_v38  ;;  %v4405_v44 = vld [vmem:[%s6923_s2] sm:$0xf] }
 0x19e   :  { %v5698_v23 = vpop.f32.mrb[69].mxu1  ;;  %v4232_v56 = vpop.eup %4231  ;;  %2859 = vmatmul.mubr.bf16.gmra.mrb[36].mxu0 %v2324_v35  ;;  %v2049_v8 = vadd.f32 1.0, %v4230_v40  ;;  %v5710_v3 = vmul.f32 0.5, %v5502_v53  ;;  %4237 = vtanh.f32 %v1801_v29  ;;  %v196_v57 = vsub.s32 2, %v4939_v34 }
 0x19f   :  { %v5707_v39 = vpop.f32.mrb[70].mxu1  ;;  %v2053_v22 = vadd.f32 1.0, %v4232_v56  ;;  %4239 = vtanh.f32 %v1805_v54  ;;  %v5717_v31 = vadd.f32 %v5618_v14, %v4950_v46  ;;  %v1800_v51 = vmul.f32 0.7978846, %v1672_v27 }
 0x1a0   :  { %v5713_v30 = vpop.f32.mrb[71].mxu1  ;;  %v4234_v45 = vpop.eup %4233  ;;  %v5720_v1 = vmul.f32 %v1445_v37, %v5653_v10  ;;  %v1804_v20 = vmul.f32 0.7978846, %v1676_v32  ;;  %v5724_v53 = vadd.f32 %v5624_v42, %v4954_v47  ;;  %v5729_v35 = vrot.slane %v4405_v44, %v196_v57 }
 0x1a1   :  { %v4236_v29 = vpop.eup %4235  ;;  %v2177_v40 = vmul.f32 %v2049_v8, %v1153_v0  ;;  %v2181_v46 = vmul.f32 %v2053_v22, %v1157_v13  ;;  %v2048_v14 = vadd.f32 1.0, %v4234_v45  ;;  %4241 = vtanh.f32 %v1800_v51 }
 0x1a2   :  { %v2052_v54 = vadd.f32 1.0, %v4236_v29  ;;  %v1449_v37 = vmul.f32 %v1321_v11, %v5672_v21  ;;  %4243 = vtanh.f32 %v1804_v20  ;;  %v5734_v27 = vadd.f32 %v5649_v19, %v5729_v35 }
 0x1a3   :  { %v2329_v47 = vpack.c.bf16 %v2181_v46, %v2177_v40  ;;  %v5737_v42 = vmul.f32 %v1448_v36, %v5660_v4  ;;  %v1324_v32 = vmul.f32 0.044715, %v5717_v31  ;;  %v200_v56 = vsub.s32 3, %v4939_v34 }
 0x1a4   :  { %v2176_v13 = vmul.f32 %v2048_v14, %v1152_v17  ;;  %v2180_v8 = vmul.f32 %v2052_v54, %v1156_v50  ;;  %v1160_v57 = vmul.f32 0.5, %v5451_v16  ;;  %v1202_v11 = vmul.f32 0.044715, %v5734_v27 }
 0x1a5   :  { %v5741_v0 = vpop.f32.mrb[72].mxu1  ;;  %2868 = vmatprep.mubr.bf16.mxu0 %v2329_v47  ;;  %v1325_v19 = vmul.f32 0.044715, %v5724_v53  ;;  %v5748_v51 = vrot.slane %v4405_v44, %v200_v56  ;;  %v1681_v36 = vadd.f32 %v5573_v48, %v5514_v63  ;;  %v1685_v45 = vadd.f32 %v5606_v60, %v5554_v24 }
 0x1a6   :  { %v5745_v22 = vpop.f32.mrb[73].mxu1  ;;  %v2328_v17 = vpack.c.bf16 %v2180_v8, %v2176_v13  ;;  %v5757_v16 = vmul.f32 %v1449_v37, %v5672_v21  ;;  %v1330_v50 = vmul.f32 %v1202_v11, %v5734_v27  ;;  %v5762_v29 = vadd.f32 %v5662_v15, %v5729_v35 }
 0x1a7   :  { %v5754_v20 = vpop.f32.mrb[74].mxu1  ;;  %v1452_v40 = vmul.f32 %v1324_v32, %v5717_v31  ;;  %v5769_v48 = vadd.f32 %v5655_v7, %v5748_v51  ;;  %v1809_v60 = vmul.f32 0.7978846, %v1681_v36  ;;  %v1813_v46 = vmul.f32 0.7978846, %v1685_v45 }
 0x1a8   :  { %v5764_v44 = vpop.f32.mrb[75].mxu1  ;;  %v4238_v14 = vpop.eup %4237  ;;  %2869 = vmatmul.mubr.bf16.gmra.mrb[40].mxu0 %v2328_v17  ;;  %v1164_v54 = vmul.f32 0.5, %v5479_v38  ;;  %v1458_v37 = vmul.f32 %v1330_v50, %v5734_v27  ;;  %v1206_v47 = vmul.f32 0.044715, %v5762_v29  ;;  %v1680_v15 = vadd.f32 %v5570_v61, %v5511_v62 }
 0x1a9   :  { %v4240_v56 = vpop.eup %4239  ;;  %v2057_v13 = vadd.f32 1.0, %v4238_v14  ;;  %v1453_v32 = vmul.f32 %v1325_v19, %v5724_v53  ;;  %4245 = vtanh.f32 %v1809_v60  ;;  %v1684_v7 = vadd.f32 %v5589_v49, %v5535_v59 }
 0x1aa   :  { %v2061_v8 = vadd.f32 1.0, %v4240_v56  ;;  %v1203_v11 = vmul.f32 0.044715, %v5769_v48  ;;  %4247 = vtanh.f32 %v1813_v46  ;;  %v1334_v38 = vmul.f32 %v1206_v47, %v5762_v29 }
 0x1ab   :  { %v4242_v36 = vpop.eup %4241  ;;  %v5782_v45 = vmul.f32 %v1452_v40, %v5717_v31  ;;  %v1586_v61 = vadd.f32 %v1458_v37, %v5734_v27  ;;  %v1808_v17 = vmul.f32 0.7978846, %v1680_v15  ;;  %v1812_v50 = vmul.f32 0.7978846, %v1684_v7 }
 0x1ac   :  { %v4244_v19 = vpop.eup %4243  ;;  %v2185_v60 = vmul.f32 %v2057_v13, %v5701_v52  ;;  %v2189_v49 = vmul.f32 %v2061_v8, %v5710_v3  ;;  %v2056_v56 = vadd.f32 1.0, %v4242_v36  ;;  %v1462_v46 = vmul.f32 %v1334_v38, %v5762_v29 }
 0x1ad   :  { %6937 = vst [vmem:[#allocation6_spill] sm:$0xff] %v5782_v45  ;;  %v5785_v14 = vpop.f32.mrb[76].mxu1  ;;  %v2060_v47 = vadd.f32 1.0, %v4244_v19  ;;  %v1169_v40 = vmul.f32 0.5, %v5514_v63  ;;  %4249 = vtanh.f32 %v1808_v17  ;;  %v5795_v37 = vadd.f32 %v5666_v58, %v5748_v51 }
 0x1ae   :  { %v5790_v34 = vpop.f32.mrb[77].mxu1  ;;  %v2333_v7 = vpack.c.bf16 %v2189_v49, %v2185_v60  ;;  %v2184_v45 = vmul.f32 %v2056_v56, %v1160_v57  ;;  %v5800_v52 = vmul.f32 %v1453_v32, %v5724_v53  ;;  %v1331_v3 = vmul.f32 %v1203_v11, %v5769_v48 }
 0x1af   :  { %v5797_v15 = vpop.f32.mrb[78].mxu1  ;;  %v2188_v8 = vmul.f32 %v2060_v47, %v1164_v54  ;;  %v1590_v38 = vadd.f32 %v1462_v46, %v5762_v29  ;;  %4251 = vtanh.f32 %v1812_v50  ;;  %v5808_v63 = vadd.f32 %v5694_v55, %v5729_v35 }
 0x1b0   :  { %v5803_v13 = vpop.f32.mrb[79].mxu1  ;;  %2878 = vmatprep.mubr.bf16.mxu0 %v2333_v7  ;;  %v5811_v58 = vmul.f32 0.5, %v5734_v27  ;;  %v1714_v57 = vmul.f32 0.7978846, %v1586_v61  ;;  %v1173_v32 = vmul.f32 0.5, %v5554_v24  ;;  %v5816_v11 = vadd.f32 %v5698_v23, %v5748_v51 }
 0x1b1   :  { %v2332_v36 = vpack.c.bf16 %v2188_v8, %v2184_v45  ;;  %v1168_v54 = vmul.f32 0.5, %v5511_v62  ;;  %v1207_v17 = vmul.f32 0.044715, %v5795_v37  ;;  %v1689_v55 = vadd.f32 %v5627_v33, %v5566_v28 }
 0x1b2   :  { %v1172_v50 = vmul.f32 0.5, %v5535_v59  ;;  %v1210_v27 = vmul.f32 0.044715, %v5808_v63  ;;  %v1693_v61 = vadd.f32 %v5675_v5, %v5603_v6  ;;  %v5828_v24 = vadd.f32 %v5707_v39, %v5729_v35 }
 0x1b3   :  { %v4246_v23 = vpop.eup %4245  ;;  %2879 = vmatmul.mubr.bf16.gmra.mrb[44].mxu0 %v2332_v36  ;;  %v5831_v62 = vmul.f32 %v1331_v3, %v5769_v48  ;;  %v5834_v45 = vmul.f32 0.5, %v5762_v29  ;;  %v1718_v33 = vmul.f32 0.7978846, %v1590_v38  ;;  %v1817_v19 = vmul.f32 0.7978846, %v1689_v55 }
 0x1b4   :  { %v4248_v60 = vpop.eup %4247  ;;  %4253 = vtanh.f32 %v1714_v57  ;;  %v2065_v49 = vadd.f32 1.0, %v4246_v23  ;;  %v1211_v5 = vmul.f32 0.044715, %v5816_v11  ;;  %v1821_v56 = vmul.f32 0.7978846, %v1693_v61  ;;  %v6940_v23 = vld [vmem:[#allocation5_spill] sm:$0xff] }
 0x1b5   :  { %v5836_v59 = vpop.f32.mrb[80].mxu1  ;;  %v2069_v46 = vadd.f32 1.0, %v4248_v60  ;;  %v1335_v47 = vmul.f32 %v1207_v17, %v5795_v37  ;;  %v5843_v7 = vmul.f32 0.5, %v5566_v28  ;;  %4255 = vtanh.f32 %v1817_v19  ;;  %v6939_v17 = vld [vmem:[#allocation4_spill] sm:$0xff] }
 0x1b6   :  { %v5839_v39 = vpop.f32.mrb[81].mxu1  ;;  %v2193_v3 = vmul.f32 %v2065_v49, %v1169_v40  ;;  %v1338_v8 = vmul.f32 %v1210_v27, %v5808_v63  ;;  %4257 = vtanh.f32 %v1821_v56  ;;  %v1214_v38 = vmul.f32 0.044715, %v5828_v24 }
 0x1b7   :  { %v5845_v29 = vpop.f32.mrb[82].mxu1  ;;  %v4250_v36 = vpop.eup %4249  ;;  %v2197_v55 = vmul.f32 %v2069_v46, %v1173_v32  ;;  %v1688_v61 = vadd.f32 %v5621_v2, %v5563_v41  ;;  %v1692_v28 = vadd.f32 %v6940_v23, %v6939_v17  ;;  %v5857_v19 = vadd.f32 %v5713_v30, %v5748_v51 }
 0x1b8   :  { %v5849_v57 = vpop.f32.mrb[83].mxu1  ;;  %4259 = vtanh.f32 %v1718_v33  ;;  %v2064_v40 = vadd.f32 1.0, %v4250_v36  ;;  %v1339_v27 = vmul.f32 %v1211_v5, %v5816_v11  ;;  %v1181_v60 = vmul.f32 0.5, %v5603_v6 }
 0x1b9   :  { %6938 = vst [vmem:[#allocation7_spill] sm:$0xff] %v5849_v57  ;;  %v4252_v49 = vpop.eup %4251  ;;  %v2337_v56 = vpack.c.bf16 %v2197_v55, %v2193_v3  ;;  %v1816_v57 = vmul.f32 0.7978846, %v1688_v61  ;;  %v1820_v32 = vmul.f32 0.7978846, %v1692_v28  ;;  %v5863_v2 = vadd.f32 %v5741_v0, %v5729_v35 }
 0x1ba   :  { %v2068_v46 = vadd.f32 1.0, %v4252_v49  ;;  %v5866_v23 = vmul.f32 %v1335_v47, %v5795_v37  ;;  %v1342_v30 = vmul.f32 %v1214_v38, %v5828_v24  ;;  %v5871_v33 = vadd.f32 %v5745_v22, %v5748_v51 }
 0x1bb   :  { %6941 = vst [vmem:[#allocation4_spill] sm:$0xff] %v5863_v2  ;;  %2888 = vmatprep.mubr.bf16.mxu0 %v2337_v56  ;;  %v5874_v6 = vmul.f32 %v1338_v8, %v5808_v63  ;;  %v5877_v5 = vmul.f32 0.5, %v5563_v41  ;;  %4261 = vtanh.f32 %v1816_v57  ;;  %v1215_v0 = vmul.f32 0.044715, %v5857_v19 }
 0x1bc   :  { %v2192_v47 = vmul.f32 %v2064_v40, %v1168_v54  ;;  %v2196_v36 = vmul.f32 %v2068_v46, %v1172_v50  ;;  %v5883_v38 = vmul.f32 0.5, %v6939_v17  ;;  %4263 = vtanh.f32 %v1820_v32 }
 0x1bd   :  { %v5880_v3 = vpop.f32.mrb[84].mxu1  ;;  %v5888_v55 = vmul.f32 %v1339_v27, %v5816_v11  ;;  %v1218_v8 = vmul.f32 0.044715, %v5863_v2  ;;  %v1697_v41 = vadd.f32 %v5681_v9, %v5616_v18  ;;  %v1701_v57 = vadd.f32 %v5720_v1, %v5653_v10 }
 0x1be   :  { %v5885_v22 = vpop.f32.mrb[85].mxu1  ;;  %v5897_v54 = vpop.eup %4253  ;;  %v2336_v50 = vpack.c.bf16 %v2196_v36, %v2192_v47  ;;  %v5900_v17 = vmul.f32 %v1342_v30, %v5828_v24  ;;  %v1219_v28 = vmul.f32 0.044715, %v5871_v33  ;;  %v5905_v40 = vadd.f32 %v5754_v20, %v5729_v35 }
 0x1bf   :  { %v5895_v61 = vpop.f32.mrb[86].mxu1  ;;  %v4256_v9 = vpop.eup %4255  ;;  %v1343_v49 = vmul.f32 %v1215_v0, %v5857_v19  ;;  %v1825_v1 = vmul.f32 0.7978846, %v1697_v41  ;;  %v1829_v56 = vmul.f32 0.7978846, %v1701_v57  ;;  %v1696_v32 = vadd.f32 %v5678_v26, %v5613_v25 }
 0x1c0   :  { %v5907_v27 = vpop.f32.mrb[87].mxu1  ;;  %v4258_v46 = vpop.eup %4257  ;;  %2889 = vmatmul.mubr.bf16.gmra.mrb[48].mxu0 %v2336_v50  ;;  %v2073_v30 = vadd.f32 1.0, %v4256_v9  ;;  %v5913_v47 = vmul.f32 0.5, %v5616_v18  ;;  %v1700_v20 = vadd.f32 %v5688_v12, %v5641_v43  ;;  %v5919_v36 = vadd.f32 %v5764_v44, %v5748_v51 }
 0x1c1   :  { %6942 = vst [vmem:[#allocation5_spill] sm:$0xff] %v5907_v27  ;;  %v2077_v27 = vadd.f32 1.0, %v4258_v46  ;;  %v1346_v0 = vmul.f32 %v1218_v8, %v5863_v2  ;;  %4265 = vtanh.f32 %v1825_v1  ;;  %v1824_v41 = vmul.f32 0.7978846, %v1696_v32 }
 0x1c2   :  { %v5922_v57 = vpop.eup %4259  ;;  %v5925_v26 = vmul.f32 0.5, %v5653_v10  ;;  %4267 = vtanh.f32 %v1829_v56  ;;  %v1222_v18 = vmul.f32 0.044715, %v5905_v40  ;;  %v1828_v50 = vmul.f32 0.7978846, %v1700_v20 }
 0x1c3   :  { %v2201_v12 = vmul.f32 %v2073_v30, %v5843_v7  ;;  %v2205_v9 = vmul.f32 %v2077_v27, %v1181_v60  ;;  %4269 = vtanh.f32 %v1824_v41  ;;  %v1223_v44 = vmul.f32 0.044715, %v5919_v36 }
 0x1c4   :  { %v1347_v8 = vmul.f32 %v1219_v28, %v5871_v33  ;;  %4271 = vtanh.f32 %v1828_v50  ;;  %v5935_v1 = vadd.f32 %v5785_v14, %v5729_v35  ;;  %v5939_v10 = vadd.f32 %v5790_v34, %v5748_v51 }
 0x1c5   :  { %v5930_v46 = vpop.f32.mrb[88].mxu1  ;;  %v4262_v7 = vpop.eup %4261  ;;  %v2341_v60 = vpack.c.bf16 %v2205_v9, %v2201_v12  ;;  %v5944_v27 = vmul.f32 %v1343_v49, %v5857_v19  ;;  %v5947_v32 = vmul.f32 %v1346_v0, %v5863_v2  ;;  %v1705_v28 = vadd.f32 %v5757_v16, %v5672_v21 }
 0x1c6   :  { %v5941_v56 = vpop.f32.mrb[89].mxu1  ;;  %v4264_v14 = vpop.eup %4263  ;;  %v2072_v20 = vadd.f32 1.0, %v4262_v7  ;;  %v1350_v34 = vmul.f32 %v1222_v18, %v5905_v40  ;;  %v1184_v41 = vmul.f32 0.5, %v5613_v25  ;;  %v1709_v50 = vadd.f32 %v5800_v52, %v5724_v53 }
 0x1c7   :  { %6943 = vst [vmem:[#allocation8_spill] sm:$0xff] %v5947_v32  ;;  %v5951_v30 = vpop.f32.mrb[90].mxu1  ;;  %2898 = vmatprep.mubr.bf16.mxu0 %v2341_v60  ;;  %v2076_v49 = vadd.f32 1.0, %v4264_v14  ;;  %v1188_v0 = vmul.f32 0.5, %v5641_v43  ;;  %v1351_v9 = vmul.f32 %v1223_v44, %v5919_v36  ;;  %v1833_v16 = vmul.f32 0.7978846, %v1705_v28 }
 0x1c8   :  { %v5957_v12 = vpop.f32.mrb[91].mxu1  ;;  %v5962_v32 = vmul.f32 %v1347_v8, %v5871_v33  ;;  %v1226_v7 = vmul.f32 0.044715, %v5935_v1  ;;  %v1227_v18 = vmul.f32 0.044715, %v5939_v10  ;;  %v2200_v2 = vmul.f32 %v2072_v20, %v5877_v5 }
 0x1c9   :  { %6944 = vst [vmem:[#allocation9_spill] sm:$0xff] %v5957_v12  ;;  %v1837_v25 = vmul.f32 0.7978846, %v1709_v50  ;;  %v2204_v52 = vmul.f32 %v2076_v49, %v5883_v38  ;;  %4273 = vtanh.f32 %v1833_v16  ;;  %v5970_v60 = vadd.f32 %v5797_v15, %v5729_v35  ;;  %v6945_v15 = vld [vmem:[#allocation6_spill] sm:$0xff] }
 0x1ca   :  { %v5973_v43 = vmul.f32 %v1350_v34, %v5905_v40  ;;  %v5976_v44 = vmul.f32 0.5, %v5672_v21  ;;  %v1704_v8 = vadd.f32 %v5737_v42, %v5660_v4  ;;  %v5981_v5 = vmul.f32 %v1351_v9, %v5919_v36 }
 0x1cb   :  { %4275 = vtanh.f32 %v1837_v25  ;;  %v4266_v28 = vpop.eup %4265  ;;  %v2340_v14 = vpack.c.bf16 %v2204_v52, %v2200_v2  ;;  %v5984_v38 = vmul.f32 0.5, %v5724_v53  ;;  %v1708_v20 = vadd.f32 %v6945_v15, %v5717_v31 }
 0x1cc   :  { %v4268_v50 = vpop.eup %4267  ;;  %v2081_v21 = vadd.f32 1.0, %v4266_v28  ;;  %v1354_v49 = vmul.f32 %v1226_v7, %v5935_v1  ;;  %v1355_v16 = vmul.f32 %v1227_v18, %v5939_v10  ;;  %v1832_v42 = vmul.f32 0.7978846, %v1704_v8 }
 0x1cd   :  { %v5988_v34 = vpop.f32.mrb[92].mxu1  ;;  %v4270_v2 = vpop.eup %4269  ;;  %2899 = vmatmul.mubr.bf16.gmra.mrb[52].mxu0 %v2340_v14  ;;  %v2085_v9 = vadd.f32 1.0, %v4268_v50  ;;  %v1230_v53 = vmul.f32 0.044715, %v5970_v60  ;;  %v1836_v52 = vmul.f32 0.7978846, %v1708_v20  ;;  %v5997_v15 = vadd.f32 %v5803_v13, %v5748_v51 }
 0x1ce   :  { %6946 = vst [vmem:[#allocation6_spill] sm:$0xff] %v5988_v34  ;;  %v5992_v25 = vpop.f32.mrb[93].mxu1  ;;  %v4272_v28 = vpop.eup %4271  ;;  %v2080_v12 = vadd.f32 1.0, %v4270_v2  ;;  %4277 = vtanh.f32 %v1832_v42  ;;  %v6003_v7 = vadd.f32 %v5836_v59, %v5729_v35  ;;  %v6007_v18 = vadd.f32 %v5839_v39, %v5748_v51 }
 0x1cf   :  { %6947 = vst [vmem:[#allocation10_spill] sm:$0xff] %v5992_v25  ;;  %v5999_v34 = vpop.f32.mrb[94].mxu1  ;;  %v2209_v14 = vmul.f32 %v2081_v21, %v5913_v47  ;;  %v2213_v13 = vmul.f32 %v2085_v9, %v5925_v26  ;;  %v2084_v20 = vadd.f32 1.0, %v4272_v28  ;;  %4279 = vtanh.f32 %v1836_v52 }
 0x1d0   :  { %6948 = vst [vmem:[#allocation11_spill] sm:$0xff] %v5999_v34  ;;  %v6009_v8 = vpop.f32.mrb[95].mxu1  ;;  %v6014_v50 = vmul.f32 %v1354_v49, %v5935_v1  ;;  %v6017_v42 = vmul.f32 %v1355_v16, %v5939_v10  ;;  %v1192_v59 = vmul.f32 0.5, %v5660_v4  ;;  %v1196_v2 = vmul.f32 0.5, %v5717_v31 }
 0x1d1   :  { %6949 = vst [vmem:[#allocation12_spill] sm:$0xff] %v6009_v8  ;;  %v2345_v39 = vpack.c.bf16 %v2213_v13, %v2209_v14  ;;  %v2208_v34 = vmul.f32 %v2080_v12, %v1184_v41  ;;  %v2212_v25 = vmul.f32 %v2084_v20, %v1188_v0  ;;  %v1231_v8 = vmul.f32 0.044715, %v5997_v15 }
 0x1d2   :  { %v1358_v47 = vmul.f32 %v1230_v53, %v5970_v60  ;;  %v1234_v26 = vmul.f32 0.044715, %v6003_v7  ;;  %v1587_v21 = vadd.f32 %v5831_v62, %v5769_v48  ;;  %v1591_v49 = vadd.f32 %v5866_v23, %v5795_v37 }
 0x1d3   :  { %v4274_v16 = vpop.eup %4273  ;;  %2908 = vmatprep.mubr.bf16.mxu0 %v2345_v39  ;;  %v2344_v4 = vpack.c.bf16 %v2212_v25, %v2208_v34  ;;  %v1235_v31 = vmul.f32 0.044715, %v6007_v18  ;;  %v1970_v41 = vadd.f32 1.0, %v5897_v54  ;;  %v1974_v12 = vadd.f32 1.0, %v5922_v57 }
 0x1d4   :  { %v2089_v53 = vadd.f32 1.0, %v4274_v16  ;;  %v1715_v52 = vmul.f32 0.7978846, %v1587_v21  ;;  %v1719_v28 = vmul.f32 0.7978846, %v1591_v49  ;;  %v6035_v62 = vadd.f32 %v5845_v29, %v5729_v35  ;;  %v6950_v29 = vld [vmem:[#allocation7_spill] sm:$0xff] }
 0x1d5   :  { %v6031_v0 = vpop.f32.mrb[96].mxu1  ;;  %v4276_v9 = vpop.eup %4275  ;;  %2909 = vmatmul.mubr.bf16.gmra.mrb[56].mxu0 %v2344_v4  ;;  %v1359_v25 = vmul.f32 %v1231_v8, %v5997_v15  ;;  %v6041_v54 = vmul.f32 %v1970_v41, %v5811_v58  ;;  %v6044_v57 = vmul.f32 %v1974_v12, %v5834_v45  ;;  %v1362_v13 = vmul.f32 %v1234_v26, %v6003_v7 }
 0x1d6   :  { %v6037_v23 = vpop.f32.mrb[97].mxu1  ;;  %v2093_v34 = vadd.f32 1.0, %v4276_v9  ;;  %4281 = vtanh.f32 %v1715_v52  ;;  %v6051_v20 = vadd.f32 %v6950_v29, %v5748_v51  ;;  %v6055_v39 = vadd.f32 %v5880_v3, %v5729_v35 }
 0x1d7   :  { %v6046_v14 = vpop.f32.mrb[98].mxu1  ;;  %v2217_v58 = vmul.f32 %v2089_v53, %v5976_v44  ;;  %4283 = vtanh.f32 %v1719_v28  ;;  %v6064_v49 = vmul.f32 %v1358_v47, %v5970_v60  ;;  %v1363_v16 = vmul.f32 %v1235_v31, %v6007_v18 }
 0x1d8   :  { %v6057_v8 = vpop.f32.mrb[99].mxu1  ;;  %v2221_v45 = vmul.f32 %v2093_v34, %v5984_v38  ;;  %v4278_v26 = vpop.eup %4277  ;;  %v1075_v4 = vmul.f32 0.5, %v5769_v48  ;;  %v1238_v3 = vmul.f32 0.044715, %v6035_v62  ;;  %v6070_v44 = vmul.f32 %v1359_v25, %v5997_v15 }
 0x1d9   :  { %v4280_v41 = vpop.eup %4279  ;;  %v2088_v9 = vadd.f32 1.0, %v4278_v26  ;;  %v6074_v38 = vadd.f32 %v5885_v22, %v5748_v51  ;;  %v1079_v47 = vmul.f32 0.5, %v5795_v37  ;;  %v1239_v52 = vmul.f32 0.044715, %v6051_v20 }
 0x1da   :  { %v2349_v12 = vpack.c.bf16 %v2221_v45, %v2217_v58  ;;  %v2092_v53 = vadd.f32 1.0, %v4280_v41  ;;  %v1242_v31 = vmul.f32 0.044715, %v6055_v39  ;;  %v6080_v48 = vmul.f32 %v1362_v13, %v6003_v7 }
 0x1db   :  { %v1595_v28 = vadd.f32 %v5888_v55, %v5816_v11  ;;  %v1599_v34 = vadd.f32 %v5944_v27, %v5857_v19  ;;  %v6088_v22 = vadd.f32 %v5895_v61, %v5729_v35  ;;  %v2216_v37 = vmul.f32 %v2088_v9, %v1192_v59 }
 0x1dc   :  { %2918 = vmatprep.mubr.bf16.mxu0 %v2349_v12  ;;  %v2220_v29 = vmul.f32 %v2092_v53, %v1196_v2  ;;  %v6093_v58 = vmul.f32 %v1363_v16, %v6007_v18  ;;  %v1366_v13 = vmul.f32 %v1238_v3, %v6035_v62  ;;  %v1243_v55 = vmul.f32 0.044715, %v6074_v38 }
 0x1dd   :  { %v6090_v25 = vpop.f32.mrb[100].mxu1  ;;  %v1723_v26 = vmul.f32 0.7978846, %v1595_v28  ;;  %v1727_v41 = vmul.f32 0.7978846, %v1599_v34  ;;  %v1594_v27 = vadd.f32 %v5874_v6, %v5808_v63  ;;  %v1367_v12 = vmul.f32 %v1239_v52, %v6051_v20 }
 0x1de   :  { %v6096_v45 = vpop.f32.mrb[101].mxu1  ;;  %v2348_v61 = vpack.c.bf16 %v2220_v29, %v2216_v37  ;;  %v1370_v59 = vmul.f32 %v1242_v31, %v6055_v39  ;;  %v6104_v2 = vmul.f32 0.5, %v5816_v11  ;;  %v1246_v3 = vmul.f32 0.044715, %v6088_v22  ;;  %v6952_v11 = vld [vmem:[#allocation5_spill] sm:$0xff] }
 0x1df   :  { %v6106_v16 = vpop.f32.mrb[102].mxu1  ;;  %4285 = vtanh.f32 %v1723_v26  ;;  %v1598_v9 = vadd.f32 %v5900_v17, %v5828_v24  ;;  %v1722_v53 = vmul.f32 0.7978846, %v1594_v27  ;;  %v6114_v52 = vmul.f32 %v1366_v13, %v6035_v62 }
 0x1e0   :  { %v6111_v28 = vpop.f32.mrb[103].mxu1  ;;  %v4282_v6 = vpop.eup %4281  ;;  %2919 = vmatmul.mubr.bf16.gmra.mrb[60].mxu0 %v2348_v61  ;;  %4287 = vtanh.f32 %v1727_v41  ;;  %v6118_v31 = vadd.f32 %v6952_v11, %v5748_v51  ;;  %v6122_v34 = vadd.f32 %v5930_v46, %v5729_v35  ;;  %v1371_v17 = vmul.f32 %v1243_v55, %v6074_v38 }
 0x1e1   :  { %6951 = vst [vmem:[#allocation7_spill] sm:$0xff] %v6111_v28  ;;  %v4284_v37 = vpop.eup %4283  ;;  %v1971_v29 = vadd.f32 1.0, %v4282_v6  ;;  %v1726_v26 = vmul.f32 0.7978846, %v1598_v9  ;;  %4289 = vtanh.f32 %v1722_v53  ;;  %v6126_v61 = vmul.f32 %v1367_v12, %v6051_v20 }
 0x1e2   :  { %v1975_v27 = vadd.f32 1.0, %v4284_v37  ;;  %v1087_v13 = vmul.f32 0.5, %v5857_v19  ;;  %v6131_v41 = vadd.f32 %v5941_v56, %v5748_v51  ;;  %v6134_v11 = vmul.f32 %v1370_v59, %v6055_v39 }
 0x1e3   :  { %v1374_v46 = vmul.f32 %v1246_v3, %v6088_v22  ;;  %4291 = vtanh.f32 %v1726_v26  ;;  %v1247_v55 = vmul.f32 0.044715, %v6118_v31  ;;  %v2099_v53 = vmul.f32 %v1971_v29, %v1075_v4 }
 0x1e4   :  { %v2103_v6 = vmul.f32 %v1975_v27, %v1079_v47  ;;  %v1250_v12 = vmul.f32 0.044715, %v6122_v34  ;;  %v1603_v19 = vadd.f32 %v5962_v32, %v5871_v33  ;;  %v6146_v56 = vmul.f32 %v1371_v17, %v6074_v38 }
 0x1e5   :  { %v6138_v9 = vpop.f32.mrb[104].mxu1  ;;  %v1082_v59 = vmul.f32 0.5, %v5808_v63  ;;  %v1607_v3 = vadd.f32 %v5981_v5, %v5919_v36  ;;  %v6153_v26 = vadd.f32 %v5951_v30, %v5729_v35  ;;  %v1086_v29 = vmul.f32 0.5, %v5828_v24  ;;  %v6959_v24 = vld [vmem:[#allocation8_spill] sm:$0xff] }
 0x1e6   :  { %6953 = vst [vmem:[#allocation5_spill] sm:$0xff] %v6138_v9  ;;  %v6143_v37 = vpop.f32.mrb[105].mxu1  ;;  %v2291_v47 = vpack.c.bf16 %v2103_v6, %v2099_v53  ;;  %v1251_v32 = vmul.f32 0.044715, %v6131_v41  ;;  %v1731_v27 = vmul.f32 0.7978846, %v1603_v19  ;;  %v6162_v17 = vmul.f32 %v1374_v46, %v6088_v22 }
 0x1e7   :  { %6954 = vst [vmem:[#allocation13_spill] sm:$0xff] %v6143_v37  ;;  %v6155_v4 = vpop.f32.mrb[106].mxu1  ;;  %v1375_v63 = vmul.f32 %v1247_v55, %v6118_v31  ;;  %v6166_v5 = vmul.f32 0.5, %v5871_v33  ;;  %v1735_v30 = vmul.f32 0.7978846, %v1607_v3  ;;  %v6958_v53 = vld [vmem:[#allocation4_spill] sm:$0xff]  ;;  %v1606_v19 = vadd.f32 %v5973_v43, %v5905_v40 }
 0x1e8   :  { %6955 = vst [vmem:[#allocation14_spill] sm:$0xff] %v6155_v4  ;;  %v6159_v21 = vpop.f32.mrb[107].mxu1  ;;  %6957 = vst [vmem:[#allocation16_spill] sm:$0xff] %v6162_v17  ;;  %2961 = vmatprep.mubr.bf16.mxu0 %v2291_v47  ;;  %v1378_v4 = vmul.f32 %v1250_v12, %v6122_v34  ;;  %4293 = vtanh.f32 %v1731_v27  ;;  %v1602_v6 = vadd.f32 %v6959_v24, %v6958_v53  ;;  %v6177_v55 = vmul.f32 0.5, %v5919_v36  ;;  %v6961_v12 = vld [vmem:[#allocation9_spill] sm:$0xff] }
 0x1e9   :  { %6956 = vst [vmem:[#allocation15_spill] sm:$0xff] %v6159_v21  ;;  %v4286_v21 = vpop.eup %4285  ;;  %v6960_v46 = vpack.c.bf16 %v6044_v57, %v6041_v54  ;;  %4295 = vtanh.f32 %v1735_v30  ;;  %v1254_v33 = vmul.f32 0.044715, %v6153_v26  ;;  %v6182_v3 = vadd.f32 %v6961_v12, %v5748_v51  ;;  %v6962_v57 = vld [vmem:[#allocation6_spill] sm:$0xff] }
 0x1ea   :  { %v4288_v47 = vpop.eup %4287  ;;  %v1979_v27 = vadd.f32 1.0, %v4286_v21  ;;  %v1379_v24 = vmul.f32 %v1251_v32, %v6131_v41  ;;  %v1730_v43 = vmul.f32 0.7978846, %v1602_v6  ;;  %v1734_v37 = vmul.f32 0.7978846, %v1606_v19  ;;  %v6965_v32 = vld [vmem:[#allocation10_spill] sm:$0xff] }
 0x1eb   :  { %2962 = vmatmul.mubr.bf16.vlgmr.msra.gmra.mrb[0].mxu0 %v6960_v46  ;;  %v4290_v9 = vpop.eup %4289  ;;  %v1983_v28 = vadd.f32 1.0, %v4288_v47  ;;  %v6186_v54 = vmul.f32 %v1375_v63, %v6118_v31  ;;  %v6189_v36 = vmul.f32 0.5, %v6958_v53  ;;  %v6193_v30 = vadd.f32 %v6962_v57, %v5729_v35 }
 0x1ec   :  { %v1978_v12 = vadd.f32 1.0, %v4290_v9  ;;  %v6198_v21 = vmul.f32 %v1378_v4, %v6122_v34  ;;  %4297 = vtanh.f32 %v1730_v43  ;;  %v6202_v6 = vadd.f32 %v6965_v32, %v5748_v51 }
 0x1ed   :  { %v6195_v46 = vpop.f32.mrb[108].mxu1  ;;  %v4292_v19 = vpop.eup %4291  ;;  %v2107_v53 = vmul.f32 %v1979_v27, %v6104_v2  ;;  %v2111_v47 = vmul.f32 %v1983_v28, %v1087_v13  ;;  %4299 = vtanh.f32 %v1734_v37  ;;  %v1255_v57 = vmul.f32 0.044715, %v6182_v3 }
 0x1ee   :  { %6963 = vst [vmem:[#allocation4_spill] sm:$0xff] %v6195_v46  ;;  %6964 = vst [vmem:[#allocation8_spill] sm:$0xff] %v6198_v21  ;;  %v6204_v63 = vpop.f32.mrb[109].mxu1  ;;  %v1982_v9 = vadd.f32 1.0, %v4292_v19  ;;  %v6211_v4 = vmul.f32 %v1379_v24, %v6131_v41  ;;  %v1382_v43 = vmul.f32 %v1254_v33, %v6153_v26  ;;  %v1094_v32 = vmul.f32 0.5, %v5905_v40  ;;  %v6968_v33 = vld [vmem:[#allocation11_spill] sm:$0xff] }
 0x1ef   :  { %6966 = vst [vmem:[#allocation9_spill] sm:$0xff] %v6204_v63  ;;  %v6208_v17 = vpop.f32.mrb[110].mxu1  ;;  %v2295_v63 = vpack.c.bf16 %v2111_v47, %v2107_v53  ;;  %v1258_v21 = vmul.f32 0.044715, %v6193_v30  ;;  %v6219_v2 = vmul.f32 0.5, %v5939_v10  ;;  %v1611_v28 = vadd.f32 %v6017_v42, %v5939_v10 }
 0x1f0   :  { %v6215_v46 = vpop.f32.mrb[111].mxu1  ;;  %v2106_v13 = vmul.f32 %v1978_v12, %v1082_v59  ;;  %v2110_v37 = vmul.f32 %v1982_v9, %v1086_v29  ;;  %v1615_v27 = vadd.f32 %v6070_v44, %v5997_v15  ;;  %v6227_v24 = vadd.f32 %v6968_v33, %v5729_v35 }
 0x1f1   :  { %6967 = vst [vmem:[#allocation6_spill] sm:$0xff] %v6215_v46  ;;  %2971 = vmatprep.mubr.bf16.mxu0 %v2295_v63  ;;  %v1383_v40 = vmul.f32 %v1255_v57, %v6182_v3  ;;  %v1259_v19 = vmul.f32 0.044715, %v6202_v6  ;;  %v1739_v53 = vmul.f32 0.7978846, %v1611_v28  ;;  %v1610_v47 = vadd.f32 %v6014_v50, %v5935_v1  ;;  %v6969_v57 = vld [vmem:[#allocation12_spill] sm:$0xff] }
 0x1f2   :  { %v4294_v46 = vpop.eup %4293  ;;  %v2294_v10 = vpack.c.bf16 %v2110_v37, %v2106_v13  ;;  %v1743_v42 = vmul.f32 0.7978846, %v1615_v27  ;;  %v1262_v59 = vmul.f32 0.044715, %v6227_v24  ;;  %v1614_v44 = vadd.f32 %v6064_v49, %v5970_v60 }
 0x1f3   :  { %v4296_v29 = vpop.eup %4295  ;;  %v1987_v12 = vadd.f32 1.0, %v4294_v46  ;;  %4301 = vtanh.f32 %v1739_v53  ;;  %v1738_v63 = vmul.f32 0.7978846, %v1610_v47  ;;  %v6238_v9 = vadd.f32 %v6969_v57, %v5748_v51 }
 0x1f4   :  { %2972 = vmatmul.mubr.bf16.gmra.mrb[4].mxu0 %v2294_v10  ;;  %v1991_v50 = vadd.f32 1.0, %v4296_v29  ;;  %v1386_v13 = vmul.f32 %v1258_v21, %v6193_v30  ;;  %4303 = vtanh.f32 %v1743_v42  ;;  %v1742_v37 = vmul.f32 0.7978846, %v1614_v44 }
 0x1f5   :  { %v6240_v28 = vpop.f32.mrb[112].mxu1  ;;  %v6246_v49 = vmul.f32 %v1382_v43, %v6153_v26  ;;  %v1387_v46 = vmul.f32 %v1259_v19, %v6202_v6  ;;  %v1103_v33 = vmul.f32 0.5, %v5997_v15  ;;  %4305 = vtanh.f32 %v1738_v63 }
 0x1f6   :  { %v6243_v27 = vpop.f32.mrb[113].mxu1  ;;  %v4298_v47 = vpop.eup %4297  ;;  %v2115_v10 = vmul.f32 %v1987_v12, %v6166_v5  ;;  %v2119_v29 = vmul.f32 %v1991_v50, %v6177_v55  ;;  %v6255_v21 = vmul.f32 %v1383_v40, %v6182_v3  ;;  %4307 = vtanh.f32 %v1742_v37 }
 0x1f7   :  { %v6250_v53 = vpop.f32.mrb[114].mxu1  ;;  %v4300_v43 = vpop.eup %4299  ;;  %v1986_v44 = vadd.f32 1.0, %v4298_v47  ;;  %v1390_v19 = vmul.f32 %v1262_v59, %v6227_v24  ;;  %v1263_v15 = vmul.f32 0.044715, %v6238_v9  ;;  %v6263_v63 = vadd.f32 %v6031_v0, %v5729_v35 }
 0x1f8   :  { %v6257_v42 = vpop.f32.mrb[115].mxu1  ;;  %v2299_v57 = vpack.c.bf16 %v2119_v29, %v2115_v10  ;;  %v1990_v5 = vadd.f32 1.0, %v4300_v43  ;;  %v6266_v55 = vmul.f32 %v1386_v13, %v6193_v30  ;;  %v6270_v40 = vadd.f32 %v6037_v23, %v5748_v51 }
 0x1f9   :  { %v6273_v12 = vmul.f32 %v1387_v46, %v6202_v6  ;;  %v1098_v59 = vmul.f32 0.5, %v5935_v1  ;;  %v1102_v50 = vmul.f32 0.5, %v5970_v60  ;;  %v1619_v0 = vadd.f32 %v6093_v58, %v6007_v18 }
 0x1fa   :  { %2981 = vmatprep.mubr.bf16.mxu0 %v2299_v57  ;;  %v2114_v37 = vmul.f32 %v1986_v44, %v6189_v36  ;;  %v2118_v47 = vmul.f32 %v1990_v5, %v1094_v32  ;;  %v1623_v13 = vadd.f32 %v6126_v61, %v6051_v20  ;;  %v6284_v23 = vadd.f32 %v6046_v14, %v5729_v35 }
 0x1fb   :  { %v6287_v46 = vmul.f32 %v1390_v19, %v6227_v24  ;;  %v1391_v1 = vmul.f32 %v1263_v15, %v6238_v9  ;;  %v1266_v60 = vmul.f32 0.044715, %v6263_v63  ;;  %v1747_v10 = vmul.f32 0.7978846, %v1619_v0 }
 0x1fc   :  { %v2298_v29 = vpack.c.bf16 %v2118_v47, %v2114_v37  ;;  %v1267_v36 = vmul.f32 0.044715, %v6270_v40  ;;  %v6295_v32 = vmul.f32 0.5, %v6007_v18  ;;  %v1751_v61 = vmul.f32 0.7978846, %v1623_v13 }
 0x1fd   :  { %v6291_v58 = vpop.f32.mrb[116].mxu1  ;;  %v4302_v14 = vpop.eup %4301  ;;  %v6300_v44 = vmul.f32 0.5, %v6051_v20  ;;  %4309 = vtanh.f32 %v1747_v10  ;;  %v1618_v19 = vadd.f32 %v6080_v48, %v6003_v7  ;;  %v1622_v15 = vadd.f32 %v6114_v52, %v6035_v62 }
 0x1fe   :  { %6970 = vst [vmem:[#allocation10_spill] sm:$0xff] %v6291_v58  ;;  %v6297_v43 = vpop.f32.mrb[117].mxu1  ;;  %v4304_v5 = vpop.eup %4303  ;;  %2982 = vmatmul.mubr.bf16.gmra.mrb[8].mxu0 %v2298_v29  ;;  %v1995_v18 = vadd.f32 1.0, %v4302_v14  ;;  %4311 = vtanh.f32 %v1751_v61  ;;  %v1270_v0 = vmul.f32 0.044715, %v6284_v23  ;;  %v6311_v37 = vadd.f32 %v6057_v8, %v5748_v51 }
 0x1ff   :  { %6971 = vst [vmem:[#allocation11_spill] sm:$0xff] %v6297_v43  ;;  %v6306_v57 = vpop.f32.mrb[118].mxu1  ;;  %v4306_v47 = vpop.eup %4305  ;;  %v1999_v13 = vadd.f32 1.0, %v4304_v5  ;;  %v1746_v48 = vmul.f32 0.7978846, %v1618_v19  ;;  %v6317_v52 = vadd.f32 %v6090_v25, %v5729_v35  ;;  %v6320_v61 = vmul.f32 %v1391_v1, %v6238_v9 }
 0x200   :  { %6972 = vst [vmem:[#allocation12_spill] sm:$0xff] %v6306_v57  ;;  %v6313_v20 = vpop.f32.mrb[119].mxu1  ;;  %v1750_v10 = vmul.f32 0.7978846, %v1622_v15  ;;  %v4308_v57 = vpop.eup %4307  ;;  %v1994_v29 = vadd.f32 1.0, %v4306_v47  ;;  %v1394_v14 = vmul.f32 %v1266_v60, %v6263_v63  ;;  %v1395_v8 = vmul.f32 %v1267_v36, %v6270_v40 }
 0x201   :  { %6973 = vst [vmem:[#allocation17_spill] sm:$0xff] %v6313_v20  ;;  %v2123_v43 = vmul.f32 %v1995_v18, %v6219_v2  ;;  %v2127_v20 = vmul.f32 %v1999_v13, %v1103_v33  ;;  %v1998_v58 = vadd.f32 1.0, %v4308_v57  ;;  %4313 = vtanh.f32 %v1746_v48 }
 0x202   :  { %v1398_v19 = vmul.f32 %v1270_v0, %v6284_v23  ;;  %4315 = vtanh.f32 %v1750_v10  ;;  %v1271_v25 = vmul.f32 0.044715, %v6311_v37  ;;  %v6329_v15 = vadd.f32 %v6096_v45, %v5748_v51 }
 0x203   :  { %v2303_v1 = vpack.c.bf16 %v2127_v20, %v2123_v43  ;;  %v2122_v5 = vmul.f32 %v1994_v29, %v1098_v59  ;;  %v2126_v47 = vmul.f32 %v1998_v58, %v1102_v50  ;;  %v1274_v60 = vmul.f32 0.044715, %v6317_v52  ;;  %v6978_v29 = vld [vmem:[#allocation16_spill] sm:$0xff] }
 0x204   :  { %v6335_v2 = vmul.f32 %v1394_v14, %v6263_v63  ;;  %v1106_v33 = vmul.f32 0.5, %v6003_v7  ;;  %v1110_v57 = vmul.f32 0.5, %v6035_v62  ;;  %v1627_v18 = vadd.f32 %v6146_v56, %v6074_v38 }
 0x205   :  { %v6332_v36 = vpop.f32.mrb[120].mxu1  ;;  %2991 = vmatprep.mubr.bf16.mxu0 %v2303_v1  ;;  %v2302_v45 = vpack.c.bf16 %v2126_v47, %v2122_v5  ;;  %v6344_v59 = vmul.f32 %v1395_v8, %v6270_v40  ;;  %v1631_v50 = vadd.f32 %v6186_v54, %v6118_v31  ;;  %v6350_v58 = vadd.f32 %v6106_v16, %v5729_v35  ;;  %v6979_v1 = vld [vmem:[#allocation7_spill] sm:$0xff] }
 0x206   :  { %6974 = vst [vmem:[#allocation18_spill] sm:$0xff] %v6332_v36  ;;  %v6341_v0 = vpop.f32.mrb[121].mxu1  ;;  %v6355_v62 = vmul.f32 %v1398_v19, %v6284_v23  ;;  %v1399_v56 = vmul.f32 %v1271_v25, %v6311_v37  ;;  %v1275_v43 = vmul.f32 0.044715, %v6329_v15  ;;  %v1755_v20 = vmul.f32 0.7978846, %v1627_v18 }
 0x207   :  { %6975 = vst [vmem:[#allocation19_spill] sm:$0xff] %v6341_v0  ;;  %v6352_v7 = vpop.f32.mrb[122].mxu1  ;;  %v4310_v48 = vpop.eup %4309  ;;  %2992 = vmatmul.mubr.bf16.gmra.mrb[12].mxu0 %v2302_v45  ;;  %v1402_v54 = vmul.f32 %v1274_v60, %v6317_v52  ;;  %v1759_v10 = vmul.f32 0.7978846, %v1631_v50  ;;  %v1626_v16 = vadd.f32 %v6134_v11, %v6055_v39  ;;  %v1630_v14 = vadd.f32 %v6978_v29, %v6088_v22 }
 0x208   :  { %6976 = vst [vmem:[#allocation20_spill] sm:$0xff] %v6352_v7  ;;  %v6359_v13 = vpop.f32.mrb[123].mxu1  ;;  %v4312_v8 = vpop.eup %4311  ;;  %v2003_v19 = vadd.f32 1.0, %v4310_v48  ;;  %4317 = vtanh.f32 %v1755_v20  ;;  %v1278_v25 = vmul.f32 0.044715, %v6350_v58  ;;  %v6369_v5 = vadd.f32 %v6979_v1, %v5748_v51  ;;  %v6980_v20 = vld [vmem:[#allocation5_spill] sm:$0xff] }
 0x209   :  { %6977 = vst [vmem:[#allocation21_spill] sm:$0xff] %v6359_v13  ;;  %v2007_v47 = vadd.f32 1.0, %v4312_v8  ;;  %v6372_v18 = vmul.f32 0.5, %v6074_v38  ;;  %4319 = vtanh.f32 %v1759_v10  ;;  %v1754_v60 = vmul.f32 0.7978846, %v1626_v16 }
 0x20a   :  { %v6375_v11 = vmul.f32 %v1399_v56, %v6311_v37  ;;  %v1403_v45 = vmul.f32 %v1275_v43, %v6329_v15  ;;  %v1758_v50 = vmul.f32 0.7978846, %v1630_v14  ;;  %v6380_v48 = vadd.f32 %v6980_v20, %v5729_v35 }
 0x20b   :  { %v4314_v29 = vpop.eup %4313  ;;  %v2131_v1 = vmul.f32 %v2003_v19, %v6295_v32  ;;  %v2135_v8 = vmul.f32 %v2007_v47, %v6300_v44  ;;  %v1119_v38 = vmul.f32 0.5, %v6118_v31  ;;  %4321 = vtanh.f32 %v1754_v60  ;;  %v6983_v44 = vld [vmem:[#allocation13_spill] sm:$0xff] }
 0x20c   :  { %v4316_v16 = vpop.eup %4315  ;;  %v2002_v56 = vadd.f32 1.0, %v4314_v29  ;;  %v1406_v13 = vmul.f32 %v1278_v25, %v6350_v58  ;;  %4323 = vtanh.f32 %v1758_v50  ;;  %v1279_v43 = vmul.f32 0.044715, %v6369_v5 }
 0x20d   :  { %v6385_v10 = vpop.f32.mrb[124].mxu1  ;;  %v2307_v20 = vpack.c.bf16 %v2135_v8, %v2131_v1  ;;  %v2006_v7 = vadd.f32 1.0, %v4316_v16  ;;  %v6392_v32 = vmul.f32 %v1402_v54, %v6317_v52  ;;  %v6396_v31 = vadd.f32 %v6983_v44, %v5748_v51 }
 0x20e   :  { %6981 = vst [vmem:[#allocation16_spill] sm:$0xff] %v6385_v10  ;;  %v6389_v14 = vpop.f32.mrb[125].mxu1  ;;  %v6401_v47 = vmul.f32 %v1403_v45, %v6329_v15  ;;  %v1114_v25 = vmul.f32 0.5, %v6055_v39  ;;  %v1118_v60 = vmul.f32 0.5, %v6088_v22  ;;  %v1282_v50 = vmul.f32 0.044715, %v6380_v48 }
 0x20f   :  { %6982 = vst [vmem:[#allocation7_spill] sm:$0xff] %v6389_v14  ;;  %v6398_v19 = vpop.f32.mrb[126].mxu1  ;;  %3001 = vmatprep.mubr.bf16.mxu0 %v2307_v20  ;;  %v2130_v54 = vmul.f32 %v2002_v56, %v1106_v33  ;;  %v2134_v1 = vmul.f32 %v2006_v7, %v1110_v57  ;;  %v1635_v8 = vadd.f32 %v6211_v4, %v6131_v41  ;;  %v6986_v22 = vld [vmem:[#allocation14_spill] sm:$0xff]  ;;  %v1283_v57 = vmul.f32 0.044715, %v6396_v31 }
 0x210   :  { %6984 = vst [vmem:[#allocation5_spill] sm:$0xff] %v6398_v19  ;;  %v6406_v29 = vpop.f32.mrb[127].mxu1  ;;  %v1639_v16 = vadd.f32 %v6255_v21, %v6182_v3  ;;  %v6413_v45 = vmul.f32 %v1406_v13, %v6350_v58  ;;  %v1407_v39 = vmul.f32 %v1279_v43, %v6369_v5  ;;  %v6418_v44 = vadd.f32 %v6986_v22, %v5729_v35 }
 0x211   :  { %6985 = vst [vmem:[#allocation13_spill] sm:$0xff] %v6406_v29  ;;  %v6987_v29 = vld [vmem:[#allocation8_spill] sm:$0xff]  ;;  %v2306_v33 = vpack.c.bf16 %v2134_v1, %v2130_v54  ;;  %v1763_v7 = vmul.f32 0.7978846, %v1635_v8  ;;  %v1410_v21 = vmul.f32 %v1282_v50, %v6380_v48  ;;  %v1638_v43 = vadd.f32 %v6246_v49, %v6153_v26 }
 0x212   :  { %v1634_v20 = vadd.f32 %v6987_v29, %v6122_v34  ;;  %v1767_v4 = vmul.f32 0.7978846, %v1639_v16  ;;  %v4318_v56 = vpop.eup %4317  ;;  %v1286_v13 = vmul.f32 0.044715, %v6418_v44  ;;  %v6988_v29 = vld [vmem:[#allocation15_spill] sm:$0xff]  ;;  %v6989_v1 = vld [vmem:[#allocation4_spill] sm:$0xff]  ;;  %v6437_v49 = vmul.f32 %v1407_v39, %v6369_v5 }
 0x213   :  { %v4320_v14 = vpop.eup %4319  ;;  %3002 = vmatmul.mubr.bf16.gmra.mrb[16].mxu0 %v2306_v33  ;;  %v2011_v22 = vadd.f32 1.0, %v4318_v56  ;;  %4325 = vtanh.f32 %v1763_v7  ;;  %v6429_v54 = vadd.f32 %v6988_v29, %v5748_v51  ;;  %v6433_v8 = vadd.f32 %v6989_v1, %v5729_v35 }
 0x214   :  { %v1762_v19 = vmul.f32 0.7978846, %v1634_v20  ;;  %v2015_v16 = vadd.f32 1.0, %v4320_v14  ;;  %v1123_v50 = vmul.f32 0.5, %v6131_v41  ;;  %4327 = vtanh.f32 %v1767_v4 }
 0x215   :  { %v1766_v10 = vmul.f32 0.7978846, %v1638_v43  ;;  %v4322_v0 = vpop.eup %4321  ;;  %v1411_v20 = vmul.f32 %v1283_v57, %v6396_v31  ;;  %v1414_v33 = vmul.f32 %v1286_v13, %v6418_v44  ;;  %v2139_v56 = vmul.f32 %v2011_v22, %v6372_v18 }
 0x216   :  { %4329 = vtanh.f32 %v1762_v19  ;;  %v4324_v7 = vpop.eup %4323  ;;  %v2143_v29 = vmul.f32 %v2015_v16, %v1119_v38  ;;  %v2010_v1 = vadd.f32 1.0, %v4322_v0  ;;  %v6443_v41 = vmul.f32 %v1410_v21, %v6380_v48  ;;  %v6990_v19 = vld [vmem:[#allocation9_spill] sm:$0xff] }
 0x217   :  { %4331 = vtanh.f32 %v1766_v10  ;;  %v2014_v14 = vadd.f32 1.0, %v4324_v7  ;;  %v1287_v4 = vmul.f32 0.044715, %v6429_v54  ;;  %v1290_v39 = vmul.f32 0.044715, %v6433_v8 }
 0x218   :  { %v2311_v43 = vpack.c.bf16 %v2143_v29, %v2139_v56  ;;  %v1127_v57 = vmul.f32 0.5, %v6182_v3  ;;  %v1122_v13 = vmul.f32 0.5, %v6122_v34  ;;  %v6451_v36 = vadd.f32 %v6990_v19, %v5748_v51 }
 0x219   :  { %v2138_v18 = vmul.f32 %v2010_v1, %v1114_v25  ;;  %v2142_v0 = vmul.f32 %v2014_v14, %v1118_v60  ;;  %v6454_v38 = vmul.f32 %v1411_v20, %v6396_v31  ;;  %v1126_v10 = vmul.f32 0.5, %v6153_v26  ;;  %v6991_v1 = vld [vmem:[#allocation6_spill] sm:$0xff] }
 0x21a   :  { %3011 = vmatprep.mubr.bf16.mxu0 %v2311_v43  ;;  %v6458_v21 = vmul.f32 %v1414_v33, %v6418_v44  ;;  %v1643_v3 = vadd.f32 %v6273_v12, %v6202_v6  ;;  %v1647_v34 = vadd.f32 %v6320_v61, %v6238_v9  ;;  %v6466_v22 = vadd.f32 %v6208_v17, %v5729_v35 }
 0x21b   :  { %v2310_v25 = vpack.c.bf16 %v2142_v0, %v2138_v18  ;;  %v1415_v60 = vmul.f32 %v1287_v4, %v6429_v54  ;;  %v1418_v16 = vmul.f32 %v1290_v39, %v6433_v8  ;;  %v1642_v26 = vadd.f32 %v6266_v55, %v6193_v30 }
 0x21c   :  { %v1291_v20 = vmul.f32 0.044715, %v6451_v36  ;;  %v1771_v33 = vmul.f32 0.7978846, %v1643_v3  ;;  %v1775_v7 = vmul.f32 0.7978846, %v1647_v34  ;;  %v1646_v12 = vadd.f32 %v6287_v46, %v6227_v24 }
 0x21d   :  { %v4326_v61 = vpop.eup %4325  ;;  %3012 = vmatmul.mubr.bf16.gmra.mrb[20].mxu0 %v2310_v25  ;;  %v6476_v17 = vmul.f32 0.5, %v6202_v6  ;;  %v1294_v56 = vmul.f32 0.044715, %v6466_v22  ;;  %v1770_v29 = vmul.f32 0.7978846, %v1642_v26  ;;  %v6481_v14 = vadd.f32 %v6991_v1, %v5748_v51 }
 0x21e   :  { %v4328_v55 = vpop.eup %4327  ;;  %v2019_v4 = vadd.f32 1.0, %v4326_v61  ;;  %4333 = vtanh.f32 %v1771_v33  ;;  %v1774_v39 = vmul.f32 0.7978846, %v1646_v12  ;;  %v6485_v43 = vadd.f32 %v6240_v28, %v5729_v35 }
 0x21f   :  { %v2023_v19 = vadd.f32 1.0, %v4328_v55  ;;  %v1135_v6 = vmul.f32 0.5, %v6238_v9  ;;  %4335 = vtanh.f32 %v1775_v7  ;;  %v1295_v18 = vmul.f32 0.044715, %v6481_v14 }
 0x220   :  { %v4330_v46 = vpop.eup %4329  ;;  %v1419_v34 = vmul.f32 %v1291_v20, %v6451_v36  ;;  %4337 = vtanh.f32 %v1770_v29  ;;  %v6492_v25 = vadd.f32 %v6243_v27, %v5748_v51  ;;  %v2147_v26 = vmul.f32 %v2019_v4, %v1123_v50 }
 0x221   :  { %v4332_v0 = vpop.eup %4331  ;;  %v2018_v3 = vadd.f32 1.0, %v4330_v46  ;;  %v2151_v33 = vmul.f32 %v2023_v19, %v1127_v57  ;;  %4339 = vtanh.f32 %v1774_v39  ;;  %v6495_v12 = vmul.f32 %v1415_v60, %v6429_v54 }
 0x222   :  { %v2022_v28 = vadd.f32 1.0, %v4332_v0  ;;  %v6498_v9 = vmul.f32 %v1418_v16, %v6433_v8  ;;  %v1422_v7 = vmul.f32 %v1294_v56, %v6466_v22  ;;  %v1298_v61 = vmul.f32 0.044715, %v6485_v43 }
 0x223   :  { %v2315_v20 = vpack.c.bf16 %v2151_v33, %v2147_v26  ;;  %v2146_v29 = vmul.f32 %v2018_v3, %v1122_v13  ;;  %v1423_v27 = vmul.f32 %v1295_v18, %v6481_v14  ;;  %v6504_v50 = vmul.f32 %v1419_v34, %v6451_v36 }
 0x224   :  { %v2150_v1 = vmul.f32 %v2022_v28, %v1126_v10  ;;  %v1130_v57 = vmul.f32 0.5, %v6193_v30  ;;  %v1651_v60 = vadd.f32 %v6344_v59, %v6270_v40  ;;  %v1655_v16 = vadd.f32 %v6375_v11, %v6311_v37 }
 0x225   :  { %3021 = vmatprep.mubr.bf16.mxu0 %v2315_v20  ;;  %v1134_v55 = vmul.f32 0.5, %v6227_v24  ;;  %v1299_v13 = vmul.f32 0.044715, %v6492_v25  ;;  %v6515_v10 = vadd.f32 %v6250_v53, %v5729_v35  ;;  %v1426_v4 = vmul.f32 %v1298_v61, %v6485_v43 }
 0x226   :  { %v2314_v56 = vpack.c.bf16 %v2150_v1, %v2146_v29  ;;  %v1779_v39 = vmul.f32 0.7978846, %v1651_v60  ;;  %v1783_v30 = vmul.f32 0.7978846, %v1655_v16  ;;  %v1650_v59 = vadd.f32 %v6335_v2, %v6263_v63  ;;  %v6992_v29 = vld [vmem:[#allocation10_spill] sm:$0xff] }
 0x227   :  { %v6521_v11 = vmul.f32 %v1422_v7, %v6466_v22  ;;  %v6524_v46 = vmul.f32 %v1423_v27, %v6481_v14  ;;  %v6527_v24 = vmul.f32 0.5, %v6270_v40  ;;  %v1654_v53 = vadd.f32 %v6355_v62, %v6284_v23 }
 0x228   :  { %3022 = vmatmul.mubr.bf16.gmra.mrb[24].mxu0 %v2314_v56  ;;  %v4334_v19 = vpop.eup %4333  ;;  %v6532_v18 = vmul.f32 0.5, %v6311_v37  ;;  %4341 = vtanh.f32 %v1779_v39  ;;  %v1302_v2 = vmul.f32 0.044715, %v6515_v10  ;;  %v1778_v0 = vmul.f32 0.7978846, %v1650_v59 }
 0x229   :  { %v4336_v3 = vpop.eup %4335  ;;  %v2027_v34 = vadd.f32 1.0, %v4334_v19  ;;  %v1427_v26 = vmul.f32 %v1299_v13, %v6492_v25  ;;  %4343 = vtanh.f32 %v1783_v30  ;;  %v1782_v33 = vmul.f32 0.7978846, %v1654_v53 }
 0x22a   :  { %v4338_v28 = vpop.eup %4337  ;;  %v2031_v40 = vadd.f32 1.0, %v4336_v3  ;;  %v6537_v7 = vmul.f32 %v1426_v4, %v6485_v43  ;;  %4345 = vtanh.f32 %v1778_v0  ;;  %v6541_v37 = vadd.f32 %v6257_v42, %v5748_v51  ;;  %v6993_v4 = vld [vmem:[#allocation11_spill] sm:$0xff] }
 0x22b   :  { %v4340_v62 = vpop.eup %4339  ;;  %v2026_v61 = vadd.f32 1.0, %v4338_v28  ;;  %v1138_v20 = vmul.f32 0.5, %v6263_v63  ;;  %4347 = vtanh.f32 %v1782_v33  ;;  %v6546_v1 = vadd.f32 %v6992_v29, %v5729_v35 }
 0x22c   :  { %v2155_v27 = vmul.f32 %v2027_v34, %v6476_v17  ;;  %v2159_v60 = vmul.f32 %v2031_v40, %v1135_v6  ;;  %v2030_v16 = vadd.f32 1.0, %v4340_v62  ;;  %v1430_v56 = vmul.f32 %v1302_v2, %v6515_v10 }
 0x22d   :  { %v6551_v13 = vmul.f32 %v1427_v26, %v6492_v25  ;;  %v1142_v42 = vmul.f32 0.5, %v6284_v23  ;;  %v6556_v39 = vadd.f32 %v6993_v4, %v5748_v51  ;;  %v1659_v63 = vadd.f32 %v6401_v47, %v6329_v15  ;;  %v6994_v23 = vld [vmem:[#allocation12_spill] sm:$0xff] }
 0x22e   :  { %v2319_v30 = vpack.c.bf16 %v2159_v60, %v2155_v27  ;;  %v2154_v59 = vmul.f32 %v2026_v61, %v1130_v57  ;;  %v2158_v53 = vmul.f32 %v2030_v16, %v1134_v55  ;;  %v1303_v17 = vmul.f32 0.044715, %v6541_v37  ;;  %v6996_v60 = vld [vmem:[#allocation18_spill] sm:$0xff] }
 0x22f   :  { %v1306_v6 = vmul.f32 0.044715, %v6546_v1  ;;  %v1663_v19 = vadd.f32 %v6437_v49, %v6369_v5  ;;  %v1787_v2 = vmul.f32 0.7978846, %v1659_v63  ;;  %v6566_v0 = vadd.f32 %v6994_v23, %v5729_v35 }
 0x230   :  { %3031 = vmatprep.mubr.bf16.mxu0 %v2319_v30  ;;  %v2318_v3 = vpack.c.bf16 %v2158_v53, %v2154_v59  ;;  %v6569_v34 = vmul.f32 %v1430_v56, %v6515_v10  ;;  %v6572_v47 = vmul.f32 0.5, %v6329_v15  ;;  %v1658_v57 = vadd.f32 %v6392_v32, %v6317_v52  ;;  %v6995_v15 = vld [vmem:[#allocation17_spill] sm:$0xff] }
 0x231   :  { %v1307_v55 = vmul.f32 0.044715, %v6556_v39  ;;  %v1791_v26 = vmul.f32 0.7978846, %v1663_v19  ;;  %4349 = vtanh.f32 %v1787_v2  ;;  %v1310_v49 = vmul.f32 0.044715, %v6566_v0 }
 0x232   :  { %v4342_v33 = vpop.eup %4341  ;;  %3032 = vmatmul.mubr.bf16.gmra.mrb[28].mxu0 %v2318_v3  ;;  %v1431_v28 = vmul.f32 %v1303_v17, %v6541_v37  ;;  %v1662_v40 = vadd.f32 %v6413_v45, %v6350_v58  ;;  %v1786_v62 = vmul.f32 0.7978846, %v1658_v57  ;;  %v6583_v61 = vadd.f32 %v6995_v15, %v5748_v51 }
 0x233   :  { %v4344_v29 = vpop.eup %4343  ;;  %v2035_v32 = vadd.f32 1.0, %v4342_v33  ;;  %v1434_v27 = vmul.f32 %v1306_v6, %v6546_v1  ;;  %4351 = vtanh.f32 %v1791_v26  ;;  %v6588_v16 = vadd.f32 %v6996_v60, %v5729_v35 }
 0x234   :  { %v4346_v56 = vpop.eup %4345  ;;  %v2039_v4 = vadd.f32 1.0, %v4344_v29  ;;  %v1151_v63 = vmul.f32 0.5, %v6369_v5  ;;  %v1790_v30 = vmul.f32 0.7978846, %v1662_v40  ;;  %4353 = vtanh.f32 %v1786_v62  ;;  %v6997_v40 = vld [vmem:[#allocation19_spill] sm:$0xff]  ;;  %v6998_v29 = vld [vmem:[#allocation20_spill] sm:$0xff] }
 0x235   :  { %v4348_v45 = vpop.eup %4347  ;;  %v2034_v59 = vadd.f32 1.0, %v4346_v56  ;;  %v1435_v53 = vmul.f32 %v1307_v55, %v6556_v39  ;;  %v1438_v17 = vmul.f32 %v1310_v49, %v6566_v0  ;;  %v1311_v19 = vmul.f32 0.044715, %v6583_v61 }
 0x236   :  { %v2163_v6 = vmul.f32 %v2035_v32, %v6527_v24  ;;  %v2167_v2 = vmul.f32 %v2039_v4, %v6532_v18  ;;  %v2038_v23 = vadd.f32 1.0, %v4348_v45  ;;  %4355 = vtanh.f32 %v1790_v30  ;;  %v6999_v45 = vld [vmem:[#allocation21_spill] sm:$0xff] }
 0x237   :  { %v6597_v3 = vmul.f32 %v1431_v28, %v6541_v37  ;;  %v6600_v5 = vmul.f32 %v1434_v27, %v6546_v1  ;;  %v1146_v57 = vmul.f32 0.5, %v6317_v52  ;;  %v1314_v55 = vmul.f32 0.044715, %v6588_v16 }
 0x238   :  { %v2323_v26 = vpack.c.bf16 %v2167_v2, %v2163_v6  ;;  %v2162_v49 = vmul.f32 %v2034_v59, %v1138_v20  ;;  %v2166_v33 = vmul.f32 %v2038_v23, %v1142_v42  ;;  %v6606_v24 = vadd.f32 %v6997_v40, %v5748_v51  ;;  %v7000_v6 = vld [vmem:[#allocation16_spill] sm:$0xff] }
 0x239   :  { %v6609_v18 = vmul.f32 %v1435_v53, %v6556_v39  ;;  %v1150_v28 = vmul.f32 0.5, %v6350_v58  ;;  %v1667_v62 = vadd.f32 %v6454_v38, %v6396_v31  ;;  %v1671_v52 = vadd.f32 %v6495_v12, %v6429_v54 }
 0x23a   :  { %3041 = vmatprep.mubr.bf16.mxu0 %v2323_v26  ;;  %v2322_v15 = vpack.c.bf16 %v2166_v33, %v2162_v49  ;;  %v6617_v20 = vmul.f32 %v1438_v17, %v6566_v0  ;;  %v1439_v42 = vmul.f32 %v1311_v19, %v6583_v61  ;;  %v6622_v32 = vadd.f32 %v6998_v29, %v5729_v35 }
 0x23b   :  { %v4350_v27 = vpop.eup %4349  ;;  %v1442_v58 = vmul.f32 %v1314_v55, %v6588_v16  ;;  %v1795_v60 = vmul.f32 0.7978846, %v1667_v62  ;;  %v1799_v56 = vmul.f32 0.7978846, %v1671_v52  ;;  %v1666_v38 = vadd.f32 %v6443_v41, %v6380_v48 }
 0x23c   :  { %3042 = vmatmul.mubr.bf16.gmra.mrb[32].mxu0 %v2322_v15  ;;  %v2043_v12 = vadd.f32 1.0, %v4350_v27  ;;  %v1315_v4 = vmul.f32 0.044715, %v6606_v24  ;;  %v1670_v30 = vadd.f32 %v6458_v21, %v6418_v44  ;;  %v6632_v59 = vadd.f32 %v6999_v45, %v5748_v51  ;;  %v7001_v21 = vld [vmem:[#allocation7_spill] sm:$0xff] }
 0x23d   :  { %v4352_v53 = vpop.eup %4351  ;;  %4357 = vtanh.f32 %v1795_v60  ;;  %v1318_v17 = vmul.f32 0.044715, %v6622_v32  ;;  %v1794_v19 = vmul.f32 0.7978846, %v1666_v38  ;;  %v6637_v2 = vadd.f32 %v7000_v6, %v5729_v35 }
 0x23e   :  { %v4354_v41 = vpop.eup %4353  ;;  %v2047_v23 = vadd.f32 1.0, %v4352_v53  ;;  %v1155_v55 = vmul.f32 0.5, %v6396_v31  ;;  %4359 = vtanh.f32 %v1799_v56  ;;  %v6642_v26 = vadd.f32 %v7001_v21, %v5748_v51 }
 0x23f   :  { %v2042_v49 = vadd.f32 1.0, %v4354_v41  ;;  %v1798_v33 = vmul.f32 0.7978846, %v1670_v30  ;;  %4361 = vtanh.f32 %v1794_v19  ;;  %v1319_v40 = vmul.f32 0.044715, %v6632_v59 }
 0x240   :  { %v4356_v62 = vpop.eup %4355  ;;  %v2171_v52 = vmul.f32 %v2043_v12, %v6572_v47  ;;  %v2175_v15 = vmul.f32 %v2047_v23, %v1151_v63  ;;  %v6647_v29 = vmul.f32 %v1439_v42, %v6583_v61  ;;  %v1443_v27 = vmul.f32 %v1315_v4, %v6606_v24 }
 0x241   :  { %v2046_v31 = vadd.f32 1.0, %v4356_v62  ;;  %v1446_v60 = vmul.f32 %v1318_v17, %v6622_v32  ;;  %4363 = vtanh.f32 %v1798_v33  ;;  %v1322_v56 = vmul.f32 0.044715, %v6637_v2 }
 0x242   :  { %v2327_v38 = vpack.c.bf16 %v2175_v15, %v2171_v52  ;;  %v6653_v30 = vmul.f32 %v1442_v58, %v6588_v16  ;;  %v1159_v45 = vmul.f32 0.5, %v6429_v54  ;;  %v1323_v47 = vmul.f32 0.044715, %v6642_v26 }
 0x243   :  { %v2170_v63 = vmul.f32 %v2042_v49, %v1146_v57  ;;  %v2174_v12 = vmul.f32 %v2046_v31, %v1150_v28  ;;  %v1447_v42 = vmul.f32 %v1319_v40, %v6632_v59  ;;  %v1675_v4 = vadd.f32 %v6504_v50, %v6451_v36  ;;  %v7002_v50 = vld [vmem:[#allocation5_spill] sm:$0xff] }
 0x244   :  { %3051 = vmatprep.mubr.bf16.mxu0 %v2327_v38  ;;  %v6661_v53 = vmul.f32 %v1443_v27, %v6606_v24  ;;  %v1154_v17 = vmul.f32 0.5, %v6380_v48  ;;  %v1158_v58 = vmul.f32 0.5, %v6418_v44  ;;  %v1679_v54 = vadd.f32 %v6524_v46, %v6481_v14 }
 0x245   :  { %v2326_v19 = vpack.c.bf16 %v2174_v12, %v2170_v63  ;;  %v6668_v57 = vmul.f32 %v1446_v60, %v6622_v32  ;;  %v1450_v28 = vmul.f32 %v1322_v56, %v6637_v2  ;;  %v1803_v6 = vmul.f32 0.7978846, %v1675_v4 }
 0x246   :  { %v1807_v41 = vmul.f32 0.7978846, %v1679_v54  ;;  %v6673_v23 = vadd.f32 %v7002_v50, %v5729_v35  ;;  %v1674_v48 = vadd.f32 %v6498_v9, %v6433_v8  ;;  %v1678_v44 = vadd.f32 %v6521_v11, %v6466_v22 }
 0x247   :  { %v4358_v21 = vpop.eup %4357  ;;  %3052 = vmatmul.mubr.bf16.gmra.mrb[36].mxu0 %v2326_v19  ;;  %v6680_v46 = vmul.f32 %v1447_v42, %v6632_v59  ;;  %v1451_v49 = vmul.f32 %v1323_v47, %v6642_v26  ;;  %v1163_v33 = vmul.f32 0.5, %v6451_v36  ;;  %4365 = vtanh.f32 %v1803_v6  ;;  %v7003_v36 = vld [vmem:[#allocation13_spill] sm:$0xff] }
 0x248   :  { %v4360_v40 = vpop.eup %4359  ;;  %v2051_v62 = vadd.f32 1.0, %v4358_v21  ;;  %v1167_v35 = vmul.f32 0.5, %v6481_v14  ;;  %4367 = vtanh.f32 %v1807_v41  ;;  %v1802_v52 = vmul.f32 0.7978846, %v1674_v48 }
 0x249   :  { %v4362_v9 = vpop.eup %4361  ;;  %v2055_v15 = vadd.f32 1.0, %v4360_v40  ;;  %v6686_v11 = vmul.f32 %v1450_v28, %v6637_v2  ;;  %v1806_v27 = vmul.f32 0.7978846, %v1678_v44  ;;  %v1683_v31 = vadd.f32 %v6551_v13, %v6492_v25 }
 0x24a   :  { %v2050_v60 = vadd.f32 1.0, %v4362_v9  ;;  %v1326_v56 = vmul.f32 0.044715, %v6673_v23  ;;  %4369 = vtanh.f32 %v1802_v52  ;;  %v6693_v38 = vadd.f32 %v7003_v36, %v5748_v51 }
 0x24b   :  { %v4364_v14 = vpop.eup %4363  ;;  %v2179_v47 = vmul.f32 %v2051_v62, %v1155_v55  ;;  %v2183_v63 = vmul.f32 %v2055_v15, %v1159_v45  ;;  %4371 = vtanh.f32 %v1806_v27  ;;  %v1687_v12 = vadd.f32 %v6597_v3, %v6541_v37 }
 0x24c   :  { %v2054_v42 = vadd.f32 1.0, %v4364_v14  ;;  %v6698_v4 = vmul.f32 %v1451_v49, %v6642_v26  ;;  %v1162_v13 = vmul.f32 0.5, %v6433_v8  ;;  %v1811_v54 = vmul.f32 0.7978846, %v1683_v31 }
 0x24d   :  { %v2331_v19 = vpack.c.bf16 %v2183_v63, %v2179_v47  ;;  %v2178_v28 = vmul.f32 %v2050_v60, %v1154_v17  ;;  %v1166_v6 = vmul.f32 0.5, %v6466_v22  ;;  %v1815_v51 = vmul.f32 0.7978846, %v1687_v12 }
 0x24e   :  { %v2182_v41 = vmul.f32 %v2054_v42, %v1158_v58  ;;  %4373 = vtanh.f32 %v1811_v54  ;;  %v1682_v55 = vadd.f32 %v6537_v7, %v6485_v43  ;;  %v1686_v3 = vadd.f32 %v6569_v34, %v6515_v10 }
 0x24f   :  { %3061 = vmatprep.mubr.bf16.mxu0 %v2331_v19  ;;  %v1454_v45 = vmul.f32 %v1326_v56, %v6673_v23  ;;  %v1327_v50 = vmul.f32 0.044715, %v6693_v38  ;;  %4375 = vtanh.f32 %v1815_v51  ;;  %v1691_v8 = vadd.f32 %v6609_v18, %v6556_v39 }
 0x250   :  { %v2330_v17 = vpack.c.bf16 %v2182_v41, %v2178_v28  ;;  %v1810_v22 = vmul.f32 0.7978846, %v1682_v55  ;;  %v1814_v48 = vmul.f32 0.7978846, %v1686_v3  ;;  %v1695_v58 = vadd.f32 %v6647_v29, %v6583_v61 }
 0x251   :  { %v4366_v44 = vpop.eup %4365  ;;  %v1171_v7 = vmul.f32 0.5, %v6492_v25  ;;  %v1175_v34 = vmul.f32 0.5, %v6541_v37  ;;  %v1819_v21 = vmul.f32 0.7978846, %v1691_v8  ;;  %v1690_v49 = vadd.f32 %v6600_v5, %v6546_v1 }
 0x252   :  { %v4368_v40 = vpop.eup %4367  ;;  %3062 = vmatmul.mubr.bf16.gmra.mrb[40].mxu0 %v2330_v17  ;;  %v2059_v62 = vadd.f32 1.0, %v4366_v44  ;;  %4377 = vtanh.f32 %v1810_v22  ;;  %v1823_v18 = vmul.f32 0.7978846, %v1695_v58  ;;  %v1694_v52 = vadd.f32 %v6617_v20, %v6566_v0 }
 0x253   :  { %v2063_v9 = vadd.f32 1.0, %v4368_v40  ;;  %v1455_v29 = vmul.f32 %v1327_v50, %v6693_v38  ;;  %4379 = vtanh.f32 %v1814_v48  ;;  %v1818_v15 = vmul.f32 0.7978846, %v1690_v49 }
 0x254   :  { %v4370_v25 = vpop.eup %4369  ;;  %v2187_v27 = vmul.f32 %v2059_v62, %v1163_v33  ;;  %v1582_v37 = vmul.f32 %v1454_v45, %v6673_v23  ;;  %4381 = vtanh.f32 %v1819_v21  ;;  %v1822_v31 = vmul.f32 0.7978846, %v1694_v52 }
 0x255   :  { %v4372_v5 = vpop.eup %4371  ;;  %v2191_v60 = vmul.f32 %v2063_v9, %v1167_v35  ;;  %v2058_v56 = vadd.f32 1.0, %v4370_v25  ;;  %4383 = vtanh.f32 %v1823_v18  ;;  %v1699_v36 = vadd.f32 %v6661_v53, %v6606_v24 }
 0x256   :  { %v2062_v14 = vadd.f32 1.0, %v4372_v5  ;;  %v1170_v20 = vmul.f32 0.5, %v6485_v43  ;;  %4385 = vtanh.f32 %v1818_v15  ;;  %v1703_v47 = vadd.f32 %v6680_v46, %v6632_v59 }
 0x257   :  { %v2335_v63 = vpack.c.bf16 %v2191_v60, %v2187_v27  ;;  %v1583_v33 = vmul.f32 %v1455_v29, %v6693_v38  ;;  %4387 = vtanh.f32 %v1822_v31  ;;  %v1827_v12 = vmul.f32 0.7978846, %v1699_v36 }
 0x258   :  { %v4374_v42 = vpop.eup %4373  ;;  %v2186_v54 = vmul.f32 %v2058_v56, %v1162_v13  ;;  %v2190_v35 = vmul.f32 %v2062_v14, %v1166_v6  ;;  %v1831_v19 = vmul.f32 0.7978846, %v1703_v47  ;;  %v1698_v28 = vadd.f32 %v6653_v30, %v6588_v16 }
 0x259   :  { %v4376_v53 = vpop.eup %4375  ;;  %3071 = vmatprep.mubr.bf16.mxu0 %v2335_v63  ;;  %v2067_v51 = vadd.f32 1.0, %v4374_v42  ;;  %v1174_v43 = vmul.f32 0.5, %v6515_v10  ;;  %4389 = vtanh.f32 %v1827_v12  ;;  %v1702_v46 = vadd.f32 %v6668_v57, %v6622_v32 }
 0x25a   :  { %v2334_v41 = vpack.c.bf16 %v2190_v35, %v2186_v54  ;;  %v2071_v55 = vadd.f32 1.0, %v4376_v53  ;;  %4391 = vtanh.f32 %v1831_v19  ;;  %v1826_v3 = vmul.f32 0.7978846, %v1698_v28 }
 0x25b   :  { %v1179_v13 = vmul.f32 0.5, %v6556_v39  ;;  %v1183_v6 = vmul.f32 0.5, %v6583_v61  ;;  %v1830_v45 = vmul.f32 0.7978846, %v1702_v46  ;;  %v1707_v30 = vadd.f32 %v6698_v4, %v6642_v26 }
 0x25c   :  { %v4378_v50 = vpop.eup %4377  ;;  %3072 = vmatmul.mubr.bf16.gmra.mrb[44].mxu0 %v2334_v41  ;;  %v2195_v8 = vmul.f32 %v2067_v51, %v1171_v7  ;;  %v2199_v10 = vmul.f32 %v2071_v55, %v1175_v34  ;;  %4393 = vtanh.f32 %v1826_v3  ;;  %v1711_v17 = vadd.f32 %v1583_v33, %v6693_v38 }
 0x25d   :  { %v4380_v57 = vpop.eup %4379  ;;  %v2066_v22 = vadd.f32 1.0, %v4378_v50  ;;  %v1178_v48 = vmul.f32 0.5, %v6546_v1  ;;  %4395 = vtanh.f32 %v1830_v45  ;;  %v1835_v58 = vmul.f32 0.7978846, %v1707_v30 }
 0x25e   :  { %v4382_v39 = vpop.eup %4381  ;;  %v2339_v44 = vpack.c.bf16 %v2199_v10, %v2195_v8  ;;  %v2070_v61 = vadd.f32 1.0, %v4380_v57  ;;  %v1839_v21 = vmul.f32 0.7978846, %v1711_v17  ;;  %v1706_v4 = vadd.f32 %v6686_v11, %v6637_v2 }
 0x25f   :  { %v4384_v49 = vpop.eup %4383  ;;  %v2194_v40 = vmul.f32 %v2066_v22, %v1170_v20  ;;  %v2075_v7 = vadd.f32 1.0, %v4382_v39  ;;  %4397 = vtanh.f32 %v1835_v58  ;;  %v1710_v34 = vadd.f32 %v1582_v37, %v6673_v23  ;;  %v7004_v39 = vld [vmem:[#allocation3_spill] sm:$0xff] }
 0x260   :  { %v4386_v62 = vpop.eup %4385  ;;  %3081 = vmatprep.mubr.bf16.mxu0 %v2339_v44  ;;  %v2198_v18 = vmul.f32 %v2070_v61, %v1174_v43  ;;  %v2079_v52 = vadd.f32 1.0, %v4384_v49  ;;  %4399 = vtanh.f32 %v1839_v21  ;;  %v1834_v1 = vmul.f32 0.7978846, %v1706_v4 }
 0x261   :  { %v4388_v9 = vpop.eup %4387  ;;  %v2203_v29 = vmul.f32 %v2075_v7, %v1179_v13  ;;  %v1182_v15 = vmul.f32 0.5, %v6566_v0  ;;  %v2074_v25 = vadd.f32 1.0, %v4386_v62  ;;  %v1838_v27 = vmul.f32 0.7978846, %v1710_v34 }
 0x262   :  { %v2338_v31 = vpack.c.bf16 %v2198_v18, %v2194_v40  ;;  %v2207_v11 = vmul.f32 %v2079_v52, %v1183_v6  ;;  %v2078_v5 = vadd.f32 1.0, %v4388_v9  ;;  %4401 = vtanh.f32 %v1834_v1 }
 0x263   :  { %v4390_v60 = vpop.eup %4389  ;;  %4403 = vtanh.f32 %v1838_v27  ;;  %v2202_v36 = vmul.f32 %v2074_v25, %v1178_v48  ;;  %v1187_v47 = vmul.f32 0.5, %v6606_v24  ;;  %v1191_v63 = vmul.f32 0.5, %v6632_v59 }
 0x264   :  { %v4392_v56 = vpop.eup %4391  ;;  %3082 = vmatmul.mubr.bf16.gmra.mrb[48].mxu0 %v2338_v31  ;;  %v2343_v37 = vpack.c.bf16 %v2207_v11, %v2203_v29  ;;  %v2206_v14 = vmul.f32 %v2078_v5, %v1182_v15  ;;  %v2083_v20 = vadd.f32 1.0, %v4390_v60  ;;  %v1186_v28 = vmul.f32 0.5, %v6588_v16 }
 0x265   :  { %v2087_v33 = vadd.f32 1.0, %v4392_v56  ;;  %v1190_v53 = vmul.f32 0.5, %v6622_v32  ;;  %v1195_v59 = vmul.f32 0.5, %v6642_v26  ;;  %v1199_v13 = vmul.f32 0.5, %v6693_v38  ;;  %v3317_v38 = vld [vmem:[%s6924_s4] sm:$0x3] }
 0x266   :  { %v4394_v0 = vpop.eup %4393  ;;  %3091 = vmatprep.mubr.bf16.mxu0 %v2343_v37  ;;  %v2342_v12 = vpack.c.bf16 %v2206_v14, %v2202_v36  ;;  %v2211_v54 = vmul.f32 %v2083_v20, %v1187_v47  ;;  %v1194_v10 = vmul.f32 0.5, %v6637_v2  ;;  %v1198_v17 = vmul.f32 0.5, %v6673_v23 }
 0x267   :  { %v4396_v42 = vpop.eup %4395  ;;  %v2215_v35 = vmul.f32 %v2087_v33, %v1191_v63  ;;  %v2082_v19 = vadd.f32 1.0, %v4394_v0  ;;  %v7005_v44 = vsub.s32 0, %v7004_v39  ;;  %v7006_v2 = vsub.s32 1, %v7004_v39 }
 0x268   :  { %v2086_v51 = vadd.f32 1.0, %v4396_v42 }
 0x269   :  { %v4398_v43 = vpop.eup %4397  ;;  %v2347_v46 = vpack.c.bf16 %v2215_v35, %v2211_v54  ;;  %v2210_v55 = vmul.f32 %v2082_v19, %v1186_v28  ;;  %v6754_v61 = vrot.slane %v3317_v38, %v7005_v44  ;;  %v6758_v21 = vrot.slane %v3317_v38, %v7006_v2 }
 0x26a   :  { %v4400_v41 = vpop.eup %4399  ;;  %v2214_v24 = vmul.f32 %v2086_v51, %v1190_v53  ;;  %v2091_v3 = vadd.f32 1.0, %v4398_v43 }
 0x26b   :  { %v2095_v6 = vadd.f32 1.0, %v4400_v41 }
 0x26c   :  { %v4402_v45 = vpop.eup %4401  ;;  %3092 = vmatmul.mubr.bf16.gmra.mrb[52].mxu0 %v2342_v12  ;;  %v2346_v30 = vpack.c.bf16 %v2214_v24, %v2210_v55  ;;  %v2219_v16 = vmul.f32 %v2091_v3, %v1195_v59 }
 0x26d   :  { %v4404_v50 = vpop.eup %4403  ;;  %3101 = vmatprep.mubr.bf16.mxu0 %v2347_v46  ;;  %v2223_v8 = vmul.f32 %v2095_v6, %v1199_v13  ;;  %v2090_v32 = vadd.f32 1.0, %v4402_v45 }
 0x26e   :  { %v2094_v57 = vadd.f32 1.0, %v4404_v50 }
 0x26f   :  { %v2351_v22 = vpack.c.bf16 %v2223_v8, %v2219_v16  ;;  %v2218_v48 = vmul.f32 %v2090_v32, %v1194_v10 }
 0x270   :  { %v2222_v58 = vmul.f32 %v2094_v57, %v1198_v17 }
 0x272   :  { %v2350_v26 = vpack.c.bf16 %v2222_v58, %v2218_v48 }
 0x274   :  { %3102 = vmatmul.mubr.bf16.gmra.mrb[56].mxu0 %v2346_v30 }
 0x275   :  { %3111 = vmatprep.mubr.bf16.mxu0 %v2351_v22 }
 0x27c   :  { %3112 = vmatmul.mubr.bf16.gmra.mrb[60].mxu0 %v2350_v26 }
 0x2be   :  { %v2963_v23 = vpop.f32.mrb[0].mxu0 }
 0x2bf   :  { %v3329_v4 = vadd.f32 %v6754_v61, %v2963_v23  ;;  %v2965_v49 = vpop.f32.mrb[1].mxu0 }
 0x2c0   :  { %v3330_v40 = vadd.f32 %v6758_v21, %v2965_v49  ;;  %v2967_v7 = vpop.f32.mrb[2].mxu0 }
 0x2c1   :  { %v3331_v34 = vadd.f32 %v6754_v61, %v2967_v7  ;;  %v2969_v62 = vpop.f32.mrb[3].mxu0 }
 0x2c2   :  { %v3813_v18 = vpack.c.bf16 %v3330_v40, %v3329_v4  ;;  %v3332_v52 = vadd.f32 %v6758_v21, %v2969_v62 }
 0x2c4   :  { %3585 = vst [vmem:[%s6925_s5] sm:$0xff] %v3813_v18  ;;  %v3814_v1 = vpack.c.bf16 %v3332_v52, %v3331_v34 }
 0x2c6   :  { %3586 = vst [vmem:[%s6925_s5 + $0x8] sm:$0xff] %v3814_v1 }
 0x2c7   :  { %v2973_v9 = vpop.f32.mrb[4].mxu0 }
 0x2c8   :  { %v3333_v29 = vadd.f32 %v6754_v61, %v2973_v9  ;;  %v2975_v15 = vpop.f32.mrb[5].mxu0 }
 0x2c9   :  { %v3334_v25 = vadd.f32 %v6758_v21, %v2975_v15  ;;  %v2977_v27 = vpop.f32.mrb[6].mxu0 }
 0x2ca   :  { %v3335_v31 = vadd.f32 %v6754_v61, %v2977_v27  ;;  %v2979_v11 = vpop.f32.mrb[7].mxu0 }
 0x2cb   :  { %v3815_v5 = vpack.c.bf16 %v3334_v25, %v3333_v29  ;;  %v3336_v60 = vadd.f32 %v6758_v21, %v2979_v11 }
 0x2cd   :  { %3587 = vst [vmem:[%s6925_s5 + $0x10] sm:$0xff] %v3815_v5  ;;  %v3816_v56 = vpack.c.bf16 %v3336_v60, %v3335_v31 }
 0x2cf   :  { %3588 = vst [vmem:[%s6925_s5 + $0x18] sm:$0xff] %v3816_v56 }
 0x2d1   :  { %v2983_v37 = vpop.f32.mrb[8].mxu0 }
 0x2d2   :  { %v3337_v36 = vadd.f32 %v6754_v61, %v2983_v37  ;;  %v2985_v14 = vpop.f32.mrb[9].mxu0 }
 0x2d3   :  { %v3338_v20 = vadd.f32 %v6758_v21, %v2985_v14  ;;  %v2987_v47 = vpop.f32.mrb[10].mxu0 }
 0x2d4   :  { %v3339_v63 = vadd.f32 %v6754_v61, %v2987_v47  ;;  %v2989_v33 = vpop.f32.mrb[11].mxu0 }
 0x2d5   :  { %v3817_v0 = vpack.c.bf16 %v3338_v20, %v3337_v36  ;;  %v3340_v12 = vadd.f32 %v6758_v21, %v2989_v33 }
 0x2d7   :  { %3589 = vst [vmem:[%s6925_s5 + $0x20] sm:$0xff] %v3817_v0  ;;  %v3818_v42 = vpack.c.bf16 %v3340_v12, %v3339_v63 }
 0x2d9   :  { %3590 = vst [vmem:[%s6925_s5 + $0x28] sm:$0xff] %v3818_v42 }
 0x2da   :  { %v2993_v54 = vpop.f32.mrb[12].mxu0 }
 0x2db   :  { %v3341_v35 = vadd.f32 %v6754_v61, %v2993_v54  ;;  %v2995_v19 = vpop.f32.mrb[13].mxu0 }
 0x2dc   :  { %v3342_v28 = vadd.f32 %v6758_v21, %v2995_v19  ;;  %v2997_v53 = vpop.f32.mrb[14].mxu0 }
 0x2dd   :  { %v3343_v51 = vadd.f32 %v6754_v61, %v2997_v53  ;;  %v2999_v43 = vpop.f32.mrb[15].mxu0 }
 0x2de   :  { %v3819_v46 = vpack.c.bf16 %v3342_v28, %v3341_v35  ;;  %v3344_v41 = vadd.f32 %v6758_v21, %v2999_v43 }
 0x2e0   :  { %3591 = vst [vmem:[%s6925_s5 + $0x30] sm:$0xff] %v3819_v46  ;;  %v3820_v55 = vpack.c.bf16 %v3344_v41, %v3343_v51 }
 0x2e2   :  { %3592 = vst [vmem:[%s6925_s5 + $0x38] sm:$0xff] %v3820_v55 }
 0x2e6   :  { %v3003_v24 = vpop.f32.mrb[16].mxu0 }
 0x2e7   :  { %v3345_v3 = vadd.f32 %v6754_v61, %v3003_v24  ;;  %v3005_v59 = vpop.f32.mrb[17].mxu0 }
 0x2e8   :  { %v3346_v13 = vadd.f32 %v6758_v21, %v3005_v59  ;;  %v3007_v6 = vpop.f32.mrb[18].mxu0 }
 0x2e9   :  { %v3347_v45 = vadd.f32 %v6754_v61, %v3007_v6  ;;  %v3009_v30 = vpop.f32.mrb[19].mxu0 }
 0x2ea   :  { %v3821_v50 = vpack.c.bf16 %v3346_v13, %v3345_v3  ;;  %v3348_v16 = vadd.f32 %v6758_v21, %v3009_v30 }
 0x2ec   :  { %3593 = vst [vmem:[%s6925_s5 + $0x40] sm:$0xff] %v3821_v50  ;;  %v3822_v8 = vpack.c.bf16 %v3348_v16, %v3347_v45 }
 0x2ee   :  { %3594 = vst [vmem:[%s6925_s5 + $0x48] sm:$0xff] %v3822_v8 }
 0x2f0   :  { %v3013_v32 = vpop.f32.mrb[20].mxu0 }
 0x2f1   :  { %v3349_v10 = vadd.f32 %v6754_v61, %v3013_v32  ;;  %v3015_v17 = vpop.f32.mrb[21].mxu0 }
 0x2f2   :  { %v3350_v57 = vadd.f32 %v6758_v21, %v3015_v17  ;;  %v3017_v22 = vpop.f32.mrb[22].mxu0 }
 0x2f3   :  { %v3351_v48 = vadd.f32 %v6754_v61, %v3017_v22  ;;  %v3019_v58 = vpop.f32.mrb[23].mxu0 }
 0x2f4   :  { %v3823_v26 = vpack.c.bf16 %v3350_v57, %v3349_v10  ;;  %v3352_v38 = vadd.f32 %v6758_v21, %v3019_v58 }
 0x2f6   :  { %3595 = vst [vmem:[%s6925_s5 + $0x50] sm:$0xff] %v3823_v26  ;;  %v3824_v39 = vpack.c.bf16 %v3352_v38, %v3351_v48 }
 0x2f8   :  { %3596 = vst [vmem:[%s6925_s5 + $0x58] sm:$0xff] %v3824_v39 }
 0x2fb   :  { %v3023_v44 = vpop.f32.mrb[24].mxu0 }
 0x2fc   :  { %v3353_v2 = vadd.f32 %v6754_v61, %v3023_v44  ;;  %v3025_v23 = vpop.f32.mrb[25].mxu0 }
 0x2fd   :  { %v3354_v4 = vadd.f32 %v6758_v21, %v3025_v23  ;;  %v3027_v49 = vpop.f32.mrb[26].mxu0 }
 0x2fe   :  { %v3355_v40 = vadd.f32 %v6754_v61, %v3027_v49  ;;  %v3029_v7 = vpop.f32.mrb[27].mxu0 }
 0x2ff   :  { %v3825_v34 = vpack.c.bf16 %v3354_v4, %v3353_v2  ;;  %v3356_v62 = vadd.f32 %v6758_v21, %v3029_v7 }
 0x301   :  { %3597 = vst [vmem:[%s6925_s5 + $0x60] sm:$0xff] %v3825_v34  ;;  %v3826_v18 = vpack.c.bf16 %v3356_v62, %v3355_v40 }
 0x303   :  { %3598 = vst [vmem:[%s6925_s5 + $0x68] sm:$0xff] %v3826_v18 }
 0x305   :  { %v3033_v52 = vpop.f32.mrb[28].mxu0 }
 0x306   :  { %v3357_v1 = vadd.f32 %v6754_v61, %v3033_v52  ;;  %v3035_v9 = vpop.f32.mrb[29].mxu0 }
 0x307   :  { %v3358_v29 = vadd.f32 %v6758_v21, %v3035_v9  ;;  %v3037_v15 = vpop.f32.mrb[30].mxu0 }
 0x308   :  { %v3359_v25 = vadd.f32 %v6754_v61, %v3037_v15  ;;  %v3039_v27 = vpop.f32.mrb[31].mxu0 }
 0x309   :  { %v3827_v31 = vpack.c.bf16 %v3358_v29, %v3357_v1  ;;  %v3360_v11 = vadd.f32 %v6758_v21, %v3039_v27 }
 0x30b   :  { %3599 = vst [vmem:[%s6925_s5 + $0x70] sm:$0xff] %v3827_v31  ;;  %v3828_v5 = vpack.c.bf16 %v3360_v11, %v3359_v25 }
 0x30d   :  { %3600 = vst [vmem:[%s6925_s5 + $0x78] sm:$0xff] %v3828_v5 }
 0x30f   :  { %v3043_v60 = vpop.f32.mrb[32].mxu0 }
 0x310   :  { %v3361_v56 = vadd.f32 %v6754_v61, %v3043_v60  ;;  %v3045_v37 = vpop.f32.mrb[33].mxu0 }
 0x311   :  { %v3362_v36 = vadd.f32 %v6758_v21, %v3045_v37  ;;  %v3047_v14 = vpop.f32.mrb[34].mxu0 }
 0x312   :  { %v3363_v20 = vadd.f32 %v6754_v61, %v3047_v14  ;;  %v3049_v47 = vpop.f32.mrb[35].mxu0 }
 0x313   :  { %v3829_v63 = vpack.c.bf16 %v3362_v36, %v3361_v56  ;;  %v3364_v33 = vadd.f32 %v6758_v21, %v3049_v47 }
 0x315   :  { %3601 = vst [vmem:[%s6925_s5 + $0x80] sm:$0xff] %v3829_v63  ;;  %v3830_v0 = vpack.c.bf16 %v3364_v33, %v3363_v20 }
 0x317   :  { %3602 = vst [vmem:[%s6925_s5 + $0x88] sm:$0xff] %v3830_v0 }
 0x31a   :  { %v3053_v12 = vpop.f32.mrb[36].mxu0 }
 0x31b   :  { %v3365_v42 = vadd.f32 %v6754_v61, %v3053_v12  ;;  %v3055_v54 = vpop.f32.mrb[37].mxu0 }
 0x31c   :  { %v3366_v35 = vadd.f32 %v6758_v21, %v3055_v54  ;;  %v3057_v19 = vpop.f32.mrb[38].mxu0 }
 0x31d   :  { %v3367_v28 = vadd.f32 %v6754_v61, %v3057_v19  ;;  %v3059_v53 = vpop.f32.mrb[39].mxu0 }
 0x31e   :  { %v3831_v51 = vpack.c.bf16 %v3366_v35, %v3365_v42  ;;  %v3368_v43 = vadd.f32 %v6758_v21, %v3059_v53 }
 0x320   :  { %3603 = vst [vmem:[%s6925_s5 + $0x90] sm:$0xff] %v3831_v51  ;;  %v3832_v46 = vpack.c.bf16 %v3368_v43, %v3367_v28 }
 0x322   :  { %3604 = vst [vmem:[%s6925_s5 + $0x98] sm:$0xff] %v3832_v46 }
 0x325   :  { %v3063_v41 = vpop.f32.mrb[40].mxu0 }
 0x326   :  { %v3369_v55 = vadd.f32 %v6754_v61, %v3063_v41  ;;  %v3065_v24 = vpop.f32.mrb[41].mxu0 }
 0x327   :  { %v3370_v3 = vadd.f32 %v6758_v21, %v3065_v24  ;;  %v3067_v59 = vpop.f32.mrb[42].mxu0 }
 0x328   :  { %v3371_v13 = vadd.f32 %v6754_v61, %v3067_v59  ;;  %v3069_v6 = vpop.f32.mrb[43].mxu0 }
 0x329   :  { %v3833_v45 = vpack.c.bf16 %v3370_v3, %v3369_v55  ;;  %v3372_v30 = vadd.f32 %v6758_v21, %v3069_v6 }
 0x32b   :  { %3605 = vst [vmem:[%s6925_s5 + $0xa0] sm:$0xff] %v3833_v45  ;;  %v3834_v50 = vpack.c.bf16 %v3372_v30, %v3371_v13 }
 0x32d   :  { %3606 = vst [vmem:[%s6925_s5 + $0xa8] sm:$0xff] %v3834_v50 }
 0x32f   :  { %v3073_v16 = vpop.f32.mrb[44].mxu0 }
 0x330   :  { %v3373_v8 = vadd.f32 %v6754_v61, %v3073_v16  ;;  %v3075_v32 = vpop.f32.mrb[45].mxu0 }
 0x331   :  { %v3374_v10 = vadd.f32 %v6758_v21, %v3075_v32  ;;  %v3077_v17 = vpop.f32.mrb[46].mxu0 }
 0x332   :  { %v3375_v57 = vadd.f32 %v6754_v61, %v3077_v17  ;;  %v3079_v22 = vpop.f32.mrb[47].mxu0 }
 0x333   :  { %v3835_v48 = vpack.c.bf16 %v3374_v10, %v3373_v8  ;;  %v3376_v58 = vadd.f32 %v6758_v21, %v3079_v22 }
 0x335   :  { %3607 = vst [vmem:[%s6925_s5 + $0xb0] sm:$0xff] %v3835_v48  ;;  %v3836_v26 = vpack.c.bf16 %v3376_v58, %v3375_v57 }
 0x337   :  { %3608 = vst [vmem:[%s6925_s5 + $0xb8] sm:$0xff] %v3836_v26  ;;  %v3083_v38 = vpop.f32.mrb[48].mxu0 }
 0x338   :  { %v3377_v39 = vadd.f32 %v6754_v61, %v3083_v38  ;;  %v3085_v44 = vpop.f32.mrb[49].mxu0 }
 0x339   :  { %v3378_v2 = vadd.f32 %v6758_v21, %v3085_v44  ;;  %v3087_v23 = vpop.f32.mrb[50].mxu0 }
 0x33a   :  { %v3379_v4 = vadd.f32 %v6754_v61, %v3087_v23  ;;  %v3089_v49 = vpop.f32.mrb[51].mxu0 }
 0x33b   :  { %v3837_v40 = vpack.c.bf16 %v3378_v2, %v3377_v39  ;;  %v3380_v7 = vadd.f32 %v6758_v21, %v3089_v49 }
 0x33d   :  { %3609 = vst [vmem:[%s6925_s5 + $0xc0] sm:$0xff] %v3837_v40  ;;  %v3838_v34 = vpack.c.bf16 %v3380_v7, %v3379_v4 }
 0x33f   :  { %3610 = vst [vmem:[%s6925_s5 + $0xc8] sm:$0xff] %v3838_v34  ;;  %v3093_v62 = vpop.f32.mrb[52].mxu0 }
 0x340   :  { %v3381_v18 = vadd.f32 %v6754_v61, %v3093_v62  ;;  %v3095_v52 = vpop.f32.mrb[53].mxu0 }
 0x341   :  { %v3382_v1 = vadd.f32 %v6758_v21, %v3095_v52  ;;  %v3097_v9 = vpop.f32.mrb[54].mxu0 }
 0x342   :  { %v3383_v29 = vadd.f32 %v6754_v61, %v3097_v9  ;;  %v3099_v15 = vpop.f32.mrb[55].mxu0 }
 0x343   :  { %v3839_v25 = vpack.c.bf16 %v3382_v1, %v3381_v18  ;;  %v3384_v27 = vadd.f32 %v6758_v21, %v3099_v15 }
 0x345   :  { %3611 = vst [vmem:[%s6925_s5 + $0xd0] sm:$0xff] %v3839_v25  ;;  %v3840_v31 = vpack.c.bf16 %v3384_v27, %v3383_v29 }
 0x347   :  { %3612 = vst [vmem:[%s6925_s5 + $0xd8] sm:$0xff] %v3840_v31  ;;  %v3103_v11 = vpop.f32.mrb[56].mxu0 }
 0x348   :  { %v3385_v5 = vadd.f32 %v6754_v61, %v3103_v11  ;;  %v3105_v60 = vpop.f32.mrb[57].mxu0 }
 0x349   :  { %v3386_v56 = vadd.f32 %v6758_v21, %v3105_v60  ;;  %v3107_v37 = vpop.f32.mrb[58].mxu0 }
 0x34a   :  { %v3387_v36 = vadd.f32 %v6754_v61, %v3107_v37  ;;  %v3109_v14 = vpop.f32.mrb[59].mxu0 }
 0x34b   :  { %v3841_v20 = vpack.c.bf16 %v3386_v56, %v3385_v5  ;;  %v3388_v47 = vadd.f32 %v6758_v21, %v3109_v14 }
 0x34d   :  { %3613 = vst [vmem:[%s6925_s5 + $0xe0] sm:$0xff] %v3841_v20  ;;  %v3842_v63 = vpack.c.bf16 %v3388_v47, %v3387_v36 }
 0x34f   :  { %3614 = vst [vmem:[%s6925_s5 + $0xe8] sm:$0xff] %v3842_v63  ;;  %v3113_v33 = vpop.f32.mrb[60].mxu0 }
 0x350   :  { %v3389_v0 = vadd.f32 %v6754_v61, %v3113_v33  ;;  %v3115_v12 = vpop.f32.mrb[61].mxu0 }
 0x351   :  { %v3390_v42 = vadd.f32 %v6758_v21, %v3115_v12  ;;  %v3117_v54 = vpop.f32.mrb[62].mxu0 }
 0x352   :  { %v3391_v35 = vadd.f32 %v6754_v61, %v3117_v54  ;;  %v3119_v19 = vpop.f32.mrb[63].mxu0 }
 0x353   :  { %v3843_v28 = vpack.c.bf16 %v3390_v42, %v3389_v0  ;;  %v3392_v53 = vadd.f32 %v6758_v21, %v3119_v19 }
 0x355   :  { %3615 = vst [vmem:[%s6925_s5 + $0xf0] sm:$0xff] %v3843_v28  ;;  %v3844_v51 = vpack.c.bf16 %v3392_v53, %v3391_v35 }
 0x357   :  { %3616 = vst [vmem:[%s6925_s5 + $0xf8] sm:$0xff] %v3844_v51 }

</bundles_post_ra>
